<compile_context>
chip_gen: v5e
topology: v5e:2x2
jax: 0.10.0
libtpu: 0.0.40
codegen_flags: <defaults>
</compile_context>

<pallas_src>
import numpy as np
import jax
import jax.numpy as jnp
from jax.experimental import pallas as pl
from jax.experimental.pallas import tpu as pltpu

NGF = 4
LATENT_DIM = 32          # opt.latent_dim
BATCH = 256              # many latents per call (keeps MXU M dimension busy)
BN_EPS = 1e-4
LEAK = 0.2

# (in_ch, out_ch, kernel, stride, pad, has_bn) for each layer
LAYER_CFG = [
    (LATENT_DIM, NGF * 16, 4, 1, 0, True),
    (NGF * 16,   NGF * 8,  4, 2, 1, True),
    (NGF * 8,    NGF * 4,  4, 2, 1, True),
    (NGF * 4,    NGF * 2,  4, 2, 1, True),
    (NGF * 2,    1,        4, 2, 1, False),
]


# ----------------------------------------------------------------------------- glue
def convT_out_len(lin, k, s, p):
    return (lin - 1) * s - 2 * p + k


def build_convT_matrix(w, lin, stride, pad):
    """Dense matrix M s.t. flatten_NCL(convT(x)) = flatten_NCL(x) @ M  (per batch row)."""
    ci, co, k = w.shape
    lout = convT_out_len(lin, k, stride, pad)
    m = np.zeros((ci * lin, co * lout), np.float32)
    for c_in in range(ci):
        for t in range(lin):
            for c_out in range(co):
                for kk in range(k):
                    j = t * stride - pad + kk
                    if 0 <= j < lout:
                        m[c_in * lin + t, c_out * lout + j] += w[c_in, c_out, kk]
    return m, lout


def bn_pool_bcast(c, l, batch):
    """pool: (C*L, C) with 1/(B*L) per channel block (powers of two -> exact in bf16).
       bcast: (C, C*L) 0/1 matrix broadcasting a per-channel value back to its L positions."""
    pool = np.zeros((c * l, c), np.float32)
    bcast = np.zeros((c, c * l), np.float32)
    inv = 1.0 / (batch * l)
    for ch in range(c):
        pool[ch * l:(ch + 1) * l, ch] = inv
        bcast[ch, ch * l:(ch + 1) * l] = 1.0
    return pool, bcast


# ---------------------------------------------------------------------------- kernel
def generator_kernel(*refs):
    x_ref = refs[0]
    out_ref = refs[-1]
    idx = 1
    h = x_ref[...]                                           # (B, Cin*Lin) f32

    for _ in range(4):  # ConvT (bias folded out by BN) -> BatchNorm (batch stats) -> LeakyReLU
        w_ref, pool_ref, bcast_ref, g_ref, be_ref = refs[idx:idx + 5]
        idx += 5

        # ConvTranspose1d (no bias: per-channel bias is exactly cancelled by the BN mean
        # subtraction below) as a single bf16 MXU matmul with f32 accumulation.
        y = jnp.dot(h.astype(jnp.bfloat16), w_ref[...],
                    preferred_element_type=jnp.float32)                   # (B, C*L) f32

        # Batch-norm statistics (training mode: stats over batch and length per channel).
        colsum = jnp.sum(y, axis=0, keepdims=True)                        # (1, C*L)
        sqsum = jnp.sum(y * y, axis=0, keepdims=True)                     # (1, C*L)
        stacked = jnp.concatenate([colsum, sqsum], axis=0)                # (2, C*L)
        # One merged stat matmul: rows = [mean_c, E[y^2]_c]   (pool already holds 1/(B*L)).
        stats = jnp.dot(stacked.astype(jnp.bfloat16), pool_ref[...],
                        preferred_element_type=jnp.float32)               # (2, C)
        mean_c = stats[0:1, :]
        var_c = stats[1:2, :] - mean_c * mean_c           # biased variance (torch BN training)
        scale_c = g_ref[...] * jax.lax.rsqrt(var_c + BN_EPS)              # (1, C)
        shift_c = be_ref[...] - mean_c * scale_c                          # (1, C)
        # One merged broadcast-back matmul: rows = [scale, shift] expanded to (1, C*L).
        sb = jnp.dot(jnp.concatenate([scale_c, shift_c], axis=0).astype(jnp.bfloat16),
                     bcast_ref[...], preferred_element_type=jnp.float32)  # (2, C*L)

        h = y * sb[0:1, :] + sb[1:2, :]                    # affine BN, all in f32
        h = jnp.maximum(h, LEAK * h)                       # LeakyReLU(0.2), 2 VPU ops

    w5_ref, b5_ref = refs[idx:idx + 2]                     # final layer keeps its bias (no BN)
    y = jnp.dot(h.astype(jnp.bfloat16), w5_ref[...],
                preferred_element_type=jnp.float32) + b5_ref[...]
    out_ref[...] = jnp.tanh(y)


def generator_forward(x, flat_params, out_width):
    args = [x] + flat_params
    return pl.pallas_call(
        generator_kernel,
        out_shape=jax.ShapeDtypeStruct((x.shape[0], out_width), jnp.float32),
        in_specs=[pl.BlockSpec(memory_space=pltpu.MemorySpace.VMEM)] * len(args),
        out_specs=pl.BlockSpec(memory_space=pltpu.MemorySpace.VMEM),
    )(*args)


# ------------------------------------------------------------------------- reference
def convT_ref(x, w, b, stride, pad):
    """Vectorized numpy ConvTranspose1d reference in float64 (bias included)."""
    bsz, ci, lin = x.shape
    _, co, k = w.shape
    lout = convT_out_len(lin, k, stride, pad)
    out = np.zeros((bsz, co, lout), np.float64)
    for t in range(lin):
        for kk in range(k):
            j = t * stride - pad + kk
            if 0 <= j < lout:
                out[:, :, j] += x[:, :, t] @ w[:, :, kk]
    return out + b[None, :, None]


def numpy_reference(x, torch_params):
    h = x[:, :, None].astype(np.float64)                   # x.view(-1, C, 1)
    for li, (ci, co, k, s, p, has_bn) in enumerate(LAYER_CFG):
        w, b, gamma, beta = torch_params[li]
        h = convT_ref(h, w.astype(np.float64), b.astype(np.float64), s, p)
        if has_bn:
            mean = h.mean(axis=(0, 2), keepdims=True)
            var = h.var(axis=(0, 2), keepdims=True)         # biased, like torch BN training
            h = (gamma[None, :, None].astype(np.float64) * (h - mean) / np.sqrt(var + BN_EPS)
                 + beta[None, :, None].astype(np.float64))
            h = np.where(h > 0, h, LEAK * h)
    h = np.tanh(h)
    return h[:, 0, :].astype(np.float32)                    # torch.squeeze(out, dim=1)


# ------------------------------------------------------------------------------ main
if __name__ == "__main__":
    key = jax.random.PRNGKey(0)
    key, kx = jax.random.split(key)
    x = jax.random.normal(kx, (BATCH, LATENT_DIM), dtype=jnp.float32)

    # deterministic synthetic parameters (DCGAN-style init)
    torch_params = []   # per layer: (weight (Ci,Co,K), bias (Co,), gamma (Co,), beta (Co,))
    for (ci, co, k, s, p, has_bn) in LAYER_CFG:
        key, kw, kb, kg, kbe = jax.random.split(key, 5)
        w = np.asarray(jax.random.normal(kw, (ci, co, k)) * 0.02, np.float32)
        b = np.asarray(jax.random.normal(kb, (co,)) * 0.01, np.float32)
        gamma = np.asarray(1.0 + 0.1 * jax.random.normal(kg, (co,)), np.float32)
        beta = np.asarray(0.05 * jax.random.normal(kbe, (co,)), np.float32)
        torch_params.append((w, b, gamma, beta))

    # build flattened kernel parameters (matmul operands in bf16, per-channel affines in f32)
    flat_params = []
    lin = 1
    out_width = None
    for li, (ci, co, k, s, p, has_bn) in enumerate(LAYER_CFG):
        w, b, gamma, beta = torch_params[li]
        m, lout = build_convT_matrix(w, lin, s, p)
        flat_params.append(jnp.asarray(m, dtype=jnp.bfloat16))
        if has_bn:
            # conv bias omitted: exactly cancelled by training-mode BatchNorm mean subtraction
            pool, bcast = bn_pool_bcast(co, lout, BATCH)
            flat_params.append(jnp.asarray(pool, dtype=jnp.bfloat16))
            flat_params.append(jnp.asarray(bcast, dtype=jnp.bfloat16))
            flat_params.append(jnp.asarray(gamma.reshape(1, -1)))           # (1, C) f32
            flat_params.append(jnp.asarray(beta.reshape(1, -1)))            # (1, C) f32
        else:
            b_flat = np.repeat(b, lout).astype(np.float32).reshape(1, -1)   # (1, Co*Lout)
            flat_params.append(jnp.asarray(b_flat))                         # f32
        lin = lout
        out_width = co * lout                                # last layer: Co=1 -> seq length

    out = generator_forward(x, flat_params, out_width)
    out = jax.block_until_ready(out)

    ref = numpy_reference(np.asarray(x), torch_params)
    # bf16 MXU matmuls give ~1% agreement vs. the float64 reference.
    np.testing.assert_allclose(np.asarray(out), ref, atol=3e-2, rtol=3e-2)

    assert out.shape == (BATCH, 64)
    print("KERNEL_OK")
</pallas_src>

<mosaic_0001>
module attributes {stable_mosaic.version = 11 : i64} {
  func.func @generator_kernel(%arg0: memref<256x32xf32, #tpu.memory_space<vmem>>, %arg1: memref<32x256xbf16, #tpu.memory_space<vmem>>, %arg2: memref<256x64xbf16, #tpu.memory_space<vmem>>, %arg3: memref<64x256xbf16, #tpu.memory_space<vmem>>, %arg4: memref<1x64xf32, #tpu.memory_space<vmem>>, %arg5: memref<1x64xf32, #tpu.memory_space<vmem>>, %arg6: memref<256x256xbf16, #tpu.memory_space<vmem>>, %arg7: memref<256x32xbf16, #tpu.memory_space<vmem>>, %arg8: memref<32x256xbf16, #tpu.memory_space<vmem>>, %arg9: memref<1x32xf32, #tpu.memory_space<vmem>>, %arg10: memref<1x32xf32, #tpu.memory_space<vmem>>, %arg11: memref<256x256xbf16, #tpu.memory_space<vmem>>, %arg12: memref<256x16xbf16, #tpu.memory_space<vmem>>, %arg13: memref<16x256xbf16, #tpu.memory_space<vmem>>, %arg14: memref<1x16xf32, #tpu.memory_space<vmem>>, %arg15: memref<1x16xf32, #tpu.memory_space<vmem>>, %arg16: memref<256x256xbf16, #tpu.memory_space<vmem>>, %arg17: memref<256x8xbf16, #tpu.memory_space<vmem>>, %arg18: memref<8x256xbf16, #tpu.memory_space<vmem>>, %arg19: memref<1x8xf32, #tpu.memory_space<vmem>>, %arg20: memref<1x8xf32, #tpu.memory_space<vmem>>, %arg21: memref<256x64xbf16, #tpu.memory_space<vmem>>, %arg22: memref<1x64xf32, #tpu.memory_space<vmem>>, %arg23: memref<256x64xf32, #tpu.memory_space<vmem>>) attributes {dimension_semantics = [], scalar_prefetch = 0 : i64, scratch_operands = 0 : i64, tpu.core_type = #tpu.core_type<tc>} {
    %c0 = arith.constant 0 : index
    %c0_0 = arith.constant 0 : index
    %0 = vector.load %arg0[%c0, %c0_0] : memref<256x32xf32, #tpu.memory_space<vmem>>, vector<256x32xf32>
    %1 = arith.truncf %0 : vector<256x32xf32> to vector<256x32xbf16>
    %c0_1 = arith.constant 0 : index
    %c0_2 = arith.constant 0 : index
    %2 = vector.load %arg1[%c0_1, %c0_2] : memref<32x256xbf16, #tpu.memory_space<vmem>>, vector<32x256xbf16>
    %cst = arith.constant dense<0.000000e+00> : vector<256x256xf32>
    %3 = tpu.matmul %1, %2, %cst {dimension_numbers = #tpu.dot_dimension_numbers<[1], [0], [0], [1], [0, 0, 1, 1], [], []>} : vector<256x32xbf16>, vector<32x256xbf16>, vector<256x256xf32> -> vector<256x256xf32>
    %cst_3 = arith.constant dense<0.000000e+00> : vector<256xf32>
    %4 = vector.multi_reduction <add>, %3, %cst_3 [0] : vector<256x256xf32> to vector<256xf32>
    %5 = vector.shape_cast %4 : vector<256xf32> to vector<1x256xf32>
    %6 = arith.mulf %3, %3 : vector<256x256xf32>
    %cst_4 = arith.constant dense<0.000000e+00> : vector<256xf32>
    %7 = vector.multi_reduction <add>, %6, %cst_4 [0] : vector<256x256xf32> to vector<256xf32>
    %8 = vector.shape_cast %7 : vector<256xf32> to vector<1x256xf32>
    %9 = tpu.concatenate %5, %8 in 0 : vector<1x256xf32>, vector<1x256xf32> -> vector<2x256xf32>
    %10 = arith.truncf %9 : vector<2x256xf32> to vector<2x256xbf16>
    %c0_5 = arith.constant 0 : index
    %c0_6 = arith.constant 0 : index
    %11 = vector.load %arg2[%c0_5, %c0_6] : memref<256x64xbf16, #tpu.memory_space<vmem>>, vector<256x64xbf16>
    %cst_7 = arith.constant dense<0.000000e+00> : vector<2x64xf32>
    %12 = tpu.matmul %10, %11, %cst_7 {dimension_numbers = #tpu.dot_dimension_numbers<[1], [0], [0], [1], [0, 0, 1, 1], [], []>} : vector<2x256xbf16>, vector<256x64xbf16>, vector<2x64xf32> -> vector<2x64xf32>
    %13 = vector.extract_strided_slice %12 {offsets = [0, 0], sizes = [1, 64], strides = [1, 1]} : vector<2x64xf32> to vector<1x64xf32>
    %14 = vector.extract_strided_slice %12 {offsets = [1, 0], sizes = [1, 64], strides = [1, 1]} : vector<2x64xf32> to vector<1x64xf32>
    %15 = arith.mulf %13, %13 : vector<1x64xf32>
    %16 = arith.subf %14, %15 : vector<1x64xf32>
    %c0_8 = arith.constant 0 : index
    %c0_9 = arith.constant 0 : index
    %17 = vector.load %arg4[%c0_8, %c0_9] : memref<1x64xf32, #tpu.memory_space<vmem>>, vector<1x64xf32>
    %cst_10 = arith.constant 9.99999974E-5 : f32
    %18 = vector.broadcast %cst_10 : f32 to vector<1x64xf32>
    %19 = arith.addf %16, %18 : vector<1x64xf32>
    %20 = math.rsqrt %19 : vector<1x64xf32>
    %21 = arith.mulf %17, %20 : vector<1x64xf32>
    %c0_11 = arith.constant 0 : index
    %c0_12 = arith.constant 0 : index
    %22 = vector.load %arg5[%c0_11, %c0_12] : memref<1x64xf32, #tpu.memory_space<vmem>>, vector<1x64xf32>
    %23 = arith.mulf %13, %21 : vector<1x64xf32>
    %24 = arith.subf %22, %23 : vector<1x64xf32>
    %25 = tpu.concatenate %21, %24 in 0 : vector<1x64xf32>, vector<1x64xf32> -> vector<2x64xf32>
    %26 = arith.truncf %25 : vector<2x64xf32> to vector<2x64xbf16>
    %c0_13 = arith.constant 0 : index
    %c0_14 = arith.constant 0 : index
    %27 = vector.load %arg3[%c0_13, %c0_14] : memref<64x256xbf16, #tpu.memory_space<vmem>>, vector<64x256xbf16>
    %cst_15 = arith.constant dense<0.000000e+00> : vector<2x256xf32>
    %28 = tpu.matmul %26, %27, %cst_15 {dimension_numbers = #tpu.dot_dimension_numbers<[1], [0], [0], [1], [0, 0, 1, 1], [], []>} : vector<2x64xbf16>, vector<64x256xbf16>, vector<2x256xf32> -> vector<2x256xf32>
    %29 = vector.extract_strided_slice %28 {offsets = [0, 0], sizes = [1, 256], strides = [1, 1]} : vector<2x256xf32> to vector<1x256xf32>
    %30 = vector.broadcast %29 : vector<1x256xf32> to vector<256x256xf32>
    %31 = arith.mulf %3, %30 : vector<256x256xf32>
    %32 = vector.extract_strided_slice %28 {offsets = [1, 0], sizes = [1, 256], strides = [1, 1]} : vector<2x256xf32> to vector<1x256xf32>
    %33 = vector.broadcast %32 : vector<1x256xf32> to vector<256x256xf32>
    %34 = arith.addf %31, %33 : vector<256x256xf32>
    %cst_16 = arith.constant 2.000000e-01 : f32
    %35 = vector.broadcast %cst_16 : f32 to vector<256x256xf32>
    %36 = arith.mulf %35, %34 : vector<256x256xf32>
    %37 = arith.maximumf %34, %36 : vector<256x256xf32>
    %38 = arith.truncf %37 : vector<256x256xf32> to vector<256x256xbf16>
    %c0_17 = arith.constant 0 : index
    %c0_18 = arith.constant 0 : index
    %39 = vector.load %arg6[%c0_17, %c0_18] : memref<256x256xbf16, #tpu.memory_space<vmem>>, vector<256x256xbf16>
    %cst_19 = arith.constant dense<0.000000e+00> : vector<256x256xf32>
    %40 = tpu.matmul %38, %39, %cst_19 {dimension_numbers = #tpu.dot_dimension_numbers<[1], [0], [0], [1], [0, 0, 1, 1], [], []>} : vector<256x256xbf16>, vector<256x256xbf16>, vector<256x256xf32> -> vector<256x256xf32>
    %cst_20 = arith.constant dense<0.000000e+00> : vector<256xf32>
    %41 = vector.multi_reduction <add>, %40, %cst_20 [0] : vector<256x256xf32> to vector<256xf32>
    %42 = vector.shape_cast %41 : vector<256xf32> to vector<1x256xf32>
    %43 = arith.mulf %40, %40 : vector<256x256xf32>
    %cst_21 = arith.constant dense<0.000000e+00> : vector<256xf32>
    %44 = vector.multi_reduction <add>, %43, %cst_21 [0] : vector<256x256xf32> to vector<256xf32>
    %45 = vector.shape_cast %44 : vector<256xf32> to vector<1x256xf32>
    %46 = tpu.concatenate %42, %45 in 0 : vector<1x256xf32>, vector<1x256xf32> -> vector<2x256xf32>
    %47 = arith.truncf %46 : vector<2x256xf32> to vector<2x256xbf16>
    %c0_22 = arith.constant 0 : index
    %c0_23 = arith.constant 0 : index
    %48 = vector.load %arg7[%c0_22, %c0_23] : memref<256x32xbf16, #tpu.memory_space<vmem>>, vector<256x32xbf16>
    %cst_24 = arith.constant dense<0.000000e+00> : vector<2x32xf32>
    %49 = tpu.matmul %47, %48, %cst_24 {dimension_numbers = #tpu.dot_dimension_numbers<[1], [0], [0], [1], [0, 0, 1, 1], [], []>} : vector<2x256xbf16>, vector<256x32xbf16>, vector<2x32xf32> -> vector<2x32xf32>
    %50 = vector.extract_strided_slice %49 {offsets = [0, 0], sizes = [1, 32], strides = [1, 1]} : vector<2x32xf32> to vector<1x32xf32>
    %51 = vector.extract_strided_slice %49 {offsets = [1, 0], sizes = [1, 32], strides = [1, 1]} : vector<2x32xf32> to vector<1x32xf32>
    %52 = arith.mulf %50, %50 : vector<1x32xf32>
    %53 = arith.subf %51, %52 : vector<1x32xf32>
    %c0_25 = arith.constant 0 : index
    %c0_26 = arith.constant 0 : index
    %54 = vector.load %arg9[%c0_25, %c0_26] : memref<1x32xf32, #tpu.memory_space<vmem>>, vector<1x32xf32>
    %cst_27 = arith.constant 9.99999974E-5 : f32
    %55 = vector.broadcast %cst_27 : f32 to vector<1x32xf32>
    %56 = arith.addf %53, %55 : vector<1x32xf32>
    %57 = math.rsqrt %56 : vector<1x32xf32>
    %58 = arith.mulf %54, %57 : vector<1x32xf32>
    %c0_28 = arith.constant 0 : index
    %c0_29 = arith.constant 0 : index
    %59 = vector.load %arg10[%c0_28, %c0_29] : memref<1x32xf32, #tpu.memory_space<vmem>>, vector<1x32xf32>
    %60 = arith.mulf %50, %58 : vector<1x32xf32>
    %61 = arith.subf %59, %60 : vector<1x32xf32>
    %62 = tpu.concatenate %58, %61 in 0 : vector<1x32xf32>, vector<1x32xf32> -> vector<2x32xf32>
    %63 = arith.truncf %62 : vector<2x32xf32> to vector<2x32xbf16>
    %c0_30 = arith.constant 0 : index
    %c0_31 = arith.constant 0 : index
    %64 = vector.load %arg8[%c0_30, %c0_31] : memref<32x256xbf16, #tpu.memory_space<vmem>>, vector<32x256xbf16>
    %cst_32 = arith.constant dense<0.000000e+00> : vector<2x256xf32>
    %65 = tpu.matmul %63, %64, %cst_32 {dimension_numbers = #tpu.dot_dimension_numbers<[1], [0], [0], [1], [0, 0, 1, 1], [], []>} : vector<2x32xbf16>, vector<32x256xbf16>, vector<2x256xf32> -> vector<2x256xf32>
    %66 = vector.extract_strided_slice %65 {offsets = [0, 0], sizes = [1, 256], strides = [1, 1]} : vector<2x256xf32> to vector<1x256xf32>
    %67 = vector.broadcast %66 : vector<1x256xf32> to vector<256x256xf32>
    %68 = arith.mulf %40, %67 : vector<256x256xf32>
    %69 = vector.extract_strided_slice %65 {offsets = [1, 0], sizes = [1, 256], strides = [1, 1]} : vector<2x256xf32> to vector<1x256xf32>
    %70 = vector.broadcast %69 : vector<1x256xf32> to vector<256x256xf32>
    %71 = arith.addf %68, %70 : vector<256x256xf32>
    %cst_33 = arith.constant 2.000000e-01 : f32
    %72 = vector.broadcast %cst_33 : f32 to vector<256x256xf32>
    %73 = arith.mulf %72, %71 : vector<256x256xf32>
    %74 = arith.maximumf %71, %73 : vector<256x256xf32>
    %75 = arith.truncf %74 : vector<256x256xf32> to vector<256x256xbf16>
    %c0_34 = arith.constant 0 : index
    %c0_35 = arith.constant 0 : index
    %76 = vector.load %arg11[%c0_34, %c0_35] : memref<256x256xbf16, #tpu.memory_space<vmem>>, vector<256x256xbf16>
    %cst_36 = arith.constant dense<0.000000e+00> : vector<256x256xf32>
    %77 = tpu.matmul %75, %76, %cst_36 {dimension_numbers = #tpu.dot_dimension_numbers<[1], [0], [0], [1], [0, 0, 1, 1], [], []>} : vector<256x256xbf16>, vector<256x256xbf16>, vector<256x256xf32> -> vector<256x256xf32>
    %cst_37 = arith.constant dense<0.000000e+00> : vector<256xf32>
    %78 = vector.multi_reduction <add>, %77, %cst_37 [0] : vector<256x256xf32> to vector<256xf32>
    %79 = vector.shape_cast %78 : vector<256xf32> to vector<1x256xf32>
    %80 = arith.mulf %77, %77 : vector<256x256xf32>
    %cst_38 = arith.constant dense<0.000000e+00> : vector<256xf32>
    %81 = vector.multi_reduction <add>, %80, %cst_38 [0] : vector<256x256xf32> to vector<256xf32>
    %82 = vector.shape_cast %81 : vector<256xf32> to vector<1x256xf32>
    %83 = tpu.concatenate %79, %82 in 0 : vector<1x256xf32>, vector<1x256xf32> -> vector<2x256xf32>
    %84 = arith.truncf %83 : vector<2x256xf32> to vector<2x256xbf16>
    %c0_39 = arith.constant 0 : index
    %c0_40 = arith.constant 0 : index
    %85 = vector.load %arg12[%c0_39, %c0_40] : memref<256x16xbf16, #tpu.memory_space<vmem>>, vector<256x16xbf16>
    %cst_41 = arith.constant dense<0.000000e+00> : vector<2x16xf32>
    %86 = tpu.matmul %84, %85, %cst_41 {dimension_numbers = #tpu.dot_dimension_numbers<[1], [0], [0], [1], [0, 0, 1, 1], [], []>} : vector<2x256xbf16>, vector<256x16xbf16>, vector<2x16xf32> -> vector<2x16xf32>
    %87 = vector.extract_strided_slice %86 {offsets = [0, 0], sizes = [1, 16], strides = [1, 1]} : vector<2x16xf32> to vector<1x16xf32>
    %88 = vector.extract_strided_slice %86 {offsets = [1, 0], sizes = [1, 16], strides = [1, 1]} : vector<2x16xf32> to vector<1x16xf32>
    %89 = arith.mulf %87, %87 : vector<1x16xf32>
    %90 = arith.subf %88, %89 : vector<1x16xf32>
    %c0_42 = arith.constant 0 : index
    %c0_43 = arith.constant 0 : index
    %91 = vector.load %arg14[%c0_42, %c0_43] : memref<1x16xf32, #tpu.memory_space<vmem>>, vector<1x16xf32>
    %cst_44 = arith.constant 9.99999974E-5 : f32
    %92 = vector.broadcast %cst_44 : f32 to vector<1x16xf32>
    %93 = arith.addf %90, %92 : vector<1x16xf32>
    %94 = math.rsqrt %93 : vector<1x16xf32>
    %95 = arith.mulf %91, %94 : vector<1x16xf32>
    %c0_45 = arith.constant 0 : index
    %c0_46 = arith.constant 0 : index
    %96 = vector.load %arg15[%c0_45, %c0_46] : memref<1x16xf32, #tpu.memory_space<vmem>>, vector<1x16xf32>
    %97 = arith.mulf %87, %95 : vector<1x16xf32>
    %98 = arith.subf %96, %97 : vector<1x16xf32>
    %99 = tpu.concatenate %95, %98 in 0 : vector<1x16xf32>, vector<1x16xf32> -> vector<2x16xf32>
    %100 = arith.truncf %99 : vector<2x16xf32> to vector<2x16xbf16>
    %c0_47 = arith.constant 0 : index
    %c0_48 = arith.constant 0 : index
    %101 = vector.load %arg13[%c0_47, %c0_48] : memref<16x256xbf16, #tpu.memory_space<vmem>>, vector<16x256xbf16>
    %cst_49 = arith.constant dense<0.000000e+00> : vector<2x256xf32>
    %102 = tpu.matmul %100, %101, %cst_49 {dimension_numbers = #tpu.dot_dimension_numbers<[1], [0], [0], [1], [0, 0, 1, 1], [], []>} : vector<2x16xbf16>, vector<16x256xbf16>, vector<2x256xf32> -> vector<2x256xf32>
    %103 = vector.extract_strided_slice %102 {offsets = [0, 0], sizes = [1, 256], strides = [1, 1]} : vector<2x256xf32> to vector<1x256xf32>
    %104 = vector.broadcast %103 : vector<1x256xf32> to vector<256x256xf32>
    %105 = arith.mulf %77, %104 : vector<256x256xf32>
    %106 = vector.extract_strided_slice %102 {offsets = [1, 0], sizes = [1, 256], strides = [1, 1]} : vector<2x256xf32> to vector<1x256xf32>
    %107 = vector.broadcast %106 : vector<1x256xf32> to vector<256x256xf32>
    %108 = arith.addf %105, %107 : vector<256x256xf32>
    %cst_50 = arith.constant 2.000000e-01 : f32
    %109 = vector.broadcast %cst_50 : f32 to vector<256x256xf32>
    %110 = arith.mulf %109, %108 : vector<256x256xf32>
    %111 = arith.maximumf %108, %110 : vector<256x256xf32>
    %112 = arith.truncf %111 : vector<256x256xf32> to vector<256x256xbf16>
    %c0_51 = arith.constant 0 : index
    %c0_52 = arith.constant 0 : index
    %113 = vector.load %arg16[%c0_51, %c0_52] : memref<256x256xbf16, #tpu.memory_space<vmem>>, vector<256x256xbf16>
    %cst_53 = arith.constant dense<0.000000e+00> : vector<256x256xf32>
    %114 = tpu.matmul %112, %113, %cst_53 {dimension_numbers = #tpu.dot_dimension_numbers<[1], [0], [0], [1], [0, 0, 1, 1], [], []>} : vector<256x256xbf16>, vector<256x256xbf16>, vector<256x256xf32> -> vector<256x256xf32>
    %cst_54 = arith.constant dense<0.000000e+00> : vector<256xf32>
    %115 = vector.multi_reduction <add>, %114, %cst_54 [0] : vector<256x256xf32> to vector<256xf32>
    %116 = vector.shape_cast %115 : vector<256xf32> to vector<1x256xf32>
    %117 = arith.mulf %114, %114 : vector<256x256xf32>
    %cst_55 = arith.constant dense<0.000000e+00> : vector<256xf32>
    %118 = vector.multi_reduction <add>, %117, %cst_55 [0] : vector<256x256xf32> to vector<256xf32>
    %119 = vector.shape_cast %118 : vector<256xf32> to vector<1x256xf32>
    %120 = tpu.concatenate %116, %119 in 0 : vector<1x256xf32>, vector<1x256xf32> -> vector<2x256xf32>
    %121 = arith.truncf %120 : vector<2x256xf32> to vector<2x256xbf16>
    %c0_56 = arith.constant 0 : index
    %c0_57 = arith.constant 0 : index
    %122 = vector.load %arg17[%c0_56, %c0_57] : memref<256x8xbf16, #tpu.memory_space<vmem>>, vector<256x8xbf16>
    %cst_58 = arith.constant dense<0.000000e+00> : vector<2x8xf32>
    %123 = tpu.matmul %121, %122, %cst_58 {dimension_numbers = #tpu.dot_dimension_numbers<[1], [0], [0], [1], [0, 0, 1, 1], [], []>} : vector<2x256xbf16>, vector<256x8xbf16>, vector<2x8xf32> -> vector<2x8xf32>
    %124 = vector.extract_strided_slice %123 {offsets = [0, 0], sizes = [1, 8], strides = [1, 1]} : vector<2x8xf32> to vector<1x8xf32>
    %125 = vector.extract_strided_slice %123 {offsets = [1, 0], sizes = [1, 8], strides = [1, 1]} : vector<2x8xf32> to vector<1x8xf32>
    %126 = arith.mulf %124, %124 : vector<1x8xf32>
    %127 = arith.subf %125, %126 : vector<1x8xf32>
    %c0_59 = arith.constant 0 : index
    %c0_60 = arith.constant 0 : index
    %128 = vector.load %arg19[%c0_59, %c0_60] : memref<1x8xf32, #tpu.memory_space<vmem>>, vector<1x8xf32>
    %cst_61 = arith.constant 9.99999974E-5 : f32
    %129 = vector.broadcast %cst_61 : f32 to vector<1x8xf32>
    %130 = arith.addf %127, %129 : vector<1x8xf32>
    %131 = math.rsqrt %130 : vector<1x8xf32>
    %132 = arith.mulf %128, %131 : vector<1x8xf32>
    %c0_62 = arith.constant 0 : index
    %c0_63 = arith.constant 0 : index
    %133 = vector.load %arg20[%c0_62, %c0_63] : memref<1x8xf32, #tpu.memory_space<vmem>>, vector<1x8xf32>
    %134 = arith.mulf %124, %132 : vector<1x8xf32>
    %135 = arith.subf %133, %134 : vector<1x8xf32>
    %136 = tpu.concatenate %132, %135 in 0 : vector<1x8xf32>, vector<1x8xf32> -> vector<2x8xf32>
    %137 = arith.truncf %136 : vector<2x8xf32> to vector<2x8xbf16>
    %c0_64 = arith.constant 0 : index
    %c0_65 = arith.constant 0 : index
    %138 = vector.load %arg18[%c0_64, %c0_65] : memref<8x256xbf16, #tpu.memory_space<vmem>>, vector<8x256xbf16>
    %cst_66 = arith.constant dense<0.000000e+00> : vector<2x256xf32>
    %139 = tpu.matmul %137, %138, %cst_66 {dimension_numbers = #tpu.dot_dimension_numbers<[1], [0], [0], [1], [0, 0, 1, 1], [], []>} : vector<2x8xbf16>, vector<8x256xbf16>, vector<2x256xf32> -> vector<2x256xf32>
    %140 = vector.extract_strided_slice %139 {offsets = [0, 0], sizes = [1, 256], strides = [1, 1]} : vector<2x256xf32> to vector<1x256xf32>
    %141 = vector.broadcast %140 : vector<1x256xf32> to vector<256x256xf32>
    %142 = arith.mulf %114, %141 : vector<256x256xf32>
    %143 = vector.extract_strided_slice %139 {offsets = [1, 0], sizes = [1, 256], strides = [1, 1]} : vector<2x256xf32> to vector<1x256xf32>
    %144 = vector.broadcast %143 : vector<1x256xf32> to vector<256x256xf32>
    %145 = arith.addf %142, %144 : vector<256x256xf32>
    %cst_67 = arith.constant 2.000000e-01 : f32
    %146 = vector.broadcast %cst_67 : f32 to vector<256x256xf32>
    %147 = arith.mulf %146, %145 : vector<256x256xf32>
    %148 = arith.maximumf %145, %147 : vector<256x256xf32>
    %149 = arith.truncf %148 : vector<256x256xf32> to vector<256x256xbf16>
    %c0_68 = arith.constant 0 : index
    %c0_69 = arith.constant 0 : index
    %150 = vector.load %arg21[%c0_68, %c0_69] : memref<256x64xbf16, #tpu.memory_space<vmem>>, vector<256x64xbf16>
    %cst_70 = arith.constant dense<0.000000e+00> : vector<256x64xf32>
    %151 = tpu.matmul %149, %150, %cst_70 {dimension_numbers = #tpu.dot_dimension_numbers<[1], [0], [0], [1], [0, 0, 1, 1], [], []>} : vector<256x256xbf16>, vector<256x64xbf16>, vector<256x64xf32> -> vector<256x64xf32>
    %c0_71 = arith.constant 0 : index
    %c0_72 = arith.constant 0 : index
    %152 = vector.load %arg22[%c0_71, %c0_72] : memref<1x64xf32, #tpu.memory_space<vmem>>, vector<1x64xf32>
    %153 = vector.broadcast %152 : vector<1x64xf32> to vector<256x64xf32>
    %154 = arith.addf %151, %153 : vector<256x64xf32>
    %155 = math.tanh %154 : vector<256x64xf32>
    %c0_73 = arith.constant 0 : index
    %c0_74 = arith.constant 0 : index
    %156 = vector.load %arg23[%c0_73, %c0_74] : memref<256x64xf32, #tpu.memory_space<vmem>>, vector<256x64xf32>
    tpu.vector_store %arg23[%c0_73, %c0_74], %155 {strides = array<i32>} : memref<256x64xf32, #tpu.memory_space<vmem>>, vector<256x64xf32>,
    return
  }
}

</mosaic_0001>

<bundles_post_ra>
// kernel: tpu_custom_call.1
= control target key start
LH: loop header
LB: loop body
LE: loop exit
PB: predicated region body
PF: predicated region fallthrough
CT: control target
= control target key end

     0   :  { %s11643_s0 = inlined_call_operand.vmem [shape: f32[256,32], index: 0, kind: input, shape index: {}]   ;;  %s11644_s1 = inlined_call_operand.vmem [shape: bf16[32,256], index: 1, kind: input, shape index: {}]   ;;  %s11645_s2 = inlined_call_operand.vmem [shape: bf16[256,64], index: 2, kind: input, shape index: {}]   ;;  %s11646_s3 = inlined_call_operand.vmem [shape: bf16[64,256], index: 3, kind: input, shape index: {}]   ;;  %s11647_s4 = inlined_call_operand.vmem [shape: f32[1,64], index: 4, kind: input, shape index: {}]   ;;  %s11648_s5 = inlined_call_operand.vmem [shape: f32[1,64], index: 5, kind: input, shape index: {}]   ;;  %s11649_s6 = inlined_call_operand.vmem [shape: bf16[256,256], index: 6, kind: input, shape index: {}]   ;;  %s11650_s7 = inlined_call_operand.vmem [shape: bf16[256,32], index: 7, kind: input, shape index: {}]   ;;  %s11651_s8 = inlined_call_operand.vmem [shape: bf16[32,256], index: 8, kind: input, shape index: {}]   ;;  %s11652_s9 = inlined_call_operand.vmem [shape: f32[1,32], index: 9, kind: input, shape index: {}]   ;;  %s11653_s10 = inlined_call_operand.vmem [shape: f32[1,32], index: 10, kind: input, shape index: {}]   ;;  %s11654_s11 = inlined_call_operand.vmem [shape: bf16[256,256], index: 11, kind: input, shape index: {}]   ;;  %s11655_s12 = inlined_call_operand.vmem [shape: bf16[256,16], index: 12, kind: input, shape index: {}]   ;;  %s11656_s13 = inlined_call_operand.vmem [shape: bf16[16,256], index: 13, kind: input, shape index: {}]   ;;  %s11657_s14 = inlined_call_operand.vmem [shape: f32[1,16], index: 14, kind: input, shape index: {}]   ;;  %s11658_s15 = inlined_call_operand.vmem [shape: f32[1,16], index: 15, kind: input, shape index: {}]   ;;  %s11659_s16 = inlined_call_operand.hbm [shape: bf16[256,256], index: 16, kind: input, shape index: {}]   ;;  %s11660_s17 = inlined_call_operand.vmem [shape: bf16[256,8], index: 17, kind: input, shape index: {}]   ;;  %s11661_s18 = inlined_call_operand.vmem [shape: bf16[8,256], index: 18, kind: input, shape index: {}]   ;;  %s11662_s19 = inlined_call_operand.vmem [shape: f32[1,8], index: 19, kind: input, shape index: {}]   ;;  %s11663_s20 = inlined_call_operand.vmem [shape: f32[1,8], index: 20, kind: input, shape index: {}]   ;;  %s11664_s21 = inlined_call_operand.vmem [shape: bf16[256,64], index: 21, kind: input, shape index: {}]   ;;  %s11665_s22 = inlined_call_operand.vmem [shape: f32[1,64], index: 22, kind: input, shape index: {}]   ;;  %s11666_s23 = inlined_call_operand.vmem [shape: f32[256,64], index: 23, kind: output, shape index: {}]  }
   0x1   :  { %11820 = sst [smem:[#allocation45_spill]] %s11643_s0 }
   0x2   :  { %11821 = sst [smem:[#allocation46_spill]] %s11644_s1 }
   0x3   :  { %11822 = sst [smem:[#allocation47_spill]] %s11645_s2 }
   0x4   :  { %11823 = sst [smem:[#allocation48_spill]] %s11646_s3 }
   0x5   :  { %11824 = sst [smem:[#allocation49_spill]] %s11647_s4 }
   0x6   :  { %11825 = sst [smem:[#allocation50_spill]] %s11648_s5 }
   0x7   :  { %11826 = sst [smem:[#allocation51_spill]] %s11649_s6 }
   0x8   :  { %11827 = sst [smem:[#allocation52_spill]] %s11650_s7 }
   0x9   :  { %28 = vsyncpa [#allocation3], 0  ;;  %s65_s24 = sshll.u32 %s11659_s16, 4  ;;  %s6530_s25 = smov [#allocation2]   ;;  %s66_s24 = int_to_ptr.hbm [resolvable:$true] %s65_s24 }
   0xa   :  { %s67_s5 = sshll.u32 %s6530_s25, 4  ;;  %s6531_s1 = smov 128   ;;  %s68_s5 = int_to_ptr.vmem [resolvable:$true] %s67_s5 }
   0xb   :  { %s6532_s26 = smov 8  }
   0xc   :  { %73 = dma.hbm_to_vmem [thread:$0]  %s66_s24, 4096, %s68_s5, [#allocation3], %s6531_s1, %s6531_s1, %s6532_s26  }
   0xd   :  { %6528 = dma.done.wait [#allocation3], 4096  }
   0xe   :  { %6529 = vsyncadd [#allocation3], 4294963200  ;;  %s11828_s27 = sld [smem:[#allocation46_spill]]  ;;  %vm163_vm0 = vcmask 261120   ;;  %vm602_vm1 = vcmask 1040384   ;;  %vm840_vm5 = vcmask 523264  }
   0xf   :  { %s11829_s28 = sld [smem:[#allocation45_spill]]  ;;  %vm3417_vm12 = vcmask 130048   ;;  %vm4698_vm13 = vcmask 1043456  }
  0x10   :  { %s11855_s16 = sld [smem:[#allocation47_spill]] }
  0x11   :  { %s11860_s4 = sld [smem:[#allocation51_spill]] }
  0x12   :  { %s11863_s24 = sld [smem:[#allocation48_spill]] }
  0x13   :  { %s11864_s3 = sld [smem:[#allocation49_spill]] }
  0x14   :  { %v5412_v0 = vld [vmem:[%s11828_s27 + $0x10] sm:$0xf]  ;;  %v6221_v1 = vld [vmem:[%s11828_s27 + $0x14] sm:$0xf0]  ;;  %v6220_v2 = vld [vmem:[%s11828_s27 + $0x14] sm:$0xf] }
  0x15   :  { %v5413_v3 = vor.u32 %v6221_v1, %v5412_v0  ;;  %v5414_v4 = vld [vmem:[%s11828_s27 + $0x18] sm:$0xf0]  ;;  %v5404_v5 = vld [vmem:[%s11828_s27] sm:$0xf]  ;;  %v6219_v6 = vld [vmem:[%s11828_s27 + $0x4] sm:$0xf0] }
  0x16   :  { %v5417_v7 = vor.u32 %v6220_v2, %v5414_v4  ;;  %v6218_v8 = vld [vmem:[%s11828_s27 + $0x4] sm:$0xf]  ;;  %v5406_v9 = vld [vmem:[%s11828_s27 + $0x8] sm:$0xf0]  ;;  %v5405_v10 = vor.u32 %v6219_v6, %v5404_v5  ;;  %v93_v15 = vld [vmem:[%s11829_s28 + $0x10] sm:$0xff]  ;;  %s11865_s27 = sld [smem:[#allocation50_spill]] }
  0x17   :  { %218 = vmatpush.bf16.msra.mxu0 %v5413_v3  ;;  %v91_v11 = vld [vmem:[%s11829_s28] sm:$0xff]  ;;  %v92_v12 = vld [vmem:[%s11829_s28 + $0x8] sm:$0xff]  ;;  %v5409_v13 = vor.u32 %v6218_v8, %v5406_v9  ;;  %v94_v16 = vld [vmem:[%s11829_s28 + $0x18] sm:$0xff]  ;;  %s11955_s1 = sld [smem:[#allocation52_spill]] }
  0x18   :  { %307 = vmatpush.bf16.msra.mxu1 %v5417_v7  ;;  %v123_v14 = vpack.c.bf16 %v92_v12, %v91_v11  ;;  %v124_v17 = vpack.c.bf16 %v94_v16, %v93_v15  ;;  %v95_v18 = vld [vmem:[%s11829_s28 + $0x20] sm:$0xff]  ;;  %v96_v19 = vld [vmem:[%s11829_s28 + $0x28] sm:$0xff]  ;;  %v97_v21 = vld [vmem:[%s11829_s28 + $0x30] sm:$0xff] }
  0x19   :  { %v125_v20 = vpack.c.bf16 %v96_v19, %v95_v18  ;;  %v98_v22 = vld [vmem:[%s11829_s28 + $0x38] sm:$0xff]  ;;  %v99_v24 = vld [vmem:[%s11829_s28 + $0x40] sm:$0xff]  ;;  %v100_v25 = vld [vmem:[%s11829_s28 + $0x48] sm:$0xff] }
  0x1a   :  { %v126_v23 = vpack.c.bf16 %v98_v22, %v97_v21  ;;  %v127_v26 = vpack.c.bf16 %v100_v25, %v99_v24  ;;  %v101_v27 = vld [vmem:[%s11829_s28 + $0x50] sm:$0xff]  ;;  %v102_v28 = vld [vmem:[%s11829_s28 + $0x58] sm:$0xff]  ;;  %v103_v30 = vld [vmem:[%s11829_s28 + $0x60] sm:$0xff] }
  0x1b   :  { %219 = vmatpush.bf16.msra.mxu0 %v5405_v10  ;;  %v128_v29 = vpack.c.bf16 %v102_v28, %v101_v27  ;;  %v104_v31 = vld [vmem:[%s11829_s28 + $0x68] sm:$0xff]  ;;  %v105_v33 = vld [vmem:[%s11829_s28 + $0x70] sm:$0xff]  ;;  %v106_v34 = vld [vmem:[%s11829_s28 + $0x78] sm:$0xff] }
  0x1c   :  { %308 = vmatpush.bf16.msra.mxu1 %v5409_v13  ;;  %v129_v32 = vpack.c.bf16 %v104_v31, %v103_v30  ;;  %v130_v35 = vpack.c.bf16 %v106_v34, %v105_v33  ;;  %v107_v36 = vld [vmem:[%s11829_s28 + $0x80] sm:$0xff]  ;;  %v108_v37 = vld [vmem:[%s11829_s28 + $0x88] sm:$0xff]  ;;  %v109_v43 = vld [vmem:[%s11829_s28 + $0x90] sm:$0xff] }
  0x1d   :  { %v131_v38 = vpack.c.bf16 %v108_v37, %v107_v36  ;;  %v110_v44 = vld [vmem:[%s11829_s28 + $0x98] sm:$0xff]  ;;  %v111_v50 = vld [vmem:[%s11829_s28 + $0xa0] sm:$0xff]  ;;  %v112_v51 = vld [vmem:[%s11829_s28 + $0xa8] sm:$0xff] }
  0x1e   :  { %5418 = vmatmul.msk.bf16.vlgmr.msra.gmra.mxu0 %vm163_vm0, %v123_v14  ;;  %v132_v45 = vpack.c.bf16 %v110_v44, %v109_v43  ;;  %v133_v52 = vpack.c.bf16 %v112_v51, %v111_v50  ;;  %v113_v57 = vld [vmem:[%s11829_s28 + $0xb0] sm:$0xff]  ;;  %v114_v58 = vld [vmem:[%s11829_s28 + $0xb8] sm:$0xff]  ;;  %v115_v0 = vld [vmem:[%s11829_s28 + $0xc0] sm:$0xff] }
  0x1f   :  { %5434 = vmatmul.msk.bf16.vlgmr.msra.gmra.mxu1 %vm163_vm0, %v123_v14  ;;  %v134_v59 = vpack.c.bf16 %v114_v58, %v113_v57  ;;  %v116_v1 = vld [vmem:[%s11829_s28 + $0xc8] sm:$0xff]  ;;  %v117_v7 = vld [vmem:[%s11829_s28 + $0xd0] sm:$0xff]  ;;  %v118_v8 = vld [vmem:[%s11829_s28 + $0xd8] sm:$0xff] }
  0x20   :  { %v135_v2 = vpack.c.bf16 %v116_v1, %v115_v0  ;;  %v136_v9 = vpack.c.bf16 %v118_v8, %v117_v7  ;;  %v119_v14 = vld [vmem:[%s11829_s28 + $0xe0] sm:$0xff]  ;;  %v120_v15 = vld [vmem:[%s11829_s28 + $0xe8] sm:$0xff]  ;;  %v121_v21 = vld [vmem:[%s11829_s28 + $0xf0] sm:$0xff] }
  0x21   :  { %v137_v16 = vpack.c.bf16 %v120_v15, %v119_v14  ;;  %v122_v22 = vld [vmem:[%s11829_s28 + $0xf8] sm:$0xff] }
  0x2e   :  { %5419 = vmatmul.msk.bf16.gmra.mxu0 %vm163_vm0, %v124_v17 }
  0x2f   :  { %5435 = vmatmul.msk.bf16.gmra.mxu1 %vm163_vm0, %v124_v17 }
  0x3e   :  { %5420 = vmatmul.msk.bf16.gmra.mxu0 %vm163_vm0, %v125_v20 }
  0x3f   :  { %5436 = vmatmul.msk.bf16.gmra.mxu1 %vm163_vm0, %v125_v20 }
  0x4e   :  { %5421 = vmatmul.msk.bf16.gmra.mxu0 %vm163_vm0, %v126_v23 }
  0x4f   :  { %5437 = vmatmul.msk.bf16.gmra.mxu1 %vm163_vm0, %v126_v23  ;;  %v138_v23 = vpack.c.bf16 %v122_v22, %v121_v21 }
  0x5e   :  { %5422 = vmatmul.msk.bf16.gmra.mxu0 %vm163_vm0, %v127_v26 }
  0x5f   :  { %5438 = vmatmul.msk.bf16.gmra.mxu1 %vm163_vm0, %v127_v26 }
  0x6e   :  { %5423 = vmatmul.msk.bf16.gmra.mxu0 %vm163_vm0, %v128_v29 }
  0x6f   :  { %5439 = vmatmul.msk.bf16.gmra.mxu1 %vm163_vm0, %v128_v29 }
  0x7e   :  { %5424 = vmatmul.msk.bf16.gmra.mxu0 %vm163_vm0, %v129_v32 }
  0x7f   :  { %5440 = vmatmul.msk.bf16.gmra.mxu1 %vm163_vm0, %v129_v32 }
  0x8e   :  { %5425 = vmatmul.msk.bf16.gmra.mxu0 %vm163_vm0, %v130_v35 }
  0x8f   :  { %5441 = vmatmul.msk.bf16.gmra.mxu1 %vm163_vm0, %v130_v35 }
  0x9b   :  { %v6750_v39 = vpop.f32.mrf.mxu0 }
  0x9c   :  { %v6752_v40 = vpop.f32.mrf.mxu1  ;;  %v464_v58 = vmul.f32 %v6750_v39, %v6750_v39 }
  0x9d   :  { %11830 = vst [vmem:[#allocation5_spill] sm:$0xff] %v6752_v40  ;;  %v465_v1 = vmul.f32 %v6752_v40, %v6752_v40 }
  0x9e   :  { %5426 = vmatmul.msk.bf16.gmra.mxu0 %vm163_vm0, %v131_v38 }
  0x9f   :  { %5442 = vmatmul.msk.bf16.gmra.mxu1 %vm163_vm0, %v131_v38 }
  0xa3   :  { %v6756_v41 = vpop.f32.mrf.mxu0 }
  0xa4   :  { %11831 = vst [vmem:[#allocation6_spill] sm:$0xff] %v6756_v41  ;;  %v6758_v42 = vpop.f32.mrf.mxu1 }
  0xa5   :  { %11832 = vst [vmem:[#allocation7_spill] sm:$0xff] %v6758_v42  ;;  %v467_v57 = vmul.f32 %v6758_v42, %v6758_v42 }
  0xab   :  { %v6766_v46 = vpop.f32.mrf.mxu0 }
  0xac   :  { %v6768_v47 = vpop.f32.mrf.mxu1  ;;  %v468_v0 = vmul.f32 %v6766_v46, %v6766_v46 }
  0xad   :  { %11833 = vst [vmem:[#allocation8_spill] sm:$0xff] %v6768_v47  ;;  %v469_v7 = vmul.f32 %v6768_v47, %v6768_v47 }
  0xae   :  { %5427 = vmatmul.msk.bf16.gmra.mxu0 %vm163_vm0, %v132_v45 }
  0xaf   :  { %5443 = vmatmul.msk.bf16.gmra.mxu1 %vm163_vm0, %v132_v45 }
  0xb3   :  { %v6772_v48 = vpop.f32.mrf.mxu0 }
  0xb4   :  { %v6774_v49 = vpop.f32.mrf.mxu1  ;;  %v470_v14 = vmul.f32 %v6772_v48, %v6772_v48 }
  0xb5   :  { %11834 = vst [vmem:[#allocation9_spill] sm:$0xff] %v6774_v49  ;;  %v471_v21 = vmul.f32 %v6774_v49, %v6774_v49 }
  0xbb   :  { %v6782_v53 = vpop.f32.mrf.mxu0 }
  0xbc   :  { %v6784_v54 = vpop.f32.mrf.mxu1 }
  0xbe   :  { %5428 = vmatmul.msk.bf16.gmra.mxu0 %vm163_vm0, %v133_v52 }
  0xbf   :  { %5444 = vmatmul.msk.bf16.gmra.mxu1 %vm163_vm0, %v133_v52  ;;  %v466_v52 = vmul.f32 %v6756_v41, %v6756_v41 }
  0xc3   :  { %v6788_v55 = vpop.f32.mrf.mxu0 }
  0xc4   :  { %v6790_v56 = vpop.f32.mrf.mxu1 }
  0xc5   :  { %11835 = vst [vmem:[#allocation10_spill] sm:$0xff] %v6790_v56 }
  0xcb   :  { %v6798_v60 = vpop.f32.mrf.mxu0 }
  0xcc   :  { %v6800_v61 = vpop.f32.mrf.mxu1 }
  0xcd   :  { %11836 = vst [vmem:[#allocation11_spill] sm:$0xff] %v6800_v61 }
  0xce   :  { %5429 = vmatmul.msk.bf16.gmra.mxu0 %vm163_vm0, %v134_v59 }
  0xcf   :  { %5445 = vmatmul.msk.bf16.gmra.mxu1 %vm163_vm0, %v134_v59  ;;  %v390_v59 = vadd.f32 %v6756_v41, %v6750_v39 }
  0xd1   :  { %v391_v8 = vadd.f32 %v390_v59, %v6766_v46  ;;  %v473_v59 = vmul.f32 %v6784_v54, %v6784_v54 }
  0xd3   :  { %v6804_v62 = vpop.f32.mrf.mxu0 }
  0xd4   :  { %v6806_v63 = vpop.f32.mrf.mxu1 }
  0xd5   :  { %11837 = vst [vmem:[#allocation12_spill] sm:$0xff] %v6806_v63 }
  0xdb   :  { %v6814_v3 = vpop.f32.mrf.mxu0 }
  0xdc   :  { %v6816_v4 = vpop.f32.mrf.mxu1 }
  0xde   :  { %5430 = vmatmul.msk.bf16.gmra.mxu0 %vm163_vm0, %v135_v2 }
  0xdf   :  { %5446 = vmatmul.msk.bf16.gmra.mxu1 %vm163_vm0, %v135_v2  ;;  %v427_v2 = vadd.f32 %v6758_v42, %v6752_v40  ;;  %v392_v42 = vadd.f32 %v391_v8, %v6772_v48  ;;  %v472_v40 = vmul.f32 %v6782_v53, %v6782_v53 }
  0xe1   :  { %v428_v15 = vadd.f32 %v427_v2, %v6768_v47  ;;  %v474_v2 = vmul.f32 %v6788_v55, %v6788_v55 }
  0xe3   :  { %v6820_v5 = vpop.f32.mrf.mxu0 }
  0xe4   :  { %v6822_v6 = vpop.f32.mrf.mxu1 }
  0xe5   :  { %11838 = vst [vmem:[#allocation13_spill] sm:$0xff] %v6822_v6 }
  0xeb   :  { %v6830_v10 = vpop.f32.mrf.mxu0 }
  0xec   :  { %v6832_v11 = vpop.f32.mrf.mxu1 }
  0xed   :  { %11839 = vst [vmem:[#allocation14_spill] sm:$0xff] %v6832_v11 }
  0xee   :  { %5431 = vmatmul.msk.bf16.gmra.mxu0 %vm163_vm0, %v136_v9 }
  0xef   :  { %5447 = vmatmul.msk.bf16.gmra.mxu1 %vm163_vm0, %v136_v9  ;;  %v528_v9 = vadd.f32 %v466_v52, %v464_v58  ;;  %v429_v58 = vadd.f32 %v428_v15, %v6774_v49  ;;  %v476_v15 = vmul.f32 %v6798_v60, %v6798_v60 }
  0xf3   :  { %v6836_v12 = vpop.f32.mrf.mxu0 }
  0xf4   :  { %v6838_v13 = vpop.f32.mrf.mxu1 }
  0xf5   :  { %11840 = vst [vmem:[#allocation15_spill] sm:$0xff] %v6838_v13 }
  0xfb   :  { %v6846_v17 = vpop.f32.mrf.mxu0 }
  0xfc   :  { %v6848_v18 = vpop.f32.mrf.mxu1 }
  0xfd   :  { %11841 = vst [vmem:[#allocation16_spill] sm:$0xff] %v6848_v18 }
  0xfe   :  { %5432 = vmatmul.msk.bf16.gmra.mxu0 %vm163_vm0, %v137_v16 }
  0xff   :  { %5448 = vmatmul.msk.bf16.gmra.mxu1 %vm163_vm0, %v137_v16  ;;  %v565_v16 = vadd.f32 %v467_v57, %v465_v1  ;;  %v393_v57 = vadd.f32 %v392_v42, %v6782_v53  ;;  %v477_v42 = vmul.f32 %v6800_v61, %v6800_v61 }
 0x101   :  { %v566_v52 = vadd.f32 %v565_v16, %v469_v7  ;;  %v394_v7 = vadd.f32 %v393_v57, %v6788_v55 }
 0x103   :  { %v6852_v19 = vpop.f32.mrf.mxu0  ;;  %v567_v8 = vadd.f32 %v566_v52, %v471_v21  ;;  %v478_v21 = vmul.f32 %v6804_v62, %v6804_v62 }
 0x104   :  { %v6854_v20 = vpop.f32.mrf.mxu1 }
 0x105   :  { %11842 = vst [vmem:[#allocation17_spill] sm:$0xff] %v6854_v20  ;;  %v568_v16 = vadd.f32 %v567_v8, %v473_v59 }
 0x10b   :  { %v6862_v24 = vpop.f32.mrf.mxu0 }
 0x10c   :  { %v6864_v25 = vpop.f32.mrf.mxu1 }
 0x10d   :  { %11843 = vst [vmem:[#allocation18_spill] sm:$0xff] %v6864_v25 }
 0x10e   :  { %5433 = vmatmul.msk.bf16.gmra.mxu0 %vm163_vm0, %v138_v23 }
 0x10f   :  { %5449 = vmatmul.msk.bf16.gmra.mxu1 %vm163_vm0, %v138_v23  ;;  %v529_v23 = vadd.f32 %v528_v9, %v468_v0  ;;  %v430_v0 = vadd.f32 %v429_v58, %v6784_v54  ;;  %v475_v9 = vmul.f32 %v6790_v56, %v6790_v56  ;;  %v479_v58 = vmul.f32 %v6806_v63, %v6806_v63 }
 0x111   :  { %v530_v1 = vadd.f32 %v529_v23, %v470_v14  ;;  %v431_v49 = vadd.f32 %v430_v0, %v6790_v56  ;;  %v395_v14 = vadd.f32 %v394_v7, %v6798_v60  ;;  %v480_v0 = vmul.f32 %v6814_v3, %v6814_v3  ;;  %v6237_v7 = vld [vmem:[%s11855_s16 + $0x78] sm:$0xff] }
 0x112   :  { %748 = vmatpush.bf16.msra.mxu3 %v6237_v7 }
 0x113   :  { %v6868_v26 = vpop.f32.mrf.mxu0  ;;  %v531_v47 = vadd.f32 %v530_v1, %v472_v40  ;;  %v432_v52 = vadd.f32 %v431_v49, %v6800_v61  ;;  %v569_v40 = vadd.f32 %v568_v16, %v475_v9  ;;  %v396_v1 = vadd.f32 %v395_v14, %v6804_v62  ;;  %v6229_v9 = vld [vmem:[%s11855_s16 + $0x38] sm:$0xff] }
 0x114   :  { %v6870_v27 = vpop.f32.mrf.mxu1  ;;  %v481_v49 = vmul.f32 %v6816_v4, %v6816_v4  ;;  %v482_v14 = vmul.f32 %v6820_v5, %v6820_v5  ;;  %735 = vmatpush.bf16.msra.mxu2 %v6229_v9  ;;  %v484_v61 = vmul.f32 %v6830_v10, %v6830_v10  ;;  %v487_v9 = vmul.f32 %v6838_v13, %v6838_v13 }
 0x115   :  { %11844 = vst [vmem:[#allocation19_spill] sm:$0xff] %v6870_v27  ;;  %v532_v23 = vadd.f32 %v531_v47, %v474_v2  ;;  %v570_v47 = vadd.f32 %v569_v40, %v477_v42  ;;  %v433_v2 = vadd.f32 %v432_v52, %v6806_v63  ;;  %v483_v52 = vmul.f32 %v6822_v6, %v6822_v6 }
 0x117   :  { %v533_v59 = vadd.f32 %v532_v23, %v476_v15  ;;  %v397_v15 = vadd.f32 %v396_v1, %v6814_v3  ;;  %v434_v42 = vadd.f32 %v433_v2, %v6816_v4  ;;  %v571_v23 = vadd.f32 %v570_v47, %v479_v58 }
 0x118   :  { %v486_v47 = vmul.f32 %v6836_v12, %v6836_v12 }
 0x119   :  { %v534_v16 = vadd.f32 %v533_v59, %v478_v21  ;;  %v398_v63 = vadd.f32 %v397_v15, %v6820_v5  ;;  %v572_v56 = vadd.f32 %v571_v23, %v481_v49  ;;  %v435_v21 = vadd.f32 %v434_v42, %v6822_v6  ;;  %v6228_v49 = vld [vmem:[%s11855_s16 + $0x30] sm:$0xff] }
 0x11a   :  { %v485_v59 = vmul.f32 %v6832_v11, %v6832_v11  ;;  %736 = vmatpush.bf16.msra.mxu2 %v6228_v49  ;;  %v492_v49 = vmul.f32 %v6862_v24, %v6862_v24 }
 0x11b   :  { %v6872_v28 = vpop.f32.mrf.mxu0  ;;  %v535_v40 = vadd.f32 %v534_v16, %v480_v0  ;;  %v399_v1 = vadd.f32 %v398_v63, %v6830_v10  ;;  %v436_v2 = vadd.f32 %v435_v21, %v6832_v11  ;;  %v573_v0 = vadd.f32 %v572_v56, %v483_v52  ;;  %v6236_v63 = vld [vmem:[%s11855_s16 + $0x70] sm:$0xff] }
 0x11c   :  { %v6874_v29 = vpop.f32.mrf.mxu1  ;;  %v489_v52 = vmul.f32 %v6848_v18, %v6848_v18  ;;  %749 = vmatpush.bf16.msra.mxu3 %v6236_v63  ;;  %v491_v11 = vmul.f32 %v6854_v20, %v6854_v20 }
 0x11d   :  { %11845 = vst [vmem:[#allocation20_spill] sm:$0xff] %v6874_v29  ;;  %v536_v58 = vadd.f32 %v535_v40, %v482_v14  ;;  %v400_v16 = vadd.f32 %v399_v1, %v6836_v12  ;;  %v488_v14 = vmul.f32 %v6846_v17, %v6846_v17  ;;  %v574_v42 = vadd.f32 %v573_v0, %v485_v59  ;;  %v6227_v59 = vld [vmem:[%s11855_s16 + $0x28] sm:$0xff] }
 0x11e   :  { %v437_v23 = vadd.f32 %v436_v2, %v6838_v13  ;;  %v6235_v2 = vld [vmem:[%s11855_s16 + $0x68] sm:$0xff]  ;;  %737 = vmatpush.bf16.msra.mxu2 %v6227_v59 }
 0x11f   :  { %v537_v15 = vadd.f32 %v536_v58, %v484_v61  ;;  %v401_v40 = vadd.f32 %v400_v16, %v6846_v17  ;;  %v490_v61 = vmul.f32 %v6852_v19, %v6852_v19  ;;  %v575_v58 = vadd.f32 %v574_v42, %v487_v9 }
 0x120   :  { %v438_v1 = vadd.f32 %v437_v23, %v6848_v18  ;;  %750 = vmatpush.bf16.msra.mxu3 %v6235_v2  ;;  %v494_v23 = vmul.f32 %v6868_v26, %v6868_v26  ;;  %v496_v2 = vmul.f32 %v6872_v28, %v6872_v28 }
 0x121   :  { %v538_v21 = vadd.f32 %v537_v15, %v486_v47  ;;  %v402_v47 = vadd.f32 %v401_v40, %v6852_v19  ;;  %v576_v63 = vadd.f32 %v575_v58, %v489_v52  ;;  %v493_v15 = vmul.f32 %v6864_v25, %v6864_v25  ;;  %v6234_v58 = vld [vmem:[%s11855_s16 + $0x60] sm:$0xff] }
 0x122   :  { %v439_v9 = vadd.f32 %v438_v1, %v6854_v20  ;;  %v6226_v1 = vld [vmem:[%s11855_s16 + $0x20] sm:$0xff] }
 0x123   :  { %v6876_v30 = vpop.f32.mrf.mxu0  ;;  %v539_v0 = vadd.f32 %v538_v21, %v488_v14  ;;  %v403_v16 = vadd.f32 %v402_v47, %v6862_v24  ;;  %v577_v40 = vadd.f32 %v576_v63, %v491_v11  ;;  %v495_v21 = vmul.f32 %v6870_v27, %v6870_v27  ;;  %738 = vmatpush.bf16.msra.mxu2 %v6226_v1 }
 0x124   :  { %v6878_v31 = vpop.f32.mrf.mxu1  ;;  %v440_v14 = vadd.f32 %v439_v9, %v6864_v25  ;;  %v497_v63 = vmul.f32 %v6874_v29, %v6874_v29  ;;  %751 = vmatpush.bf16.msra.mxu3 %v6234_v58 }
 0x125   :  { %11846 = vst [vmem:[#allocation21_spill] sm:$0xff] %v6878_v31  ;;  %v540_v42 = vadd.f32 %v539_v0, %v490_v61  ;;  %v404_v59 = vadd.f32 %v403_v16, %v6868_v26  ;;  %v578_v0 = vadd.f32 %v577_v40, %v493_v15  ;;  %v499_v20 = vmul.f32 %v6878_v31, %v6878_v31  ;;  %v6225_v15 = vld [vmem:[%s11855_s16 + $0x18] sm:$0xff] }
 0x126   :  { %v441_v47 = vadd.f32 %v440_v14, %v6870_v27  ;;  %v6233_v14 = vld [vmem:[%s11855_s16 + $0x58] sm:$0xff] }
 0x127   :  { %v541_v61 = vadd.f32 %v540_v42, %v492_v49  ;;  %v405_v9 = vadd.f32 %v404_v59, %v6872_v28  ;;  %v498_v49 = vmul.f32 %v6876_v30, %v6876_v30  ;;  %v579_v42 = vadd.f32 %v578_v0, %v495_v21  ;;  %739 = vmatpush.bf16.msra.mxu2 %v6225_v15 }
 0x128   :  { %v442_v16 = vadd.f32 %v441_v47, %v6874_v29  ;;  %752 = vmatpush.bf16.msra.mxu3 %v6233_v14 }
 0x129   :  { %v542_v25 = vadd.f32 %v541_v61, %v494_v23  ;;  %v406_v23 = vadd.f32 %v405_v9, %v6876_v30  ;;  %v580_v58 = vadd.f32 %v579_v42, %v497_v63  ;;  %v6232_v42 = vld [vmem:[%s11855_s16 + $0x50] sm:$0xff] }
 0x12a   :  { %v443_v21 = vadd.f32 %v442_v16, %v6878_v31  ;;  %v6224_v16 = vld [vmem:[%s11855_s16 + $0x10] sm:$0xff] }
 0x12b   :  { %v6880_v32 = vpop.f32.mrf.mxu0  ;;  %v543_v40 = vadd.f32 %v542_v25, %v496_v2  ;;  %v581_v2 = vadd.f32 %v580_v58, %v499_v20  ;;  %740 = vmatpush.bf16.msra.mxu2 %v6224_v16 }
 0x12c   :  { %v6882_v33 = vpop.f32.mrf.mxu1  ;;  %v500_v1 = vmul.f32 %v6880_v32, %v6880_v32  ;;  %v407_v59 = vadd.f32 %v406_v23, %v6880_v32  ;;  %753 = vmatpush.bf16.msra.mxu3 %v6232_v42 }
 0x12d   :  { %11847 = vst [vmem:[#allocation22_spill] sm:$0xff] %v6882_v33  ;;  %v501_v61 = vmul.f32 %v6882_v33, %v6882_v33  ;;  %v544_v0 = vadd.f32 %v543_v40, %v498_v49  ;;  %v444_v25 = vadd.f32 %v443_v21, %v6882_v33  ;;  %v6223_v21 = vld [vmem:[%s11855_s16 + $0x8] sm:$0xff] }
 0x12f   :  { %v545_v49 = vadd.f32 %v544_v0, %v500_v1  ;;  %v582_v40 = vadd.f32 %v581_v2, %v501_v61  ;;  %v6231_v1 = vld [vmem:[%s11855_s16 + $0x48] sm:$0xff]  ;;  %741 = vmatpush.bf16.msra.mxu2 %v6223_v21 }
 0x130   :  { %754 = vmatpush.bf16.msra.mxu3 %v6231_v1 }
 0x133   :  { %v6884_v34 = vpop.f32.mrf.mxu0 }
 0x134   :  { %v6886_v35 = vpop.f32.mrf.mxu1  ;;  %v502_v47 = vmul.f32 %v6884_v34, %v6884_v34  ;;  %v408_v15 = vadd.f32 %v407_v59, %v6884_v34 }
 0x135   :  { %11848 = vst [vmem:[#allocation23_spill] sm:$0xff] %v6886_v35  ;;  %v503_v9 = vmul.f32 %v6886_v35, %v6886_v35  ;;  %v445_v23 = vadd.f32 %v444_v25, %v6886_v35 }
 0x136   :  { %v546_v0 = vadd.f32 %v545_v49, %v502_v47  ;;  %v6230_v49 = vld [vmem:[%s11855_s16 + $0x40] sm:$0xff] }
 0x137   :  { %v583_v2 = vadd.f32 %v582_v40, %v503_v9  ;;  %v6222_v9 = vld [vmem:[%s11855_s16] sm:$0xff]  ;;  %755 = vmatpush.bf16.msra.mxu3 %v6230_v49  ;;  %v6261_v49 = vld [vmem:[%s11860_s4 + $0x74] sm:$0xf0] }
 0x138   :  { %742 = vmatpush.bf16.msra.mxu2 %v6222_v9  ;;  %v5606_v9 = vld [vmem:[%s11860_s4 + $0x70] sm:$0xf] }
 0x13b   :  { %v6888_v36 = vpop.f32.mrf.mxu0 }
 0x13c   :  { %v6890_v37 = vpop.f32.mrf.mxu1  ;;  %v504_v14 = vmul.f32 %v6888_v36, %v6888_v36  ;;  %v409_v59 = vadd.f32 %v408_v15, %v6888_v36 }
 0x13d   :  { %11849 = vst [vmem:[#allocation24_spill] sm:$0xff] %v6890_v37  ;;  %v505_v58 = vmul.f32 %v6890_v37, %v6890_v37  ;;  %v446_v25 = vadd.f32 %v445_v23, %v6890_v37 }
 0x13e   :  { %v547_v42 = vadd.f32 %v546_v0, %v504_v14 }
 0x13f   :  { %v584_v31 = vadd.f32 %v583_v2, %v505_v58 }
 0x143   :  { %v6892_v38 = vpop.f32.mrf.mxu0 }
 0x144   :  { %v6894_v43 = vpop.f32.mrf.mxu1  ;;  %v506_v61 = vmul.f32 %v6892_v38, %v6892_v38  ;;  %v410_v35 = vadd.f32 %v409_v59, %v6892_v38 }
 0x145   :  { %11850 = vst [vmem:[#allocation25_spill] sm:$0xff] %v6894_v43  ;;  %v507_v16 = vmul.f32 %v6894_v43, %v6894_v43  ;;  %v447_v29 = vadd.f32 %v446_v25, %v6894_v43 }
 0x146   :  { %v548_v14 = vadd.f32 %v547_v42, %v506_v61 }
 0x147   :  { %v585_v58 = vadd.f32 %v584_v31, %v507_v16 }
 0x14b   :  { %v6896_v44 = vpop.f32.mrf.mxu0 }
 0x14c   :  { %v6898_v45 = vpop.f32.mrf.mxu1  ;;  %v508_v33 = vmul.f32 %v6896_v44, %v6896_v44  ;;  %v411_v15 = vadd.f32 %v410_v35, %v6896_v44 }
 0x14d   :  { %11851 = vst [vmem:[#allocation26_spill] sm:$0xff] %v6898_v45  ;;  %v509_v47 = vmul.f32 %v6898_v45, %v6898_v45  ;;  %v448_v23 = vadd.f32 %v447_v29, %v6898_v45 }
 0x14e   :  { %v549_v59 = vadd.f32 %v548_v14, %v508_v33 }
 0x14f   :  { %v586_v35 = vadd.f32 %v585_v58, %v509_v47 }
 0x153   :  { %v6900_v50 = vpop.f32.mrf.mxu0 }
 0x154   :  { %v6902_v51 = vpop.f32.mrf.mxu1  ;;  %v510_v40 = vmul.f32 %v6900_v50, %v6900_v50  ;;  %v412_v0 = vadd.f32 %v411_v15, %v6900_v50 }
 0x155   :  { %11852 = vst [vmem:[#allocation27_spill] sm:$0xff] %v6902_v51  ;;  %v511_v21 = vmul.f32 %v6902_v51, %v6902_v51  ;;  %v449_v61 = vadd.f32 %v448_v23, %v6902_v51 }
 0x156   :  { %v550_v16 = vadd.f32 %v549_v59, %v510_v40  ;;  %v5670_v40 = vld [vmem:[%s11860_s4 + $0xf0] sm:$0xf] }
 0x157   :  { %v587_v15 = vadd.f32 %v586_v35, %v511_v21  ;;  %v6277_v35 = vld [vmem:[%s11860_s4 + $0xf4] sm:$0xf0] }
 0x15b   :  { %v6926_v22 = vpop.f32.mrf.mxu0 }
 0x15c   :  { %v6931_v41 = vpop.f32.mrf.mxu1  ;;  %v512_v25 = vmul.f32 %v6926_v22, %v6926_v22  ;;  %v413_v31 = vadd.f32 %v412_v0, %v6926_v22 }
 0x15d   :  { %11853 = vst [vmem:[#allocation28_spill] sm:$0xff] %v6931_v41  ;;  %v513_v29 = vmul.f32 %v6931_v41, %v6931_v41  ;;  %v450_v42 = vadd.f32 %v449_v61, %v6931_v41  ;;  %v5598_v61 = vld [vmem:[%s11860_s4 + $0x60] sm:$0xf] }
 0x15e   :  { %v551_v47 = vadd.f32 %v550_v16, %v512_v25  ;;  %v7145_v25 = vor.u32 %v6261_v49, %v5606_v9  ;;  %v5662_v9 = vld [vmem:[%s11860_s4 + $0xe0] sm:$0xf]  ;;  %v6275_v49 = vld [vmem:[%s11860_s4 + $0xe4] sm:$0xf0] }
 0x15f   :  { %v588_v21 = vadd.f32 %v587_v15, %v513_v29  ;;  %v7159_v15 = vor.u32 %v6277_v35, %v5670_v40 }
 0x160   :  { %1354 = vmatpush.bf16.msrb.mxu0 %v7145_v25 }
 0x161   :  { %1443 = vmatpush.bf16.msrb.mxu1 %v7159_v15 }
 0x163   :  { %v6954_v57 = vpop.f32.mrf.mxu0 }
 0x164   :  { %v6959_v8 = vpop.f32.mrf.mxu1  ;;  %v514_v33 = vmul.f32 %v6954_v57, %v6954_v57  ;;  %v414_v23 = vadd.f32 %v413_v31, %v6954_v57  ;;  %v6259_v31 = vld [vmem:[%s11860_s4 + $0x64] sm:$0xf0] }
 0x165   :  { %11854 = vst [vmem:[#allocation29_spill] sm:$0xff] %v6959_v8  ;;  %v515_v14 = vmul.f32 %v6959_v8, %v6959_v8  ;;  %v451_v59 = vadd.f32 %v450_v42, %v6959_v8 }
 0x166   :  { %v552_v16 = vadd.f32 %v551_v47, %v514_v33  ;;  %v7173_v47 = vor.u32 %v6259_v31, %v5598_v61 }
 0x167   :  { %v589_v41 = vadd.f32 %v588_v21, %v515_v14  ;;  %v7181_v14 = vor.u32 %v6275_v49, %v5662_v9 }
 0x168   :  { %1355 = vmatpush.bf16.msrb.mxu0 %v7173_v47 }
 0x169   :  { %1444 = vmatpush.bf16.msrb.mxu1 %v7181_v14 }
 0x16b   :  { %v6988_v7 = vpop.f32.mrf.mxu0 }
 0x16c   :  { %v6999_v56 = vpop.f32.mrf.mxu1  ;;  %v516_v58 = vmul.f32 %v6988_v7, %v6988_v7  ;;  %v415_v29 = vadd.f32 %v414_v23, %v6988_v7 }
 0x16d   :  { %11856 = vst [vmem:[#allocation30_spill] sm:$0xff] %v6999_v56  ;;  %v517_v0 = vmul.f32 %v6999_v56, %v6999_v56  ;;  %v452_v8 = vadd.f32 %v451_v59, %v6999_v56 }
 0x16e   :  { %v553_v40 = vadd.f32 %v552_v16, %v516_v58 }
 0x16f   :  { %v590_v21 = vadd.f32 %v589_v41, %v517_v0 }
 0x173   :  { %v7028_v52 = vpop.f32.mrf.mxu0 }
 0x174   :  { %v7039_v11 = vpop.f32.mrf.mxu1  ;;  %v518_v42 = vmul.f32 %v7028_v52, %v7028_v52  ;;  %v416_v35 = vadd.f32 %v415_v29, %v7028_v52 }
 0x175   :  { %11857 = vst [vmem:[#allocation31_spill] sm:$0xff] %v7039_v11  ;;  %v519_v23 = vmul.f32 %v7039_v11, %v7039_v11  ;;  %v453_v59 = vadd.f32 %v452_v8, %v7039_v11 }
 0x176   :  { %v554_v58 = vadd.f32 %v553_v40, %v518_v42 }
 0x177   :  { %v591_v16 = vadd.f32 %v590_v21, %v519_v23 }
 0x17b   :  { %v7068_v63 = vpop.f32.mrf.mxu0 }
 0x17c   :  { %v7079_v20 = vpop.f32.mrf.mxu1  ;;  %v520_v51 = vmul.f32 %v7068_v63, %v7068_v63  ;;  %v417_v61 = vadd.f32 %v416_v35, %v7068_v63 }
 0x17d   :  { %11858 = vst [vmem:[#allocation32_spill] sm:$0xff] %v7079_v20  ;;  %v521_v56 = vmul.f32 %v7079_v20, %v7079_v20  ;;  %v454_v29 = vadd.f32 %v453_v59, %v7079_v20 }
 0x17e   :  { %v555_v41 = vadd.f32 %v554_v58, %v520_v51 }
 0x17f   :  { %v592_v42 = vadd.f32 %v591_v16, %v521_v56 }
 0x183   :  { %v7114_v1 = vpop.f32.mrf.mxu0 }
 0x184   :  { %v7119_v2 = vpop.f32.mrf.mxu1  ;;  %v522_v31 = vmul.f32 %v7114_v1, %v7114_v1  ;;  %v418_v8 = vadd.f32 %v417_v61, %v7114_v1 }
 0x185   :  { %11859 = vst [vmem:[#allocation33_spill] sm:$0xff] %v7119_v2  ;;  %v523_v43 = vmul.f32 %v7119_v2, %v7119_v2  ;;  %v455_v9 = vadd.f32 %v454_v29, %v7119_v2 }
 0x186   :  { %v556_v40 = vadd.f32 %v555_v41, %v522_v31 }
 0x187   :  { %v593_v21 = vadd.f32 %v592_v42, %v523_v43 }
 0x18b   :  { %v7170_v33 = vpop.f32.mrf.mxu0 }
 0x18c   :  { %v7178_v45 = vpop.f32.mrf.mxu1  ;;  %v524_v0 = vmul.f32 %v7170_v33, %v7170_v33  ;;  %v419_v23 = vadd.f32 %v418_v8, %v7170_v33 }
 0x18d   :  { %11861 = vst [vmem:[#allocation34_spill] sm:$0xff] %v7178_v45  ;;  %v525_v49 = vmul.f32 %v7178_v45, %v7178_v45  ;;  %v456_v35 = vadd.f32 %v455_v9, %v7178_v45 }
 0x18e   :  { %v557_v59 = vadd.f32 %v556_v40, %v524_v0 }
 0x18f   :  { %v594_v29 = vadd.f32 %v593_v21, %v525_v49 }
 0x193   :  { %v7202_v51 = vpop.f32.mrf.mxu0 }
 0x194   :  { %v420_v61 = vadd.f32 %v419_v23, %v7202_v51  ;;  %v526_v58 = vmul.f32 %v7202_v51, %v7202_v51  ;;  %v7207_v56 = vpop.f32.mrf.mxu1 }
 0x195   :  { %11862 = vst [vmem:[#allocation35_spill] sm:$0xff] %v7207_v56  ;;  %v457_v16 = vadd.f32 %v456_v35, %v7207_v56  ;;  %v527_v8 = vmul.f32 %v7207_v56, %v7207_v56 }
 0x196   :  { %v421_v31 = vrot.slane %v420_v61, 4  ;;  %v558_v41 = vadd.f32 %v557_v59, %v526_v58 }
 0x197   :  { %v458_v9 = vrot.slane %v457_v16, 4  ;;  %v595_v43 = vadd.f32 %v594_v29, %v527_v8 }
 0x198   :  { %v422_v42 = vadd.f32 %v421_v31, %v420_v61  ;;  %v559_v45 = vrot.slane %v558_v41, 4 }
 0x199   :  { %v459_v0 = vadd.f32 %v458_v9, %v457_v16  ;;  %v596_v40 = vrot.slane %v595_v43, 4  ;;  %v5532_v9 = vld [vmem:[%s11863_s24 + $0x20] sm:$0xf] }
 0x19a   :  { %v423_v23 = vrot.slane %v422_v42, 2  ;;  %v560_v2 = vadd.f32 %v559_v45, %v558_v41 }
 0x19b   :  { %v460_v20 = vrot.slane %v459_v0, 2  ;;  %v597_v11 = vadd.f32 %v596_v40, %v595_v43  ;;  %v6243_v43 = vld [vmem:[%s11863_s24 + $0x24] sm:$0xf0] }
 0x19c   :  { %v424_v37 = vadd.f32 %v423_v23, %v422_v42  ;;  %v561_v27 = vrot.slane %v560_v2, 2  ;;  %v6242_v42 = vld [vmem:[%s11863_s24 + $0x24] sm:$0xf]  ;;  %v5533_v40 = vor.u32 %v6243_v43, %v5532_v9  ;;  %v5534_v23 = vld [vmem:[%s11863_s24 + $0x28] sm:$0xf0] }
 0x19d   :  { %v461_v49 = vadd.f32 %v460_v20, %v459_v0  ;;  %v598_v21 = vrot.slane %v597_v11, 2  ;;  %v6273_v9 = vld [vmem:[%s11860_s4 + $0xd4] sm:$0xf0]  ;;  %v5582_v43 = vld [vmem:[%s11860_s4 + $0x40] sm:$0xf] }
 0x19e   :  { %v425_v35 = vrot.slane %v424_v37, 1  ;;  %v562_v18 = vadd.f32 %v561_v27, %v560_v2  ;;  %v5540_v27 = vld [vmem:[%s11863_s24 + $0x30] sm:$0xf] }
 0x19f   :  { %v462_v13 = vrot.slane %v461_v49, 1  ;;  %v599_v56 = vadd.f32 %v598_v21, %v597_v11  ;;  %v6245_v11 = vld [vmem:[%s11863_s24 + $0x34] sm:$0xf0] }
 0x1a0   :  { %v563_v6 = vrot.slane %v562_v18, 1  ;;  %v426_v58 = vadd.f32 %v425_v35, %v424_v37  ;;  %v5542_v37 = vld [vmem:[%s11863_s24 + $0x38] sm:$0xf0]  ;;  %v5524_v35 = vld [vmem:[%s11863_s24 + $0x10] sm:$0xf] }
 0x1a1   :  { %v600_v59 = vrot.slane %v599_v56, 1  ;;  %v463_v29 = vadd.f32 %v462_v13, %v461_v49  ;;  %v5537_v49 = vor.u32 %v6242_v42, %v5534_v23  ;;  %v6255_v42 = vld [vmem:[%s11860_s4 + $0x44] sm:$0xf0] }
 0x1a2   :  { %v564_v61 = vadd.f32 %v563_v6, %v562_v18  ;;  %v6244_v6 = vld [vmem:[%s11863_s24 + $0x34] sm:$0xf]  ;;  %v5541_v18 = vor.u32 %v6245_v11, %v5540_v27  ;;  %v5516_v27 = vld [vmem:[%s11863_s24] sm:$0xf]  ;;  %v6239_v11 = vld [vmem:[%s11863_s24 + $0x4] sm:$0xf0] }
 0x1a3   :  { %v601_v16 = vadd.f32 %v600_v59, %v599_v56  ;;  %v5545_v2 = vor.u32 %v6244_v6, %v5542_v37  ;;  %v6241_v59 = vld [vmem:[%s11863_s24 + $0x14] sm:$0xf0]  ;;  %v6238_v6 = vld [vmem:[%s11863_s24 + $0x4] sm:$0xf]  ;;  %v5654_v37 = vld [vmem:[%s11860_s4 + $0xd0] sm:$0xf] }
 0x1a4   :  { %v603_v8 = vsel %vm602_vm1, %v426_v58, %v564_v61  ;;  %848 = vmatpush.bf16.msrb.mxu2 %v5541_v18  ;;  %v6240_v58 = vld [vmem:[%s11863_s24 + $0x14] sm:$0xf]  ;;  %v6257_v18 = vld [vmem:[%s11860_s4 + $0x54] sm:$0xf0]  ;;  %v6271_v23 = vld [vmem:[%s11860_s4 + $0xc4] sm:$0xf0] }
 0x1a5   :  { %v605_v45 = vpack.c.bf16 %v603_v8, %v603_v8  ;;  %v604_v31 = vsel %vm602_vm1, %v463_v29, %v601_v16  ;;  %861 = vmatpush.bf16.msrb.mxu3 %v5545_v2  ;;  %v5525_v16 = vor.u32 %v6241_v59, %v5524_v35  ;;  %v5526_v8 = vld [vmem:[%s11863_s24 + $0x18] sm:$0xf0] }
 0x1a6   :  { %v606_v41 = vpack.c.bf16 %v604_v31, %v604_v31  ;;  %v5529_v31 = vor.u32 %v6240_v58, %v5526_v8  ;;  %v5574_v58 = vld [vmem:[%s11860_s4 + $0x30] sm:$0xf] }
 0x1a7   :  { %743 = vmatmul.bf16.vlgmr.msra.gmra.mxu2 %v605_v45 }
 0x1a8   :  { %756 = vmatmul.bf16.vlgmr.msra.gmra.mxu3 %v606_v41  ;;  %849 = vmatpush.bf16.msrb.mxu2 %v5533_v40  ;;  %v5646_v40 = vld [vmem:[%s11860_s4 + $0xc0] sm:$0xf] }
 0x1a9   :  { %862 = vmatpush.bf16.msrb.mxu3 %v5537_v49  ;;  %v5518_v49 = vld [vmem:[%s11863_s24 + $0x8] sm:$0xf0]  ;;  %v5647_v59 = vor.u32 %v6271_v23, %v5646_v40 }
 0x1aa   :  { %v5521_v35 = vor.u32 %v6238_v6, %v5518_v49  ;;  %v5550_v49 = vld [vmem:[%s11860_s4] sm:$0xf] }
 0x1ac   :  { %850 = vmatpush.bf16.msrb.mxu2 %v5525_v16 }
 0x1ad   :  { %863 = vmatpush.bf16.msrb.mxu3 %v5529_v31 }
 0x1b1   :  { %864 = vmatpush.bf16.msrb.mxu3 %v5521_v35  ;;  %v6247_v35 = vld [vmem:[%s11860_s4 + $0x4] sm:$0xf0] }
 0x1b5   :  { %6420 = vmatpush.bf16.msra.mxu3 %v7159_v15  ;;  %v5630_v15 = vld [vmem:[%s11860_s4 + $0xa0] sm:$0xf] }
 0x1b9   :  { %6421 = vmatpush.bf16.msra.mxu3 %v7181_v14  ;;  %v5622_v14 = vld [vmem:[%s11860_s4 + $0x90] sm:$0xf] }
 0x22a   :  { %v744_v13 = vpop.f32.mrf.mxu2 }
 0x22b   :  { %v757_v20 = vpop.f32.mrf.mxu3 }
 0x22c   :  { %v7226_v56 = vadd.f32 %v757_v20, %v744_v13  ;;  %v5590_v13 = vld [vmem:[%s11860_s4 + $0x50] sm:$0xf]  ;;  %v5517_v20 = vor.u32 %v6239_v11, %v5516_v27  ;;  %v5566_v27 = vld [vmem:[%s11860_s4 + $0x20] sm:$0xf]  ;;  %v6251_v11 = vld [vmem:[%s11860_s4 + $0x24] sm:$0xf0] }
 0x22d   :  { %v5591_v2 = vor.u32 %v6257_v18, %v5590_v13  ;;  %v6267_v13 = vld [vmem:[%s11860_s4 + $0xa4] sm:$0xf0]  ;;  %v5567_v18 = vor.u32 %v6251_v11, %v5566_v27 }
 0x22e   :  { %v761_v0 = vmul.f32 %v7226_v56, %v7226_v56  ;;  %851 = vmatpush.bf16.msrb.mxu2 %v5517_v20  ;;  %v5558_v20 = vld [vmem:[%s11860_s4 + $0x10] sm:$0xf] }
 0x22f   :  { %1356 = vmatpush.bf16.msrb.mxu0 %v5591_v2 }
 0x230   :  { %v763_v21 = vrot.slane %v761_v0, 7  ;;  %v5655_v0 = vor.u32 %v6273_v9, %v5654_v37  ;;  %v5631_v37 = vor.u32 %v6267_v13, %v5630_v15  ;;  %v6249_v9 = vld [vmem:[%s11860_s4 + $0x14] sm:$0xf0] }
 0x231   :  { %v5559_v40 = vor.u32 %v6249_v9, %v5558_v20 }
 0x232   :  { %v765_v61 = vsub.f32 %v7226_v56, %v763_v21  ;;  %v746_v29 = vpop.f32.mrf.mxu2  ;;  %v5583_v21 = vor.u32 %v6255_v42, %v5582_v43  ;;  %6412 = vmatpush.bf16.msra.mxu2 %v7145_v25  ;;  %1445 = vmatpush.bf16.msrb.mxu1 %v5655_v0  ;;  %v6269_v25 = vld [vmem:[%s11860_s4 + $0xb4] sm:$0xf0] }
 0x233   :  { %v759_v45 = vpop.f32.mrf.mxu3  ;;  %v5638_v29 = vld [vmem:[%s11860_s4 + $0xb0] sm:$0xf]  ;;  %6422 = vmatpush.bf16.msra.mxu3 %v5655_v0  ;;  %v5614_v0 = vld [vmem:[%s11860_s4 + $0x80] sm:$0xf] }
 0x234   :  { %v7255_v41 = vadd.f32 0.0001, %v765_v61  ;;  %v6253_v61 = vld [vmem:[%s11860_s4 + $0x34] sm:$0xf0]  ;;  %1357 = vmatpush.bf16.msrb.mxu0 %v5583_v21  ;;  %v5639_v31 = vor.u32 %v6269_v25, %v5638_v29  ;;  %v766_v29 = vld [vmem:[%s11864_s3] sm:$0x1] }
 0x235   :  { %v5575_v45 = vor.u32 %v6253_v61, %v5574_v58 }
 0x236   :  { %6432 = vrsqrt.f32 %v7255_v41  ;;  %6413 = vmatpush.bf16.msra.mxu2 %v7173_v47  ;;  %1446 = vmatpush.bf16.msrb.mxu1 %v5647_v59  ;;  %vm774_vm3 = vweird.f32 %v7255_v41 }
 0x237   :  { %6423 = vmatpush.bf16.msra.mxu3 %v5647_v59  ;;  %v784_v59 = vld [vmem:[%s11865_s27] sm:$0x1] }
 0x238   :  { %1358 = vmatpush.bf16.msrb.mxu0 %v5575_v45 }
 0x23a   :  { %6414 = vmatpush.bf16.msra.mxu2 %v5591_v2  ;;  %1447 = vmatpush.bf16.msrb.mxu1 %v5639_v31  ;;  %v6265_v2 = vld [vmem:[%s11860_s4 + $0x94] sm:$0xf0] }
 0x23b   :  { %v5623_v23 = vor.u32 %v6265_v2, %v5622_v14  ;;  %6424 = vmatpush.bf16.msra.mxu3 %v5639_v31 }
 0x23c   :  { %v6433_v16 = vpop.eup %6432  ;;  %1359 = vmatpush.bf16.msrb.mxu0 %v5567_v18 }
 0x23d   :  { %v769_v8 = vmul.f32 %v6433_v16, %v7255_v41  ;;  %vm775_vm2 = vweird.f32 %v6433_v16  ;;  %v6263_v41 = vld [vmem:[%s11860_s4 + $0x84] sm:$0xf0] }
 0x23e   :  { %6415 = vmatpush.bf16.msra.mxu2 %v5583_v21  ;;  %vm776_vm4 = vmor %vm774_vm3, %vm775_vm2  ;;  %1448 = vmatpush.bf16.msrb.mxu1 %v5631_v37  ;;  %v5551_v21 = vor.u32 %v6247_v35, %v5550_v49  ;;  %v5615_v61 = vor.u32 %v6263_v41, %v5614_v0  ;;  %vm4694_vm2 = vcmask 64512  }
 0x23f   :  { %v770_v6 = vmul.f32 %v6433_v16, %v769_v8  ;;  %6425 = vmatpush.bf16.msra.mxu3 %v5631_v37  ;;  %v11866_v37 = vld [vmem:[#allocation6_spill] sm:$0xff] }
 0x240   :  { %1360 = vmatpush.bf16.msrb.mxu0 %v5559_v40 }
 0x241   :  { %v771_v47 = vmul.f32 0.5, %v770_v6 }
 0x242   :  { %6416 = vmatpush.bf16.msra.mxu2 %v5575_v45  ;;  %1449 = vmatpush.bf16.msrb.mxu1 %v5623_v23 }
 0x243   :  { %v772_v43 = vsub.f32 1.5, %v771_v47  ;;  %6426 = vmatpush.bf16.msra.mxu3 %v5623_v23 }
 0x244   :  { %1361 = vmatpush.bf16.msrb.mxu0 %v5551_v21 }
 0x245   :  { %v773_v42 = vmul.f32 %v6433_v16, %v772_v43 }
 0x246   :  { %6417 = vmatpush.bf16.msra.mxu2 %v5567_v18  ;;  %1450 = vmatpush.bf16.msrb.mxu1 %v5615_v61 }
 0x247   :  { %v777_v58 = vsel %vm776_vm4, %v6433_v16, %v773_v42  ;;  %6427 = vmatpush.bf16.msra.mxu3 %v5615_v61  ;;  %v11882_v61 = vld [vmem:[#allocation11_spill] sm:$0xff] }
 0x248   :  { %779 = vst [vmem:[#allocation1] sm:$0xff] %v777_v58 }
 0x24a   :  { %6418 = vmatpush.bf16.msra.mxu2 %v5559_v40 }
 0x24e   :  { %6419 = vmatpush.bf16.msra.mxu2 %v5551_v21 }
 0x24f   :  { %v781_v16 = vld [vmem:[#allocation1 + $0x1] ss:$9 sm:$0xff] }
 0x250   :  { %v783_v25 = vmul.f32 %v781_v16, %v766_v29  ;;  %v11883_v16 = vld [vmem:[#allocation12_spill] sm:$0xff] }
 0x252   :  { %v785_v8 = vmul.f32 %v783_v25, %v7226_v56 }
 0x254   :  { %v786_v45 = vsub.f32 %v784_v59, %v785_v8  ;;  %v11884_v8 = vld [vmem:[#allocation13_spill] sm:$0xff] }
 0x256   :  { %v788_v31 = vperm.slane %v786_v45, 0 }
 0x258   :  { %v790_v27 = vsel %vm602_vm1, %v783_v25, %v788_v31 }
 0x259   :  { %v791_v11 = vpack.c.bf16 %v790_v27, %v790_v27  ;;  %v11886_v27 = vld [vmem:[#allocation15_spill] sm:$0xff] }
 0x25b   :  { %5546 = vmatmul.msk.bf16.vlgmr.msrb.gmra.mxu2 %vm840_vm5, %v791_v11  ;;  %5547 = vmatmul.msk.bf16.vlgmr.msrb.gmra.mxu3 %vm840_vm5, %v791_v11 }
 0x2de   :  { %v853_v6 = vpop.f32.mrf.mxu2  ;;  %v866_v15 = vpop.f32.mrf.mxu3 }
 0x2df   :  { %v870_v13 = vperm.slane %v853_v6, 0  ;;  %v7358_v47 = vperm.slane %v853_v6, 1  ;;  %v7360_v18 = vperm.slane %v866_v15, 0  ;;  %v7371_v43 = vperm.slane %v866_v15, 1  ;;  %v11887_v6 = vld [vmem:[#allocation16_spill] sm:$0xff] }
 0x2e1   :  { %v7363_v56 = vmul.f32 %v870_v13, %v6750_v39  ;;  %v7366_v20 = vmul.f32 %v870_v13, %v11866_v37  ;;  %v7369_v9 = vmul.f32 %v870_v13, %v6766_v46  ;;  %v7374_v14 = vmul.f32 %v870_v13, %v6772_v48 }
 0x2e2   :  { %v7377_v2 = vmul.f32 %v870_v13, %v6782_v53  ;;  %v7380_v42 = vmul.f32 %v870_v13, %v6788_v55  ;;  %v7383_v39 = vmul.f32 %v870_v13, %v6798_v60  ;;  %v7386_v40 = vmul.f32 %v870_v13, %v6804_v62 }
 0x2e3   :  { %v888_v46 = vmul.f32 %v870_v13, %v6814_v3  ;;  %v890_v23 = vmul.f32 %v870_v13, %v6820_v5  ;;  %v892_v49 = vmul.f32 %v870_v13, %v6830_v10  ;;  %v894_v48 = vmul.f32 %v870_v13, %v6836_v12 }
 0x2e4   :  { %v7393_v53 = vmul.f32 %v870_v13, %v6846_v17  ;;  %v7396_v55 = vmul.f32 %v870_v13, %v6852_v19  ;;  %v7399_v60 = vmul.f32 %v870_v13, %v6862_v24  ;;  %v7402_v58 = vmul.f32 %v870_v13, %v6868_v26 }
 0x2e5   :  { %v7405_v3 = vmul.f32 %v870_v13, %v6872_v28  ;;  %v7408_v5 = vmul.f32 %v870_v13, %v6876_v30  ;;  %v7411_v10 = vmul.f32 %v870_v13, %v6880_v32  ;;  %v7414_v12 = vmul.f32 %v870_v13, %v6884_v34 }
 0x2e6   :  { %v855_v35 = vpop.f32.mrf.mxu2  ;;  %v868_v62 = vpop.f32.mrf.mxu3  ;;  %v7417_v17 = vmul.f32 %v870_v13, %v6888_v36  ;;  %v7420_v19 = vmul.f32 %v870_v13, %v6892_v38  ;;  %v7423_v24 = vmul.f32 %v870_v13, %v6896_v44  ;;  %v7426_v26 = vmul.f32 %v870_v13, %v6900_v50 }
 0x2e7   :  { %v7429_v28 = vmul.f32 %v870_v13, %v6926_v22  ;;  %v7432_v30 = vmul.f32 %v870_v13, %v6954_v57  ;;  %v7435_v32 = vmul.f32 %v870_v13, %v6988_v7  ;;  %v7438_v34 = vmul.f32 %v870_v13, %v7028_v52  ;;  %v11877_v22 = vld [vmem:[#allocation5_spill] sm:$0xff]  ;;  %v11878_v7 = vld [vmem:[#allocation7_spill] sm:$0xff]  ;;  %v11879_v52 = vld [vmem:[#allocation8_spill] sm:$0xff] }
 0x2e8   :  { %11867 = vst [vmem:[#allocation6_spill] sm:$0xff] %v7423_v24  ;;  %v7441_v36 = vmul.f32 %v870_v13, %v7068_v63  ;;  %v7444_v38 = vmul.f32 %v870_v13, %v7114_v1  ;;  %v7447_v44 = vmul.f32 %v870_v13, %v7170_v33  ;;  %v7450_v50 = vmul.f32 %v870_v13, %v7202_v51  ;;  %v11880_v63 = vld [vmem:[#allocation9_spill] sm:$0xff]  ;;  %v11881_v33 = vld [vmem:[#allocation10_spill] sm:$0xff] }
 0x2e9   :  { %11868 = vst [vmem:[#allocation36_spill] sm:$0xff] %v7426_v26  ;;  %v873_v57 = vmul.f32 %v7360_v18, %v11877_v22  ;;  %v875_v0 = vmul.f32 %v7360_v18, %v11878_v7  ;;  %v877_v41 = vmul.f32 %v7360_v18, %v11879_v52  ;;  %v879_v21 = vmul.f32 %v7360_v18, %v11880_v63  ;;  %v11888_v13 = vld [vmem:[#allocation17_spill] sm:$0xff]  ;;  %v11889_v35 = vld [vmem:[#allocation18_spill] sm:$0xff]  ;;  %v11891_v7 = vld [vmem:[#allocation20_spill] sm:$0xff] }
 0x2ea   :  { %11869 = vst [vmem:[#allocation37_spill] sm:$0xff] %v7429_v28  ;;  %v7462_v1 = vmul.f32 %v7360_v18, %v6784_v54  ;;  %v7466_v51 = vmul.f32 %v7360_v18, %v11881_v33  ;;  %v7470_v29 = vmul.f32 %v7360_v18, %v11882_v61  ;;  %v7474_v25 = vmul.f32 %v7360_v18, %v11883_v16  ;;  %v11885_v54 = vld [vmem:[#allocation14_spill] sm:$0xff]  ;;  %v11892_v63 = vld [vmem:[#allocation21_spill] sm:$0xff] }
 0x2eb   :  { %11870 = vst [vmem:[#allocation38_spill] sm:$0xff] %v7432_v30  ;;  %v889_v59 = vmul.f32 %v7360_v18, %v6816_v4  ;;  %v891_v45 = vmul.f32 %v7360_v18, %v11884_v8  ;;  %v893_v31 = vmul.f32 %v7360_v18, %v11885_v54  ;;  %v895_v11 = vmul.f32 %v7360_v18, %v11886_v27  ;;  %v11890_v4 = vld [vmem:[#allocation19_spill] sm:$0xff]  ;;  %v11893_v61 = vld [vmem:[#allocation22_spill] sm:$0xff]  ;;  %v11895_v27 = vld [vmem:[#allocation24_spill] sm:$0xff] }
 0x2ec   :  { %11871 = vst [vmem:[#allocation39_spill] sm:$0xff] %v7435_v32  ;;  %v897_v15 = vmul.f32 %v7360_v18, %v11887_v6  ;;  %v899_v37 = vmul.f32 %v7360_v18, %v11888_v13  ;;  %v7490_v62 = vmul.f32 %v7360_v18, %v11889_v35  ;;  %v7494_v22 = vmul.f32 %v7360_v18, %v11890_v4  ;;  %v11894_v8 = vld [vmem:[#allocation23_spill] sm:$0xff]  ;;  %v11897_v13 = vld [vmem:[#allocation25_spill] sm:$0xff]  ;;  %v11899_v4 = vld [vmem:[#allocation26_spill] sm:$0xff] }
 0x2ed   :  { %11872 = vst [vmem:[#allocation40_spill] sm:$0xff] %v7438_v34  ;;  %v7498_v52 = vmul.f32 %v7360_v18, %v11891_v7  ;;  %v7502_v33 = vmul.f32 %v7360_v18, %v11892_v63  ;;  %v7506_v16 = vmul.f32 %v7360_v18, %v11893_v61  ;;  %v7510_v54 = vmul.f32 %v7360_v18, %v11894_v8  ;;  %v11901_v63 = vld [vmem:[#allocation27_spill] sm:$0xff]  ;;  %v11911_v34 = vld [vmem:[#allocation32_spill] sm:$0xff]  ;;  %v11913_v32 = vld [vmem:[#allocation33_spill] sm:$0xff] }
 0x2ee   :  { %11873 = vst [vmem:[#allocation41_spill] sm:$0xff] %v7441_v36  ;;  %v7514_v6 = vmul.f32 %v7360_v18, %v11895_v27  ;;  %v7518_v35 = vmul.f32 %v7360_v18, %v11897_v13  ;;  %v7522_v7 = vmul.f32 %v7360_v18, %v11899_v4  ;;  %v7526_v61 = vmul.f32 %v7360_v18, %v11901_v63  ;;  %v11909_v36 = vld [vmem:[#allocation31_spill] sm:$0xff] }
 0x2ef   :  { %11874 = vst [vmem:[#allocation42_spill] sm:$0xff] %v7444_v38  ;;  %v11907_v38 = vld [vmem:[#allocation30_spill] sm:$0xff]  ;;  %v7542_v4 = vmul.f32 %v7360_v18, %v11909_v36  ;;  %v7546_v63 = vmul.f32 %v7360_v18, %v11911_v34  ;;  %v7563_v36 = vadd.f32 %v7358_v47, %v892_v49  ;;  %v7566_v34 = vadd.f32 %v7358_v47, %v894_v48 }
 0x2f0   :  { %11875 = vst [vmem:[#allocation43_spill] sm:$0xff] %v7447_v44  ;;  %v11905_v44 = vld [vmem:[#allocation29_spill] sm:$0xff]  ;;  %v7538_v13 = vmul.f32 %v7360_v18, %v11907_v38  ;;  %v7560_v38 = vadd.f32 %v7358_v47, %v890_v23  ;;  %v7579_v23 = vadd.f32 %v7358_v47, %v7369_v9  ;;  %v7583_v49 = vadd.f32 %v7358_v47, %v7374_v14 }
 0x2f1   :  { %11876 = vst [vmem:[#allocation44_spill] sm:$0xff] %v7450_v50  ;;  %v11903_v50 = vld [vmem:[#allocation28_spill] sm:$0xff]  ;;  %v7534_v27 = vmul.f32 %v7360_v18, %v11905_v44  ;;  %v941_v48 = vadd.f32 %v7371_v43, %v875_v0  ;;  %v7598_v9 = vadd.f32 %v7358_v47, %v7380_v42  ;;  %v7602_v14 = vadd.f32 %v7358_v47, %v7383_v39  ;;  %v6276_v0 = vld [vmem:[%s11860_s4 + $0xf4] sm:$0xf] }
 0x2f2   :  { %11896 = vst [vmem:[#allocation5_spill] sm:$0xff] %v7514_v6  ;;  %v7530_v8 = vmul.f32 %v7360_v18, %v11903_v50  ;;  %v7550_v50 = vmul.f32 %v7360_v18, %v11913_v32  ;;  %v962_v42 = vadd.f32 %v7358_v47, %v7393_v53  ;;  %v964_v39 = vadd.f32 %v7358_v47, %v7396_v55  ;;  %v6256_v6 = vld [vmem:[%s11860_s4 + $0x54] sm:$0xf] }
 0x2f3   :  { %11898 = vst [vmem:[#allocation7_spill] sm:$0xff] %v7518_v35  ;;  %v963_v30 = vadd.f32 %v7371_v43, %v897_v15  ;;  %v965_v28 = vadd.f32 %v7371_v43, %v899_v37  ;;  %v7630_v53 = vadd.f32 %v7358_v47, %v7386_v40  ;;  %v7633_v55 = vadd.f32 %v7371_v43, %v877_v41  ;;  %v6258_v15 = vld [vmem:[%s11860_s4 + $0x64] sm:$0xf] }
 0x2f4   :  { %11900 = vst [vmem:[#allocation8_spill] sm:$0xff] %v7522_v7  ;;  %v7643_v37 = vadd.f32 %v7371_v43, %v7462_v1  ;;  %v7647_v40 = vadd.f32 %v7371_v43, %v7466_v51  ;;  %v7651_v41 = vadd.f32 %v7371_v43, %v7470_v29  ;;  %v5664_v1 = vld [vmem:[%s11860_s4 + $0xe8] sm:$0xf0]  ;;  %v7664_v51 = vadd.f32 %v7371_v43, %v7474_v25 }
 0x2f5   :  { %11902 = vst [vmem:[#allocation9_spill] sm:$0xff] %v7526_v61  ;;  %v1005_v61 = vmul.f32 0.2, %v941_v48  ;;  %v7667_v29 = vmul.f32 0.2, %v7579_v23 }
 0x2f6   :  { %11904 = vst [vmem:[#allocation10_spill] sm:$0xff] %v7530_v8  ;;  %v11915_v8 = vld [vmem:[#allocation34_spill] sm:$0xff] }
 0x2f7   :  { %11906 = vst [vmem:[#allocation11_spill] sm:$0xff] %v7534_v27  ;;  %v7554_v44 = vmul.f32 %v7360_v18, %v11915_v8  ;;  %v7557_v27 = vadd.f32 %v7358_v47, %v888_v46  ;;  %v938_v8 = vadd.f32 %v7358_v47, %v7363_v56  ;;  %v940_v46 = vadd.f32 %v7358_v47, %v7366_v20  ;;  %v6260_v56 = vld [vmem:[%s11860_s4 + $0x74] sm:$0xf]  ;;  %v5608_v20 = vld [vmem:[%s11860_s4 + $0x78] sm:$0xf0] }
 0x2f8   :  { %11908 = vst [vmem:[#allocation12_spill] sm:$0xff] %v7538_v13  ;;  %v5611_v13 = vor.u32 %v6260_v56, %v5608_v20  ;;  %v1029_v56 = vmul.f32 0.2, %v965_v28  ;;  %v1069_v20 = vmax.f32 %v941_v48, %v1005_v61  ;;  %v7680_v61 = vmul.f32 0.2, %v7633_v55 }
 0x2f9   :  { %11910 = vst [vmem:[#allocation13_spill] sm:$0xff] %v7542_v4  ;;  %v1004_v4 = vmul.f32 0.2, %v940_v46  ;;  %v6272_v48 = vld [vmem:[%s11860_s4 + $0xd4] sm:$0xf] }
 0x2fa   :  { %11912 = vst [vmem:[#allocation14_spill] sm:$0xff] %v7546_v63  ;;  %v11918_v63 = vld [vmem:[#allocation35_spill] sm:$0xff]  ;;  %1532 = vmatpush.bf16.msra.mxu0 %v5611_v13  ;;  %v5600_v13 = vld [vmem:[%s11860_s4 + $0x68] sm:$0xf0]  ;;  %v1093_v25 = vmax.f32 %v965_v28, %v1029_v56  ;;  %v7688_v28 = vadd.f32 %v7358_v47, %v7399_v60 }
 0x2fb   :  { %11914 = vst [vmem:[#allocation15_spill] sm:$0xff] %v7550_v50  ;;  %v7570_v32 = vmul.f32 %v7360_v18, %v11918_v63  ;;  %v7587_v18 = vadd.f32 %v7358_v47, %v7377_v2  ;;  %v7605_v2 = vadd.f32 %v7371_v43, %v889_v59  ;;  %v5672_v63 = vld [vmem:[%s11860_s4 + $0xf8] sm:$0xf0]  ;;  %v7621_v59 = vadd.f32 %v7371_v43, %v893_v31 }
 0x2fc   :  { %11916 = vst [vmem:[#allocation16_spill] sm:$0xff] %v7554_v44  ;;  %v939_v44 = vadd.f32 %v7371_v43, %v873_v57  ;;  %v7608_v57 = vadd.f32 %v7371_v43, %v891_v45  ;;  %v7624_v45 = vadd.f32 %v7371_v43, %v895_v11  ;;  %v5675_v7 = vor.u32 %v6276_v0, %v5672_v63 }
 0x2fd   :  { %11917 = vst [vmem:[#allocation17_spill] sm:$0xff] %v7566_v34  ;;  %v7636_v31 = vadd.f32 %v7371_v43, %v879_v21 }
 0x2fe   :  { %11919 = vst [vmem:[#allocation18_spill] sm:$0xff] %v7570_v32  ;;  %v1002_v32 = vmul.f32 0.2, %v938_v8  ;;  %v1003_v50 = vmul.f32 0.2, %v939_v44  ;;  %1621 = vmatpush.bf16.msra.mxu1 %v5675_v7 }
 0x2ff   :  { %11920 = vst [vmem:[#allocation19_spill] sm:$0xff] %v7624_v45  ;;  %v1026_v7 = vmul.f32 0.2, %v962_v42  ;;  %v5603_v45 = vor.u32 %v6258_v15, %v5600_v13  ;;  %v1008_v15 = vmul.f32 0.2, %v7583_v49  ;;  %v969_v13 = vadd.f32 %v7371_v43, %v7494_v22 }
 0x300   :  { %v1066_v11 = vmax.f32 %v938_v8, %v1002_v32  ;;  %v1067_v21 = vmax.f32 %v939_v44, %v1003_v50  ;;  %v6274_v32 = vld [vmem:[%s11860_s4 + $0xe4] sm:$0xf]  ;;  %v1068_v50 = vmax.f32 %v940_v46, %v1004_v4  ;;  %v1027_v44 = vmul.f32 0.2, %v963_v30  ;;  %v5592_v4 = vld [vmem:[%s11860_s4 + $0x58] sm:$0xf0] }
 0x301   :  { %v1028_v8 = vmul.f32 0.2, %v964_v39  ;;  %v1090_v0 = vmax.f32 %v962_v42, %v1026_v7  ;;  %v5667_v26 = vor.u32 %v6274_v32, %v5664_v1  ;;  %v7683_v46 = vmul.f32 0.2, %v7587_v18  ;;  %1533 = vmatpush.bf16.msra.mxu0 %v5603_v45 }
 0x302   :  { %v7669_v63 = vpack.c.bf16 %v1068_v50, %v1066_v11  ;;  %v1091_v24 = vmax.f32 %v963_v30, %v1027_v44  ;;  %v7671_v35 = vpack.c.bf16 %v1069_v20, %v1067_v21  ;;  %v7692_v30 = vadd.f32 %v7358_v47, %v7402_v58  ;;  %v5656_v58 = vld [vmem:[%s11860_s4 + $0xd8] sm:$0xf0] }
 0x303   :  { %v1092_v34 = vmax.f32 %v964_v39, %v1028_v8  ;;  %1622 = vmatpush.bf16.msra.mxu1 %v5667_v26  ;;  %v7698_v42 = vmul.f32 0.2, %v7643_v37  ;;  %v7701_v39 = vmul.f32 0.2, %v7602_v14  ;;  %v7712_v26 = vmul.f32 0.2, %v7651_v41 }
 0x304   :  { %1362 = vmatmul.bf16.vlgmr.msrb.gmra.mxu0 %v7669_v63  ;;  %1451 = vmatmul.bf16.vlgmr.msrb.gmra.mxu1 %v7671_v35  ;;  %v7706_v60 = vpack.c.bf16 %v1093_v25, %v1091_v24  ;;  %v1009_v21 = vmul.f32 0.2, %v7636_v31  ;;  %v1030_v24 = vmul.f32 0.2, %v7688_v28  ;;  %v1032_v45 = vmul.f32 0.2, %v7692_v30 }
 0x305   :  { %v7703_v11 = vpack.c.bf16 %v1092_v34, %v1090_v0  ;;  %v967_v34 = vadd.f32 %v7371_v43, %v7490_v62  ;;  %v5595_v32 = vor.u32 %v6256_v6, %v5592_v4  ;;  %v7725_v1 = vmul.f32 0.2, %v7557_v27 }
 0x306   :  { %11922 = vst [vmem:[#allocation21_spill] sm:$0xff] %v7706_v60  ;;  %1481 = vmatmul.bf16.vlgmr.msra.gmra.mxu3 %v7706_v60  ;;  %v7728_v7 = vmul.f32 0.2, %v7605_v2  ;;  %v7731_v62 = vmul.f32 0.2, %v7563_v36  ;;  %v1070_v50 = vmax.f32 %v7579_v23, %v7667_v29  ;;  %v1071_v44 = vmax.f32 %v7633_v55, %v7680_v61 }
 0x307   :  { %11921 = vst [vmem:[#allocation20_spill] sm:$0xff] %v7703_v11  ;;  %1392 = vmatmul.bf16.vlgmr.msra.gmra.mxu2 %v7703_v11  ;;  %v1031_v8 = vmul.f32 0.2, %v967_v34  ;;  %1534 = vmatpush.bf16.msra.mxu0 %v5595_v32  ;;  %v5659_v56 = vor.u32 %v6272_v48, %v5656_v58  ;;  %v1012_v22 = vmul.f32 0.2, %v7598_v9  ;;  %v1072_v6 = vmax.f32 %v7583_v49, %v1008_v15 }
 0x308   :  { %v1073_v20 = vmax.f32 %v7636_v31, %v1009_v21  ;;  %v1033_v0 = vmul.f32 0.2, %v969_v13  ;;  %v970_v25 = vadd.f32 %v7358_v47, %v7405_v3  ;;  %v6254_v23 = vld [vmem:[%s11860_s4 + $0x44] sm:$0xf]  ;;  %v5584_v55 = vld [vmem:[%s11860_s4 + $0x48] sm:$0xf0]  ;;  %v1094_v29 = vmax.f32 %v7688_v28, %v1030_v24 }
 0x309   :  { %v1096_v4 = vmax.f32 %v7692_v30, %v1032_v45  ;;  %1623 = vmatpush.bf16.msra.mxu1 %v5659_v56  ;;  %v972_v49 = vadd.f32 %v7358_v47, %v7408_v5  ;;  %v1013_v31 = vmul.f32 0.2, %v7647_v40  ;;  %v6270_v3 = vld [vmem:[%s11860_s4 + $0xc4] sm:$0xf]  ;;  %v5648_v61 = vld [vmem:[%s11860_s4 + $0xc8] sm:$0xf0]  ;;  %v1074_v48 = vmax.f32 %v7587_v18, %v7683_v46 }
 0x30a   :  { %v1034_v28 = vmul.f32 0.2, %v970_v25  ;;  %v971_v30 = vadd.f32 %v7371_v43, %v7498_v52  ;;  %v973_v5 = vadd.f32 %v7371_v43, %v7502_v33  ;;  %v1095_v58 = vmax.f32 %v967_v34, %v1031_v8 }
 0x30b   :  { %v1076_v15 = vmax.f32 %v7598_v9, %v1012_v22  ;;  %v1036_v21 = vmul.f32 0.2, %v972_v49  ;;  %v5587_v24 = vor.u32 %v6254_v23, %v5584_v55  ;;  %v1097_v45 = vmax.f32 %v969_v13, %v1033_v0 }
 0x30c   :  { %v1075_v32 = vmax.f32 %v7643_v37, %v7698_v42  ;;  %v1077_v56 = vmax.f32 %v7647_v40, %v1013_v31  ;;  %v5651_v60 = vor.u32 %v6270_v3, %v5648_v61  ;;  %v7770_v18 = vmul.f32 0.2, %v7621_v59  ;;  %v5576_v31 = vld [vmem:[%s11860_s4 + $0x38] sm:$0xf0] }
 0x30d   :  { %v7772_v46 = vpack.c.bf16 %v1072_v6, %v1070_v50  ;;  %v1035_v52 = vmul.f32 0.2, %v971_v30  ;;  %v1037_v11 = vmul.f32 0.2, %v973_v5  ;;  %1535 = vmatpush.bf16.msra.mxu0 %v5587_v24  ;;  %v7774_v33 = vpack.c.bf16 %v1073_v20, %v1071_v44  ;;  %v11924_v24 = vld [vmem:[#allocation7_spill] sm:$0xff] }
 0x30e   :  { %v1098_v9 = vmax.f32 %v970_v25, %v1034_v28  ;;  %v1100_v34 = vmax.f32 %v972_v49, %v1036_v21  ;;  %1624 = vmatpush.bf16.msra.mxu1 %v5651_v60  ;;  %v7777_v13 = vmul.f32 0.2, %v7630_v53  ;;  %v7779_v37 = vpack.c.bf16 %v1096_v4, %v1094_v29  ;;  %v5640_v28 = vld [vmem:[%s11860_s4 + $0xb8] sm:$0xf0] }
 0x30f   :  { %v7781_v40 = vpack.c.bf16 %v1076_v15, %v1074_v48  ;;  %v7785_v42 = vadd.f32 %v7358_v47, %v7411_v10  ;;  %v7789_v50 = vadd.f32 %v7358_v47, %v7414_v12  ;;  %v7791_v44 = vpack.c.bf16 %v1097_v45, %v1095_v58  ;;  %v11923_v15 = vld [vmem:[#allocation5_spill] sm:$0xff] }
 0x310   :  { %v7793_v8 = vpack.c.bf16 %v1077_v56, %v1075_v32  ;;  %v1078_v60 = vmax.f32 %v7602_v14, %v7701_v39  ;;  %v7799_v22 = vadd.f32 %v7371_v43, %v7506_v16  ;;  %v1099_v6 = vmax.f32 %v971_v30, %v1035_v52  ;;  %v6250_v30 = vld [vmem:[%s11860_s4 + $0x24] sm:$0xf]  ;;  %v5632_v52 = vld [vmem:[%s11860_s4 + $0xa8] sm:$0xf0] }
 0x311   :  { %v1101_v20 = vmax.f32 %v973_v5, %v1037_v11  ;;  %v7803_v10 = vadd.f32 %v7371_v43, %v7510_v54  ;;  %v1020_v12 = vmul.f32 0.2, %v7560_v38  ;;  %v7807_v0 = vpack.c.bf16 %v1100_v34, %v1098_v9  ;;  %v5568_v5 = vld [vmem:[%s11860_s4 + $0x28] sm:$0xf0]  ;;  %v6266_v56 = vld [vmem:[%s11860_s4 + $0xa4] sm:$0xf] }
 0x312   :  { %v7812_v23 = vmul.f32 0.2, %v7664_v51  ;;  %v1082_v16 = vmax.f32 %v7557_v27, %v7725_v1  ;;  %v7818_v54 = vmul.f32 0.2, %v7785_v42  ;;  %v7821_v11 = vmul.f32 0.2, %v7789_v50 }
 0x313   :  { %v1084_v55 = vmax.f32 %v7560_v38, %v1020_v12  ;;  %v978_v29 = vadd.f32 %v7358_v47, %v7417_v17  ;;  %v7827_v4 = vmul.f32 0.2, %v7799_v22  ;;  %v7830_v49 = vmul.f32 0.2, %v7803_v10  ;;  %v6252_v17 = vld [vmem:[%s11860_s4 + $0x34] sm:$0xf] }
 0x314   :  { %1367 = vmatmul.bf16.gmra.mxu0 %v7772_v46  ;;  %1456 = vmatmul.bf16.gmra.mxu1 %v7774_v33  ;;  %v980_v27 = vadd.f32 %v7358_v47, %v7420_v19  ;;  %v1021_v1 = vmul.f32 0.2, %v7608_v57  ;;  %v6268_v19 = vld [vmem:[%s11860_s4 + $0xb4] sm:$0xf]  ;;  %v1083_v61 = vmax.f32 %v7605_v2, %v7728_v7  ;;  %v5579_v48 = vor.u32 %v6252_v17, %v5576_v31  ;;  %v6246_v14 = vld [vmem:[%s11860_s4 + $0x4] sm:$0xf] }
 0x315   :  { %v7848_v3 = vpack.c.bf16 %v1084_v55, %v1082_v16  ;;  %v979_v21 = vadd.f32 %v7371_v43, %v11923_v15  ;;  %v981_v2 = vadd.f32 %v7371_v43, %v11924_v24  ;;  %v7866_v7 = vpack.c.bf16 %v1101_v20, %v1099_v6  ;;  %v11925_v55 = vld [vmem:[#allocation17_spill] sm:$0xff]  ;;  %v11940_v38 = vld [vmem:[#allocation42_spill] sm:$0xff] }
 0x316   :  { %1486 = vmatmul.bf16.gmra.mxu3 %v7791_v44  ;;  %v1085_v58 = vmax.f32 %v7608_v57, %v1021_v1  ;;  %v5643_v45 = vor.u32 %v6268_v19, %v5640_v28  ;;  %v5571_v32 = vor.u32 %v6250_v30, %v5568_v5  ;;  %v1042_v9 = vmul.f32 0.2, %v978_v29  ;;  %1536 = vmatpush.bf16.msra.mxu0 %v5579_v48  ;;  %v11926_v28 = vld [vmem:[#allocation6_spill] sm:$0xff]  ;;  %v11927_v5 = vld [vmem:[#allocation36_spill] sm:$0xff] }
 0x317   :  { %1397 = vmatmul.bf16.gmra.mxu2 %v7779_v37  ;;  %v5635_v57 = vor.u32 %v6266_v56, %v5632_v52  ;;  %v1044_v34 = vmul.f32 0.2, %v980_v27  ;;  %v1043_v16 = vmul.f32 0.2, %v979_v21  ;;  %v1045_v20 = vmul.f32 0.2, %v981_v2 }
 0x318   :  { %v7874_v12 = vpack.c.bf16 %v1085_v58, %v1083_v61  ;;  %1625 = vmatpush.bf16.msra.mxu1 %v5643_v45  ;;  %v1106_v6 = vmax.f32 %v978_v29, %v1042_v9  ;;  %v1024_v1 = vmul.f32 0.2, %v11925_v55  ;;  %v1086_v17 = vmax.f32 %v7563_v36, %v7731_v62  ;;  %v11928_v58 = vld [vmem:[#allocation19_spill] sm:$0xff]  ;;  %v11930_v9 = vld [vmem:[#allocation9_spill] sm:$0xff] }
 0x319   :  { %v1108_v31 = vmax.f32 %v980_v27, %v1044_v34  ;;  %v1107_v19 = vmax.f32 %v979_v21, %v1043_v16  ;;  %v982_v30 = vadd.f32 %v7358_v47, %v11926_v28  ;;  %v984_v48 = vadd.f32 %v7358_v47, %v11927_v5  ;;  %v11929_v27 = vld [vmem:[#allocation8_spill] sm:$0xff] }
 0x31a   :  { %v1109_v15 = vmax.f32 %v981_v2, %v1045_v20  ;;  %v1088_v61 = vmax.f32 %v11925_v55, %v1024_v1  ;;  %v1025_v24 = vmul.f32 0.2, %v11928_v58  ;;  %v1087_v29 = vmax.f32 %v7621_v59, %v7770_v18  ;;  %1537 = vmatpush.bf16.msra.mxu0 %v5571_v32  ;;  %v11931_v32 = vld [vmem:[#allocation37_spill] sm:$0xff]  ;;  %v11932_v1 = vld [vmem:[#allocation38_spill] sm:$0xff] }
 0x31b   :  { %v7887_v45 = vpack.c.bf16 %v1108_v31, %v1106_v6  ;;  %v1046_v36 = vmul.f32 0.2, %v982_v30  ;;  %v1048_v62 = vmul.f32 0.2, %v984_v48  ;;  %v983_v21 = vadd.f32 %v7371_v43, %v11929_v27  ;;  %v11933_v31 = vld [vmem:[#allocation10_spill] sm:$0xff]  ;;  %v11936_v27 = vld [vmem:[#allocation40_spill] sm:$0xff] }
 0x31c   :  { %1626 = vmatpush.bf16.msra.mxu1 %v5635_v57  ;;  %v7891_v56 = vpack.c.bf16 %v1109_v15, %v1107_v19  ;;  %v7893_v52 = vpack.c.bf16 %v1088_v61, %v1086_v17  ;;  %v1089_v2 = vmax.f32 %v11928_v58, %v1025_v24  ;;  %v985_v34 = vadd.f32 %v7371_v43, %v11930_v9  ;;  %v11934_v15 = vld [vmem:[#allocation11_spill] sm:$0xff]  ;;  %v11937_v9 = vld [vmem:[#allocation12_spill] sm:$0xff] }
 0x31d   :  { %v1110_v16 = vmax.f32 %v982_v30, %v1046_v36  ;;  %v1112_v59 = vmax.f32 %v984_v48, %v1048_v62  ;;  %v1047_v18 = vmul.f32 0.2, %v983_v21  ;;  %v986_v6 = vadd.f32 %v7358_v47, %v11931_v32  ;;  %v11935_v24 = vld [vmem:[#allocation39_spill] sm:$0xff] }
 0x31e   :  { %v7900_v20 = vpack.c.bf16 %v1089_v2, %v1087_v29  ;;  %v1049_v55 = vmul.f32 0.2, %v985_v34  ;;  %v988_v57 = vadd.f32 %v7358_v47, %v11932_v1  ;;  %v987_v17 = vadd.f32 %v7371_v43, %v11933_v31  ;;  %v11938_v1 = vld [vmem:[#allocation13_spill] sm:$0xff] }
 0x31f   :  { %v7906_v19 = vpack.c.bf16 %v1112_v59, %v1110_v16  ;;  %v1111_v28 = vmax.f32 %v983_v21, %v1047_v18  ;;  %v1050_v5 = vmul.f32 0.2, %v986_v6  ;;  %v989_v30 = vadd.f32 %v7371_v43, %v11934_v15 }
 0x320   :  { %v1113_v48 = vmax.f32 %v985_v34, %v1049_v55  ;;  %v1052_v61 = vmul.f32 0.2, %v988_v57  ;;  %v1051_v58 = vmul.f32 0.2, %v987_v17  ;;  %v990_v29 = vadd.f32 %v7358_v47, %v11935_v24 }
 0x321   :  { %v1114_v36 = vmax.f32 %v986_v6, %v1050_v5  ;;  %v1053_v62 = vmul.f32 0.2, %v989_v30  ;;  %v992_v2 = vadd.f32 %v7358_v47, %v11936_v27  ;;  %v991_v21 = vadd.f32 %v7371_v43, %v11937_v9  ;;  %v6248_v5 = vld [vmem:[%s11860_s4 + $0x14] sm:$0xf] }
 0x322   :  { %v7918_v16 = vpack.c.bf16 %v1113_v48, %v1111_v28  ;;  %v1116_v34 = vmax.f32 %v988_v57, %v1052_v61  ;;  %v1115_v59 = vmax.f32 %v987_v17, %v1051_v58  ;;  %v1054_v18 = vmul.f32 0.2, %v990_v29  ;;  %v5560_v57 = vld [vmem:[%s11860_s4 + $0x18] sm:$0xf0]  ;;  %v6264_v17 = vld [vmem:[%s11860_s4 + $0x94] sm:$0xf] }
 0x323   :  { %v1117_v32 = vmax.f32 %v989_v30, %v1053_v62  ;;  %v1056_v55 = vmul.f32 0.2, %v992_v2  ;;  %v993_v31 = vadd.f32 %v7371_v43, %v11938_v1  ;;  %v1055_v6 = vmul.f32 0.2, %v991_v21  ;;  %v11939_v30 = vld [vmem:[#allocation41_spill] sm:$0xff] }
 0x324   :  { %1372 = vmatmul.bf16.gmra.mxu0 %v7781_v40  ;;  %1461 = vmatmul.bf16.gmra.mxu1 %v7793_v8  ;;  %v7933_v28 = vpack.c.bf16 %v1116_v34, %v1114_v36  ;;  %v1118_v15 = vmax.f32 %v990_v29, %v1054_v18  ;;  %v994_v48 = vadd.f32 %v7358_v47, %v11939_v30  ;;  %v5624_v58 = vld [vmem:[%s11860_s4 + $0x98] sm:$0xf0]  ;;  %v11941_v18 = vld [vmem:[#allocation14_spill] sm:$0xff] }
 0x325   :  { %v5563_v61 = vor.u32 %v6248_v5, %v5560_v57  ;;  %v7940_v24 = vpack.c.bf16 %v1117_v32, %v1115_v59  ;;  %v1120_v62 = vmax.f32 %v992_v2, %v1056_v55  ;;  %v1057_v27 = vmul.f32 0.2, %v993_v31  ;;  %v11942_v57 = vld [vmem:[#allocation15_spill] sm:$0xff]  ;;  %v11944_v55 = vld [vmem:[#allocation44_spill] sm:$0xff] }
 0x326   :  { %1491 = vmatmul.bf16.gmra.mxu3 %v7866_v7  ;;  %v5627_v9 = vor.u32 %v6264_v17, %v5624_v58  ;;  %v1119_v1 = vmax.f32 %v991_v21, %v1055_v6  ;;  %v996_v25 = vadd.f32 %v7358_v47, %v11940_v38  ;;  %v1058_v36 = vmul.f32 0.2, %v994_v48  ;;  %v11943_v32 = vld [vmem:[#allocation43_spill] sm:$0xff] }
 0x327   :  { %1402 = vmatmul.bf16.gmra.mxu2 %v7807_v0  ;;  %1538 = vmatpush.bf16.msra.mxu0 %v5563_v61  ;;  %v7944_v29 = vpack.c.bf16 %v1120_v62, %v1118_v15  ;;  %v1121_v34 = vmax.f32 %v993_v31, %v1057_v27  ;;  %v995_v5 = vadd.f32 %v7371_v43, %v11941_v18  ;;  %v11945_v31 = vld [vmem:[#allocation16_spill] sm:$0xff]  ;;  %v11946_v18 = vld [vmem:[#allocation18_spill] sm:$0xff] }
 0x328   :  { %v997_v30 = vadd.f32 %v7371_v43, %v11942_v57  ;;  %1627 = vmatpush.bf16.msra.mxu1 %v5627_v9  ;;  %v1060_v59 = vmul.f32 0.2, %v996_v25  ;;  %v1122_v2 = vmax.f32 %v994_v48, %v1058_v36  ;;  %v998_v21 = vadd.f32 %v7358_v47, %v11943_v32 }
 0x329   :  { %v1000_v38 = vadd.f32 %v7358_v47, %v11944_v55  ;;  %v7954_v6 = vpack.c.bf16 %v1121_v34, %v1119_v1  ;;  %v1059_v17 = vmul.f32 0.2, %v995_v5  ;;  %v999_v61 = vadd.f32 %v7371_v43, %v11945_v31 }
 0x32a   :  { %v1061_v15 = vmul.f32 0.2, %v997_v30  ;;  %v1124_v58 = vmax.f32 %v996_v25, %v1060_v59  ;;  %v1062_v62 = vmul.f32 0.2, %v998_v21  ;;  %v1001_v9 = vadd.f32 %v7371_v43, %v11946_v18 }
 0x32b   :  { %v1064_v27 = vmul.f32 0.2, %v1000_v38  ;;  %v1081_v48 = vmax.f32 %v7664_v51, %v7812_v23  ;;  %v1123_v36 = vmax.f32 %v995_v5, %v1059_v17  ;;  %v1063_v32 = vmul.f32 0.2, %v999_v61 }
 0x32c   :  { %v1125_v57 = vmax.f32 %v997_v30, %v1061_v15  ;;  %v7962_v47 = vpack.c.bf16 %v1124_v58, %v1122_v2  ;;  %v1126_v1 = vmax.f32 %v998_v21, %v1062_v62  ;;  %v1065_v55 = vmul.f32 0.2, %v1001_v9 }
 0x32d   :  { %v1128_v34 = vmax.f32 %v1000_v38, %v1064_v27  ;;  %v1102_v31 = vmax.f32 %v7785_v42, %v7818_v54  ;;  %v1104_v25 = vmax.f32 %v7789_v50, %v7821_v11  ;;  %v1127_v43 = vmax.f32 %v999_v61, %v1063_v32 }
 0x32e   :  { %v7968_v59 = vpack.c.bf16 %v1125_v57, %v1123_v36  ;;  %v1103_v51 = vmax.f32 %v7799_v22, %v7827_v4  ;;  %v1105_v23 = vmax.f32 %v7803_v10, %v7830_v49  ;;  %v1129_v30 = vmax.f32 %v1001_v9, %v1065_v55 }
 0x32f   :  { %v7974_v5 = vpack.c.bf16 %v1128_v34, %v1126_v1  ;;  %v11947_v42 = vmax.f32 %v7630_v53, %v7777_v13  ;;  %v11948_v50 = vmax.f32 %v7651_v41, %v7712_v26  ;;  %v7987_v22 = vpack.c.bf16 %v1104_v25, %v1102_v31  ;;  %v5552_v53 = vld [vmem:[%s11860_s4 + $0x8] sm:$0xf0]  ;;  %v6262_v41 = vld [vmem:[%s11860_s4 + $0x84] sm:$0xf] }
 0x330   :  { %v7985_v2 = vpack.c.bf16 %v1129_v30, %v1127_v43  ;;  %v7989_v10 = vpack.c.bf16 %v1105_v23, %v1103_v51  ;;  %v5555_v39 = vor.u32 %v6246_v14, %v5552_v53  ;;  %v5616_v26 = vld [vmem:[%s11860_s4 + $0x88] sm:$0xf0] }
 0x331   :  { %v1136_v54 = vpack.c.bf16 %v11947_v42, %v1078_v60  ;;  %v1137_v11 = vpack.c.bf16 %v1081_v48, %v11948_v50  ;;  %v5619_v13 = vor.u32 %v6262_v41, %v5616_v26 }
 0x332   :  { %1539 = vmatpush.bf16.msra.mxu0 %v5555_v39 }
 0x333   :  { %1628 = vmatpush.bf16.msra.mxu1 %v5619_v13 }
 0x334   :  { %1377 = vmatmul.bf16.gmra.mxu0 %v1136_v54  ;;  %1466 = vmatmul.bf16.gmra.mxu1 %v1137_v11 }
 0x336   :  { %1496 = vmatmul.bf16.gmra.mxu3 %v7989_v10 }
 0x337   :  { %1407 = vmatmul.bf16.gmra.mxu2 %v7987_v22 }
 0x344   :  { %1382 = vmatmul.bf16.gmra.mxu0 %v7848_v3  ;;  %1471 = vmatmul.bf16.gmra.mxu1 %v7874_v12 }
 0x346   :  { %1501 = vmatmul.bf16.gmra.mxu3 %v7891_v56 }
 0x347   :  { %1412 = vmatmul.bf16.gmra.mxu2 %v7887_v45 }
 0x354   :  { %1387 = vmatmul.bf16.gmra.mxu0 %v7893_v52  ;;  %1476 = vmatmul.bf16.gmra.mxu1 %v7900_v20 }
 0x356   :  { %1506 = vmatmul.bf16.gmra.mxu3 %v7918_v16 }
 0x357   :  { %1417 = vmatmul.bf16.gmra.mxu2 %v7906_v19 }
 0x364   :  { %1540 = vmatmul.bf16.vlgmr.msra.gmra.mxu0 %v7669_v63  ;;  %1629 = vmatmul.bf16.vlgmr.msra.gmra.mxu1 %v7671_v35 }
 0x366   :  { %1511 = vmatmul.bf16.gmra.mxu3 %v7940_v24 }
 0x367   :  { %1422 = vmatmul.bf16.gmra.mxu2 %v7933_v28 }
 0x374   :  { %1545 = vmatmul.bf16.gmra.mxu0 %v7772_v46  ;;  %1634 = vmatmul.bf16.gmra.mxu1 %v7774_v33 }
 0x376   :  { %1516 = vmatmul.bf16.gmra.mxu3 %v7954_v6 }
 0x377   :  { %1427 = vmatmul.bf16.gmra.mxu2 %v7944_v29 }
 0x381   :  { %v1363_v60 = vpop.f32.mrf.mxu0  ;;  %v1452_v4 = vpop.f32.mrf.mxu1 }
 0x382   :  { %v8021_v49 = vadd.f32 %v1452_v4, %v1363_v60  ;;  %v11950_v60 = vld [vmem:[#allocation20_spill] sm:$0xff]  ;;  %v11951_v4 = vld [vmem:[#allocation21_spill] sm:$0xff] }
 0x384   :  { %1550 = vmatmul.bf16.gmra.mxu0 %v7781_v40  ;;  %1639 = vmatmul.bf16.gmra.mxu1 %v7793_v8 }
 0x386   :  { %1521 = vmatmul.bf16.gmra.mxu3 %v7968_v59 }
 0x387   :  { %1432 = vmatmul.bf16.gmra.mxu2 %v7962_v47 }
 0x389   :  { %v1365_v35 = vpop.f32.mrf.mxu0  ;;  %v1482_v46 = vpop.f32.mrf.mxu3 }
 0x38a   :  { %v1393_v63 = vpop.f32.mrf.mxu2  ;;  %v1454_v21 = vpop.f32.mrf.mxu1 }
 0x38b   :  { %v8027_v33 = vadd.f32 %v1482_v46, %v1393_v63  ;;  %v8029_v38 = vadd.f32 %v1454_v21, %v1365_v35  ;;  %v1784_v46 = vmul.f32 %v8021_v49, %v8021_v49 }
 0x38d   :  { %v1710_v21 = vadd.f32 %v8029_v38, %v8021_v49 }
 0x391   :  { %v1368_v17 = vpop.f32.mrf.mxu0  ;;  %v8033_v61 = vpop.f32.mrf.mxu3 }
 0x392   :  { %v8031_v15 = vpop.f32.mrf.mxu2  ;;  %v1457_v40 = vpop.f32.mrf.mxu1 }
 0x393   :  { %v8035_v58 = vadd.f32 %v1457_v40, %v1368_v17 }
 0x394   :  { %1555 = vmatmul.bf16.gmra.mxu0 %v1136_v54  ;;  %1644 = vmatmul.bf16.gmra.mxu1 %v1137_v11 }
 0x395   :  { %v1788_v17 = vmul.f32 %v8035_v58, %v8035_v58 }
 0x396   :  { %1526 = vmatmul.bf16.gmra.mxu3 %v7985_v2 }
 0x397   :  { %1437 = vmatmul.bf16.gmra.mxu2 %v7974_v5 }
 0x399   :  { %v1370_v8 = vpop.f32.mrf.mxu0  ;;  %v1487_v27 = vpop.f32.mrf.mxu3 }
 0x39a   :  { %v1398_v62 = vpop.f32.mrf.mxu2  ;;  %v1459_v9 = vpop.f32.mrf.mxu1 }
 0x39b   :  { %v8039_v18 = vadd.f32 %v1487_v27, %v1398_v62  ;;  %v8041_v48 = vadd.f32 %v1459_v9, %v1370_v8  ;;  %v1711_v27 = vadd.f32 %v1710_v21, %v8035_v58 }
 0x39d   :  { %v1790_v9 = vmul.f32 %v8041_v48, %v8041_v48 }
 0x3a1   :  { %v1373_v36 = vpop.f32.mrf.mxu0  ;;  %v8045_v32 = vpop.f32.mrf.mxu3 }
 0x3a2   :  { %v8043_v57 = vpop.f32.mrf.mxu2  ;;  %v1462_v1 = vpop.f32.mrf.mxu1 }
 0x3a3   :  { %v8047_v34 = vadd.f32 %v1462_v1, %v1373_v36  ;;  %v1712_v1 = vadd.f32 %v1711_v27, %v8041_v48 }
 0x3a4   :  { %1560 = vmatmul.bf16.gmra.mxu0 %v7848_v3  ;;  %1649 = vmatmul.bf16.gmra.mxu1 %v7874_v12 }
 0x3a9   :  { %v1375_v55 = vpop.f32.mrf.mxu0  ;;  %v1492_v25 = vpop.f32.mrf.mxu3 }
 0x3aa   :  { %v1403_v31 = vpop.f32.mrf.mxu2  ;;  %v1464_v51 = vpop.f32.mrf.mxu1 }
 0x3ab   :  { %v8051_v43 = vadd.f32 %v1492_v25, %v1403_v31  ;;  %v8053_v23 = vadd.f32 %v1464_v51, %v1375_v55  ;;  %v1792_v55 = vmul.f32 %v8047_v34, %v8047_v34  ;;  %v1713_v51 = vadd.f32 %v1712_v1, %v8047_v34 }
 0x3b1   :  { %v1378_v30 = vpop.f32.mrf.mxu0  ;;  %v8057_v54 = vpop.f32.mrf.mxu3 }
 0x3b2   :  { %v8055_v42 = vpop.f32.mrf.mxu2  ;;  %v1467_v50 = vpop.f32.mrf.mxu1 }
 0x3b3   :  { %v8085_v31 = vadd.f32 %v1467_v50, %v1378_v30 }
 0x3b4   :  { %1565 = vmatmul.bf16.gmra.mxu0 %v7893_v52  ;;  %1654 = vmatmul.bf16.gmra.mxu1 %v7900_v20  ;;  %v1786_v52 = vmul.f32 %v8029_v38, %v8029_v38 }
 0x3b5   :  { %v1796_v30 = vmul.f32 %v8085_v31, %v8085_v31 }
 0x3b6   :  { %v1848_v62 = vadd.f32 %v1786_v52, %v1784_v46 }
 0x3b8   :  { %v1849_v36 = vadd.f32 %v1848_v62, %v1788_v17 }
 0x3b9   :  { %v1380_v3 = vpop.f32.mrf.mxu0  ;;  %v1497_v11 = vpop.f32.mrf.mxu3 }
 0x3ba   :  { %v1408_v12 = vpop.f32.mrf.mxu2  ;;  %v1469_v53 = vpop.f32.mrf.mxu1  ;;  %v1850_v25 = vadd.f32 %v1849_v36, %v1790_v9 }
 0x3bb   :  { %v8061_v14 = vadd.f32 %v1497_v11, %v1408_v12  ;;  %v1794_v12 = vmul.f32 %v8053_v23, %v8053_v23  ;;  %v8090_v11 = vadd.f32 %v1469_v53, %v1380_v3 }
 0x3bd   :  { %11949 = vst [vmem:[#allocation22_spill] sm:$0xff] %v8061_v14  ;;  %v1798_v53 = vmul.f32 %v8090_v11, %v8090_v11 }
 0x3c1   :  { %v1383_v41 = vpop.f32.mrf.mxu0  ;;  %v8065_v26 = vpop.f32.mrf.mxu3 }
 0x3c2   :  { %v8063_v39 = vpop.f32.mrf.mxu2  ;;  %v1472_v13 = vpop.f32.mrf.mxu1 }
 0x3c3   :  { %v8099_v50 = vadd.f32 %v1472_v13, %v1383_v41 }
 0x3c4   :  { %1570 = vmatmul.bf16.gmra.mxu0 %v11950_v60  ;;  %1659 = vmatmul.bf16.gmra.mxu1 %v11951_v4 }
 0x3c5   :  { %v1800_v41 = vmul.f32 %v8099_v50, %v8099_v50 }
 0x3c9   :  { %v1385_v20 = vpop.f32.mrf.mxu0  ;;  %v1502_v63 = vpop.f32.mrf.mxu3 }
 0x3ca   :  { %v1413_v35 = vpop.f32.mrf.mxu2  ;;  %v1474_v8 = vpop.f32.mrf.mxu1 }
 0x3cb   :  { %v8077_v40 = vadd.f32 %v1502_v63, %v1413_v35  ;;  %v1851_v35 = vadd.f32 %v1850_v25, %v1792_v55  ;;  %v1714_v63 = vadd.f32 %v1713_v51, %v8053_v23  ;;  %v8105_v17 = vadd.f32 %v1474_v8, %v1385_v20 }
 0x3cd   :  { %11952 = vst [vmem:[#allocation23_spill] sm:$0xff] %v8077_v40  ;;  %v1852_v21 = vadd.f32 %v1851_v35, %v1794_v12  ;;  %v1715_v3 = vadd.f32 %v1714_v63, %v8085_v31  ;;  %v1802_v36 = vmul.f32 %v8105_v17, %v8105_v17 }
 0x3cf   :  { %v1853_v62 = vadd.f32 %v1852_v21, %v1796_v30  ;;  %v1716_v27 = vadd.f32 %v1715_v3, %v8090_v11 }
 0x3d1   :  { %v1388_v60 = vpop.f32.mrf.mxu0  ;;  %v8094_v52 = vpop.f32.mrf.mxu3  ;;  %v1854_v9 = vadd.f32 %v1853_v62, %v1798_v53 }
 0x3d2   :  { %v8092_v4 = vpop.f32.mrf.mxu2  ;;  %v1477_v46 = vpop.f32.mrf.mxu1 }
 0x3d3   :  { %v8111_v13 = vadd.f32 %v1477_v46, %v1388_v60 }
 0x3d4   :  { %1575 = vmatmul.bf16.gmra.mxu0 %v7779_v37  ;;  %1664 = vmatmul.bf16.gmra.mxu1 %v7791_v44  ;;  %v1717_v37 = vadd.f32 %v1716_v27, %v8099_v50  ;;  %v1855_v44 = vadd.f32 %v1854_v9, %v1800_v41  ;;  %v1808_v27 = vmul.f32 %v8027_v33, %v8027_v33 }
 0x3d5   :  { %v1804_v25 = vmul.f32 %v8111_v13, %v8111_v13  ;;  %v8137_v41 = vadd.f32 %v8033_v61, %v8031_v15  ;;  %v1812_v61 = vmul.f32 %v8039_v18, %v8039_v18 }
 0x3d6   :  { %v1718_v8 = vadd.f32 %v1717_v37, %v8105_v17  ;;  %v1856_v60 = vadd.f32 %v1855_v44, %v1802_v36 }
 0x3d7   :  { %v1810_v44 = vmul.f32 %v8137_v41, %v8137_v41 }
 0x3d8   :  { %v1719_v35 = vadd.f32 %v1718_v8, %v8111_v13  ;;  %v1857_v30 = vadd.f32 %v1856_v60, %v1804_v25 }
 0x3d9   :  { %v1390_v1 = vpop.f32.mrf.mxu0  ;;  %v8118_v20 = vpop.f32.mrf.mxu3 }
 0x3da   :  { %v8116_v55 = vpop.f32.mrf.mxu2  ;;  %v1479_v51 = vpop.f32.mrf.mxu1 }
 0x3db   :  { %v8123_v12 = vadd.f32 %v1479_v51, %v1390_v1 }
 0x3dd   :  { %v1806_v63 = vmul.f32 %v8123_v12, %v8123_v12  ;;  %v1720_v46 = vadd.f32 %v1719_v35, %v8123_v12 }
 0x3df   :  { %v1858_v21 = vadd.f32 %v1857_v30, %v1806_v63  ;;  %v1721_v9 = vadd.f32 %v1720_v46, %v8027_v33 }
 0x3e1   :  { %v1541_v3 = vpop.f32.mrf.mxu0  ;;  %v8131_v62 = vpop.f32.mrf.mxu3  ;;  %v1859_v1 = vadd.f32 %v1858_v21, %v1808_v27  ;;  %v1722_v8 = vadd.f32 %v1721_v9, %v8137_v41 }
 0x3e2   :  { %v8129_v53 = vpop.f32.mrf.mxu2  ;;  %v1630_v37 = vpop.f32.mrf.mxu1 }
 0x3e3   :  { %v8140_v36 = vadd.f32 %v1630_v37, %v1541_v3  ;;  %v1860_v25 = vadd.f32 %v1859_v1, %v1810_v44 }
 0x3e4   :  { %1580 = vmatmul.bf16.gmra.mxu0 %v7807_v0  ;;  %1669 = vmatmul.bf16.gmra.mxu1 %v7866_v7  ;;  %v8155_v0 = vadd.f32 %v8045_v32, %v8043_v57  ;;  %v1723_v7 = vadd.f32 %v1722_v8, %v8039_v18  ;;  %v1816_v57 = vmul.f32 %v8051_v43, %v8051_v43 }
 0x3e5   :  { %v1861_v30 = vadd.f32 %v1860_v25, %v1812_v61  ;;  %v8171_v32 = vadd.f32 %v8057_v54, %v8055_v42  ;;  %v6285_v42 = vld [vmem:[%s11955_s1 + $0x38] sm:$0xff] }
 0x3e6   :  { %v1814_v46 = vmul.f32 %v8155_v0, %v8155_v0  ;;  %v1724_v21 = vadd.f32 %v1723_v7, %v8155_v0  ;;  %2054 = vmatpush.bf16.msrb.mxu2 %v6285_v42 }
 0x3e7   :  { %11954 = vst [vmem:[#allocation25_spill] sm:$0xff] %v8171_v32 }
 0x3e8   :  { %v1862_v3 = vadd.f32 %v1861_v30, %v1814_v46  ;;  %v1725_v1 = vadd.f32 %v1724_v21, %v8051_v43 }
 0x3e9   :  { %v1543_v51 = vpop.f32.mrf.mxu0  ;;  %v8149_v15 = vpop.f32.mrf.mxu3 }
 0x3ea   :  { %v8147_v60 = vpop.f32.mrf.mxu2  ;;  %v1632_v35 = vpop.f32.mrf.mxu1  ;;  %v1863_v25 = vadd.f32 %v1862_v3, %v1816_v57  ;;  %v1726_v61 = vadd.f32 %v1725_v1, %v8171_v32 }
 0x3eb   :  { %v8158_v63 = vadd.f32 %v1632_v35, %v1543_v51  ;;  %v1818_v51 = vmul.f32 %v8171_v32, %v8171_v32 }
 0x3ec   :  { %v1727_v46 = vadd.f32 %v1726_v61, %v8061_v14  ;;  %v1824_v61 = vmul.f32 %v8077_v40, %v8077_v40 }
 0x3ed   :  { %11953 = vst [vmem:[#allocation24_spill] sm:$0xff] %v8158_v63  ;;  %v1864_v54 = vadd.f32 %v1863_v25, %v1818_v51 }
 0x3f1   :  { %v1546_v27 = vpop.f32.mrf.mxu0  ;;  %v8165_v37 = vpop.f32.mrf.mxu3 }
 0x3f2   :  { %v8163_v9 = vpop.f32.mrf.mxu2  ;;  %v1635_v44 = vpop.f32.mrf.mxu1 }
 0x3f3   :  { %v8174_v8 = vadd.f32 %v1635_v44, %v1546_v27  ;;  %v6284_v44 = vld [vmem:[%s11955_s1 + $0x30] sm:$0xff] }
 0x3f4   :  { %1585 = vmatmul.bf16.gmra.mxu0 %v7987_v22  ;;  %1674 = vmatmul.bf16.gmra.mxu1 %v7989_v10  ;;  %v1820_v22 = vmul.f32 %v8061_v14, %v8061_v14  ;;  %v8188_v10 = vadd.f32 %v8065_v26, %v8063_v39  ;;  %v6283_v26 = vld [vmem:[%s11955_s1 + $0x28] sm:$0xff] }
 0x3f5   :  { %2055 = vmatpush.bf16.msrb.mxu2 %v6284_v44 }
 0x3f6   :  { %11956 = vst [vmem:[#allocation26_spill] sm:$0xff] %v8188_v10  ;;  %v1865_v27 = vadd.f32 %v1864_v54, %v1820_v22  ;;  %v1822_v57 = vmul.f32 %v8188_v10, %v8188_v10  ;;  %v1728_v1 = vadd.f32 %v1727_v46, %v8188_v10  ;;  %v8206_v54 = vadd.f32 %v8094_v52, %v8092_v4 }
 0x3f8   :  { %v1866_v25 = vadd.f32 %v1865_v27, %v1822_v57  ;;  %11958 = vst [vmem:[#allocation28_spill] sm:$0xff] %v8206_v54  ;;  %v1826_v27 = vmul.f32 %v8206_v54, %v8206_v54  ;;  %v8217_v57 = vadd.f32 %v8118_v20, %v8116_v55 }
 0x3f9   :  { %v1548_v7 = vpop.f32.mrf.mxu0  ;;  %v1517_v30 = vpop.f32.mrf.mxu3  ;;  %2056 = vmatpush.bf16.msrb.mxu2 %v6283_v26 }
 0x3fa   :  { %v1428_v35 = vpop.f32.mrf.mxu2  ;;  %v1637_v21 = vpop.f32.mrf.mxu1  ;;  %11960 = vst [vmem:[#allocation30_spill] sm:$0xff] %v8217_v57 }
 0x3fb   :  { %v8191_v3 = vadd.f32 %v1637_v21, %v1548_v7  ;;  %v1729_v7 = vadd.f32 %v1728_v1, %v8077_v40  ;;  %v1867_v21 = vadd.f32 %v1866_v25, %v1824_v61 }
 0x3fd   :  { %11957 = vst [vmem:[#allocation27_spill] sm:$0xff] %v8191_v3  ;;  %v1730_v4 = vadd.f32 %v1729_v7, %v8206_v54  ;;  %v1868_v52 = vadd.f32 %v1867_v21, %v1826_v27 }
 0x3ff   :  { %v1731_v25 = vadd.f32 %v1730_v4, %v8217_v57 }
 0x401   :  { %v1551_v51 = vpop.f32.mrf.mxu0  ;;  %v1519_v39 = vpop.f32.mrf.mxu3 }
 0x402   :  { %v1430_v42 = vpop.f32.mrf.mxu2  ;;  %v1640_v22 = vpop.f32.mrf.mxu1 }
 0x403   :  { %v8209_v46 = vadd.f32 %v1640_v22, %v1551_v51  ;;  %v8234_v22 = vadd.f32 %v8149_v15, %v8147_v60 }
 0x404   :  { %1590 = vmatmul.bf16.gmra.mxu0 %v7887_v45  ;;  %1679 = vmatmul.bf16.gmra.mxu1 %v7891_v56  ;;  %v1828_v45 = vmul.f32 %v8217_v57, %v8217_v57  ;;  %v8224_v56 = vadd.f32 %v8131_v62, %v8129_v53 }
 0x405   :  { %11959 = vst [vmem:[#allocation29_spill] sm:$0xff] %v8209_v46  ;;  %v1832_v4 = vmul.f32 %v8234_v22, %v8234_v22  ;;  %v1793_v40 = vmul.f32 %v8209_v46, %v8209_v46 }
 0x406   :  { %11961 = vst [vmem:[#allocation31_spill] sm:$0xff] %v8224_v56  ;;  %v1869_v55 = vadd.f32 %v1868_v52, %v1828_v45  ;;  %v1732_v20 = vadd.f32 %v1731_v25, %v8224_v56  ;;  %v1830_v7 = vmul.f32 %v8224_v56, %v8224_v56  ;;  %v8241_v52 = vadd.f32 %v8165_v37, %v8163_v9  ;;  %v6282_v45 = vld [vmem:[%s11955_s1 + $0x20] sm:$0xff]  ;;  %v6281_v9 = vld [vmem:[%s11955_s1 + $0x18] sm:$0xff] }
 0x407   :  { %11962 = vst [vmem:[#allocation32_spill] sm:$0xff] %v8234_v22  ;;  %v8249_v25 = vadd.f32 %v1517_v30, %v1428_v35  ;;  %2057 = vmatpush.bf16.msrb.mxu2 %v6282_v45 }
 0x408   :  { %v1870_v21 = vadd.f32 %v1869_v55, %v1830_v7  ;;  %v1733_v62 = vadd.f32 %v1732_v20, %v8234_v22  ;;  %11963 = vst [vmem:[#allocation33_spill] sm:$0xff] %v8241_v52  ;;  %v8258_v55 = vadd.f32 %v1519_v39, %v1430_v42 }
 0x409   :  { %v1553_v1 = vpop.f32.mrf.mxu0  ;;  %v1522_v51 = vpop.f32.mrf.mxu3  ;;  %11964 = vst [vmem:[#allocation34_spill] sm:$0xff] %v8249_v25 }
 0x40a   :  { %v1433_v44 = vpop.f32.mrf.mxu2  ;;  %v1642_v26 = vpop.f32.mrf.mxu1  ;;  %v1871_v15 = vadd.f32 %v1870_v21, %v1832_v4  ;;  %v1734_v37 = vadd.f32 %v1733_v62, %v8241_v52  ;;  %11965 = vst [vmem:[#allocation35_spill] sm:$0xff] %v8258_v55  ;;  %v1838_v42 = vmul.f32 %v8258_v55, %v8258_v55 }
 0x40b   :  { %v8227_v61 = vadd.f32 %v1642_v26, %v1553_v1  ;;  %v1834_v26 = vmul.f32 %v8241_v52, %v8241_v52  ;;  %v8262_v35 = vadd.f32 %v1522_v51, %v1433_v44  ;;  %2058 = vmatpush.bf16.msrb.mxu2 %v6281_v9 }
 0x40d   :  { %v1872_v20 = vadd.f32 %v1871_v15, %v1834_v26  ;;  %11966 = vst [vmem:[#allocation5_spill] sm:$0xff] %v8262_v35  ;;  %v6279_v15 = vld [vmem:[%s11955_s1 + $0x8] sm:$0xff]  ;;  %v1795_v32 = vmul.f32 %v8227_v61, %v8227_v61 }
 0x411   :  { %v1556_v27 = vpop.f32.mrf.mxu0  ;;  %v1524_v53 = vpop.f32.mrf.mxu3 }
 0x412   :  { %v1435_v54 = vpop.f32.mrf.mxu2  ;;  %v1645_v1 = vpop.f32.mrf.mxu1 }
 0x413   :  { %v8246_v60 = vadd.f32 %v1645_v1, %v1556_v27  ;;  %v1735_v27 = vadd.f32 %v1734_v37, %v8249_v25  ;;  %v8270_v39 = vadd.f32 %v1524_v53, %v1435_v54  ;;  %v1840_v1 = vmul.f32 %v8262_v35, %v8262_v35 }
 0x414   :  { %1595 = vmatmul.bf16.gmra.mxu0 %v7906_v19  ;;  %1684 = vmatmul.bf16.gmra.mxu1 %v7918_v16  ;;  %v1836_v19 = vmul.f32 %v8249_v25, %v8249_v25  ;;  %v6280_v16 = vld [vmem:[%s11955_s1 + $0x10] sm:$0xff]  ;;  %v1747_v25 = vadd.f32 %v8158_v63, %v8140_v36 }
 0x415   :  { %11967 = vst [vmem:[#allocation7_spill] sm:$0xff] %v8270_v39  ;;  %v1736_v51 = vadd.f32 %v1735_v27, %v8258_v55  ;;  %2059 = vmatpush.bf16.msrb.mxu2 %v6280_v16  ;;  %v1842_v53 = vmul.f32 %v8270_v39, %v8270_v39 }
 0x416   :  { %v1873_v44 = vadd.f32 %v1872_v20, %v1836_v19  ;;  %v1748_v56 = vadd.f32 %v1747_v25, %v8174_v8  ;;  %v1797_v25 = vmul.f32 %v8246_v60, %v8246_v60 }
 0x417   :  { %v1737_v54 = vadd.f32 %v1736_v51, %v8262_v35 }
 0x418   :  { %v1874_v9 = vadd.f32 %v1873_v44, %v1838_v42  ;;  %v1749_v10 = vadd.f32 %v1748_v56, %v8191_v3 }
 0x419   :  { %v1558_v30 = vpop.f32.mrf.mxu0  ;;  %v1527_v21 = vpop.f32.mrf.mxu3  ;;  %v1738_v26 = vadd.f32 %v1737_v54, %v8270_v39  ;;  %2060 = vmatpush.bf16.msrb.mxu2 %v6279_v15 }
 0x41a   :  { %v1438_v7 = vpop.f32.mrf.mxu2  ;;  %v1647_v62 = vpop.f32.mrf.mxu1  ;;  %v1875_v37 = vadd.f32 %v1874_v9, %v1840_v1 }
 0x41b   :  { %v8272_v4 = vadd.f32 %v1647_v62, %v1558_v30  ;;  %v8277_v45 = vadd.f32 %v1527_v21, %v1438_v7  ;;  %v6278_v30 = vld [vmem:[%s11955_s1] sm:$0xff] }
 0x41c   :  { %v1876_v21 = vadd.f32 %v1875_v37, %v1842_v53 }
 0x41d   :  { %11968 = vst [vmem:[#allocation17_spill] sm:$0xff] %v8277_v45  ;;  %v1844_v20 = vmul.f32 %v8277_v45, %v8277_v45  ;;  %v1739_v27 = vadd.f32 %v1738_v26, %v8277_v45  ;;  %2061 = vmatpush.bf16.msrb.mxu2 %v6278_v30 }
 0x41f   :  { %v1877_v51 = vadd.f32 %v1876_v21, %v1844_v20 }
 0x421   :  { %v1561_v19 = vpop.f32.mrf.mxu0  ;;  %v1529_v7 = vpop.f32.mrf.mxu3 }
 0x422   :  { %v1440_v16 = vpop.f32.mrf.mxu2  ;;  %v1650_v62 = vpop.f32.mrf.mxu1 }
 0x423   :  { %v8292_v42 = vadd.f32 %v1529_v7, %v1440_v16  ;;  %v8294_v44 = vadd.f32 %v1650_v62, %v1561_v19  ;;  %v6293_v62 = vld [vmem:[%s11955_s1 + $0x78] sm:$0xff] }
 0x424   :  { %1600 = vmatmul.bf16.gmra.mxu0 %v7933_v28  ;;  %1689 = vmatmul.bf16.gmra.mxu1 %v7940_v24 }
 0x425   :  { %11969 = vst [vmem:[#allocation6_spill] sm:$0xff] %v8292_v42  ;;  %v1740_v1 = vadd.f32 %v1739_v27, %v8292_v42  ;;  %v1846_v15 = vmul.f32 %v8292_v42, %v8292_v42  ;;  %2067 = vmatpush.bf16.msrb.mxu3 %v6293_v62 }
 0x427   :  { %v1741_v9 = vrot.slane %v1740_v1, 4  ;;  %v1878_v54 = vadd.f32 %v1877_v51, %v1846_v15 }
 0x429   :  { %v1742_v53 = vadd.f32 %v1741_v9, %v1740_v1  ;;  %v1879_v37 = vrot.slane %v1878_v54, 4  ;;  %v8301_v26 = vpop.f32.mrf.mxu0 }
 0x42a   :  { %v8303_v7 = vpop.f32.mrf.mxu1 }
 0x42b   :  { %v1743_v16 = vrot.slane %v1742_v53, 2  ;;  %v1880_v19 = vadd.f32 %v1879_v37, %v1878_v54 }
 0x42d   :  { %v1744_v28 = vadd.f32 %v1743_v16, %v1742_v53  ;;  %v1881_v20 = vrot.slane %v1880_v19, 2 }
 0x42f   :  { %v1745_v21 = vrot.slane %v1744_v28, 1  ;;  %v1882_v27 = vadd.f32 %v1881_v20, %v1880_v19 }
 0x431   :  { %v1883_v24 = vrot.slane %v1882_v27, 1  ;;  %v1566_v30 = vpop.f32.mrf.mxu0  ;;  %v1746_v51 = vadd.f32 %v1745_v21, %v1744_v28 }
 0x432   :  { %v1655_v15 = vpop.f32.mrf.mxu1 }
 0x433   :  { %v1884_v1 = vadd.f32 %v1883_v24, %v1882_v27  ;;  %v8308_v9 = vadd.f32 %v1655_v15, %v1566_v30 }
 0x434   :  { %1605 = vmatmul.bf16.gmra.mxu0 %v7944_v29  ;;  %1694 = vmatmul.bf16.gmra.mxu1 %v7954_v6  ;;  %v6292_v29 = vld [vmem:[%s11955_s1 + $0x70] sm:$0xff] }
 0x435   :  { %v1922_v54 = vsel %vm602_vm1, %v1746_v51, %v1884_v1  ;;  %2068 = vmatpush.bf16.msrb.mxu3 %v6292_v29 }
 0x436   :  { %v1924_v53 = vpack.c.bf16 %v1922_v54, %v1922_v54 }
 0x438   :  { %2062 = vmatmul.bf16.vlgmr.msrb.gmra.mxu2 %v1924_v53 }
 0x439   :  { %v8313_v37 = vpop.f32.mrf.mxu0 }
 0x43a   :  { %v8315_v16 = vpop.f32.mrf.mxu1 }
 0x441   :  { %v1571_v19 = vpop.f32.mrf.mxu0 }
 0x442   :  { %v1660_v20 = vpop.f32.mrf.mxu1 }
 0x443   :  { %v8317_v62 = vadd.f32 %v1660_v20, %v1571_v19 }
 0x444   :  { %1610 = vmatmul.bf16.gmra.mxu0 %v7962_v47  ;;  %1699 = vmatmul.bf16.gmra.mxu1 %v7968_v59  ;;  %v6291_v47 = vld [vmem:[%s11955_s1 + $0x68] sm:$0xff] }
 0x445   :  { %2069 = vmatpush.bf16.msrb.mxu3 %v6291_v47 }
 0x449   :  { %v8324_v6 = vpop.f32.mrf.mxu0 }
 0x44a   :  { %v8326_v28 = vpop.f32.mrf.mxu1 }
 0x451   :  { %v1576_v21 = vpop.f32.mrf.mxu0 }
 0x452   :  { %v1665_v27 = vpop.f32.mrf.mxu1 }
 0x453   :  { %v8328_v24 = vadd.f32 %v1665_v27, %v1576_v21  ;;  %v6289_v27 = vld [vmem:[%s11955_s1 + $0x58] sm:$0xff] }
 0x454   :  { %1615 = vmatmul.bf16.gmra.mxu0 %v7974_v5  ;;  %1704 = vmatmul.bf16.gmra.mxu1 %v7985_v2  ;;  %v6290_v5 = vld [vmem:[%s11955_s1 + $0x60] sm:$0xff] }
 0x455   :  { %11970 = vst [vmem:[#allocation36_spill] sm:$0xff] %v8328_v24  ;;  %2070 = vmatpush.bf16.msrb.mxu3 %v6290_v5 }
 0x459   :  { %v8335_v59 = vpop.f32.mrf.mxu0  ;;  %2071 = vmatpush.bf16.msrb.mxu3 %v6289_v27  ;;  %v1787_v27 = vmul.f32 %v8158_v63, %v8158_v63  ;;  %v1750_v63 = vadd.f32 %v1749_v10, %v8209_v46  ;;  %v8407_v10 = vadd.f32 %v8303_v7, %v8301_v26  ;;  %v1801_v46 = vmul.f32 %v8294_v44, %v8294_v44 }
 0x45a   :  { %v8337_v30 = vpop.f32.mrf.mxu1 }
 0x461   :  { %v1581_v51 = vpop.f32.mrf.mxu0 }
 0x462   :  { %v1670_v1 = vpop.f32.mrf.mxu1 }
 0x463   :  { %v8339_v15 = vadd.f32 %v1670_v1, %v1581_v51 }
 0x469   :  { %v8341_v54 = vpop.f32.mrf.mxu0 }
 0x46a   :  { %v8343_v53 = vpop.f32.mrf.mxu1 }
 0x471   :  { %v1586_v2 = vpop.f32.mrf.mxu0 }
 0x472   :  { %v1675_v19 = vpop.f32.mrf.mxu1 }
 0x473   :  { %v8348_v20 = vadd.f32 %v1675_v19, %v1586_v2  ;;  %v6288_v19 = vld [vmem:[%s11955_s1 + $0x50] sm:$0xff] }
 0x474   :  { %2072 = vmatpush.bf16.msrb.mxu3 %v6288_v19  ;;  %v1791_v19 = vmul.f32 %v8191_v3, %v8191_v3 }
 0x479   :  { %v8350_v29 = vpop.f32.mrf.mxu0 }
 0x47a   :  { %v8352_v21 = vpop.f32.mrf.mxu1 }
 0x481   :  { %v1591_v47 = vpop.f32.mrf.mxu0 }
 0x482   :  { %v1680_v51 = vpop.f32.mrf.mxu1 }
 0x483   :  { %v8357_v1 = vadd.f32 %v1680_v51, %v1591_v47  ;;  %v1785_v47 = vmul.f32 %v8140_v36, %v8140_v36  ;;  %v1789_v51 = vmul.f32 %v8174_v8, %v8174_v8 }
 0x485   :  { %v1885_v52 = vadd.f32 %v1787_v27, %v1785_v47  ;;  %v6287_v27 = vld [vmem:[%s11955_s1 + $0x48] sm:$0xff] }
 0x486   :  { %2073 = vmatpush.bf16.msrb.mxu3 %v6287_v27  ;;  %v8419_v27 = vadd.f32 %v8315_v16, %v8313_v37 }
 0x487   :  { %v1886_v57 = vadd.f32 %v1885_v52, %v1789_v51  ;;  %v1751_v51 = vadd.f32 %v1750_v63, %v8227_v61 }
 0x489   :  { %v8359_v42 = vpop.f32.mrf.mxu0  ;;  %v1887_v14 = vadd.f32 %v1886_v57, %v1791_v19  ;;  %v1799_v57 = vmul.f32 %v8272_v4, %v8272_v4 }
 0x48a   :  { %v8361_v45 = vpop.f32.mrf.mxu1 }
 0x48b   :  { %v1888_v47 = vadd.f32 %v1887_v14, %v1793_v40  ;;  %v1752_v14 = vadd.f32 %v1751_v51, %v8246_v60 }
 0x48d   :  { %v1889_v56 = vadd.f32 %v1888_v47, %v1795_v32  ;;  %v1753_v3 = vadd.f32 %v1752_v14, %v8272_v4  ;;  %v1803_v32 = vmul.f32 %v8407_v10, %v8407_v10  ;;  %v1805_v47 = vmul.f32 %v8308_v9, %v8308_v9 }
 0x48e   :  { %v8431_v14 = vadd.f32 %v8326_v28, %v8324_v6 }
 0x48f   :  { %v1890_v40 = vadd.f32 %v1889_v56, %v1797_v25  ;;  %v1754_v26 = vadd.f32 %v1753_v3, %v8294_v44 }
 0x491   :  { %v8363_v5 = vpop.f32.mrf.mxu0  ;;  %v1891_v63 = vadd.f32 %v1890_v40, %v1799_v57  ;;  %v1755_v51 = vadd.f32 %v1754_v26, %v8407_v10  ;;  %v1807_v57 = vmul.f32 %v8419_v27, %v8419_v27  ;;  %v8441_v26 = vadd.f32 %v8337_v30, %v8335_v59 }
 0x492   :  { %v8365_v2 = vpop.f32.mrf.mxu1 }
 0x493   :  { %v1892_v7 = vadd.f32 %v1891_v63, %v1801_v46  ;;  %v1756_v16 = vadd.f32 %v1755_v51, %v8308_v9  ;;  %v1809_v46 = vmul.f32 %v8317_v62, %v8317_v62 }
 0x495   :  { %v1893_v56 = vadd.f32 %v1892_v7, %v1803_v32  ;;  %v1757_v40 = vadd.f32 %v1756_v16, %v8419_v27  ;;  %v1811_v32 = vmul.f32 %v8431_v14, %v8431_v14  ;;  %v1813_v7 = vmul.f32 %v8328_v24, %v8328_v24 }
 0x496   :  { %v8451_v16 = vadd.f32 %v8343_v53, %v8341_v54 }
 0x497   :  { %v1894_v3 = vadd.f32 %v1893_v56, %v1805_v47  ;;  %v1758_v6 = vadd.f32 %v1757_v40, %v8317_v62  ;;  %v1817_v40 = vmul.f32 %v8339_v15, %v8339_v15 }
 0x499   :  { %v8370_v39 = vpop.f32.mrf.mxu0  ;;  %v1895_v63 = vadd.f32 %v1894_v3, %v1807_v57  ;;  %v1759_v51 = vadd.f32 %v1758_v6, %v8431_v14  ;;  %v1815_v57 = vmul.f32 %v8441_v26, %v8441_v26 }
 0x49a   :  { %v8372_v35 = vpop.f32.mrf.mxu1 }
 0x49b   :  { %v1896_v28 = vadd.f32 %v1895_v63, %v1809_v46  ;;  %v1760_v30 = vadd.f32 %v1759_v51, %v8328_v24  ;;  %v1821_v51 = vmul.f32 %v8348_v20, %v8348_v20 }
 0x49d   :  { %v1897_v56 = vadd.f32 %v1896_v28, %v1811_v32  ;;  %v1761_v63 = vadd.f32 %v1760_v30, %v8441_v26  ;;  %v1819_v32 = vmul.f32 %v8451_v16, %v8451_v16  ;;  %v8463_v28 = vadd.f32 %v8352_v21, %v8350_v29 }
 0x49e   :  { %v8473_v30 = vadd.f32 %v8361_v45, %v8359_v42  ;;  %v8487_v45 = vadd.f32 %v8372_v35, %v8370_v39 }
 0x49f   :  { %v1898_v46 = vadd.f32 %v1897_v56, %v1813_v7  ;;  %v1762_v54 = vadd.f32 %v1761_v63, %v8339_v15 }
 0x4a1   :  { %v8380_v55 = vpop.f32.mrf.mxu0  ;;  %v1899_v6 = vadd.f32 %v1898_v46, %v1815_v57  ;;  %v1763_v56 = vadd.f32 %v1762_v54, %v8451_v16  ;;  %v1823_v57 = vmul.f32 %v8463_v28, %v8463_v28 }
 0x4a2   :  { %v8386_v22 = vpop.f32.mrf.mxu1 }
 0x4a3   :  { %v1900_v53 = vadd.f32 %v1899_v6, %v1817_v40  ;;  %v1764_v21 = vadd.f32 %v1763_v56, %v8348_v20  ;;  %v1825_v40 = vmul.f32 %v8357_v1, %v8357_v1  ;;  %v8480_v6 = vadd.f32 %v8365_v2, %v8363_v5 }
 0x4a4   :  { %v8494_v5 = vadd.f32 %v8386_v22, %v8380_v55 }
 0x4a5   :  { %v1901_v24 = vadd.f32 %v1900_v53, %v1819_v32  ;;  %v1765_v32 = vadd.f32 %v1764_v21, %v8463_v28  ;;  %v1827_v53 = vmul.f32 %v8473_v30, %v8473_v30 }
 0x4a6   :  { %11971 = vst [vmem:[#allocation19_spill] sm:$0xff] %v8494_v5  ;;  %v1833_v55 = vmul.f32 %v8494_v5, %v8494_v5 }
 0x4a7   :  { %v1902_v63 = vadd.f32 %v1901_v24, %v1821_v51  ;;  %v1766_v42 = vadd.f32 %v1765_v32, %v8357_v1  ;;  %v1829_v51 = vmul.f32 %v8480_v6, %v8480_v6 }
 0x4a9   :  { %v8400_v52 = vpop.f32.mrf.mxu0  ;;  %v1903_v54 = vadd.f32 %v1902_v63, %v1823_v57  ;;  %v1767_v56 = vadd.f32 %v1766_v42, %v8473_v30  ;;  %v6286_v63 = vld [vmem:[%s11955_s1 + $0x40] sm:$0xff] }
 0x4aa   :  { %v8409_v19 = vpop.f32.mrf.mxu1  ;;  %2074 = vmatpush.bf16.msrb.mxu3 %v6286_v63  ;;  %v5810_v63 = vld [vmem:[%s11654_s11 + $0x68] sm:$0xf0] }
 0x4ab   :  { %v1904_v24 = vadd.f32 %v1903_v54, %v1825_v40  ;;  %v8501_v35 = vadd.f32 %v8409_v19, %v8400_v52  ;;  %v1768_v21 = vadd.f32 %v1767_v56, %v8480_v6 }
 0x4ad   :  { %v1905_v57 = vadd.f32 %v1904_v24, %v1827_v53  ;;  %11972 = vst [vmem:[#allocation8_spill] sm:$0xff] %v8501_v35  ;;  %v1769_v40 = vadd.f32 %v1768_v21, %v8487_v45  ;;  %v1835_v52 = vmul.f32 %v8501_v35, %v8501_v35  ;;  %v6310_v21 = vld [vmem:[%s11654_s11 + $0x64] sm:$0xf] }
 0x4af   :  { %v1906_v22 = vadd.f32 %v1905_v57, %v1829_v51  ;;  %v1770_v19 = vadd.f32 %v1769_v40, %v8494_v5  ;;  %v6312_v51 = vld [vmem:[%s11654_s11 + $0x74] sm:$0xf] }
 0x4b1   :  { %v8424_v25 = vpop.f32.mrf.mxu0  ;;  %v1771_v56 = vadd.f32 %v1770_v19, %v8501_v35 }
 0x4b2   :  { %v1695_v37 = vpop.f32.mrf.mxu1 }
 0x4b3   :  { %v8511_v32 = vadd.f32 %v1695_v37, %v8424_v25  ;;  %v5818_v25 = vld [vmem:[%s11654_s11 + $0x78] sm:$0xf0]  ;;  %v6328_v37 = vld [vmem:[%s11654_s11 + $0xf4] sm:$0xf] }
 0x4b4   :  { %v5821_v57 = vor.u32 %v6312_v51, %v5818_v25  ;;  %v5813_v25 = vor.u32 %v6310_v21, %v5810_v63 }
 0x4b5   :  { %11973 = vst [vmem:[#allocation9_spill] sm:$0xff] %v8511_v32 }
 0x4b6   :  { %2826 = vmatpush.bf16.msrb.mxu0 %v5821_v57 }
 0x4b9   :  { %v1608_v47 = vpop.f32.mrf.mxu0 }
 0x4ba   :  { %v1697_v59 = vpop.f32.mrf.mxu1  ;;  %2827 = vmatpush.bf16.msrb.mxu0 %v5813_v25 }
 0x4bb   :  { %v8453_v3 = vpop.f32.mrf.mxu2  ;;  %v8516_v53 = vadd.f32 %v1697_v59, %v1608_v47  ;;  %v1837_v47 = vmul.f32 %v8511_v32, %v8511_v32 }
 0x4bd   :  { %v1839_v19 = vmul.f32 %v8516_v53, %v8516_v53 }
 0x4c1   :  { %v1611_v7 = vpop.f32.mrf.mxu0 }
 0x4c2   :  { %v1700_v29 = vpop.f32.mrf.mxu1 }
 0x4c3   :  { %v2065_v46 = vpop.f32.mrf.mxu2  ;;  %v8530_v59 = vadd.f32 %v1700_v29, %v1611_v7  ;;  %v6326_v7 = vld [vmem:[%s11654_s11 + $0xe4] sm:$0xf]  ;;  %v5874_v29 = vld [vmem:[%s11654_s11 + $0xe8] sm:$0xf0] }
 0x4c4   :  { %v1831_v46 = vmul.f32 %v8487_v45, %v8487_v45 }
 0x4c6   :  { %v1907_v54 = vadd.f32 %v1906_v22, %v1831_v46  ;;  %v5882_v46 = vld [vmem:[%s11654_s11 + $0xf8] sm:$0xf0] }
 0x4c7   :  { %v5885_v40 = vor.u32 %v6328_v37, %v5882_v46  ;;  %v1841_v46 = vmul.f32 %v8530_v59, %v8530_v59 }
 0x4c8   :  { %v1908_v42 = vadd.f32 %v1907_v54, %v1833_v55  ;;  %v1772_v54 = vadd.f32 %v1771_v56, %v8511_v32 }
 0x4c9   :  { %v1613_v2 = vpop.f32.mrf.mxu0  ;;  %2915 = vmatpush.bf16.msrb.mxu1 %v5885_v40 }
 0x4ca   :  { %v1702_v39 = vpop.f32.mrf.mxu1  ;;  %v1909_v22 = vadd.f32 %v1908_v42, %v1835_v52  ;;  %v5877_v52 = vor.u32 %v6326_v7, %v5874_v29  ;;  %v1773_v37 = vadd.f32 %v1772_v54, %v8516_v53 }
 0x4cb   :  { %v8550_v51 = vadd.f32 %v1702_v39, %v1613_v2 }
 0x4cc   :  { %v1910_v42 = vadd.f32 %v1909_v22, %v1837_v47  ;;  %v1774_v56 = vadd.f32 %v1773_v37, %v8530_v59 }
 0x4cd   :  { %v1843_v32 = vmul.f32 %v8550_v51, %v8550_v51  ;;  %2916 = vmatpush.bf16.msrb.mxu1 %v5877_v52 }
 0x4ce   :  { %v1911_v5 = vadd.f32 %v1910_v42, %v1839_v19  ;;  %v1775_v57 = vadd.f32 %v1774_v56, %v8550_v51 }
 0x4d0   :  { %v1912_v39 = vadd.f32 %v1911_v5, %v1841_v46 }
 0x4d1   :  { %v1616_v24 = vpop.f32.mrf.mxu0 }
 0x4d2   :  { %v1705_v55 = vpop.f32.mrf.mxu1  ;;  %v1913_v63 = vadd.f32 %v1912_v39, %v1843_v32 }
 0x4d3   :  { %v8555_v35 = vadd.f32 %v1705_v55, %v1616_v24 }
 0x4d5   :  { %v1845_v47 = vmul.f32 %v8555_v35, %v8555_v35  ;;  %v1776_v24 = vadd.f32 %v1775_v57, %v8555_v35 }
 0x4d7   :  { %v1914_v55 = vadd.f32 %v1913_v63, %v1845_v47 }
 0x4d9   :  { %v1618_v2 = vpop.f32.mrf.mxu0 }
 0x4da   :  { %v1707_v21 = vpop.f32.mrf.mxu1 }
 0x4db   :  { %v8564_v22 = vadd.f32 %v1707_v21, %v1618_v2 }
 0x4dd   :  { %v1777_v40 = vadd.f32 %v1776_v24, %v8564_v22  ;;  %v1847_v7 = vmul.f32 %v8564_v22, %v8564_v22 }
 0x4df   :  { %v1778_v29 = vrot.slane %v1777_v40, 4  ;;  %v1915_v54 = vadd.f32 %v1914_v55, %v1847_v7 }
 0x4e1   :  { %v1779_v5 = vadd.f32 %v1778_v29, %v1777_v40  ;;  %v1916_v19 = vrot.slane %v1915_v54, 4 }
 0x4e3   :  { %v1780_v25 = vrot.slane %v1779_v5, 2  ;;  %v1917_v52 = vadd.f32 %v1916_v19, %v1915_v54  ;;  %v6308_v54 = vld [vmem:[%s11654_s11 + $0x54] sm:$0xf] }
 0x4e5   :  { %v1781_v42 = vadd.f32 %v1780_v25, %v1779_v5  ;;  %v1918_v37 = vrot.slane %v1917_v52, 2  ;;  %v6324_v5 = vld [vmem:[%s11654_s11 + $0xd4] sm:$0xf]  ;;  %v5866_v25 = vld [vmem:[%s11654_s11 + $0xd8] sm:$0xf0] }
 0x4e7   :  { %v1782_v46 = vrot.slane %v1781_v42, 1  ;;  %v1919_v32 = vadd.f32 %v1918_v37, %v1917_v52  ;;  %v5750_v52 = vld [vmem:[%s11651_s8 + $0x10] sm:$0xf]  ;;  %v5869_v37 = vor.u32 %v6324_v5, %v5866_v25  ;;  %v6294_v5 = vld [vmem:[%s11651_s8 + $0x4] sm:$0xf] }
 0x4e8   :  { %v5744_v25 = vld [vmem:[%s11651_s8 + $0x8] sm:$0xf0] }
 0x4e9   :  { %v1920_v56 = vrot.slane %v1919_v32, 1  ;;  %v1783_v39 = vadd.f32 %v1782_v46, %v1781_v42  ;;  %v6297_v42 = vld [vmem:[%s11651_s8 + $0x14] sm:$0xf0]  ;;  %2917 = vmatpush.bf16.msrb.mxu1 %v5869_v37  ;;  %v5747_v37 = vor.u32 %v6294_v5, %v5744_v25  ;;  %v5816_v5 = vld [vmem:[%s11654_s11 + $0x70] sm:$0xf] }
 0x4ea   :  { %v5751_v46 = vor.u32 %v6297_v42, %v5750_v52  ;;  %v6304_v52 = vld [vmem:[%s11654_s11 + $0x34] sm:$0xf] }
 0x4eb   :  { %v1921_v2 = vadd.f32 %v1920_v56, %v1919_v32  ;;  %v6296_v32 = vld [vmem:[%s11651_s8 + $0x14] sm:$0xf]  ;;  %v5752_v56 = vld [vmem:[%s11651_s8 + $0x18] sm:$0xf0] }
 0x4ec   :  { %2144 = vmatpush.bf16.msra.mxu2 %v5751_v46  ;;  %v5786_v46 = vld [vmem:[%s11654_s11 + $0x38] sm:$0xf0] }
 0x4ed   :  { %v1923_v57 = vsel %vm602_vm1, %v1783_v39, %v1921_v2  ;;  %v6306_v39 = vld [vmem:[%s11654_s11 + $0x44] sm:$0xf] }
 0x4ee   :  { %v1925_v47 = vpack.c.bf16 %v1923_v57, %v1923_v57  ;;  %v5755_v57 = vor.u32 %v6296_v32, %v5752_v56  ;;  %v6320_v32 = vld [vmem:[%s11654_s11 + $0xb4] sm:$0xf]  ;;  %v5850_v56 = vld [vmem:[%s11654_s11 + $0xb8] sm:$0xf0] }
 0x4f0   :  { %2075 = vmatmul.bf16.vlgmr.msrb.gmra.mxu3 %v1925_v47  ;;  %v5794_v47 = vld [vmem:[%s11654_s11 + $0x48] sm:$0xf0] }
 0x4f1   :  { %2157 = vmatpush.bf16.msra.mxu3 %v5755_v57 }
 0x4f5   :  { %2158 = vmatpush.bf16.msra.mxu3 %v5747_v37  ;;  %v6329_v37 = vld [vmem:[%s11654_s11 + $0xf4] sm:$0xf0] }
 0x573   :  { %v2076_v21 = vpop.f32.mrf.mxu3 }
 0x574   :  { %v8571_v63 = vadd.f32 %v2076_v21, %v8453_v3  ;;  %v5802_v3 = vld [vmem:[%s11654_s11 + $0x58] sm:$0xf0]  ;;  %v6322_v21 = vld [vmem:[%s11654_s11 + $0xc4] sm:$0xf] }
 0x575   :  { %v5805_v19 = vor.u32 %v6308_v54, %v5802_v3  ;;  %v5742_v54 = vld [vmem:[%s11651_s8] sm:$0xf]  ;;  %v6295_v3 = vld [vmem:[%s11651_s8 + $0x4] sm:$0xf0] }
 0x576   :  { %v2080_v24 = vmul.f32 %v8571_v63, %v8571_v63 }
 0x577   :  { %2828 = vmatpush.bf16.msrb.mxu0 %v5805_v19  ;;  %v5743_v19 = vor.u32 %v6295_v3, %v5742_v54  ;;  %v6300_v54 = vld [vmem:[%s11654_s11 + $0x14] sm:$0xf]  ;;  %v5770_v3 = vld [vmem:[%s11654_s11 + $0x18] sm:$0xf0] }
 0x578   :  { %v2082_v55 = vrot.slane %v2080_v24, 7  ;;  %v5858_v24 = vld [vmem:[%s11654_s11 + $0xc8] sm:$0xf0] }
 0x579   :  { %2145 = vmatpush.bf16.msra.mxu2 %v5743_v19  ;;  %v6313_v19 = vld [vmem:[%s11654_s11 + $0x74] sm:$0xf0] }
 0x57a   :  { %v2084_v40 = vsub.f32 %v8571_v63, %v2082_v55 }
 0x57b   :  { %v2078_v7 = vpop.f32.mrf.mxu3 }
 0x57c   :  { %v8576_v29 = vadd.f32 0.0001, %v2084_v40  ;;  %v5797_v40 = vor.u32 %v6306_v39, %v5794_v47  ;;  %v5861_v7 = vor.u32 %v6322_v21, %v5858_v24  ;;  %v5789_v39 = vor.u32 %v6304_v52, %v5786_v46  ;;  %v6302_v21 = vld [vmem:[%s11654_s11 + $0x24] sm:$0xf]  ;;  %v5778_v24 = vld [vmem:[%s11654_s11 + $0x28] sm:$0xf0] }
 0x57d   :  { %v5853_v47 = vor.u32 %v6320_v32, %v5850_v56  ;;  %v5781_v25 = vor.u32 %v6302_v21, %v5778_v24  ;;  %v5817_v52 = vor.u32 %v6313_v19, %v5816_v5  ;;  %v5808_v46 = vld [vmem:[%s11654_s11 + $0x60] sm:$0xf]  ;;  %v6327_v24 = vld [vmem:[%s11654_s11 + $0xe4] sm:$0xf0]  ;;  %v5800_v5 = vld [vmem:[%s11654_s11 + $0x50] sm:$0xf] }
 0x57e   :  { %6434 = vrsqrt.f32 %v8576_v29  ;;  %2829 = vmatpush.bf16.msrb.mxu0 %v5797_v40  ;;  %2918 = vmatpush.bf16.msrb.mxu1 %v5861_v7  ;;  %v5842_v40 = vld [vmem:[%s11654_s11 + $0xa8] sm:$0xf0]  ;;  %vm2093_vm7 = vweird.f32 %v8576_v29  ;;  %v5872_v21 = vld [vmem:[%s11654_s11 + $0xe0] sm:$0xf]  ;;  %v6309_v19 = vld [vmem:[%s11654_s11 + $0x54] sm:$0xf0] }
 0x57f   :  { %2648 = vmatpush.bf16.msrb.mxu2 %v5817_v52  ;;  %v5864_v52 = vld [vmem:[%s11654_s11 + $0xd0] sm:$0xf] }
 0x582   :  { %2830 = vmatpush.bf16.msrb.mxu0 %v5789_v39  ;;  %2919 = vmatpush.bf16.msrb.mxu1 %v5853_v47  ;;  %v5834_v47 = vld [vmem:[%s11654_s11 + $0x98] sm:$0xf0] }
 0x584   :  { %v8606_v2 = vpop.eup %6434 }
 0x585   :  { %v2088_v55 = vmul.f32 %v8606_v2, %v8576_v29  ;;  %vm2094_vm6 = vweird.f32 %v8606_v2  ;;  %v6316_v29 = vld [vmem:[%s11654_s11 + $0x94] sm:$0xf] }
 0x586   :  { %vm2095_vm8 = vmor %vm2093_vm7, %vm2094_vm6  ;;  %2831 = vmatpush.bf16.msrb.mxu0 %v5781_v25  ;;  %v5801_v25 = vor.u32 %v6309_v19, %v5800_v5  ;;  %v5784_v19 = vld [vmem:[%s11654_s11 + $0x30] sm:$0xf] }
 0x587   :  { %v2089_v42 = vmul.f32 %v8606_v2, %v2088_v55  ;;  %v6318_v55 = vld [vmem:[%s11654_s11 + $0xa4] sm:$0xf] }
 0x588   :  { %v5845_v56 = vor.u32 %v6318_v55, %v5842_v40 }
 0x589   :  { %v2090_v57 = vmul.f32 0.5, %v2089_v42  ;;  %v5880_v42 = vld [vmem:[%s11654_s11 + $0xf0] sm:$0xf] }
 0x58a   :  { %v5881_v39 = vor.u32 %v6329_v37, %v5880_v42  ;;  %v5773_v42 = vor.u32 %v6300_v54, %v5770_v3  ;;  %2920 = vmatpush.bf16.msrb.mxu1 %v5845_v56  ;;  %v5837_v37 = vor.u32 %v6316_v29, %v5834_v47  ;;  %v6314_v54 = vld [vmem:[%s11654_s11 + $0x84] sm:$0xf]  ;;  %v5826_v3 = vld [vmem:[%s11654_s11 + $0x88] sm:$0xf0]  ;;  %v6323_v29 = vld [vmem:[%s11654_s11 + $0xc4] sm:$0xf0] }
 0x58b   :  { %v2091_v7 = vsub.f32 1.5, %v2090_v57  ;;  %v6311_v57 = vld [vmem:[%s11654_s11 + $0x64] sm:$0xf0]  ;;  %v2085_v47 = vld [vmem:[%s11652_s9] sm:$0x1] }
 0x58c   :  { %v5809_v55 = vor.u32 %v6311_v57, %v5808_v46  ;;  %2737 = vmatpush.bf16.msrb.mxu3 %v5881_v39  ;;  %v6298_v46 = vld [vmem:[%s11654_s11 + $0x4] sm:$0xf]  ;;  %v5792_v39 = vld [vmem:[%s11654_s11 + $0x40] sm:$0xf]  ;;  %v6307_v57 = vld [vmem:[%s11654_s11 + $0x44] sm:$0xf0]  ;;  %2832 = vmatpush.bf16.msrb.mxu0 %v5773_v42 }
 0x58d   :  { %v2092_v32 = vmul.f32 %v8606_v2, %v2091_v7  ;;  %v5873_v7 = vor.u32 %v6327_v24, %v5872_v21  ;;  %v5856_v24 = vld [vmem:[%s11654_s11 + $0xc0] sm:$0xf]  ;;  %v6305_v42 = vld [vmem:[%s11654_s11 + $0x34] sm:$0xf0] }
 0x58e   :  { %2649 = vmatpush.bf16.msrb.mxu2 %v5809_v55  ;;  %2921 = vmatpush.bf16.msrb.mxu1 %v5837_v37  ;;  %v5829_v55 = vor.u32 %v6314_v54, %v5826_v3  ;;  %v5857_v5 = vor.u32 %v6323_v29, %v5856_v24  ;;  %v6321_v37 = vld [vmem:[%s11654_s11 + $0xb4] sm:$0xf0]  ;;  %v5785_v54 = vor.u32 %v6305_v42, %v5784_v19  ;;  %v5840_v24 = vld [vmem:[%s11654_s11 + $0xa0] sm:$0xf]  ;;  %v5832_v42 = vld [vmem:[%s11654_s11 + $0x90] sm:$0xf] }
 0x58f   :  { %v2096_v40 = vsel %vm2095_vm8, %v8606_v2, %v2092_v32  ;;  %v6325_v2 = vld [vmem:[%s11654_s11 + $0xd4] sm:$0xf0]  ;;  %v5762_v32 = vld [vmem:[%s11654_s11 + $0x8] sm:$0xf0] }
 0x590   :  { %2098 = vst [vmem:[#allocation1] sm:$0xff] %v2096_v40  ;;  %2738 = vmatpush.bf16.msrb.mxu3 %v5873_v7  ;;  %v5865_v56 = vor.u32 %v6325_v2, %v5864_v52  ;;  %v5765_v21 = vor.u32 %v6298_v46, %v5762_v32  ;;  %v5793_v40 = vor.u32 %v6307_v57, %v5792_v39  ;;  %v5848_v2 = vld [vmem:[%s11654_s11 + $0xb0] sm:$0xf]  ;;  %v2103_v46 = vld [vmem:[%s11653_s10] sm:$0x1] }
 0x591   :  { %v5849_v3 = vor.u32 %v6321_v37, %v5848_v2 }
 0x592   :  { %2650 = vmatpush.bf16.msrb.mxu2 %v5801_v25  ;;  %2833 = vmatpush.bf16.msrb.mxu0 %v5765_v21  ;;  %v5776_v21 = vld [vmem:[%s11654_s11 + $0x20] sm:$0xf] }
 0x593   :  { %2922 = vmatpush.bf16.msrb.mxu1 %v5829_v55  ;;  %v5768_v55 = vld [vmem:[%s11654_s11 + $0x10] sm:$0xf] }
 0x594   :  { %2739 = vmatpush.bf16.msrb.mxu3 %v5865_v56 }
 0x596   :  { %2651 = vmatpush.bf16.msrb.mxu2 %v5793_v40  ;;  %v6301_v40 = vld [vmem:[%s11654_s11 + $0x14] sm:$0xf0] }
 0x597   :  { %v2100_v7 = vld [vmem:[#allocation1 + $0x1] ss:$9 sm:$0xff]  ;;  %v5769_v37 = vor.u32 %v6301_v40, %v5768_v55 }
 0x598   :  { %v2102_v52 = vmul.f32 %v2100_v7, %v2085_v47  ;;  %2740 = vmatpush.bf16.msrb.mxu3 %v5857_v5  ;;  %v6319_v47 = vld [vmem:[%s11654_s11 + $0xa4] sm:$0xf0] }
 0x599   :  { %v5841_v19 = vor.u32 %v6319_v47, %v5840_v24 }
 0x59a   :  { %v2104_v32 = vmul.f32 %v2102_v52, %v8571_v63  ;;  %2652 = vmatpush.bf16.msrb.mxu2 %v5785_v54  ;;  %v6303_v63 = vld [vmem:[%s11654_s11 + $0x24] sm:$0xf0] }
 0x59b   :  { %v5777_v29 = vor.u32 %v6303_v63, %v5776_v21 }
 0x59c   :  { %v2105_v25 = vsub.f32 %v2103_v46, %v2104_v32  ;;  %2741 = vmatpush.bf16.msrb.mxu3 %v5849_v3  ;;  %v5760_v46 = vld [vmem:[%s11654_s11] sm:$0xf]  ;;  %v6299_v32 = vld [vmem:[%s11654_s11 + $0x4] sm:$0xf0] }
 0x59d   :  { %v5761_v21 = vor.u32 %v6299_v32, %v5760_v46  ;;  %v11985_v32 = vld [vmem:[#allocation31_spill] sm:$0xff] }
 0x59e   :  { %v2107_v56 = vperm.slane %v2105_v25, 0  ;;  %2653 = vmatpush.bf16.msrb.mxu2 %v5777_v29 }
 0x5a0   :  { %v2109_v39 = vsel %vm602_vm1, %v2102_v52, %v2107_v56  ;;  %v6317_v52 = vld [vmem:[%s11654_s11 + $0x94] sm:$0xf0]  ;;  %2742 = vmatpush.bf16.msrb.mxu3 %v5841_v19  ;;  %v11978_v19 = vld [vmem:[#allocation22_spill] sm:$0xff] }
 0x5a1   :  { %v2110_v57 = vpack.c.bf16 %v2109_v39, %v2109_v39  ;;  %v5833_v54 = vor.u32 %v6317_v52, %v5832_v42  ;;  %v11979_v42 = vld [vmem:[#allocation26_spill] sm:$0xff] }
 0x5a2   :  { %2654 = vmatpush.bf16.msrb.mxu2 %v5769_v37  ;;  %v11982_v37 = vld [vmem:[#allocation28_spill] sm:$0xff] }
 0x5a3   :  { %5756 = vmatmul.msk.bf16.vlgmr.msra.gmra.mxu2 %vm163_vm0, %v2110_v57  ;;  %5757 = vmatmul.msk.bf16.vlgmr.msra.gmra.mxu3 %vm163_vm0, %v2110_v57 }
 0x5a4   :  { %2743 = vmatpush.bf16.msrb.mxu3 %v5833_v54  ;;  %v11986_v54 = vld [vmem:[#allocation32_spill] sm:$0xff] }
 0x5a6   :  { %2655 = vmatpush.bf16.msrb.mxu2 %v5761_v21  ;;  %v11995_v21 = vld [vmem:[#allocation17_spill] sm:$0xff] }
 0x626   :  { %v2147_v7 = vpop.f32.mrf.mxu2  ;;  %v2160_v5 = vpop.f32.mrf.mxu3 }
 0x627   :  { %v2164_v2 = vperm.slane %v2147_v7, 0  ;;  %v8786_v3 = vperm.slane %v2147_v7, 1  ;;  %v8788_v25 = vperm.slane %v2160_v5, 0  ;;  %v8796_v57 = vperm.slane %v2160_v5, 1 }
 0x629   :  { %v8791_v56 = vmul.f32 %v2164_v2, %v8021_v49  ;;  %v8794_v39 = vmul.f32 %v2164_v2, %v8029_v38  ;;  %v8799_v63 = vmul.f32 %v2164_v2, %v8035_v58  ;;  %v8802_v24 = vmul.f32 %v2164_v2, %v8041_v48 }
 0x62a   :  { %v8805_v29 = vmul.f32 %v2164_v2, %v8047_v34  ;;  %v8808_v47 = vmul.f32 %v2164_v2, %v8053_v23  ;;  %v8811_v49 = vmul.f32 %v2164_v2, %v8085_v31  ;;  %v8814_v38 = vmul.f32 %v2164_v2, %v8090_v11 }
 0x62b   :  { %v2182_v55 = vmul.f32 %v2164_v2, %v8099_v50  ;;  %v8818_v58 = vmul.f32 %v2164_v2, %v8105_v17  ;;  %v2186_v48 = vmul.f32 %v2164_v2, %v8111_v13  ;;  %v8822_v34 = vmul.f32 %v2164_v2, %v8123_v12  ;;  %v11976_v17 = vld [vmem:[#allocation25_spill] sm:$0xff] }
 0x62c   :  { %v2190_v23 = vmul.f32 %v2164_v2, %v8027_v33  ;;  %v8826_v40 = vmul.f32 %v2164_v2, %v8137_v41  ;;  %v2194_v31 = vmul.f32 %v2164_v2, %v8039_v18  ;;  %v8830_v11 = vmul.f32 %v2164_v2, %v8155_v0  ;;  %v11981_v33 = vld [vmem:[#allocation23_spill] sm:$0xff]  ;;  %v11984_v18 = vld [vmem:[#allocation30_spill] sm:$0xff] }
 0x62d   :  { %v2198_v50 = vmul.f32 %v2164_v2, %v8051_v43  ;;  %v8834_v7 = vmul.f32 %v2164_v2, %v11976_v17  ;;  %v2202_v12 = vmul.f32 %v2164_v2, %v11978_v19  ;;  %v8838_v52 = vmul.f32 %v2164_v2, %v11979_v42  ;;  %v11989_v19 = vld [vmem:[#allocation34_spill] sm:$0xff]  ;;  %v11990_v42 = vld [vmem:[#allocation35_spill] sm:$0xff] }
 0x62e   :  { %11974 = vst [vmem:[#allocation37_spill] sm:$0xff] %v8826_v40  ;;  %v2149_v5 = vpop.f32.mrf.mxu2  ;;  %v2162_v13 = vpop.f32.mrf.mxu3  ;;  %v2206_v41 = vmul.f32 %v2164_v2, %v11981_v33  ;;  %v8842_v46 = vmul.f32 %v2164_v2, %v11982_v37  ;;  %v2210_v0 = vmul.f32 %v2164_v2, %v11984_v18  ;;  %v8846_v43 = vmul.f32 %v2164_v2, %v11985_v32  ;;  %v11992_v33 = vld [vmem:[#allocation5_spill] sm:$0xff]  ;;  %v11993_v37 = vld [vmem:[#allocation7_spill] sm:$0xff]  ;;  %v11996_v40 = vld [vmem:[#allocation6_spill] sm:$0xff] }
 0x62f   :  { %11975 = vst [vmem:[#allocation38_spill] sm:$0xff] %v8830_v11  ;;  %v2214_v17 = vmul.f32 %v2164_v2, %v11986_v54  ;;  %v11987_v5 = vld [vmem:[#allocation33_spill] sm:$0xff]  ;;  %v2222_v11 = vmul.f32 %v2164_v2, %v11992_v33  ;;  %v2226_v18 = vmul.f32 %v2164_v2, %v11995_v21  ;;  %v8862_v32 = vmul.f32 %v2164_v2, %v11996_v40 }
 0x630   :  { %11977 = vst [vmem:[#allocation10_spill] sm:$0xff] %v8834_v7  ;;  %v8850_v13 = vmul.f32 %v2164_v2, %v11987_v5  ;;  %v2218_v7 = vmul.f32 %v2164_v2, %v11989_v19  ;;  %v2167_v54 = vmul.f32 %v8788_v25, %v8140_v36  ;;  %v11998_v5 = vld [vmem:[#allocation24_spill] sm:$0xff]  ;;  %v2171_v19 = vmul.f32 %v8788_v25, %v8174_v8 }
 0x631   :  { %11980 = vst [vmem:[#allocation11_spill] sm:$0xff] %v8838_v52  ;;  %v8854_v52 = vmul.f32 %v2164_v2, %v11990_v42  ;;  %v11999_v42 = vld [vmem:[#allocation27_spill] sm:$0xff]  ;;  %v8882_v36 = vmul.f32 %v8788_v25, %v8246_v60  ;;  %v8886_v40 = vmul.f32 %v8788_v25, %v8272_v4  ;;  %v2183_v8 = vmul.f32 %v8788_v25, %v8294_v44 }
 0x632   :  { %11983 = vst [vmem:[#allocation39_spill] sm:$0xff] %v8842_v46  ;;  %v8858_v46 = vmul.f32 %v2164_v2, %v11993_v37  ;;  %v8872_v33 = vmul.f32 %v8788_v25, %v11999_v42  ;;  %v12000_v37 = vld [vmem:[#allocation29_spill] sm:$0xff]  ;;  %v8878_v2 = vmul.f32 %v8788_v25, %v8227_v61  ;;  %v8892_v21 = vmul.f32 %v8788_v25, %v8407_v10  ;;  %v12001_v42 = vld [vmem:[#allocation36_spill] sm:$0xff] }
 0x633   :  { %11988 = vst [vmem:[#allocation40_spill] sm:$0xff] %v8850_v13  ;;  %v2169_v13 = vmul.f32 %v8788_v25, %v11998_v5  ;;  %v2187_v5 = vmul.f32 %v8788_v25, %v8308_v9  ;;  %v8898_v61 = vmul.f32 %v8788_v25, %v8419_v27  ;;  %v2191_v60 = vmul.f32 %v8788_v25, %v8317_v62 }
 0x634   :  { %11991 = vst [vmem:[#allocation12_spill] sm:$0xff] %v8854_v52  ;;  %v8904_v4 = vmul.f32 %v8788_v25, %v8431_v14  ;;  %v2195_v44 = vmul.f32 %v8788_v25, %v12001_v42  ;;  %v8910_v10 = vmul.f32 %v8788_v25, %v8441_v26  ;;  %v2199_v9 = vmul.f32 %v8788_v25, %v8339_v15  ;;  %v12003_v42 = vld [vmem:[#allocation19_spill] sm:$0xff] }
 0x635   :  { %11994 = vst [vmem:[#allocation13_spill] sm:$0xff] %v8858_v46  ;;  %v2175_v46 = vmul.f32 %v8788_v25, %v12000_v37  ;;  %v8916_v27 = vmul.f32 %v8788_v25, %v8451_v16  ;;  %v2203_v62 = vmul.f32 %v8788_v25, %v8348_v20  ;;  %v8922_v14 = vmul.f32 %v8788_v25, %v8463_v28 }
 0x636   :  { %11997 = vst [vmem:[#allocation41_spill] sm:$0xff] %v8862_v32  ;;  %v2207_v37 = vmul.f32 %v8788_v25, %v8357_v1  ;;  %v8928_v26 = vmul.f32 %v8788_v25, %v8473_v30  ;;  %v2211_v15 = vmul.f32 %v8788_v25, %v8480_v6  ;;  %v8934_v16 = vmul.f32 %v8788_v25, %v8487_v45  ;;  %v12004_v32 = vld [vmem:[#allocation9_spill] sm:$0xff] }
 0x637   :  { %v2215_v20 = vmul.f32 %v8788_v25, %v12003_v42  ;;  %v2219_v28 = vmul.f32 %v8788_v25, %v12004_v32  ;;  %v2223_v1 = vmul.f32 %v8788_v25, %v8530_v59  ;;  %v2227_v30 = vmul.f32 %v8788_v25, %v8555_v35 }
 0x638   :  { %12002 = vst [vmem:[#allocation42_spill] sm:$0xff] %v8934_v16  ;;  %v2232_v52 = vadd.f32 %v8786_v3, %v8791_v56  ;;  %v2234_v6 = vadd.f32 %v8786_v3, %v8794_v39  ;;  %v8950_v45 = vadd.f32 %v8786_v3, %v8799_v63  ;;  %v8953_v42 = vadd.f32 %v8786_v3, %v2182_v55 }
 0x639   :  { %v8956_v32 = vadd.f32 %v8786_v3, %v2186_v48  ;;  %v8959_v59 = vadd.f32 %v8786_v3, %v2190_v23  ;;  %v8962_v35 = vadd.f32 %v8786_v3, %v2194_v31  ;;  %v8965_v56 = vadd.f32 %v8786_v3, %v2198_v50 }
 0x63a   :  { %v8968_v39 = vadd.f32 %v8786_v3, %v2202_v12  ;;  %v8971_v63 = vadd.f32 %v8786_v3, %v2206_v41  ;;  %v8974_v55 = vadd.f32 %v8786_v3, %v2210_v0  ;;  %v8977_v48 = vadd.f32 %v8786_v3, %v2214_v17 }
 0x63b   :  { %v8980_v23 = vadd.f32 %v8786_v3, %v2218_v7  ;;  %v8983_v31 = vadd.f32 %v8786_v3, %v2222_v11  ;;  %v8987_v50 = vadd.f32 %v8786_v3, %v8805_v29  ;;  %v8990_v12 = vadd.f32 %v8786_v3, %v2226_v18 }
 0x63c   :  { %12005 = vst [vmem:[#allocation14_spill] sm:$0xff] %v8974_v55  ;;  %v2233_v41 = vadd.f32 %v8796_v57, %v2167_v54  ;;  %v2235_v0 = vadd.f32 %v8796_v57, %v2169_v13  ;;  %v8995_v17 = vadd.f32 %v8796_v57, %v2171_v19  ;;  %v8998_v7 = vadd.f32 %v8796_v57, %v2175_v46  ;;  %v5824_v46 = vld [vmem:[%s11654_s11 + $0x80] sm:$0xf]  ;;  %v6315_v19 = vld [vmem:[%s11654_s11 + $0x84] sm:$0xf0] }
 0x63d   :  { %12006 = vst [vmem:[#allocation15_spill] sm:$0xff] %v8977_v48  ;;  %v9001_v11 = vadd.f32 %v8796_v57, %v2183_v8  ;;  %v9007_v29 = vadd.f32 %v8796_v57, %v2191_v60  ;;  %v9010_v18 = vadd.f32 %v8796_v57, %v2195_v44  ;;  %v9013_v13 = vadd.f32 %v8796_v57, %v2199_v9 }
 0x63e   :  { %12007 = vst [vmem:[#allocation43_spill] sm:$0xff] %v8980_v23  ;;  %v9016_v54 = vadd.f32 %v8796_v57, %v2203_v62  ;;  %v9025_v8 = vadd.f32 %v8796_v57, %v2207_v37  ;;  %v9031_v60 = vadd.f32 %v8796_v57, %v2215_v20  ;;  %v9034_v44 = vadd.f32 %v8796_v57, %v2219_v28 }
 0x63f   :  { %12008 = vst [vmem:[#allocation44_spill] sm:$0xff] %v8983_v31  ;;  %v9004_v31 = vadd.f32 %v8796_v57, %v2187_v5  ;;  %v9028_v5 = vadd.f32 %v8796_v57, %v2211_v15  ;;  %v9037_v9 = vadd.f32 %v8796_v57, %v2223_v1  ;;  %v9040_v62 = vadd.f32 %v8796_v57, %v2227_v30 }
 0x640   :  { %12009 = vst [vmem:[#allocation16_spill] sm:$0xff] %v8990_v12  ;;  %v2296_v12 = vmul.f32 0.2, %v2232_v52  ;;  %v2297_v23 = vmul.f32 0.2, %v2233_v41  ;;  %v5825_v16 = vor.u32 %v6315_v19, %v5824_v46  ;;  %v2238_v15 = vadd.f32 %v8786_v3, %v8802_v24 }
 0x641   :  { %12010 = vst [vmem:[#allocation18_spill] sm:$0xff] %v9028_v5  ;;  %v2298_v48 = vmul.f32 0.2, %v2234_v6  ;;  %v2299_v37 = vmul.f32 0.2, %v2235_v0  ;;  %v2239_v28 = vadd.f32 %v8796_v57, %v8872_v33  ;;  %v2242_v24 = vadd.f32 %v8786_v3, %v8808_v47 }
 0x642   :  { %12011 = vst [vmem:[#allocation20_spill] sm:$0xff] %v9031_v60  ;;  %v2360_v5 = vmax.f32 %v2232_v52, %v2296_v12  ;;  %v2361_v20 = vmax.f32 %v2233_v41, %v2297_v23  ;;  %v2300_v60 = vmul.f32 0.2, %v8950_v45  ;;  %2744 = vmatpush.bf16.msrb.mxu3 %v5825_v16  ;;  %v2302_v30 = vmul.f32 0.2, %v2238_v15 }
 0x643   :  { %12012 = vst [vmem:[#allocation21_spill] sm:$0xff] %v9034_v44  ;;  %v2362_v1 = vmax.f32 %v2234_v6, %v2298_v48  ;;  %v12015_v44 = vld [vmem:[#allocation8_spill] sm:$0xff]  ;;  %v2303_v46 = vmul.f32 0.2, %v2239_v28  ;;  %v2304_v52 = vmul.f32 0.2, %v8987_v50  ;;  %v9058_v16 = vmul.f32 %v8788_v25, %v8516_v53 }
 0x644   :  { %12013 = vst [vmem:[#allocation25_spill] sm:$0xff] %v9037_v9  ;;  %v2363_v9 = vmax.f32 %v2235_v0, %v2299_v37  ;;  %v9050_v55 = vmul.f32 %v8788_v25, %v12015_v44  ;;  %v2364_v33 = vmax.f32 %v8950_v45, %v2300_v60  ;;  %v2366_v6 = vmax.f32 %v2238_v15, %v2302_v30 }
 0x645   :  { %12014 = vst [vmem:[#allocation22_spill] sm:$0xff] %v9040_v62  ;;  %v2301_v62 = vmul.f32 0.2, %v8995_v17  ;;  %v2424_v23 = vpack.c.bf16 %v2362_v1, %v2360_v5  ;;  %v9062_v48 = vadd.f32 %v8786_v3, %v8811_v49  ;;  %v2306_v41 = vmul.f32 0.2, %v2242_v24 }
 0x646   :  { %v2425_v12 = vpack.c.bf16 %v2363_v9, %v2361_v20  ;;  %v2243_v0 = vadd.f32 %v8796_v57, %v8878_v2  ;;  %v2367_v19 = vmax.f32 %v2239_v28, %v2303_v46  ;;  %v2305_v45 = vmul.f32 0.2, %v8998_v7 }
 0x647   :  { %2656 = vmatmul.bf16.vlgmr.msrb.gmra.mxu2 %v2424_v23  ;;  %v2365_v47 = vmax.f32 %v8995_v17, %v2301_v62  ;;  %v9070_v5 = vadd.f32 %v8786_v3, %v8814_v38  ;;  %v9074_v53 = vadd.f32 %v8796_v57, %v8882_v36  ;;  %2834 = vmatmul.bf16.vlgmr.msrb.gmra.mxu0 %v2424_v23  ;;  %v2313_v28 = vmul.f32 0.2, %v9001_v11 }
 0x648   :  { %2745 = vmatmul.bf16.vlgmr.msrb.gmra.mxu3 %v2425_v12  ;;  %2923 = vmatmul.bf16.vlgmr.msrb.gmra.mxu1 %v2425_v12  ;;  %v2368_v49 = vmax.f32 %v8987_v50, %v2304_v52  ;;  %v2370_v2 = vmax.f32 %v2242_v24, %v2306_v41  ;;  %v2307_v60 = vmul.f32 0.2, %v2243_v0  ;;  %v9079_v17 = vmul.f32 %v8788_v25, %v8550_v51 }
 0x649   :  { %v9083_v44 = vmul.f32 %v8788_v25, %v8564_v22  ;;  %v2426_v38 = vpack.c.bf16 %v2366_v6, %v2364_v33  ;;  %v9087_v9 = vadd.f32 %v8796_v57, %v8886_v40  ;;  %v2369_v36 = vmax.f32 %v8998_v7, %v2305_v45 }
 0x64a   :  { %v2371_v62 = vmax.f32 %v2243_v0, %v2307_v60  ;;  %v9091_v50 = vmul.f32 0.2, %v9062_v48  ;;  %v2250_v37 = vadd.f32 %v8786_v3, %v8818_v58  ;;  %v2427_v51 = vpack.c.bf16 %v2367_v19, %v2365_v47  ;;  %v12016_v47 = vld [vmem:[#allocation37_spill] sm:$0xff] }
 0x64b   :  { %v9096_v15 = vmul.f32 0.2, %v9070_v5  ;;  %v2312_v22 = vmul.f32 0.2, %v8953_v42  ;;  %v2251_v25 = vadd.f32 %v8796_v57, %v8892_v21  ;;  %v9101_v40 = vpack.c.bf16 %v2370_v2, %v2368_v49 }
 0x64c   :  { %v9104_v7 = vmul.f32 0.2, %v9074_v53  ;;  %v2314_v20 = vmul.f32 0.2, %v2250_v37  ;;  %v9108_v1 = vmul.f32 0.2, %v9087_v9  ;;  %v2254_v46 = vadd.f32 %v8786_v3, %v8822_v34 }
 0x64d   :  { %v2376_v58 = vmax.f32 %v8953_v42, %v2312_v22  ;;  %v2315_v30 = vmul.f32 0.2, %v2251_v25  ;;  %v9113_v24 = vpack.c.bf16 %v2371_v62, %v2369_v36  ;;  %v2377_v52 = vmax.f32 %v9001_v11, %v2313_v28  ;;  %v12017_v22 = vld [vmem:[#allocation38_spill] sm:$0xff] }
 0x64e   :  { %v2378_v21 = vmax.f32 %v2250_v37, %v2314_v20  ;;  %v2316_v23 = vmul.f32 0.2, %v8956_v32  ;;  %v2318_v33 = vmul.f32 0.2, %v2254_v46  ;;  %v2255_v6 = vadd.f32 %v8796_v57, %v8898_v61 }
 0x64f   :  { %v2379_v12 = vmax.f32 %v2251_v25, %v2315_v30  ;;  %v2317_v41 = vmul.f32 0.2, %v9004_v31  ;;  %v2258_v34 = vadd.f32 %v8786_v3, %v12016_v47  ;;  %v2320_v19 = vmul.f32 0.2, %v8959_v59 }
 0x650   :  { %v9120_v0 = vpack.c.bf16 %v2378_v21, %v2376_v58  ;;  %v2380_v42 = vmax.f32 %v8956_v32, %v2316_v23  ;;  %v2382_v11 = vmax.f32 %v2254_v46, %v2318_v33  ;;  %v2319_v49 = vmul.f32 0.2, %v2255_v6  ;;  %v12018_v33 = vld [vmem:[#allocation10_spill] sm:$0xff] }
 0x651   :  { %v9126_v45 = vpack.c.bf16 %v2379_v12, %v2377_v52  ;;  %v2381_v2 = vmax.f32 %v9004_v31, %v2317_v41  ;;  %v2322_v60 = vmul.f32 0.2, %v2258_v34  ;;  %v2384_v61 = vmax.f32 %v8959_v59, %v2320_v19 }
 0x652   :  { %v2259_v36 = vadd.f32 %v8796_v57, %v8904_v4  ;;  %v2321_v62 = vmul.f32 0.2, %v9007_v29  ;;  %v9133_v32 = vpack.c.bf16 %v2382_v11, %v2380_v42  ;;  %v2383_v37 = vmax.f32 %v2255_v6, %v2319_v49 }
 0x653   :  { %v2262_v25 = vadd.f32 %v8786_v3, %v12017_v22  ;;  %v2324_v20 = vmul.f32 0.2, %v8962_v35  ;;  %v2386_v28 = vmax.f32 %v2258_v34, %v2322_v60  ;;  %v2263_v59 = vadd.f32 %v8796_v57, %v8910_v10  ;;  %v12019_v60 = vld [vmem:[#allocation11_spill] sm:$0xff] }
 0x654   :  { %v2323_v58 = vmul.f32 0.2, %v2259_v36  ;;  %v2385_v31 = vmax.f32 %v9007_v29, %v2321_v62  ;;  %v9141_v30 = vpack.c.bf16 %v2383_v37, %v2381_v2  ;;  %v2325_v21 = vmul.f32 0.2, %v9010_v18 }
 0x655   :  { %v2326_v4 = vmul.f32 0.2, %v2262_v25  ;;  %v2388_v46 = vmax.f32 %v8962_v35, %v2324_v20  ;;  %v9145_v52 = vpack.c.bf16 %v2386_v28, %v2384_v61  ;;  %v2327_v12 = vmul.f32 0.2, %v2263_v59  ;;  %v12020_v20 = vld [vmem:[#allocation39_spill] sm:$0xff] }
 0x656   :  { %v2387_v23 = vmax.f32 %v2259_v36, %v2323_v58  ;;  %v2266_v6 = vadd.f32 %v8786_v3, %v12018_v33  ;;  %v2389_v41 = vmax.f32 %v9010_v18, %v2325_v21  ;;  %v2328_v10 = vmul.f32 0.2, %v8965_v56 }
 0x657   :  { %2661 = vmatmul.bf16.gmra.mxu2 %v2426_v38  ;;  %v2390_v29 = vmax.f32 %v2262_v25, %v2326_v4  ;;  %v2267_v42 = vadd.f32 %v8796_v57, %v8916_v27  ;;  %2839 = vmatmul.bf16.gmra.mxu0 %v2426_v38  ;;  %v2391_v47 = vmax.f32 %v2263_v59, %v2327_v12  ;;  %v2329_v19 = vmul.f32 0.2, %v9013_v13 }
 0x658   :  { %2750 = vmatmul.bf16.gmra.mxu3 %v2427_v51  ;;  %2928 = vmatmul.bf16.gmra.mxu1 %v2427_v51  ;;  %v9153_v35 = vpack.c.bf16 %v2387_v23, %v2385_v31  ;;  %v2330_v34 = vmul.f32 0.2, %v2266_v6  ;;  %v2392_v49 = vmax.f32 %v8965_v56, %v2328_v10  ;;  %v2270_v18 = vadd.f32 %v8786_v3, %v12019_v60 }
 0x659   :  { %v9156_v11 = vpack.c.bf16 %v2390_v29, %v2388_v46  ;;  %v2331_v2 = vmul.f32 0.2, %v2267_v42  ;;  %v9161_v61 = vpack.c.bf16 %v2391_v47, %v2389_v41  ;;  %v2393_v27 = vmax.f32 %v9013_v13, %v2329_v19  ;;  %v12023_v19 = vld [vmem:[#allocation18_spill] sm:$0xff] }
 0x65a   :  { %v2394_v36 = vmax.f32 %v2266_v6, %v2330_v34  ;;  %v2332_v38 = vmul.f32 0.2, %v8968_v39  ;;  %v2334_v62 = vmul.f32 0.2, %v2270_v18  ;;  %v2271_v37 = vadd.f32 %v8796_v57, %v8922_v14  ;;  %v12021_v6 = vld [vmem:[#allocation14_spill] sm:$0xff] }
 0x65b   :  { %v2395_v51 = vmax.f32 %v2267_v42, %v2331_v2  ;;  %v2333_v22 = vmul.f32 0.2, %v9016_v54  ;;  %v2274_v28 = vadd.f32 %v8786_v3, %v12020_v20  ;;  %v2336_v58 = vmul.f32 0.2, %v8971_v63  ;;  %v12022_v42 = vld [vmem:[#allocation42_spill] sm:$0xff]  ;;  %v12026_v20 = vld [vmem:[#allocation20_spill] sm:$0xff] }
 0x65c   :  { %v9168_v25 = vpack.c.bf16 %v2394_v36, %v2392_v49  ;;  %v2396_v56 = vmax.f32 %v8968_v39, %v2332_v38  ;;  %v2398_v13 = vmax.f32 %v2270_v18, %v2334_v62  ;;  %v2335_v59 = vmul.f32 0.2, %v2271_v37  ;;  %v12024_v18 = vld [vmem:[#allocation40_spill] sm:$0xff]  ;;  %v12025_v38 = vld [vmem:[#allocation15_spill] sm:$0xff] }
 0x65d   :  { %v9174_v31 = vpack.c.bf16 %v2395_v51, %v2393_v27  ;;  %v2397_v4 = vmax.f32 %v9016_v54, %v2333_v22  ;;  %v2338_v46 = vmul.f32 0.2, %v2274_v28  ;;  %v2400_v14 = vmax.f32 %v8971_v63, %v2336_v58 }
 0x65e   :  { %v2275_v21 = vadd.f32 %v8796_v57, %v8928_v26  ;;  %v2337_v23 = vmul.f32 0.2, %v9025_v8  ;;  %v9181_v39 = vpack.c.bf16 %v2398_v13, %v2396_v56  ;;  %v2399_v12 = vmax.f32 %v2271_v37, %v2335_v59 }
 0x65f   :  { %v2278_v33 = vadd.f32 %v8786_v3, %v8846_v43  ;;  %v2340_v29 = vmul.f32 0.2, %v12021_v6  ;;  %v2402_v41 = vmax.f32 %v2274_v28, %v2338_v46  ;;  %v2279_v63 = vadd.f32 %v8796_v57, %v12022_v42 }
 0x660   :  { %v2339_v10 = vmul.f32 0.2, %v2275_v21  ;;  %v2401_v54 = vmax.f32 %v9025_v8, %v2337_v23  ;;  %v9189_v47 = vpack.c.bf16 %v2399_v12, %v2397_v4  ;;  %v2341_v49 = vmul.f32 0.2, %v12023_v19  ;;  %v12027_v4 = vld [vmem:[#allocation12_spill] sm:$0xff] }
 0x661   :  { %v2342_v26 = vmul.f32 0.2, %v2278_v33  ;;  %v2404_v34 = vmax.f32 %v12021_v6, %v2340_v29  ;;  %v9193_v2 = vpack.c.bf16 %v2402_v41, %v2400_v14  ;;  %v2343_v43 = vmul.f32 0.2, %v2279_v63  ;;  %v12029_v41 = vld [vmem:[#allocation21_spill] sm:$0xff] }
 0x662   :  { %v2403_v60 = vmax.f32 %v2275_v21, %v2339_v10  ;;  %v2282_v36 = vadd.f32 %v8786_v3, %v12024_v18  ;;  %v2405_v8 = vmax.f32 %v12023_v19, %v2341_v49  ;;  %v2344_v51 = vmul.f32 0.2, %v12025_v38 }
 0x663   :  { %v2406_v27 = vmax.f32 %v2278_v33, %v2342_v26  ;;  %v2283_v62 = vadd.f32 %v8796_v57, %v9050_v55  ;;  %v2407_v22 = vmax.f32 %v2279_v63, %v2343_v43  ;;  %v2345_v28 = vmul.f32 0.2, %v12026_v20  ;;  %v12028_v55 = vld [vmem:[#allocation43_spill] sm:$0xff]  ;;  %v12030_v63 = vld [vmem:[#allocation13_spill] sm:$0xff] }
 0x664   :  { %v9201_v37 = vpack.c.bf16 %v2403_v60, %v2401_v54  ;;  %v2346_v56 = vmul.f32 0.2, %v2282_v36  ;;  %v2408_v13 = vmax.f32 %v12025_v38, %v2344_v51  ;;  %v2286_v46 = vadd.f32 %v8786_v3, %v12027_v4  ;;  %v12033_v51 = vld [vmem:[#allocation41_spill] sm:$0xff] }
 0x665   :  { %v9204_v58 = vpack.c.bf16 %v2406_v27, %v2404_v34  ;;  %v2347_v59 = vmul.f32 0.2, %v2283_v62  ;;  %v9209_v14 = vpack.c.bf16 %v2407_v22, %v2405_v8  ;;  %v2409_v23 = vmax.f32 %v12026_v20, %v2345_v28  ;;  %v12031_v34 = vld [vmem:[#allocation44_spill] sm:$0xff] }
 0x666   :  { %v2410_v21 = vmax.f32 %v2282_v36, %v2346_v56  ;;  %v2348_v12 = vmul.f32 0.2, %v12028_v55  ;;  %v2350_v6 = vmul.f32 0.2, %v2286_v46  ;;  %v2287_v29 = vadd.f32 %v8796_v57, %v9058_v16  ;;  %v12032_v36 = vld [vmem:[#allocation25_spill] sm:$0xff]  ;;  %v12034_v22 = vld [vmem:[#allocation16_spill] sm:$0xff] }
 0x667   :  { %2666 = vmatmul.bf16.gmra.mxu2 %v9101_v40  ;;  %v2411_v33 = vmax.f32 %v2283_v62, %v2347_v59  ;;  %v2349_v10 = vmul.f32 0.2, %v12029_v41  ;;  %2844 = vmatmul.bf16.gmra.mxu0 %v9101_v40  ;;  %v2290_v26 = vadd.f32 %v8786_v3, %v12030_v63  ;;  %v2352_v19 = vmul.f32 0.2, %v12031_v34 }
 0x668   :  { %2755 = vmatmul.bf16.gmra.mxu3 %v9113_v24  ;;  %2933 = vmatmul.bf16.gmra.mxu1 %v9113_v24  ;;  %v9220_v54 = vpack.c.bf16 %v2410_v21, %v2408_v13  ;;  %v2412_v42 = vmax.f32 %v12028_v55, %v2348_v12  ;;  %v2414_v60 = vmax.f32 %v2286_v46, %v2350_v6  ;;  %v2351_v43 = vmul.f32 0.2, %v2287_v29  ;;  %v12035_v21 = vld [vmem:[#allocation22_spill] sm:$0xff] }
 0x669   :  { %v9226_v49 = vpack.c.bf16 %v2411_v33, %v2409_v23  ;;  %v2413_v16 = vmax.f32 %v12029_v41, %v2349_v10  ;;  %v2354_v18 = vmul.f32 0.2, %v2290_v26  ;;  %v2416_v40 = vmax.f32 %v12031_v34, %v2352_v19 }
 0x66a   :  { %v2291_v24 = vadd.f32 %v8796_v57, %v9079_v17  ;;  %v2353_v27 = vmul.f32 0.2, %v12032_v36  ;;  %v9233_v8 = vpack.c.bf16 %v2414_v60, %v2412_v42  ;;  %v2415_v38 = vmax.f32 %v2287_v29, %v2351_v43  ;;  %v6336_v43 = vld [vmem:[%s11655_s12 + $0x30] sm:$0xff] }
 0x66b   :  { %v2294_v62 = vadd.f32 %v8786_v3, %v12033_v51  ;;  %v2356_v56 = vmul.f32 0.2, %v12034_v22  ;;  %v2418_v20 = vmax.f32 %v2290_v26, %v2354_v18  ;;  %v2295_v59 = vadd.f32 %v8796_v57, %v9083_v44 }
 0x66c   :  { %v2355_v28 = vmul.f32 0.2, %v2291_v24  ;;  %v2417_v13 = vmax.f32 %v12032_v36, %v2353_v27  ;;  %v9241_v4 = vpack.c.bf16 %v2415_v38, %v2413_v16  ;;  %v2357_v23 = vmul.f32 0.2, %v12035_v21  ;;  %v6344_v16 = vld [vmem:[%s11655_s12 + $0x70] sm:$0xff] }
 0x66d   :  { %v2358_v17 = vmul.f32 0.2, %v2294_v62  ;;  %v2420_v46 = vmax.f32 %v12034_v22, %v2356_v56  ;;  %v9245_v55 = vpack.c.bf16 %v2418_v20, %v2416_v40  ;;  %v2359_v3 = vmul.f32 0.2, %v2295_v59 }
 0x66e   :  { %v2419_v12 = vmax.f32 %v2291_v24, %v2355_v28  ;;  %v2421_v6 = vmax.f32 %v12035_v21, %v2357_v23  ;;  %v2372_v29 = vmax.f32 %v9062_v48, %v9091_v50  ;;  %v2374_v44 = vmax.f32 %v9070_v5, %v9096_v15  ;;  %v6337_v48 = vld [vmem:[%s11655_s12 + $0x38] sm:$0xff] }
 0x66f   :  { %v2422_v33 = vmax.f32 %v2294_v62, %v2358_v17  ;;  %v2423_v57 = vmax.f32 %v2295_v59, %v2359_v3  ;;  %v2373_v10 = vmax.f32 %v9074_v53, %v9104_v7  ;;  %v2375_v42 = vmax.f32 %v9087_v9, %v9108_v1  ;;  %v6345_v5 = vld [vmem:[%s11655_s12 + $0x78] sm:$0xff]  ;;  %3348 = vmatpush.bf16.msra.mxu2 %v6337_v48 }
 0x670   :  { %v9250_v41 = vpack.c.bf16 %v2419_v12, %v2417_v13  ;;  %v2430_v34 = vpack.c.bf16 %v2374_v44, %v2372_v29  ;;  %3361 = vmatpush.bf16.msra.mxu3 %v6345_v5 }
 0x671   :  { %v9258_v63 = vpack.c.bf16 %v2422_v33, %v2420_v46  ;;  %v9260_v26 = vpack.c.bf16 %v2423_v57, %v2421_v6  ;;  %v2431_v19 = vpack.c.bf16 %v2375_v42, %v2373_v10  ;;  %v6335_v33 = vld [vmem:[%s11655_s12 + $0x28] sm:$0xff] }
 0x672   :  { %v6343_v6 = vld [vmem:[%s11655_s12 + $0x68] sm:$0xff] }
 0x673   :  { %3349 = vmatpush.bf16.msra.mxu2 %v6336_v43 }
 0x674   :  { %3362 = vmatpush.bf16.msra.mxu3 %v6344_v16 }
 0x677   :  { %2671 = vmatmul.bf16.gmra.mxu2 %v2430_v34  ;;  %2849 = vmatmul.bf16.gmra.mxu0 %v2430_v34 }
 0x678   :  { %2760 = vmatmul.bf16.gmra.mxu3 %v2431_v19  ;;  %2938 = vmatmul.bf16.gmra.mxu1 %v2431_v19 }
 0x679   :  { %3350 = vmatpush.bf16.msra.mxu2 %v6335_v33  ;;  %3363 = vmatpush.bf16.msra.mxu3 %v6343_v6 }
 0x687   :  { %2676 = vmatmul.bf16.gmra.mxu2 %v9120_v0  ;;  %2854 = vmatmul.bf16.gmra.mxu0 %v9120_v0 }
 0x688   :  { %2765 = vmatmul.bf16.gmra.mxu3 %v9126_v45  ;;  %2943 = vmatmul.bf16.gmra.mxu1 %v9126_v45 }
 0x697   :  { %2681 = vmatmul.bf16.gmra.mxu2 %v9133_v32  ;;  %2859 = vmatmul.bf16.gmra.mxu0 %v9133_v32 }
 0x698   :  { %2770 = vmatmul.bf16.gmra.mxu3 %v9141_v30  ;;  %2948 = vmatmul.bf16.gmra.mxu1 %v9141_v30 }
 0x6a7   :  { %2686 = vmatmul.bf16.gmra.mxu2 %v9145_v52  ;;  %2864 = vmatmul.bf16.gmra.mxu0 %v9145_v52 }
 0x6a8   :  { %2775 = vmatmul.bf16.gmra.mxu3 %v9153_v35  ;;  %2953 = vmatmul.bf16.gmra.mxu1 %v9153_v35 }
 0x6b7   :  { %2691 = vmatmul.bf16.gmra.mxu2 %v9156_v11  ;;  %2869 = vmatmul.bf16.gmra.mxu0 %v9156_v11 }
 0x6b8   :  { %2780 = vmatmul.bf16.gmra.mxu3 %v9161_v61  ;;  %2958 = vmatmul.bf16.gmra.mxu1 %v9161_v61 }
 0x6c4   :  { %v2835_v53 = vpop.f32.mrf.mxu0 }
 0x6c5   :  { %v2924_v9 = vpop.f32.mrf.mxu1 }
 0x6c6   :  { %v9284_v50 = vadd.f32 %v2924_v9, %v2835_v53 }
 0x6c7   :  { %2696 = vmatmul.bf16.gmra.mxu2 %v9168_v25  ;;  %2874 = vmatmul.bf16.gmra.mxu0 %v9168_v25 }
 0x6c8   :  { %12036 = vst [vmem:[#allocation26_spill] sm:$0xff] %v9284_v50  ;;  %2785 = vmatmul.bf16.gmra.mxu3 %v9174_v31  ;;  %2963 = vmatmul.bf16.gmra.mxu1 %v9174_v31 }
 0x6ca   :  { %v2657_v15 = vpop.f32.mrf.mxu2 }
 0x6cb   :  { %v2746_v7 = vpop.f32.mrf.mxu3 }
 0x6cc   :  { %v9290_v1 = vadd.f32 %v2746_v7, %v2657_v15  ;;  %v2837_v0 = vpop.f32.mrf.mxu0 }
 0x6cd   :  { %v2926_v45 = vpop.f32.mrf.mxu1 }
 0x6ce   :  { %12037 = vst [vmem:[#allocation23_spill] sm:$0xff] %v9290_v1  ;;  %v9292_v32 = vadd.f32 %v2926_v45, %v2837_v0 }
 0x6d0   :  { %12038 = vst [vmem:[#allocation28_spill] sm:$0xff] %v9292_v32 }
 0x6d2   :  { %v2659_v30 = vpop.f32.mrf.mxu2 }
 0x6d3   :  { %v2748_v52 = vpop.f32.mrf.mxu3 }
 0x6d4   :  { %v9294_v35 = vadd.f32 %v2748_v52, %v2659_v30  ;;  %v2840_v11 = vpop.f32.mrf.mxu0 }
 0x6d5   :  { %v2929_v61 = vpop.f32.mrf.mxu1 }
 0x6d6   :  { %12039 = vst [vmem:[#allocation30_spill] sm:$0xff] %v9294_v35  ;;  %v9296_v60 = vadd.f32 %v2929_v61, %v2840_v11  ;;  %v6334_v61 = vld [vmem:[%s11655_s12 + $0x20] sm:$0xff] }
 0x6d7   :  { %2701 = vmatmul.bf16.gmra.mxu2 %v9181_v39  ;;  %2879 = vmatmul.bf16.gmra.mxu0 %v9181_v39 }
 0x6d8   :  { %12040 = vst [vmem:[#allocation31_spill] sm:$0xff] %v9296_v60  ;;  %2790 = vmatmul.bf16.gmra.mxu3 %v9189_v47  ;;  %2968 = vmatmul.bf16.gmra.mxu1 %v9189_v47 }
 0x6d9   :  { %3351 = vmatpush.bf16.msra.mxu2 %v6334_v61 }
 0x6da   :  { %v2662_v25 = vpop.f32.mrf.mxu2 }
 0x6db   :  { %v2751_v31 = vpop.f32.mrf.mxu3 }
 0x6dc   :  { %v9308_v18 = vadd.f32 %v2751_v31, %v2662_v25  ;;  %v2842_v40 = vpop.f32.mrf.mxu0  ;;  %v6342_v25 = vld [vmem:[%s11655_s12 + $0x60] sm:$0xff] }
 0x6dd   :  { %v2931_v24 = vpop.f32.mrf.mxu1  ;;  %3364 = vmatpush.bf16.msra.mxu3 %v6342_v25 }
 0x6de   :  { %v9310_v36 = vadd.f32 %v2931_v24, %v2842_v40 }
 0x6e0   :  { %12041 = vst [vmem:[#allocation32_spill] sm:$0xff] %v9310_v36 }
 0x6e2   :  { %v2664_v39 = vpop.f32.mrf.mxu2 }
 0x6e3   :  { %v2753_v47 = vpop.f32.mrf.mxu3 }
 0x6e4   :  { %v9312_v27 = vadd.f32 %v2753_v47, %v2664_v39  ;;  %v2845_v38 = vpop.f32.mrf.mxu0 }
 0x6e5   :  { %v2934_v51 = vpop.f32.mrf.mxu1 }
 0x6e6   :  { %v9314_v62 = vadd.f32 %v2934_v51, %v2845_v38 }
 0x6e7   :  { %2706 = vmatmul.bf16.gmra.mxu2 %v9193_v2  ;;  %2884 = vmatmul.bf16.gmra.mxu0 %v9193_v2 }
 0x6e8   :  { %12042 = vst [vmem:[#allocation33_spill] sm:$0xff] %v9314_v62  ;;  %2795 = vmatmul.bf16.gmra.mxu3 %v9201_v37  ;;  %2973 = vmatmul.bf16.gmra.mxu1 %v9201_v37 }
 0x6ea   :  { %v2667_v22 = vpop.f32.mrf.mxu2 }
 0x6eb   :  { %v2756_v56 = vpop.f32.mrf.mxu3 }
 0x6ec   :  { %v9320_v20 = vadd.f32 %v2756_v56, %v2667_v22  ;;  %v2847_v28 = vpop.f32.mrf.mxu0 }
 0x6ed   :  { %v2936_v13 = vpop.f32.mrf.mxu1 }
 0x6ee   :  { %v9322_v59 = vadd.f32 %v2936_v13, %v2847_v28 }
 0x6f0   :  { %12043 = vst [vmem:[#allocation34_spill] sm:$0xff] %v9322_v59 }
 0x6f2   :  { %v2669_v17 = vpop.f32.mrf.mxu2 }
 0x6f3   :  { %v2758_v46 = vpop.f32.mrf.mxu3 }
 0x6f4   :  { %v9324_v21 = vadd.f32 %v2758_v46, %v2669_v17  ;;  %v2850_v23 = vpop.f32.mrf.mxu0 }
 0x6f5   :  { %v2939_v12 = vpop.f32.mrf.mxu1 }
 0x6f6   :  { %v9326_v3 = vadd.f32 %v2939_v12, %v2850_v23  ;;  %v6333_v12 = vld [vmem:[%s11655_s12 + $0x18] sm:$0xff] }
 0x6f7   :  { %2711 = vmatmul.bf16.gmra.mxu2 %v9204_v58  ;;  %2889 = vmatmul.bf16.gmra.mxu0 %v9204_v58 }
 0x6f8   :  { %12044 = vst [vmem:[#allocation35_spill] sm:$0xff] %v9326_v3  ;;  %2800 = vmatmul.bf16.gmra.mxu3 %v9209_v14  ;;  %2978 = vmatmul.bf16.gmra.mxu1 %v9209_v14 }
 0x6f9   :  { %3352 = vmatpush.bf16.msra.mxu2 %v6333_v12 }
 0x6fa   :  { %v2672_v2 = vpop.f32.mrf.mxu2 }
 0x6fb   :  { %v2761_v37 = vpop.f32.mrf.mxu3 }
 0x6fc   :  { %v9338_v29 = vadd.f32 %v2761_v37, %v2672_v2  ;;  %v2852_v57 = vpop.f32.mrf.mxu0  ;;  %v6341_v2 = vld [vmem:[%s11655_s12 + $0x58] sm:$0xff] }
 0x6fd   :  { %v2941_v44 = vpop.f32.mrf.mxu1  ;;  %3365 = vmatpush.bf16.msra.mxu3 %v6341_v2 }
 0x6fe   :  { %v9340_v10 = vadd.f32 %v2941_v44, %v2852_v57 }
 0x702   :  { %v2674_v58 = vpop.f32.mrf.mxu2 }
 0x703   :  { %v2763_v14 = vpop.f32.mrf.mxu3 }
 0x704   :  { %v9342_v42 = vadd.f32 %v2763_v14, %v2674_v58  ;;  %v2855_v34 = vpop.f32.mrf.mxu0 }
 0x705   :  { %v2944_v19 = vpop.f32.mrf.mxu1 }
 0x706   :  { %v9344_v48 = vadd.f32 %v2944_v19, %v2855_v34 }
 0x707   :  { %2716 = vmatmul.bf16.gmra.mxu2 %v9220_v54  ;;  %2894 = vmatmul.bf16.gmra.mxu0 %v9220_v54 }
 0x708   :  { %12045 = vst [vmem:[#allocation5_spill] sm:$0xff] %v9344_v48  ;;  %2805 = vmatmul.bf16.gmra.mxu3 %v9226_v49  ;;  %2983 = vmatmul.bf16.gmra.mxu1 %v9226_v49 }
 0x70a   :  { %v2677_v5 = vpop.f32.mrf.mxu2 }
 0x70b   :  { %v2766_v53 = vpop.f32.mrf.mxu3 }
 0x70c   :  { %v9350_v9 = vadd.f32 %v2766_v53, %v2677_v5  ;;  %v9352_v15 = vpop.f32.mrf.mxu0 }
 0x70d   :  { %v9354_v7 = vpop.f32.mrf.mxu1 }
 0x712   :  { %v9356_v0 = vpop.f32.mrf.mxu2 }
 0x713   :  { %v9358_v45 = vpop.f32.mrf.mxu3 }
 0x714   :  { %v2860_v30 = vpop.f32.mrf.mxu0 }
 0x715   :  { %v2949_v52 = vpop.f32.mrf.mxu1 }
 0x716   :  { %v9360_v11 = vadd.f32 %v2949_v52, %v2860_v30 }
 0x717   :  { %2721 = vmatmul.bf16.gmra.mxu2 %v9233_v8  ;;  %2899 = vmatmul.bf16.gmra.mxu0 %v9233_v8 }
 0x718   :  { %12046 = vst [vmem:[#allocation7_spill] sm:$0xff] %v9360_v11  ;;  %2810 = vmatmul.bf16.gmra.mxu3 %v9241_v4  ;;  %2988 = vmatmul.bf16.gmra.mxu1 %v9241_v4 }
 0x71a   :  { %v2682_v54 = vpop.f32.mrf.mxu2 }
 0x71b   :  { %v2771_v49 = vpop.f32.mrf.mxu3 }
 0x71c   :  { %v9372_v31 = vadd.f32 %v2771_v49, %v2682_v54  ;;  %v9374_v43 = vpop.f32.mrf.mxu0 }
 0x71d   :  { %v9376_v16 = vpop.f32.mrf.mxu1 }
 0x722   :  { %v9378_v8 = vpop.f32.mrf.mxu2 }
 0x723   :  { %v9380_v4 = vpop.f32.mrf.mxu3 }
 0x724   :  { %v2865_v40 = vpop.f32.mrf.mxu0 }
 0x725   :  { %v2954_v24 = vpop.f32.mrf.mxu1 }
 0x726   :  { %v9382_v39 = vadd.f32 %v2954_v24, %v2865_v40  ;;  %v6332_v24 = vld [vmem:[%s11655_s12 + $0x10] sm:$0xff] }
 0x727   :  { %2726 = vmatmul.bf16.gmra.mxu2 %v9245_v55  ;;  %2904 = vmatmul.bf16.gmra.mxu0 %v9245_v55 }
 0x728   :  { %12047 = vst [vmem:[#allocation17_spill] sm:$0xff] %v9382_v39  ;;  %2815 = vmatmul.bf16.gmra.mxu3 %v9250_v41  ;;  %2993 = vmatmul.bf16.gmra.mxu1 %v9250_v41 }
 0x729   :  { %3353 = vmatpush.bf16.msra.mxu2 %v6332_v24 }
 0x72a   :  { %v2687_v47 = vpop.f32.mrf.mxu2 }
 0x72b   :  { %v2776_v38 = vpop.f32.mrf.mxu3 }
 0x72c   :  { %v9388_v51 = vadd.f32 %v2776_v38, %v2687_v47  ;;  %v9390_v22 = vpop.f32.mrf.mxu0  ;;  %v6340_v47 = vld [vmem:[%s11655_s12 + $0x50] sm:$0xff] }
 0x72d   :  { %v9392_v56 = vpop.f32.mrf.mxu1  ;;  %3366 = vmatpush.bf16.msra.mxu3 %v6340_v47 }
 0x732   :  { %v9394_v28 = vpop.f32.mrf.mxu2 }
 0x733   :  { %v9396_v13 = vpop.f32.mrf.mxu3 }
 0x734   :  { %v2870_v17 = vpop.f32.mrf.mxu0 }
 0x735   :  { %v2959_v46 = vpop.f32.mrf.mxu1 }
 0x736   :  { %v9398_v23 = vadd.f32 %v2959_v46, %v2870_v17 }
 0x737   :  { %2731 = vmatmul.bf16.gmra.mxu2 %v9258_v63  ;;  %2909 = vmatmul.bf16.gmra.mxu0 %v9258_v63 }
 0x738   :  { %12048 = vst [vmem:[#allocation6_spill] sm:$0xff] %v9398_v23  ;;  %2820 = vmatmul.bf16.gmra.mxu3 %v9260_v26  ;;  %2998 = vmatmul.bf16.gmra.mxu1 %v9260_v26 }
 0x73a   :  { %v2692_v55 = vpop.f32.mrf.mxu2 }
 0x73b   :  { %v2781_v41 = vpop.f32.mrf.mxu3 }
 0x73c   :  { %v9410_v37 = vadd.f32 %v2781_v41, %v2692_v55  ;;  %v9412_v33 = vpop.f32.mrf.mxu0 }
 0x73d   :  { %v9414_v6 = vpop.f32.mrf.mxu1 }
 0x742   :  { %v9416_v63 = vpop.f32.mrf.mxu2 }
 0x743   :  { %v9418_v26 = vpop.f32.mrf.mxu3 }
 0x744   :  { %v2875_v57 = vpop.f32.mrf.mxu0 }
 0x745   :  { %v2964_v44 = vpop.f32.mrf.mxu1 }
 0x746   :  { %v9420_v58 = vadd.f32 %v2964_v44, %v2875_v57 }
 0x748   :  { %12049 = vst [vmem:[#allocation24_spill] sm:$0xff] %v9420_v58 }
 0x74a   :  { %v2697_v14 = vpop.f32.mrf.mxu2 }
 0x74b   :  { %v2786_v34 = vpop.f32.mrf.mxu3 }
 0x74c   :  { %v9422_v19 = vadd.f32 %v2786_v34, %v2697_v14  ;;  %v9424_v5 = vpop.f32.mrf.mxu0 }
 0x74d   :  { %v9426_v53 = vpop.f32.mrf.mxu1 }
 0x752   :  { %v9428_v30 = vpop.f32.mrf.mxu2 }
 0x753   :  { %v9430_v52 = vpop.f32.mrf.mxu3 }
 0x754   :  { %v2880_v54 = vpop.f32.mrf.mxu0 }
 0x755   :  { %v2969_v49 = vpop.f32.mrf.mxu1 }
 0x756   :  { %v9432_v61 = vadd.f32 %v2969_v49, %v2880_v54 }
 0x758   :  { %12050 = vst [vmem:[#allocation27_spill] sm:$0xff] %v9432_v61 }
 0x75a   :  { %v2702_v25 = vpop.f32.mrf.mxu2 }
 0x75b   :  { %v2791_v40 = vpop.f32.mrf.mxu3 }
 0x75c   :  { %v9440_v38 = vadd.f32 %v2791_v40, %v2702_v25  ;;  %v9442_v17 = vpop.f32.mrf.mxu0 }
 0x75d   :  { %v9444_v46 = vpop.f32.mrf.mxu1 }
 0x75e   :  { %12051 = vst [vmem:[#allocation29_spill] sm:$0xff] %v9440_v38 }
 0x762   :  { %v9446_v55 = vpop.f32.mrf.mxu2 }
 0x763   :  { %v9448_v41 = vpop.f32.mrf.mxu3 }
 0x764   :  { %v2885_v12 = vpop.f32.mrf.mxu0 }
 0x765   :  { %v2974_v2 = vpop.f32.mrf.mxu1 }
 0x766   :  { %v9450_v57 = vadd.f32 %v2974_v2, %v2885_v12  ;;  %v6331_v2 = vld [vmem:[%s11655_s12 + $0x8] sm:$0xff] }
 0x767   :  { %3354 = vmatpush.bf16.msra.mxu2 %v6331_v2  ;;  %v3083_v2 = vmul.f32 %v9296_v60, %v9296_v60 }
 0x768   :  { %12052 = vst [vmem:[#allocation36_spill] sm:$0xff] %v9450_v57  ;;  %v3078_v57 = vmul.f32 %v9290_v1, %v9290_v1 }
 0x76a   :  { %v2707_v44 = vpop.f32.mrf.mxu2 }
 0x76b   :  { %v2796_v14 = vpop.f32.mrf.mxu3 }
 0x76c   :  { %v9452_v34 = vadd.f32 %v2796_v14, %v2707_v44  ;;  %v9454_v54 = vpop.f32.mrf.mxu0  ;;  %v6339_v44 = vld [vmem:[%s11655_s12 + $0x48] sm:$0xff] }
 0x76d   :  { %12054 = vst [vmem:[#allocation9_spill] sm:$0xff] %v9454_v54  ;;  %v9456_v49 = vpop.f32.mrf.mxu1  ;;  %3367 = vmatpush.bf16.msra.mxu3 %v6339_v44  ;;  %v3080_v44 = vmul.f32 %v9294_v35, %v9294_v35 }
 0x76e   :  { %12053 = vst [vmem:[#allocation19_spill] sm:$0xff] %v9452_v34 }
 0x76f   :  { %12055 = vst [vmem:[#allocation8_spill] sm:$0xff] %v9456_v49 }
 0x772   :  { %v9458_v25 = vpop.f32.mrf.mxu2 }
 0x773   :  { %12056 = vst [vmem:[#allocation37_spill] sm:$0xff] %v9458_v25  ;;  %v9460_v40 = vpop.f32.mrf.mxu3  ;;  %v3079_v25 = vmul.f32 %v9284_v50, %v9284_v50 }
 0x774   :  { %12057 = vst [vmem:[#allocation38_spill] sm:$0xff] %v9460_v40  ;;  %v9462_v24 = vpop.f32.mrf.mxu0  ;;  %v3081_v40 = vmul.f32 %v9292_v32, %v9292_v32 }
 0x775   :  { %12058 = vst [vmem:[#allocation10_spill] sm:$0xff] %v9462_v24  ;;  %v9464_v47 = vpop.f32.mrf.mxu1 }
 0x776   :  { %12059 = vst [vmem:[#allocation11_spill] sm:$0xff] %v9464_v47  ;;  %v3041_v47 = vadd.f32 %v9292_v32, %v9284_v50  ;;  %v3179_v24 = vadd.f32 %v3081_v40, %v3079_v25  ;;  %v3004_v32 = vadd.f32 %v9294_v35, %v9290_v1  ;;  %v3082_v50 = vmul.f32 %v9308_v18, %v9308_v18 }
 0x777   :  { %v3087_v25 = vmul.f32 %v9314_v62, %v9314_v62  ;;  %v3142_v40 = vadd.f32 %v3080_v44, %v3078_v57  ;;  %v3089_v35 = vmul.f32 %v9322_v59, %v9322_v59  ;;  %v3086_v57 = vmul.f32 %v9320_v20, %v9320_v20 }
 0x778   :  { %v3180_v49 = vadd.f32 %v3179_v24, %v3083_v2 }
 0x77a   :  { %v9466_v38 = vpop.f32.mrf.mxu2 }
 0x77b   :  { %12060 = vst [vmem:[#allocation39_spill] sm:$0xff] %v9466_v38  ;;  %v9468_v12 = vpop.f32.mrf.mxu3 }
 0x77c   :  { %12061 = vst [vmem:[#allocation14_spill] sm:$0xff] %v9468_v12  ;;  %v9476_v14 = vpop.f32.mrf.mxu0 }
 0x77d   :  { %12062 = vst [vmem:[#allocation42_spill] sm:$0xff] %v9476_v14  ;;  %v9478_v34 = vpop.f32.mrf.mxu1 }
 0x77e   :  { %12063 = vst [vmem:[#allocation18_spill] sm:$0xff] %v9478_v34 }
 0x782   :  { %v9482_v38 = vpop.f32.mrf.mxu2 }
 0x783   :  { %12064 = vst [vmem:[#allocation40_spill] sm:$0xff] %v9482_v38  ;;  %v9484_v12 = vpop.f32.mrf.mxu3  ;;  %v3042_v38 = vadd.f32 %v3041_v47, %v9296_v60  ;;  %v3005_v47 = vadd.f32 %v3004_v32, %v9308_v18  ;;  %v3084_v60 = vmul.f32 %v9312_v27, %v9312_v27 }
 0x784   :  { %12065 = vst [vmem:[#allocation15_spill] sm:$0xff] %v9484_v12  ;;  %v9494_v34 = vpop.f32.mrf.mxu0  ;;  %v3085_v12 = vmul.f32 %v9310_v36, %v9310_v36 }
 0x785   :  { %12066 = vst [vmem:[#allocation20_spill] sm:$0xff] %v9494_v34  ;;  %v9496_v14 = vpop.f32.mrf.mxu1  ;;  %v3043_v34 = vadd.f32 %v3042_v38, %v9310_v36  ;;  %v3143_v38 = vadd.f32 %v3142_v40, %v3082_v50  ;;  %v3006_v2 = vadd.f32 %v3005_v47, %v9312_v27 }
 0x786   :  { %12067 = vst [vmem:[#allocation12_spill] sm:$0xff] %v9496_v14  ;;  %v3181_v14 = vadd.f32 %v3180_v49, %v3085_v12  ;;  %v3091_v49 = vmul.f32 %v9326_v3, %v9326_v3 }
 0x787   :  { %v3044_v54 = vadd.f32 %v3043_v34, %v9314_v62  ;;  %v3144_v34 = vadd.f32 %v3143_v38, %v3084_v60  ;;  %v3007_v12 = vadd.f32 %v3006_v2, %v9320_v20  ;;  %v3088_v62 = vmul.f32 %v9324_v21, %v9324_v21 }
 0x788   :  { %v3182_v32 = vadd.f32 %v3181_v14, %v3087_v25  ;;  %v3093_v14 = vmul.f32 %v9340_v10, %v9340_v10  ;;  %v3090_v38 = vmul.f32 %v9338_v29, %v9338_v29 }
 0x789   :  { %v3045_v44 = vadd.f32 %v3044_v54, %v9322_v59  ;;  %v9538_v54 = vadd.f32 %v9354_v7, %v9352_v15  ;;  %v3145_v60 = vadd.f32 %v3144_v34, %v3086_v57  ;;  %v3008_v25 = vadd.f32 %v3007_v12, %v9324_v21 }
 0x78a   :  { %v9516_v1 = vpop.f32.mrf.mxu2  ;;  %v3183_v40 = vadd.f32 %v3182_v32, %v3089_v35  ;;  %v3095_v35 = vmul.f32 %v9344_v48, %v9344_v48  ;;  %v9551_v15 = vadd.f32 %v9358_v45, %v9356_v0  ;;  %v9558_v34 = vadd.f32 %v9376_v16, %v9374_v43 }
 0x78b   :  { %v9518_v24 = vpop.f32.mrf.mxu3  ;;  %v3046_v47 = vadd.f32 %v3045_v44, %v9326_v3  ;;  %12068 = vst [vmem:[#allocation43_spill] sm:$0xff] %v9538_v54  ;;  %v3146_v32 = vadd.f32 %v3145_v60, %v3088_v62  ;;  %v3009_v44 = vadd.f32 %v3008_v25, %v9338_v29  ;;  %v3092_v3 = vmul.f32 %v9342_v42, %v9342_v42 }
 0x78c   :  { %v9529_v36 = vpop.f32.mrf.mxu0  ;;  %v3184_v2 = vadd.f32 %v3183_v40, %v3091_v49  ;;  %v3097_v49 = vmul.f32 %v9538_v54, %v9538_v54  ;;  %12069 = vst [vmem:[#allocation21_spill] sm:$0xff] %v9558_v34  ;;  %v3094_v0 = vmul.f32 %v9350_v9, %v9350_v9  ;;  %v3096_v16 = vmul.f32 %v9551_v15, %v9551_v15 }
 0x78d   :  { %v9531_v50 = vpop.f32.mrf.mxu1  ;;  %v3047_v59 = vadd.f32 %v3046_v47, %v9340_v10  ;;  %v3147_v40 = vadd.f32 %v3146_v32, %v3090_v38  ;;  %v3010_v47 = vadd.f32 %v3009_v44, %v9342_v42  ;;  %v9575_v25 = vadd.f32 %v9380_v4, %v9378_v8 }
 0x78e   :  { %v3185_v7 = vadd.f32 %v3184_v2, %v3093_v14  ;;  %v3099_v14 = vmul.f32 %v9360_v11, %v9360_v11  ;;  %v3101_v44 = vmul.f32 %v9558_v34, %v9558_v34  ;;  %v3098_v8 = vmul.f32 %v9372_v31, %v9372_v31 }
 0x78f   :  { %v3048_v57 = vadd.f32 %v3047_v59, %v9344_v48  ;;  %v3148_v60 = vadd.f32 %v3147_v40, %v3092_v3  ;;  %v3011_v43 = vadd.f32 %v3010_v47, %v9350_v9  ;;  %v9586_v3 = vadd.f32 %v9392_v56, %v9390_v22  ;;  %v12091_v48 = vld [vmem:[#allocation15_spill] sm:$0xff] }
 0x790   :  { %v3186_v45 = vadd.f32 %v3185_v7, %v3095_v35  ;;  %v9599_v22 = vadd.f32 %v9396_v13, %v9394_v28  ;;  %v6338_v28 = vld [vmem:[%s11655_s12 + $0x40] sm:$0xff] }
 0x791   :  { %v3049_v59 = vadd.f32 %v3048_v57, %v9538_v54  ;;  %12070 = vst [vmem:[#allocation13_spill] sm:$0xff] %v9586_v3  ;;  %v3149_v7 = vadd.f32 %v3148_v60, %v3094_v0  ;;  %v3012_v57 = vadd.f32 %v3011_v43, %v9551_v15  ;;  %v9606_v60 = vadd.f32 %v9414_v6, %v9412_v33  ;;  %v12090_v54 = vld [vmem:[#allocation40_spill] sm:$0xff] }
 0x792   :  { %v9560_v62 = vpop.f32.mrf.mxu2  ;;  %v3187_v35 = vadd.f32 %v3186_v45, %v3097_v49  ;;  %v3103_v49 = vmul.f32 %v9382_v39, %v9382_v39  ;;  %3368 = vmatpush.bf16.msra.mxu3 %v6338_v28 }
 0x793   :  { %v9562_v12 = vpop.f32.mrf.mxu3  ;;  %v3050_v32 = vadd.f32 %v3049_v59, %v9360_v11  ;;  %v3150_v47 = vadd.f32 %v3149_v7, %v3096_v16  ;;  %v3013_v45 = vadd.f32 %v3012_v57, %v9372_v31  ;;  %v3100_v59 = vmul.f32 %v9575_v25, %v9575_v25  ;;  %12071 = vst [vmem:[#allocation44_spill] sm:$0xff] %v9606_v60 }
 0x794   :  { %v9577_v38 = vpop.f32.mrf.mxu0  ;;  %v3188_v4 = vadd.f32 %v3187_v35, %v3099_v14  ;;  %v3105_v14 = vmul.f32 %v9586_v3, %v9586_v3  ;;  %v6330_v35 = vld [vmem:[%s11655_s12] sm:$0xff]  ;;  %v3107_v7 = vmul.f32 %v9398_v23, %v9398_v23 }
 0x795   :  { %v9579_v2 = vpop.f32.mrf.mxu1  ;;  %v3051_v40 = vadd.f32 %v3050_v32, %v9558_v34  ;;  %v3151_v13 = vadd.f32 %v3150_v47, %v3098_v8  ;;  %v3014_v32 = vadd.f32 %v3013_v45, %v9575_v25  ;;  %3355 = vmatpush.bf16.msra.mxu2 %v6330_v35  ;;  %v9629_v8 = vadd.f32 %v9418_v26, %v9416_v63  ;;  %v12089_v34 = vld [vmem:[#allocation12_spill] sm:$0xff] }
 0x796   :  { %v3189_v56 = vadd.f32 %v3188_v4, %v3101_v44  ;;  %v3102_v44 = vmul.f32 %v9388_v51, %v9388_v51  ;;  %v3106_v63 = vmul.f32 %v9410_v37, %v9410_v37 }
 0x797   :  { %v3052_v0 = vadd.f32 %v3051_v40, %v9382_v39  ;;  %v3152_v57 = vadd.f32 %v3151_v13, %v3100_v59  ;;  %v3015_v4 = vadd.f32 %v3014_v32, %v9388_v51  ;;  %v3104_v40 = vmul.f32 %v9599_v22, %v9599_v22  ;;  %v12085_v39 = vld [vmem:[#allocation19_spill] sm:$0xff] }
 0x798   :  { %v3190_v33 = vadd.f32 %v3189_v56, %v3103_v49  ;;  %v9640_v59 = vadd.f32 %v9426_v53, %v9424_v5  ;;  %v9653_v5 = vadd.f32 %v9430_v52, %v9428_v30  ;;  %v3110_v30 = vmul.f32 %v9422_v19, %v9422_v19 }
 0x799   :  { %v3053_v6 = vadd.f32 %v3052_v0, %v9586_v3  ;;  %v3109_v0 = vmul.f32 %v9606_v60, %v9606_v60  ;;  %v3153_v35 = vadd.f32 %v3152_v57, %v3102_v44  ;;  %v3016_v28 = vadd.f32 %v3015_v4, %v9599_v22  ;;  %v12084_v3 = vld [vmem:[#allocation18_spill] sm:$0xff] }
 0x79a   :  { %v9608_v43 = vpop.f32.mrf.mxu2  ;;  %v3191_v45 = vadd.f32 %v3190_v33, %v3105_v14  ;;  %12072 = vst [vmem:[#allocation25_spill] sm:$0xff] %v9640_v59  ;;  %v3111_v14 = vmul.f32 %v9420_v58, %v9420_v58  ;;  %v9660_v57 = vadd.f32 %v9444_v46, %v9442_v17  ;;  %v3112_v46 = vmul.f32 %v9653_v5, %v9653_v5 }
 0x79b   :  { %v9610_v16 = vpop.f32.mrf.mxu3  ;;  %v3054_v56 = vadd.f32 %v3053_v6, %v9398_v23  ;;  %v3154_v32 = vadd.f32 %v3153_v35, %v3104_v40  ;;  %v3017_v33 = vadd.f32 %v3016_v28, %v9410_v37  ;;  %v3108_v6 = vmul.f32 %v9629_v8, %v9629_v8 }
 0x79c   :  { %v9631_v47 = vpop.f32.mrf.mxu0  ;;  %v3192_v26 = vadd.f32 %v3191_v45, %v3107_v7  ;;  %v3113_v7 = vmul.f32 %v9640_v59, %v9640_v59  ;;  %12073 = vst [vmem:[#allocation41_spill] sm:$0xff] %v9660_v57  ;;  %v3115_v35 = vmul.f32 %v9432_v61, %v9432_v61 }
 0x79d   :  { %v9633_v49 = vpop.f32.mrf.mxu1  ;;  %v3055_v13 = vadd.f32 %v3054_v56, %v9606_v60  ;;  %v3155_v45 = vadd.f32 %v3154_v32, %v3106_v63  ;;  %v3018_v56 = vadd.f32 %v3017_v33, %v9629_v8  ;;  %v9677_v63 = vadd.f32 %v9448_v41, %v9446_v55  ;;  %v12078_v60 = vld [vmem:[#allocation36_spill] sm:$0xff] }
 0x79e   :  { %v3193_v53 = vadd.f32 %v3192_v26, %v3109_v0  ;;  %v3117_v33 = vmul.f32 %v9660_v57, %v9660_v57 }
 0x79f   :  { %v3056_v44 = vadd.f32 %v3055_v13, %v9420_v58  ;;  %v3156_v28 = vadd.f32 %v3155_v45, %v3108_v6  ;;  %v3019_v17 = vadd.f32 %v3018_v56, %v9422_v19  ;;  %v12074_v6 = vld [vmem:[#allocation9_spill] sm:$0xff] }
 0x7a0   :  { %v3194_v52 = vadd.f32 %v3193_v53, %v3111_v14  ;;  %v12075_v53 = vld [vmem:[#allocation8_spill] sm:$0xff] }
 0x7a1   :  { %v3057_v0 = vadd.f32 %v3056_v44, %v9640_v59  ;;  %v9688_v44 = vadd.f32 %v12075_v53, %v12074_v6  ;;  %v3157_v45 = vadd.f32 %v3156_v28, %v3110_v30  ;;  %v3020_v56 = vadd.f32 %v3019_v17, %v9653_v5  ;;  %v12077_v59 = vld [vmem:[#allocation29_spill] sm:$0xff]  ;;  %v12082_v17 = vld [vmem:[#allocation38_spill] sm:$0xff] }
 0x7a2   :  { %v9662_v4 = vpop.f32.mrf.mxu2  ;;  %v3195_v14 = vadd.f32 %v3194_v52, %v3113_v7  ;;  %v3114_v55 = vmul.f32 %v12077_v59, %v12077_v59  ;;  %v3119_v7 = vmul.f32 %v12078_v60, %v12078_v60  ;;  %v12079_v52 = vld [vmem:[#allocation10_spill] sm:$0xff]  ;;  %v3116_v30 = vmul.f32 %v9677_v63, %v9677_v63  ;;  %v12081_v28 = vld [vmem:[#allocation37_spill] sm:$0xff] }
 0x7a3   :  { %v9664_v40 = vpop.f32.mrf.mxu3  ;;  %v3058_v32 = vadd.f32 %v3057_v0, %v9432_v61  ;;  %12076 = vst [vmem:[#allocation16_spill] sm:$0xff] %v9688_v44  ;;  %v12080_v0 = vld [vmem:[#allocation11_spill] sm:$0xff]  ;;  %v3158_v23 = vadd.f32 %v3157_v45, %v3112_v46  ;;  %v3021_v6 = vadd.f32 %v3020_v56, %v12077_v59  ;;  %v9705_v53 = vadd.f32 %v12082_v17, %v12081_v28 }
 0x7a4   :  { %v9679_v26 = vpop.f32.mrf.mxu0  ;;  %v3196_v41 = vadd.f32 %v3195_v14, %v3115_v35  ;;  %v9698_v61 = vadd.f32 %v12080_v0, %v12079_v52  ;;  %v3118_v28 = vmul.f32 %v12085_v39, %v12085_v39 }
 0x7a5   :  { %v9681_v13 = vpop.f32.mrf.mxu1  ;;  %v3059_v58 = vadd.f32 %v3058_v32, %v9660_v57  ;;  %v3121_v32 = vmul.f32 %v9688_v44, %v9688_v44  ;;  %v12083_v57 = vld [vmem:[#allocation42_spill] sm:$0xff]  ;;  %v3159_v56 = vadd.f32 %v3158_v23, %v3114_v55  ;;  %v3022_v0 = vadd.f32 %v3021_v6, %v9677_v63 }
 0x7a6   :  { %v3197_v35 = vadd.f32 %v3196_v41, %v3117_v33  ;;  %v9712_v52 = vadd.f32 %v12084_v3, %v12083_v57  ;;  %v12086_v33 = vld [vmem:[#allocation39_spill] sm:$0xff]  ;;  %v12087_v41 = vld [vmem:[#allocation14_spill] sm:$0xff]  ;;  %v3123_v3 = vmul.f32 %v9698_v61, %v9698_v61  ;;  %v12088_v57 = vld [vmem:[#allocation20_spill] sm:$0xff]  ;;  %v3120_v6 = vmul.f32 %v9705_v53, %v9705_v53 }
 0x7a7   :  { %v3060_v14 = vadd.f32 %v3059_v58, %v12078_v60  ;;  %v9723_v58 = vadd.f32 %v12087_v41, %v12086_v33  ;;  %v9730_v11 = vadd.f32 %v12089_v34, %v12088_v57  ;;  %v3160_v23 = vadd.f32 %v3159_v56, %v3116_v30 }
 0x7a8   :  { %v3198_v17 = vadd.f32 %v3197_v35, %v3119_v7  ;;  %v3023_v55 = vadd.f32 %v3022_v0, %v12085_v39  ;;  %v9737_v33 = vadd.f32 %v12091_v48, %v12090_v54  ;;  %v9744_v34 = vadd.f32 %v9531_v50, %v9529_v36 }
 0x7a9   :  { %v3061_v60 = vadd.f32 %v3060_v14, %v9688_v44  ;;  %v3125_v44 = vmul.f32 %v9712_v52, %v9712_v52  ;;  %v3161_v30 = vadd.f32 %v3160_v23, %v3118_v28  ;;  %v3122_v0 = vmul.f32 %v9723_v58, %v9723_v58 }
 0x7aa   :  { %v9714_v46 = vpop.f32.mrf.mxu2  ;;  %v3199_v14 = vadd.f32 %v3198_v17, %v3121_v32  ;;  %12092 = vst [vmem:[#allocation22_spill] sm:$0xff] %v9744_v34  ;;  %v3024_v56 = vadd.f32 %v3023_v55, %v9705_v53  ;;  %v9751_v48 = vadd.f32 %v9518_v24, %v9516_v1  ;;  %v3127_v32 = vmul.f32 %v9730_v11, %v9730_v11 }
 0x7ab   :  { %v9716_v45 = vpop.f32.mrf.mxu3  ;;  %v3062_v41 = vadd.f32 %v3061_v60, %v9698_v61  ;;  %v9758_v36 = vadd.f32 %v9579_v2, %v9577_v38  ;;  %v3162_v50 = vadd.f32 %v3161_v30, %v3120_v6  ;;  %v3124_v17 = vmul.f32 %v9737_v33, %v9737_v33 }
 0x7ac   :  { %v2907_v7 = vpop.f32.mrf.mxu0  ;;  %v3200_v54 = vadd.f32 %v3199_v14, %v3123_v3  ;;  %v3025_v28 = vadd.f32 %v3024_v56, %v9723_v58  ;;  %v9765_v1 = vadd.f32 %v9562_v12, %v9560_v62  ;;  %v3129_v57 = vmul.f32 %v9744_v34, %v9744_v34 }
 0x7ad   :  { %v2996_v35 = vpop.f32.mrf.mxu1  ;;  %v3063_v60 = vadd.f32 %v3062_v41, %v9712_v52  ;;  %v9772_v38 = vadd.f32 %v9633_v49, %v9631_v47  ;;  %v3163_v55 = vadd.f32 %v3162_v50, %v3122_v0  ;;  %v3126_v14 = vmul.f32 %v9751_v48, %v9751_v48 }
 0x7ae   :  { %v3201_v24 = vadd.f32 %v3200_v54, %v3125_v44  ;;  %v3026_v6 = vadd.f32 %v3025_v28, %v9737_v33  ;;  %v3131_v44 = vmul.f32 %v9758_v36, %v9758_v36  ;;  %v9782_v41 = vadd.f32 %v9681_v13, %v9679_v26 }
 0x7af   :  { %v3064_v3 = vadd.f32 %v3063_v60, %v9730_v11  ;;  %12093 = vst [vmem:[#allocation9_spill] sm:$0xff] %v9772_v38  ;;  %v3164_v47 = vadd.f32 %v3163_v55, %v3124_v17  ;;  %v3128_v30 = vmul.f32 %v9765_v1, %v9765_v1  ;;  %v9789_v56 = vadd.f32 %v9610_v16, %v9608_v43  ;;  %v6020_v55 = vld [vmem:[#allocation2 + $0x78] sm:$0xf0] }
 0x7b0   :  { %v3202_v62 = vadd.f32 %v3201_v24, %v3127_v32  ;;  %v3027_v49 = vadd.f32 %v3026_v6, %v9751_v48  ;;  %v3133_v50 = vmul.f32 %v9772_v38, %v9772_v38  ;;  %v9794_v26 = vadd.f32 %v2996_v35, %v2907_v7  ;;  %v6378_v6 = vld [vmem:[#allocation2 + $0xf4] sm:$0xf] }
 0x7b1   :  { %v3065_v12 = vadd.f32 %v3064_v3, %v9744_v34  ;;  %v3165_v13 = vadd.f32 %v3164_v47, %v3126_v14  ;;  %v9799_v17 = vadd.f32 %v9664_v40, %v9662_v4  ;;  %v3135_v16 = vmul.f32 %v9782_v41, %v9782_v41  ;;  %v6084_v40 = vld [vmem:[#allocation2 + $0xf8] sm:$0xf0] }
 0x7b2   :  { %v2729_v2 = vpop.f32.mrf.mxu2  ;;  %v3203_v60 = vadd.f32 %v3202_v62, %v3129_v57  ;;  %12094 = vst [vmem:[#allocation8_spill] sm:$0xff] %v9794_v26  ;;  %v3028_v28 = vadd.f32 %v3027_v49, %v9765_v1  ;;  %v6362_v57 = vld [vmem:[#allocation2 + $0x74] sm:$0xf]  ;;  %v3130_v35 = vmul.f32 %v9789_v56, %v9789_v56  ;;  %v9810_v14 = vadd.f32 %v9716_v45, %v9714_v46  ;;  %v6360_v62 = vld [vmem:[#allocation2 + $0x64] sm:$0xf] }
 0x7b3   :  { %v2818_v23 = vpop.f32.mrf.mxu3  ;;  %v3066_v32 = vadd.f32 %v3065_v12, %v9758_v36  ;;  %v3166_v7 = vadd.f32 %v3165_v13, %v3128_v30  ;;  %v6023_v4 = vor.u32 %v6362_v57, %v6020_v55  ;;  %v6012_v12 = vld [vmem:[#allocation2 + $0x68] sm:$0xf0]  ;;  %v3137_v49 = vmul.f32 %v9794_v26, %v9794_v26  ;;  %v5972_v34 = vld [vmem:[#allocation2 + $0x18] sm:$0xf0] }
 0x7b4   :  { %v2910_v0 = vpop.f32.mrf.mxu0  ;;  %v3204_v24 = vadd.f32 %v3203_v60, %v3131_v44  ;;  %v6087_v30 = vor.u32 %v6378_v6, %v6084_v40  ;;  %v6376_v60 = vld [vmem:[#allocation2 + $0xe4] sm:$0xf]  ;;  %v3029_v13 = vadd.f32 %v3028_v28, %v9789_v56  ;;  %v3132_v46 = vmul.f32 %v9799_v17, %v9799_v17 }
 0x7b5   :  { %v2999_v54 = vpop.f32.mrf.mxu1  ;;  %v3067_v43 = vadd.f32 %v3066_v32, %v9772_v38  ;;  %v6076_v32 = vld [vmem:[#allocation2 + $0xe8] sm:$0xf0]  ;;  %v9818_v45 = vadd.f32 %v2818_v23, %v2729_v2  ;;  %4109 = vmatpush.bf16.msra.mxu0 %v6023_v4  ;;  %v6015_v57 = vor.u32 %v6360_v62, %v6012_v12  ;;  %v3167_v6 = vadd.f32 %v3166_v7, %v3130_v35 }
 0x7b6   :  { %v9804_v3 = vadd.f32 %v2999_v54, %v2910_v0  ;;  %v3205_v44 = vadd.f32 %v3204_v24, %v3133_v50  ;;  %4198 = vmatpush.bf16.msra.mxu1 %v6087_v30  ;;  %v6079_v55 = vor.u32 %v6376_v60, %v6076_v32  ;;  %v3030_v40 = vadd.f32 %v3029_v13, %v9799_v17 }
 0x7b7   :  { %v3068_v47 = vadd.f32 %v3067_v43, %v9782_v41  ;;  %v3134_v28 = vmul.f32 %v9810_v14, %v9810_v14  ;;  %v3168_v12 = vadd.f32 %v3167_v6, %v3132_v46  ;;  %v3136_v7 = vmul.f32 %v9818_v45, %v9818_v45 }
 0x7b8   :  { %12095 = vst [vmem:[#allocation29_spill] sm:$0xff] %v9804_v3  ;;  %v3206_v50 = vadd.f32 %v3205_v44, %v3135_v16  ;;  %v3139_v43 = vmul.f32 %v9804_v3, %v9804_v3  ;;  %v3031_v44 = vadd.f32 %v3030_v40, %v9810_v14 }
 0x7b9   :  { %v3069_v24 = vadd.f32 %v3068_v47, %v9794_v26  ;;  %4110 = vmatpush.bf16.msra.mxu0 %v6015_v57 }
 0x7ba   :  { %v2732_v0 = vpop.f32.mrf.mxu2  ;;  %v3207_v4 = vadd.f32 %v3206_v50, %v3137_v49  ;;  %4199 = vmatpush.bf16.msra.mxu1 %v6079_v55  ;;  %v3032_v49 = vadd.f32 %v3031_v44, %v9818_v45 }
 0x7bb   :  { %v2821_v54 = vpop.f32.mrf.mxu3  ;;  %v3070_v16 = vadd.f32 %v3069_v24, %v9804_v3  ;;  %v6366_v3 = vld [vmem:[#allocation2 + $0x94] sm:$0xf] }
 0x7bc   :  { %v9826_v38 = vadd.f32 %v2821_v54, %v2732_v0  ;;  %v2912_v2 = vpop.f32.mrf.mxu0  ;;  %v3208_v35 = vadd.f32 %v3207_v4, %v3139_v43  ;;  %v3169_v54 = vadd.f32 %v3168_v12, %v3134_v28 }
 0x7bd   :  { %v3001_v23 = vpop.f32.mrf.mxu1 }
 0x7be   :  { %v9829_v62 = vadd.f32 %v3001_v23, %v2912_v2  ;;  %v3138_v30 = vmul.f32 %v9826_v38, %v9826_v38  ;;  %v3170_v50 = vadd.f32 %v3169_v54, %v3136_v7  ;;  %v3033_v57 = vadd.f32 %v3032_v49, %v9826_v38 }
 0x7c0   :  { %12096 = vst [vmem:[#allocation10_spill] sm:$0xff] %v9829_v62  ;;  %v3071_v47 = vadd.f32 %v3070_v16, %v9829_v62  ;;  %v3141_v0 = vmul.f32 %v9829_v62, %v9829_v62  ;;  %v3171_v40 = vadd.f32 %v3170_v50, %v3138_v30 }
 0x7c2   :  { %v3072_v60 = vrot.slane %v3071_v47, 4  ;;  %v3209_v32 = vadd.f32 %v3208_v35, %v3141_v0  ;;  %v2734_v13 = vpop.f32.mrf.mxu2 }
 0x7c3   :  { %v2823_v46 = vpop.f32.mrf.mxu3 }
 0x7c4   :  { %v9841_v24 = vadd.f32 %v2823_v46, %v2734_v13  ;;  %v3073_v43 = vadd.f32 %v3072_v60, %v3071_v47  ;;  %v3210_v6 = vrot.slane %v3209_v32, 4 }
 0x7c6   :  { %v3034_v55 = vadd.f32 %v3033_v57, %v9841_v24  ;;  %v3140_v28 = vmul.f32 %v9841_v24, %v9841_v24  ;;  %v3074_v2 = vrot.slane %v3073_v43, 2  ;;  %v3211_v23 = vadd.f32 %v3210_v6, %v3209_v32 }
 0x7c8   :  { %v3035_v4 = vrot.slane %v3034_v55, 4  ;;  %v3172_v16 = vadd.f32 %v3171_v40, %v3140_v28  ;;  %v3075_v12 = vadd.f32 %v3074_v2, %v3073_v43  ;;  %v3212_v44 = vrot.slane %v3211_v23, 2 }
 0x7ca   :  { %v3036_v35 = vadd.f32 %v3035_v4, %v3034_v55  ;;  %v3173_v7 = vrot.slane %v3172_v16, 4  ;;  %v3076_v0 = vrot.slane %v3075_v12, 1  ;;  %v3213_v54 = vadd.f32 %v3212_v44, %v3211_v23 }
 0x7cc   :  { %v3037_v49 = vrot.slane %v3036_v35, 2  ;;  %v3174_v13 = vadd.f32 %v3173_v7, %v3172_v16  ;;  %v3214_v47 = vrot.slane %v3213_v54, 1  ;;  %v3077_v46 = vadd.f32 %v3076_v0, %v3075_v12  ;;  %v6004_v0 = vld [vmem:[#allocation2 + $0x58] sm:$0xf0] }
 0x7ce   :  { %v3038_v60 = vadd.f32 %v3037_v49, %v3036_v35  ;;  %v3175_v30 = vrot.slane %v3174_v13, 2  ;;  %v3215_v50 = vadd.f32 %v3214_v47, %v3213_v54  ;;  %v6374_v54 = vld [vmem:[#allocation2 + $0xd4] sm:$0xf]  ;;  %v5952_v47 = vld [vmem:[%s11656_s13] sm:$0xf] }
 0x7d0   :  { %v3039_v57 = vrot.slane %v3038_v60, 1  ;;  %v3176_v62 = vadd.f32 %v3175_v30, %v3174_v13  ;;  %v3217_v26 = vsel %vm602_vm1, %v3077_v46, %v3215_v50  ;;  %v6068_v13 = vld [vmem:[#allocation2 + $0xd8] sm:$0xf0] }
 0x7d1   :  { %v3219_v6 = vpack.c.bf16 %v3217_v26, %v3217_v26  ;;  %v6071_v30 = vor.u32 %v6374_v54, %v6068_v13  ;;  %v6346_v50 = vld [vmem:[%s11656_s13 + $0x4] sm:$0xf]  ;;  %v6352_v54 = vld [vmem:[#allocation2 + $0x24] sm:$0xf]  ;;  %v5980_v13 = vld [vmem:[#allocation2 + $0x28] sm:$0xf0] }
 0x7d2   :  { %v3177_v32 = vrot.slane %v3176_v62, 1  ;;  %v3040_v40 = vadd.f32 %v3039_v57, %v3038_v60  ;;  %v6347_v60 = vld [vmem:[%s11656_s13 + $0x4] sm:$0xf0]  ;;  %v5954_v57 = vld [vmem:[%s11656_s13 + $0x8] sm:$0xf0] }
 0x7d3   :  { %3369 = vmatmul.bf16.vlgmr.msra.gmra.mxu3 %v3219_v6  ;;  %v5953_v46 = vor.u32 %v6347_v60, %v5952_v47  ;;  %4200 = vmatpush.bf16.msra.mxu1 %v6071_v30  ;;  %v6018_v30 = vld [vmem:[#allocation2 + $0x70] sm:$0xf] }
 0x7d4   :  { %v3178_v43 = vadd.f32 %v3177_v32, %v3176_v62  ;;  %v6358_v62 = vld [vmem:[#allocation2 + $0x54] sm:$0xf]  ;;  %v6356_v32 = vld [vmem:[#allocation2 + $0x44] sm:$0xf] }
 0x7d5   :  { %v6007_v49 = vor.u32 %v6358_v62, %v6004_v0  ;;  %3428 = vmatpush.bf16.msrb.mxu2 %v5953_v46  ;;  %v6363_v46 = vld [vmem:[#allocation2 + $0x74] sm:$0xf0] }
 0x7d6   :  { %v3216_v55 = vsel %vm602_vm1, %v3040_v40, %v3178_v43  ;;  %v5957_v40 = vor.u32 %v6346_v50, %v5954_v57  ;;  %v5996_v43 = vld [vmem:[#allocation2 + $0x48] sm:$0xf0]  ;;  %v6082_v57 = vld [vmem:[#allocation2 + $0xf0] sm:$0xf] }
 0x7d7   :  { %v3218_v28 = vpack.c.bf16 %v3216_v55, %v3216_v55  ;;  %4111 = vmatpush.bf16.msra.mxu0 %v6007_v49  ;;  %v6372_v55 = vld [vmem:[#allocation2 + $0xc4] sm:$0xf]  ;;  %v6044_v50 = vld [vmem:[#allocation2 + $0xa8] sm:$0xf0] }
 0x7d8   :  { %3441 = vmatpush.bf16.msrb.mxu3 %v5957_v40  ;;  %v6368_v49 = vld [vmem:[#allocation2 + $0xa4] sm:$0xf]  ;;  %v6019_v40 = vor.u32 %v6363_v46, %v6018_v30  ;;  %v6002_v46 = vld [vmem:[#allocation2 + $0x50] sm:$0xf] }
 0x7d9   :  { %3356 = vmatmul.bf16.vlgmr.msra.gmra.mxu2 %v3218_v28  ;;  %v6060_v28 = vld [vmem:[#allocation2 + $0xc8] sm:$0xf0] }
 0x7da   :  { %3931 = vmatpush.bf16.msra.mxu2 %v6019_v40 }
 0x856   :  { %v3370_v2 = vpop.f32.mrf.mxu3 }
 0x85c   :  { %v3357_v23 = vpop.f32.mrf.mxu2 }
 0x85d   :  { %v9848_v4 = vadd.f32 %v3370_v2, %v3357_v23  ;;  %v5999_v23 = vor.u32 %v6356_v32, %v5996_v43  ;;  %v6379_v32 = vld [vmem:[#allocation2 + $0xf4] sm:$0xf0] }
 0x85e   :  { %v3372_v12 = vpop.f32.mrf.mxu3 }
 0x85f   :  { %v3374_v16 = vmul.f32 %v9848_v4, %v9848_v4  ;;  %v6354_v12 = vld [vmem:[#allocation2 + $0x34] sm:$0xf]  ;;  %4112 = vmatpush.bf16.msra.mxu0 %v5999_v23  ;;  %v6373_v23 = vld [vmem:[#allocation2 + $0xc4] sm:$0xf0] }
 0x861   :  { %v3376_v44 = vrot.slane %v3374_v16, 7  ;;  %v6063_v16 = vor.u32 %v6372_v55, %v6060_v28  ;;  %v6083_v55 = vor.u32 %v6379_v32, %v6082_v57  ;;  %v6010_v28 = vld [vmem:[#allocation2 + $0x60] sm:$0xf]  ;;  %v6359_v57 = vld [vmem:[#allocation2 + $0x54] sm:$0xf0] }
 0x862   :  { %v6003_v40 = vor.u32 %v6359_v57, %v6002_v46  ;;  %v3397_v57 = vld [vmem:[%s11658_s15] sm:$0x1] }
 0x863   :  { %v3378_v35 = vsub.f32 %v9848_v4, %v3376_v44  ;;  %v5988_v44 = vld [vmem:[#allocation2 + $0x38] sm:$0xf0]  ;;  %4201 = vmatpush.bf16.msra.mxu1 %v6063_v16  ;;  %v6377_v16 = vld [vmem:[#allocation2 + $0xe4] sm:$0xf0]  ;;  %4020 = vmatpush.bf16.msra.mxu3 %v6083_v55  ;;  %v6028_v55 = vld [vmem:[#allocation2 + $0x88] sm:$0xf0] }
 0x864   :  { %v3359_v7 = vpop.f32.mrf.mxu2  ;;  %v5991_v0 = vor.u32 %v6354_v12, %v5988_v44  ;;  %v5983_v12 = vor.u32 %v6352_v54, %v5980_v13  ;;  %v6074_v44 = vld [vmem:[#allocation2 + $0xe0] sm:$0xf]  ;;  %v6375_v54 = vld [vmem:[#allocation2 + $0xd4] sm:$0xf0] }
 0x865   :  { %v3380_v26 = vadd.f32 0.0001, %v3378_v35  ;;  %v6370_v35 = vld [vmem:[#allocation2 + $0xb4] sm:$0xf]  ;;  %v6052_v7 = vld [vmem:[#allocation2 + $0xb8] sm:$0xf0]  ;;  %v6075_v30 = vor.u32 %v6377_v16, %v6074_v44 }
 0x866   :  { %v6055_v60 = vor.u32 %v6370_v35, %v6052_v7  ;;  %4113 = vmatpush.bf16.msra.mxu0 %v5991_v0  ;;  %v6047_v7 = vor.u32 %v6368_v49, %v6044_v50  ;;  %v6066_v0 = vld [vmem:[#allocation2 + $0xd0] sm:$0xf]  ;;  %v5964_v50 = vld [vmem:[#allocation2 + $0x8] sm:$0xf0]  ;;  %v6357_v44 = vld [vmem:[#allocation2 + $0x44] sm:$0xf0] }
 0x867   :  { %6436 = vrsqrt.f32 %v3380_v26  ;;  %vm3387_vm10 = vweird.f32 %v3380_v26  ;;  %4021 = vmatpush.bf16.msra.mxu3 %v6075_v30  ;;  %v6058_v16 = vld [vmem:[#allocation2 + $0xc0] sm:$0xf]  ;;  %v6371_v30 = vld [vmem:[#allocation2 + $0xb4] sm:$0xf0] }
 0x868   :  { %4202 = vmatpush.bf16.msra.mxu1 %v6055_v60  ;;  %v6348_v60 = vld [vmem:[#allocation2 + $0x4] sm:$0xf] }
 0x86a   :  { %4114 = vmatpush.bf16.msra.mxu0 %v5983_v12 }
 0x86c   :  { %4203 = vmatpush.bf16.msra.mxu1 %v6047_v7  ;;  %v5986_v7 = vld [vmem:[#allocation2 + $0x30] sm:$0xf] }
 0x86d   :  { %v6437_v6 = vpop.eup %6436 }
 0x86e   :  { %v3382_v2 = vmul.f32 %v6437_v6, %v3380_v26  ;;  %vm3388_vm9 = vweird.f32 %v6437_v6 }
 0x86f   :  { %vm9865_vm11 = vmor %vm3387_vm10, %vm3388_vm9 }
 0x870   :  { %v3383_v62 = vmul.f32 %v6437_v6, %v3382_v2  ;;  %v6361_v2 = vld [vmem:[#allocation2 + $0x64] sm:$0xf0] }
 0x871   :  { %v6011_v26 = vor.u32 %v6361_v2, %v6010_v28  ;;  %v6067_v28 = vor.u32 %v6375_v54, %v6066_v0  ;;  %v5994_v2 = vld [vmem:[#allocation2 + $0x40] sm:$0xf] }
 0x872   :  { %v3384_v47 = vmul.f32 0.5, %v3383_v62  ;;  %v6350_v62 = vld [vmem:[#allocation2 + $0x14] sm:$0xf]  ;;  %v5995_v12 = vor.u32 %v6357_v44, %v5994_v2  ;;  %v6369_v2 = vld [vmem:[#allocation2 + $0xa4] sm:$0xf0] }
 0x873   :  { %v5975_v13 = vor.u32 %v6350_v62, %v5972_v34  ;;  %3932 = vmatpush.bf16.msra.mxu2 %v6011_v26  ;;  %v3379_v34 = vld [vmem:[%s11657_s14] sm:$0x1]  ;;  %4022 = vmatpush.bf16.msra.mxu3 %v6067_v28  ;;  %v5970_v44 = vld [vmem:[#allocation2 + $0x10] sm:$0xf] }
 0x874   :  { %v3385_v43 = vsub.f32 1.5, %v3384_v47  ;;  %v6036_v47 = vld [vmem:[#allocation2 + $0x98] sm:$0xf0]  ;;  %v6355_v62 = vld [vmem:[#allocation2 + $0x34] sm:$0xf0] }
 0x875   :  { %v6039_v49 = vor.u32 %v6366_v3, %v6036_v47  ;;  %4115 = vmatpush.bf16.msra.mxu0 %v5975_v13  ;;  %v6050_v47 = vld [vmem:[#allocation2 + $0xb0] sm:$0xf] }
 0x876   :  { %v3386_v35 = vmul.f32 %v6437_v6, %v3385_v43  ;;  %v6364_v43 = vld [vmem:[#allocation2 + $0x84] sm:$0xf]  ;;  %v6051_v54 = vor.u32 %v6371_v30, %v6050_v47 }
 0x877   :  { %4204 = vmatpush.bf16.msra.mxu1 %v6039_v49  ;;  %v6031_v3 = vor.u32 %v6364_v43, %v6028_v55  ;;  %3933 = vmatpush.bf16.msra.mxu2 %v6003_v40  ;;  %v5978_v43 = vld [vmem:[#allocation2 + $0x20] sm:$0xf]  ;;  %v6353_v40 = vld [vmem:[#allocation2 + $0x24] sm:$0xf0] }
 0x878   :  { %v3390_v32 = vsel %vm9865_vm11, %v6437_v6, %v3386_v35  ;;  %v5967_v6 = vor.u32 %v6348_v60, %v5964_v50  ;;  %v6059_v35 = vor.u32 %v6373_v23, %v6058_v16  ;;  %v6042_v55 = vld [vmem:[#allocation2 + $0xa0] sm:$0xf]  ;;  %v5979_v28 = vor.u32 %v6353_v40, %v5978_v43  ;;  %v6351_v16 = vld [vmem:[#allocation2 + $0x14] sm:$0xf0] }
 0x879   :  { %3392 = vst [vmem:[#allocation1] sm:$0xff] %v3390_v32  ;;  %v5987_v32 = vor.u32 %v6355_v62, %v5986_v7  ;;  %v5962_v7 = vld [vmem:[#allocation2] sm:$0xf]  ;;  %v6349_v62 = vld [vmem:[#allocation2 + $0x4] sm:$0xf0] }
 0x87a   :  { %4116 = vmatpush.bf16.msra.mxu0 %v5967_v6  ;;  %4023 = vmatpush.bf16.msra.mxu3 %v6059_v35  ;;  %v6043_v6 = vor.u32 %v6369_v2, %v6042_v55  ;;  %v5971_v35 = vor.u32 %v6351_v16, %v5970_v44 }
 0x87b   :  { %4205 = vmatpush.bf16.msra.mxu1 %v6031_v3  ;;  %3934 = vmatpush.bf16.msra.mxu2 %v5995_v12  ;;  %v6367_v3 = vld [vmem:[#allocation2 + $0x94] sm:$0xf0] }
 0x87e   :  { %4024 = vmatpush.bf16.msra.mxu3 %v6051_v54 }
 0x87f   :  { %3935 = vmatpush.bf16.msra.mxu2 %v5987_v32  ;;  %v12100_v32 = vld [vmem:[#allocation30_spill] sm:$0xff] }
 0x880   :  { %v3394_v26 = vld [vmem:[#allocation1 + $0x1] ss:$9 sm:$0xff] }
 0x881   :  { %v3396_v46 = vmul.f32 %v3394_v26, %v3379_v34  ;;  %v6034_v34 = vld [vmem:[#allocation2 + $0x90] sm:$0xf] }
 0x882   :  { %4025 = vmatpush.bf16.msra.mxu3 %v6043_v6  ;;  %v6035_v26 = vor.u32 %v6367_v3, %v6034_v34  ;;  %v12109_v6 = vld [vmem:[#allocation32_spill] sm:$0xff]  ;;  %v12112_v3 = vld [vmem:[#allocation35_spill] sm:$0xff] }
 0x883   :  { %v3398_v0 = vmul.f32 %v3396_v46, %v9848_v4  ;;  %3936 = vmatpush.bf16.msra.mxu2 %v5979_v28 }
 0x885   :  { %v3399_v13 = vsub.f32 %v3397_v57, %v3398_v0 }
 0x886   :  { %4026 = vmatpush.bf16.msra.mxu3 %v6035_v26  ;;  %v12114_v26 = vld [vmem:[#allocation43_spill] sm:$0xff] }
 0x887   :  { %v3401_v49 = vperm.slane %v3399_v13, 0  ;;  %v5963_v13 = vor.u32 %v6349_v62, %v5962_v7  ;;  %3937 = vmatpush.bf16.msra.mxu2 %v5971_v35  ;;  %v12113_v7 = vld [vmem:[#allocation5_spill] sm:$0xff] }
 0x889   :  { %v3403_v60 = vsel %vm602_vm1, %v3396_v46, %v3401_v49  ;;  %v12099_v46 = vld [vmem:[#allocation23_spill] sm:$0xff] }
 0x88a   :  { %v3404_v50 = vpack.c.bf16 %v3403_v60, %v3403_v60 }
 0x88b   :  { %3938 = vmatpush.bf16.msra.mxu2 %v5963_v13 }
 0x88c   :  { %5958 = vmatmul.msk.bf16.vlgmr.msrb.gmra.mxu2 %vm3417_vm12, %v3404_v50  ;;  %5959 = vmatmul.msk.bf16.vlgmr.msrb.gmra.mxu3 %vm3417_vm12, %v3404_v50 }
 0x90f   :  { %v3430_v4 = vpop.f32.mrf.mxu2  ;;  %v3443_v23 = vpop.f32.mrf.mxu3 }
 0x910   :  { %v3447_v12 = vperm.slane %v3430_v4, 0  ;;  %v9879_v47 = vperm.slane %v3430_v4, 1  ;;  %v9881_v30 = vperm.slane %v3443_v23, 0  ;;  %v9889_v54 = vperm.slane %v3443_v23, 1  ;;  %v12106_v4 = vld [vmem:[#allocation26_spill] sm:$0xff] }
 0x912   :  { %v9884_v57 = vmul.f32 %v3447_v12, %v12099_v46  ;;  %v9887_v0 = vmul.f32 %v3447_v12, %v12100_v32  ;;  %v9892_v49 = vmul.f32 %v3447_v12, %v9308_v18  ;;  %v9895_v60 = vmul.f32 %v3447_v12, %v9312_v27  ;;  %v12115_v32 = vld [vmem:[#allocation7_spill] sm:$0xff] }
 0x913   :  { %v9898_v50 = vmul.f32 %v3447_v12, %v9320_v20  ;;  %v9901_v43 = vmul.f32 %v3447_v12, %v9324_v21  ;;  %v9904_v40 = vmul.f32 %v3447_v12, %v9338_v29  ;;  %v9907_v55 = vmul.f32 %v3447_v12, %v9342_v42 }
 0x914   :  { %v3465_v28 = vmul.f32 %v3447_v12, %v9350_v9  ;;  %v9911_v18 = vmul.f32 %v3447_v12, %v9551_v15  ;;  %v3469_v27 = vmul.f32 %v3447_v12, %v9372_v31  ;;  %v9915_v20 = vmul.f32 %v3447_v12, %v9575_v25 }
 0x915   :  { %v3473_v21 = vmul.f32 %v3447_v12, %v9388_v51  ;;  %v9919_v2 = vmul.f32 %v3447_v12, %v9599_v22  ;;  %v3477_v29 = vmul.f32 %v3447_v12, %v9410_v37  ;;  %v9923_v42 = vmul.f32 %v3447_v12, %v9629_v8 }
 0x916   :  { %v3481_v9 = vmul.f32 %v3447_v12, %v9422_v19  ;;  %v9927_v15 = vmul.f32 %v3447_v12, %v9653_v5  ;;  %v3485_v25 = vmul.f32 %v3447_v12, %v12077_v59  ;;  %v9931_v16 = vmul.f32 %v3447_v12, %v9677_v63 }
 0x917   :  { %v3432_v44 = vpop.f32.mrf.mxu2  ;;  %v3445_v31 = vpop.f32.mrf.mxu3  ;;  %v3489_v51 = vmul.f32 %v3447_v12, %v12085_v39  ;;  %v9935_v22 = vmul.f32 %v3447_v12, %v9705_v53  ;;  %v3493_v37 = vmul.f32 %v3447_v12, %v9723_v58  ;;  %v9939_v19 = vmul.f32 %v3447_v12, %v9737_v33 }
 0x918   :  { %v3497_v8 = vmul.f32 %v3447_v12, %v9751_v48  ;;  %v9943_v5 = vmul.f32 %v3447_v12, %v9765_v1  ;;  %v3501_v59 = vmul.f32 %v3447_v12, %v9789_v56  ;;  %v9947_v63 = vmul.f32 %v3447_v12, %v9799_v17  ;;  %v12107_v1 = vld [vmem:[#allocation28_spill] sm:$0xff]  ;;  %v12108_v56 = vld [vmem:[#allocation31_spill] sm:$0xff]  ;;  %v12116_v44 = vld [vmem:[#allocation21_spill] sm:$0xff] }
 0x919   :  { %12101 = vst [vmem:[#allocation11_spill] sm:$0xff] %v9939_v19  ;;  %v3505_v39 = vmul.f32 %v3447_v12, %v9810_v14  ;;  %v9951_v53 = vmul.f32 %v3447_v12, %v9818_v45  ;;  %v3509_v58 = vmul.f32 %v3447_v12, %v9826_v38  ;;  %v9955_v33 = vmul.f32 %v3447_v12, %v9841_v24  ;;  %v12110_v45 = vld [vmem:[#allocation33_spill] sm:$0xff]  ;;  %v12111_v38 = vld [vmem:[#allocation34_spill] sm:$0xff] }
 0x91a   :  { %12102 = vst [vmem:[#allocation37_spill] sm:$0xff] %v9943_v5  ;;  %v3450_v48 = vmul.f32 %v9881_v30, %v12106_v4  ;;  %v3452_v23 = vmul.f32 %v9881_v30, %v12107_v1  ;;  %v3454_v17 = vmul.f32 %v9881_v30, %v12108_v56  ;;  %v9965_v14 = vmul.f32 %v9881_v30, %v12109_v6  ;;  %v12117_v4 = vld [vmem:[#allocation17_spill] sm:$0xff]  ;;  %v12119_v6 = vld [vmem:[#allocation6_spill] sm:$0xff]  ;;  %v12126_v5 = vld [vmem:[#allocation16_spill] sm:$0xff] }
 0x91b   :  { %12103 = vst [vmem:[#allocation38_spill] sm:$0xff] %v9947_v63  ;;  %v3458_v34 = vmul.f32 %v9881_v30, %v12110_v45  ;;  %v9971_v24 = vmul.f32 %v9881_v30, %v12111_v38  ;;  %v9975_v12 = vmul.f32 %v9881_v30, %v12112_v3  ;;  %v9979_v35 = vmul.f32 %v9881_v30, %v9340_v10  ;;  %v12118_v56 = vld [vmem:[#allocation13_spill] sm:$0xff]  ;;  %v12120_v38 = vld [vmem:[#allocation44_spill] sm:$0xff] }
 0x91c   :  { %12104 = vst [vmem:[#allocation42_spill] sm:$0xff] %v9951_v53  ;;  %v3466_v62 = vmul.f32 %v9881_v30, %v12113_v7  ;;  %v9985_v46 = vmul.f32 %v9881_v30, %v12114_v26  ;;  %v3470_v13 = vmul.f32 %v9881_v30, %v12115_v32  ;;  %v9991_v31 = vmul.f32 %v9881_v30, %v12116_v44  ;;  %v12121_v7 = vld [vmem:[#allocation24_spill] sm:$0xff]  ;;  %v12122_v32 = vld [vmem:[#allocation25_spill] sm:$0xff] }
 0x91d   :  { %12105 = vst [vmem:[#allocation18_spill] sm:$0xff] %v9955_v33  ;;  %v3474_v1 = vmul.f32 %v9881_v30, %v12117_v4  ;;  %v9997_v10 = vmul.f32 %v9881_v30, %v12118_v56  ;;  %v3478_v45 = vmul.f32 %v9881_v30, %v12119_v6  ;;  %v10003_v3 = vmul.f32 %v9881_v30, %v12120_v38  ;;  %v12123_v33 = vld [vmem:[#allocation27_spill] sm:$0xff]  ;;  %v12124_v53 = vld [vmem:[#allocation41_spill] sm:$0xff]  ;;  %v12125_v63 = vld [vmem:[#allocation36_spill] sm:$0xff] }
 0x91e   :  { %v3482_v26 = vmul.f32 %v9881_v30, %v12121_v7  ;;  %v10009_v44 = vmul.f32 %v9881_v30, %v12122_v32  ;;  %v3486_v4 = vmul.f32 %v9881_v30, %v12123_v33  ;;  %v10015_v56 = vmul.f32 %v9881_v30, %v12124_v53  ;;  %v12129_v19 = vld [vmem:[#allocation29_spill] sm:$0xff] }
 0x91f   :  { %v3490_v6 = vmul.f32 %v9881_v30, %v12125_v63  ;;  %v10021_v38 = vmul.f32 %v9881_v30, %v12126_v5  ;;  %v3494_v7 = vmul.f32 %v9881_v30, %v9698_v61  ;;  %v10027_v32 = vmul.f32 %v9881_v30, %v9712_v52 }
 0x920   :  { %v3498_v33 = vmul.f32 %v9881_v30, %v9730_v11  ;;  %v3502_v53 = vmul.f32 %v9881_v30, %v9758_v36  ;;  %v3506_v63 = vmul.f32 %v9881_v30, %v9782_v41  ;;  %v3510_v5 = vmul.f32 %v9881_v30, %v12129_v19 }
 0x921   :  { %12127 = vst [vmem:[#allocation19_spill] sm:$0xff] %v10021_v38  ;;  %v3515_v38 = vadd.f32 %v9879_v47, %v9884_v57  ;;  %v3517_v61 = vadd.f32 %v9879_v47, %v9887_v0  ;;  %v10043_v52 = vadd.f32 %v9879_v47, %v9892_v49  ;;  %v10046_v11 = vadd.f32 %v9879_v47, %v3465_v28 }
 0x922   :  { %12128 = vst [vmem:[#allocation39_spill] sm:$0xff] %v10027_v32  ;;  %v10049_v36 = vadd.f32 %v9879_v47, %v3469_v27  ;;  %v10052_v41 = vadd.f32 %v9879_v47, %v3473_v21  ;;  %v10055_v19 = vadd.f32 %v9879_v47, %v3477_v29  ;;  %v10058_v57 = vadd.f32 %v9879_v47, %v3481_v9 }
 0x923   :  { %v10061_v0 = vadd.f32 %v9879_v47, %v3485_v25  ;;  %v10064_v49 = vadd.f32 %v9879_v47, %v3489_v51  ;;  %v10067_v28 = vadd.f32 %v9879_v47, %v3493_v37  ;;  %v10070_v27 = vadd.f32 %v9879_v47, %v3497_v8 }
 0x924   :  { %v10073_v21 = vadd.f32 %v9879_v47, %v3501_v59  ;;  %v10076_v29 = vadd.f32 %v9879_v47, %v3505_v39  ;;  %v10080_v9 = vadd.f32 %v9879_v47, %v9898_v50  ;;  %v10083_v25 = vadd.f32 %v9879_v47, %v3509_v58 }
 0x925   :  { %12130 = vst [vmem:[#allocation14_spill] sm:$0xff] %v10067_v28  ;;  %v3516_v51 = vadd.f32 %v9889_v54, %v3450_v48  ;;  %v3518_v37 = vadd.f32 %v9889_v54, %v3452_v23  ;;  %v10088_v8 = vadd.f32 %v9889_v54, %v3454_v17  ;;  %v10091_v59 = vadd.f32 %v9889_v54, %v3458_v34  ;;  %v6026_v17 = vld [vmem:[#allocation2 + $0x80] sm:$0xf]  ;;  %v6365_v34 = vld [vmem:[#allocation2 + $0x84] sm:$0xf0] }
 0x926   :  { %12131 = vst [vmem:[#allocation20_spill] sm:$0xff] %v10070_v27  ;;  %v10094_v39 = vadd.f32 %v9889_v54, %v3466_v62  ;;  %v10100_v50 = vadd.f32 %v9889_v54, %v3474_v1  ;;  %v10103_v58 = vadd.f32 %v9889_v54, %v3478_v45  ;;  %v10106_v48 = vadd.f32 %v9889_v54, %v3482_v26 }
 0x927   :  { %12132 = vst [vmem:[#allocation12_spill] sm:$0xff] %v10073_v21  ;;  %v10109_v23 = vadd.f32 %v9889_v54, %v3486_v4  ;;  %v10112_v62 = vadd.f32 %v9889_v54, %v3490_v6  ;;  %v10118_v1 = vadd.f32 %v9889_v54, %v3498_v33  ;;  %v10121_v45 = vadd.f32 %v9889_v54, %v3502_v53 }
 0x928   :  { %12133 = vst [vmem:[#allocation40_spill] sm:$0xff] %v10076_v29  ;;  %v10097_v29 = vadd.f32 %v9889_v54, %v3470_v13  ;;  %v10115_v13 = vadd.f32 %v9889_v54, %v3494_v7  ;;  %v10124_v26 = vadd.f32 %v9889_v54, %v3506_v63  ;;  %v10127_v4 = vadd.f32 %v9889_v54, %v3510_v5 }
 0x929   :  { %12134 = vst [vmem:[#allocation15_spill] sm:$0xff] %v10083_v25  ;;  %v3579_v25 = vmul.f32 0.2, %v3515_v38  ;;  %v3580_v21 = vmul.f32 0.2, %v3516_v51  ;;  %v6027_v32 = vor.u32 %v6365_v34, %v6026_v17  ;;  %v3521_v7 = vadd.f32 %v9879_v47, %v9895_v60 }
 0x92a   :  { %12135 = vst [vmem:[#allocation23_spill] sm:$0xff] %v10115_v13  ;;  %v3581_v27 = vmul.f32 0.2, %v3517_v61  ;;  %v3582_v6 = vmul.f32 0.2, %v3518_v37  ;;  %v3522_v53 = vadd.f32 %v9889_v54, %v9965_v14  ;;  %v3525_v60 = vadd.f32 %v9879_v47, %v9901_v43 }
 0x92b   :  { %12136 = vst [vmem:[#allocation30_spill] sm:$0xff] %v10118_v1  ;;  %v3643_v13 = vmax.f32 %v3515_v38, %v3579_v25  ;;  %v3644_v33 = vmax.f32 %v3516_v51, %v3580_v21  ;;  %v3583_v1 = vmul.f32 0.2, %v10043_v52  ;;  %4027 = vmatpush.bf16.msra.mxu3 %v6027_v32  ;;  %v3585_v5 = vmul.f32 0.2, %v3521_v7 }
 0x92c   :  { %12137 = vst [vmem:[#allocation26_spill] sm:$0xff] %v10121_v45  ;;  %v3645_v63 = vmax.f32 %v3517_v61, %v3581_v27  ;;  %v12140_v45 = vld [vmem:[#allocation22_spill] sm:$0xff]  ;;  %v3586_v17 = vmul.f32 0.2, %v3522_v53  ;;  %v3587_v38 = vmul.f32 0.2, %v10080_v9  ;;  %v10149_v51 = vadd.f32 %v9879_v47, %v9904_v40 }
 0x92d   :  { %12138 = vst [vmem:[#allocation28_spill] sm:$0xff] %v10124_v26  ;;  %v3646_v26 = vmax.f32 %v3518_v37, %v3582_v6  ;;  %v10137_v28 = vmul.f32 %v9881_v30, %v12140_v45  ;;  %v3647_v14 = vmax.f32 %v10043_v52, %v3583_v1  ;;  %v3649_v61 = vmax.f32 %v3521_v7, %v3585_v5  ;;  %v12141_v27 = vld [vmem:[#allocation9_spill] sm:$0xff]  ;;  %v12142_v6 = vld [vmem:[#allocation8_spill] sm:$0xff] }
 0x92e   :  { %12139 = vst [vmem:[#allocation31_spill] sm:$0xff] %v10127_v4  ;;  %v3584_v4 = vmul.f32 0.2, %v10088_v8  ;;  %v3707_v21 = vpack.c.bf16 %v3645_v63, %v3643_v13  ;;  %v10145_v32 = vmul.f32 %v9881_v30, %v12141_v27  ;;  %v3589_v37 = vmul.f32 0.2, %v3525_v60 }
 0x92f   :  { %v3708_v25 = vpack.c.bf16 %v3646_v26, %v3644_v33  ;;  %v3526_v34 = vadd.f32 %v9889_v54, %v9971_v24  ;;  %v3650_v13 = vmax.f32 %v3522_v53, %v3586_v17  ;;  %v3588_v52 = vmul.f32 0.2, %v10091_v59 }
 0x930   :  { %3939 = vmatmul.bf16.vlgmr.msra.gmra.mxu2 %v3707_v21  ;;  %v3648_v43 = vmax.f32 %v10088_v8, %v3584_v4  ;;  %v10157_v1 = vadd.f32 %v9879_v47, %v9907_v55  ;;  %v10161_v45 = vadd.f32 %v9889_v54, %v9975_v12  ;;  %4117 = vmatmul.bf16.vlgmr.msra.gmra.mxu0 %v3707_v21  ;;  %v12143_v4 = vld [vmem:[#allocation10_spill] sm:$0xff]  ;;  %v3596_v21 = vmul.f32 0.2, %v10094_v39 }
 0x931   :  { %4028 = vmatmul.bf16.vlgmr.msra.gmra.mxu3 %v3708_v25  ;;  %4206 = vmatmul.bf16.vlgmr.msra.gmra.mxu1 %v3708_v25  ;;  %v3651_v40 = vmax.f32 %v10080_v9, %v3587_v38  ;;  %v3653_v24 = vmax.f32 %v3525_v60, %v3589_v37  ;;  %v3590_v26 = vmul.f32 0.2, %v3526_v34  ;;  %v10166_v8 = vmul.f32 %v9881_v30, %v12142_v6 }
 0x932   :  { %v10170_v7 = vmul.f32 %v9881_v30, %v12143_v4  ;;  %v3709_v55 = vpack.c.bf16 %v3649_v61, %v3647_v14  ;;  %v10174_v33 = vadd.f32 %v9889_v54, %v9979_v35  ;;  %v3652_v12 = vmax.f32 %v10091_v59, %v3588_v52 }
 0x933   :  { %v3654_v53 = vmax.f32 %v3526_v34, %v3590_v26  ;;  %v10178_v9 = vmul.f32 0.2, %v10149_v51  ;;  %v3533_v63 = vadd.f32 %v9879_v47, %v9911_v18  ;;  %v3710_v5 = vpack.c.bf16 %v3650_v13, %v3648_v43 }
 0x934   :  { %v10183_v17 = vmul.f32 0.2, %v10157_v1  ;;  %v3595_v30 = vmul.f32 0.2, %v10046_v11  ;;  %v3534_v60 = vadd.f32 %v9889_v54, %v9985_v46  ;;  %v10188_v35 = vpack.c.bf16 %v3653_v24, %v3651_v40 }
 0x935   :  { %v10191_v59 = vmul.f32 0.2, %v10161_v45  ;;  %v3597_v38 = vmul.f32 0.2, %v3533_v63  ;;  %v10195_v25 = vmul.f32 0.2, %v10174_v33  ;;  %v3537_v61 = vadd.f32 %v9879_v47, %v9915_v20 }
 0x936   :  { %v3659_v18 = vmax.f32 %v10046_v11, %v3595_v30  ;;  %v3598_v14 = vmul.f32 0.2, %v3534_v60  ;;  %v10200_v27 = vpack.c.bf16 %v3654_v53, %v3652_v12  ;;  %v3660_v37 = vmax.f32 %v10094_v39, %v3596_v21 }
 0x937   :  { %v3661_v46 = vmax.f32 %v3533_v63, %v3597_v38  ;;  %v3599_v34 = vmul.f32 0.2, %v10049_v36  ;;  %v3601_v13 = vmul.f32 0.2, %v3537_v61  ;;  %v3538_v52 = vadd.f32 %v9889_v54, %v9991_v31 }
 0x938   :  { %v3662_v43 = vmax.f32 %v3534_v60, %v3598_v14  ;;  %v3600_v40 = vmul.f32 0.2, %v10097_v29  ;;  %v3541_v20 = vadd.f32 %v9879_v47, %v9919_v2  ;;  %v3603_v26 = vmul.f32 0.2, %v10052_v41 }
 0x939   :  { %v10207_v24 = vpack.c.bf16 %v3661_v46, %v3659_v18  ;;  %v3663_v11 = vmax.f32 %v10049_v36, %v3599_v34  ;;  %v3665_v39 = vmax.f32 %v3537_v61, %v3601_v13  ;;  %v3602_v4 = vmul.f32 0.2, %v3538_v52 }
 0x93a   :  { %v10213_v6 = vpack.c.bf16 %v3662_v43, %v3660_v37  ;;  %v3664_v12 = vmax.f32 %v10097_v29, %v3600_v40  ;;  %v3605_v53 = vmul.f32 0.2, %v3541_v20  ;;  %v3667_v31 = vmax.f32 %v10052_v41, %v3603_v26 }
 0x93b   :  { %v3542_v63 = vadd.f32 %v9889_v54, %v9997_v10  ;;  %v3604_v30 = vmul.f32 0.2, %v10100_v50  ;;  %v10220_v36 = vpack.c.bf16 %v3665_v39, %v3663_v11  ;;  %v3666_v60 = vmax.f32 %v3538_v52, %v3602_v4 }
 0x93c   :  { %v3545_v2 = vadd.f32 %v9879_v47, %v9923_v42  ;;  %v3607_v38 = vmul.f32 0.2, %v10055_v19  ;;  %v3669_v21 = vmax.f32 %v3541_v20, %v3605_v53  ;;  %v3546_v41 = vadd.f32 %v9889_v54, %v10003_v3 }
 0x93d   :  { %v3606_v18 = vmul.f32 0.2, %v3542_v63  ;;  %v3668_v29 = vmax.f32 %v10100_v50, %v3604_v30  ;;  %v10228_v14 = vpack.c.bf16 %v3666_v60, %v3664_v12  ;;  %v3608_v46 = vmul.f32 0.2, %v10103_v58 }
 0x93e   :  { %v3609_v10 = vmul.f32 0.2, %v3545_v2  ;;  %v3671_v61 = vmax.f32 %v10055_v19, %v3607_v38  ;;  %v10232_v37 = vpack.c.bf16 %v3669_v21, %v3667_v31  ;;  %v3610_v42 = vmul.f32 0.2, %v3546_v41 }
 0x93f   :  { %v3670_v34 = vmax.f32 %v3542_v63, %v3606_v18  ;;  %v3549_v43 = vadd.f32 %v9879_v47, %v9927_v15  ;;  %v3672_v13 = vmax.f32 %v10103_v58, %v3608_v46  ;;  %v3611_v3 = vmul.f32 0.2, %v10058_v57 }
 0x940   :  { %3944 = vmatmul.bf16.gmra.mxu2 %v3709_v55  ;;  %v3673_v50 = vmax.f32 %v3545_v2, %v3609_v10  ;;  %v3550_v52 = vadd.f32 %v9889_v54, %v10009_v44  ;;  %4122 = vmatmul.bf16.gmra.mxu0 %v3709_v55  ;;  %v3674_v40 = vmax.f32 %v3546_v41, %v3610_v42  ;;  %v3612_v20 = vmul.f32 0.2, %v10106_v48 }
 0x941   :  { %4033 = vmatmul.bf16.gmra.mxu3 %v3710_v5  ;;  %4211 = vmatmul.bf16.gmra.mxu1 %v3710_v5  ;;  %v10240_v19 = vpack.c.bf16 %v3670_v34, %v3668_v29  ;;  %v3613_v11 = vmul.f32 0.2, %v3549_v43  ;;  %v3675_v15 = vmax.f32 %v10058_v57, %v3611_v3  ;;  %v3553_v58 = vadd.f32 %v9879_v47, %v9931_v16  ;;  %v12144_v29 = vld [vmem:[#allocation19_spill] sm:$0xff]  ;;  %v12146_v34 = vld [vmem:[#allocation14_spill] sm:$0xff] }
 0x942   :  { %v10243_v26 = vpack.c.bf16 %v3673_v50, %v3671_v61  ;;  %v3614_v39 = vmul.f32 0.2, %v3550_v52  ;;  %v10248_v4 = vpack.c.bf16 %v3674_v40, %v3672_v13  ;;  %v3676_v44 = vmax.f32 %v10106_v48, %v3612_v20  ;;  %v12147_v13 = vld [vmem:[#allocation39_spill] sm:$0xff] }
 0x943   :  { %v3677_v12 = vmax.f32 %v3549_v43, %v3613_v11  ;;  %v3615_v55 = vmul.f32 0.2, %v10061_v0  ;;  %v3617_v53 = vmul.f32 0.2, %v3553_v58  ;;  %v3554_v31 = vadd.f32 %v9889_v54, %v10015_v56  ;;  %v12148_v11 = vld [vmem:[#allocation23_spill] sm:$0xff] }
 0x944   :  { %v3678_v5 = vmax.f32 %v3550_v52, %v3614_v39  ;;  %v3616_v63 = vmul.f32 0.2, %v10109_v23  ;;  %v3557_v16 = vadd.f32 %v9879_v47, %v9935_v22  ;;  %v3619_v60 = vmul.f32 0.2, %v10064_v49  ;;  %v12145_v22 = vld [vmem:[#allocation11_spill] sm:$0xff] }
 0x945   :  { %v10255_v30 = vpack.c.bf16 %v3677_v12, %v3675_v15  ;;  %v3679_v57 = vmax.f32 %v10061_v0, %v3615_v55  ;;  %v3681_v48 = vmax.f32 %v3553_v58, %v3617_v53  ;;  %v3618_v38 = vmul.f32 0.2, %v3554_v31  ;;  %v12149_v12 = vld [vmem:[#allocation37_spill] sm:$0xff] }
 0x946   :  { %v10261_v2 = vpack.c.bf16 %v3678_v5, %v3676_v44  ;;  %v3680_v21 = vmax.f32 %v10109_v23, %v3616_v63  ;;  %v3621_v18 = vmul.f32 0.2, %v3557_v16  ;;  %v3683_v56 = vmax.f32 %v10064_v49, %v3619_v60  ;;  %v12150_v5 = vld [vmem:[#allocation20_spill] sm:$0xff]  ;;  %v12151_v60 = vld [vmem:[#allocation30_spill] sm:$0xff] }
 0x947   :  { %v3558_v41 = vadd.f32 %v9889_v54, %v12144_v29  ;;  %v3620_v10 = vmul.f32 0.2, %v10112_v62  ;;  %v10268_v0 = vpack.c.bf16 %v3681_v48, %v3679_v57  ;;  %v3682_v61 = vmax.f32 %v3554_v31, %v3618_v38 }
 0x948   :  { %v3561_v46 = vadd.f32 %v9879_v47, %v12145_v22  ;;  %v3623_v42 = vmul.f32 0.2, %v12146_v34  ;;  %v3685_v43 = vmax.f32 %v3557_v16, %v3621_v18  ;;  %v3562_v49 = vadd.f32 %v9889_v54, %v12147_v13 }
 0x949   :  { %v3622_v50 = vmul.f32 0.2, %v3558_v41  ;;  %v3684_v23 = vmax.f32 %v10112_v62, %v3620_v10  ;;  %v10276_v3 = vpack.c.bf16 %v3682_v61, %v3680_v21  ;;  %v3624_v20 = vmul.f32 0.2, %v12148_v11 }
 0x94a   :  { %v3625_v52 = vmul.f32 0.2, %v3561_v46  ;;  %v3687_v40 = vmax.f32 %v12146_v34, %v3623_v42  ;;  %v10280_v15 = vpack.c.bf16 %v3685_v43, %v3683_v56  ;;  %v3626_v58 = vmul.f32 0.2, %v3562_v49  ;;  %v12152_v56 = vld [vmem:[#allocation38_spill] sm:$0xff] }
 0x94b   :  { %v3686_v39 = vmax.f32 %v3558_v41, %v3622_v50  ;;  %v3565_v44 = vadd.f32 %v9879_v47, %v12149_v12  ;;  %v3688_v62 = vmax.f32 %v12148_v11, %v3624_v20  ;;  %v3627_v53 = vmul.f32 0.2, %v12150_v5  ;;  %v12154_v43 = vld [vmem:[#allocation26_spill] sm:$0xff] }
 0x94c   :  { %v3689_v55 = vmax.f32 %v3561_v46, %v3625_v52  ;;  %v3566_v31 = vadd.f32 %v9889_v54, %v10137_v28  ;;  %v3690_v57 = vmax.f32 %v3562_v49, %v3626_v58  ;;  %v3628_v48 = vmul.f32 0.2, %v12151_v60  ;;  %v12153_v28 = vld [vmem:[#allocation12_spill] sm:$0xff]  ;;  %v12155_v49 = vld [vmem:[#allocation42_spill] sm:$0xff] }
 0x94d   :  { %v10288_v63 = vpack.c.bf16 %v3686_v39, %v3684_v23  ;;  %v3629_v16 = vmul.f32 0.2, %v3565_v44  ;;  %v3691_v21 = vmax.f32 %v12150_v5, %v3627_v53  ;;  %v3569_v29 = vadd.f32 %v9879_v47, %v12152_v56  ;;  %v12158_v53 = vld [vmem:[#allocation18_spill] sm:$0xff] }
 0x94e   :  { %v10291_v38 = vpack.c.bf16 %v3689_v55, %v3687_v40  ;;  %v3630_v18 = vmul.f32 0.2, %v3566_v31  ;;  %v10296_v41 = vpack.c.bf16 %v3690_v57, %v3688_v62  ;;  %v3692_v61 = vmax.f32 %v12151_v60, %v3628_v48  ;;  %v12156_v40 = vld [vmem:[#allocation40_spill] sm:$0xff]  ;;  %v12159_v57 = vld [vmem:[#allocation15_spill] sm:$0xff] }
 0x94f   :  { %v3693_v10 = vmax.f32 %v3565_v44, %v3629_v16  ;;  %v3631_v22 = vmul.f32 0.2, %v12153_v28  ;;  %v3633_v34 = vmul.f32 0.2, %v3569_v29  ;;  %v3570_v42 = vadd.f32 %v9889_v54, %v10145_v32  ;;  %v12157_v44 = vld [vmem:[#allocation28_spill] sm:$0xff] }
 0x950   :  { %3949 = vmatmul.bf16.gmra.mxu2 %v10188_v35  ;;  %v3694_v46 = vmax.f32 %v3566_v31, %v3630_v18  ;;  %v3632_v50 = vmul.f32 0.2, %v12154_v43  ;;  %4127 = vmatmul.bf16.gmra.mxu0 %v10188_v35  ;;  %v3573_v52 = vadd.f32 %v9879_v47, %v12155_v49  ;;  %v3635_v11 = vmul.f32 0.2, %v12156_v40 }
 0x951   :  { %4038 = vmatmul.bf16.gmra.mxu3 %v10200_v27  ;;  %4216 = vmatmul.bf16.gmra.mxu1 %v10200_v27  ;;  %v10307_v23 = vpack.c.bf16 %v3693_v10, %v3691_v21  ;;  %v3695_v13 = vmax.f32 %v12153_v28, %v3631_v22  ;;  %v3697_v39 = vmax.f32 %v3569_v29, %v3633_v34  ;;  %v3634_v58 = vmul.f32 0.2, %v3570_v42  ;;  %v12160_v10 = vld [vmem:[#allocation31_spill] sm:$0xff] }
 0x952   :  { %v10313_v20 = vpack.c.bf16 %v3694_v46, %v3692_v61  ;;  %v3696_v32 = vmax.f32 %v12154_v43, %v3632_v50  ;;  %v3637_v12 = vmul.f32 0.2, %v3573_v52  ;;  %v3699_v35 = vmax.f32 %v12156_v40, %v3635_v11 }
 0x953   :  { %v3574_v27 = vadd.f32 %v9889_v54, %v10166_v8  ;;  %v3636_v55 = vmul.f32 0.2, %v12157_v44  ;;  %v10320_v62 = vpack.c.bf16 %v3697_v39, %v3695_v13  ;;  %v3698_v5 = vmax.f32 %v3570_v42, %v3634_v58  ;;  %v6386_v58 = vld [vmem:[%s11660_s17 + $0x30] sm:$0xff] }
 0x954   :  { %v3577_v31 = vadd.f32 %v9879_v47, %v12158_v53  ;;  %v3639_v16 = vmul.f32 0.2, %v12159_v57  ;;  %v3701_v60 = vmax.f32 %v3573_v52, %v3637_v12  ;;  %v3578_v18 = vadd.f32 %v9889_v54, %v10170_v7 }
 0x955   :  { %v3638_v48 = vmul.f32 0.2, %v3574_v27  ;;  %v3700_v21 = vmax.f32 %v12157_v44, %v3636_v55  ;;  %v10328_v56 = vpack.c.bf16 %v3698_v5, %v3696_v32  ;;  %v3640_v61 = vmul.f32 0.2, %v12160_v10  ;;  %v6394_v32 = vld [vmem:[%s11660_s17 + $0x70] sm:$0xff] }
 0x956   :  { %v3641_v8 = vmul.f32 0.2, %v3577_v31  ;;  %v3703_v29 = vmax.f32 %v12159_v57, %v3639_v16  ;;  %v10332_v28 = vpack.c.bf16 %v3701_v60, %v3699_v35  ;;  %v3642_v47 = vmul.f32 0.2, %v3578_v18 }
 0x957   :  { %v3702_v22 = vmax.f32 %v3574_v27, %v3638_v48  ;;  %v3704_v34 = vmax.f32 %v12160_v10, %v3640_v61  ;;  %v3655_v42 = vmax.f32 %v10149_v51, %v10178_v9  ;;  %v3657_v7 = vmax.f32 %v10157_v1, %v10183_v17  ;;  %v6387_v51 = vld [vmem:[%s11660_s17 + $0x38] sm:$0xff] }
 0x958   :  { %v3705_v46 = vmax.f32 %v3577_v31, %v3641_v8  ;;  %v3706_v54 = vmax.f32 %v3578_v18, %v3642_v47  ;;  %v3656_v50 = vmax.f32 %v10161_v45, %v10191_v59  ;;  %v3658_v13 = vmax.f32 %v10174_v33, %v10195_v25  ;;  %v6395_v1 = vld [vmem:[%s11660_s17 + $0x78] sm:$0xff]  ;;  %4631 = vmatpush.bf16.msrb.mxu0 %v6387_v51 }
 0x959   :  { %v10337_v43 = vpack.c.bf16 %v3702_v22, %v3700_v21  ;;  %v3713_v40 = vpack.c.bf16 %v3657_v7, %v3655_v42  ;;  %4644 = vmatpush.bf16.msrb.mxu1 %v6395_v1 }
 0x95a   :  { %v10345_v49 = vpack.c.bf16 %v3705_v46, %v3703_v29  ;;  %v10347_v52 = vpack.c.bf16 %v3706_v54, %v3704_v34  ;;  %v3714_v11 = vpack.c.bf16 %v3658_v13, %v3656_v50  ;;  %v6385_v46 = vld [vmem:[%s11660_s17 + $0x28] sm:$0xff] }
 0x95b   :  { %v6393_v34 = vld [vmem:[%s11660_s17 + $0x68] sm:$0xff] }
 0x95c   :  { %4632 = vmatpush.bf16.msrb.mxu0 %v6386_v58 }
 0x95d   :  { %4645 = vmatpush.bf16.msrb.mxu1 %v6394_v32 }
 0x960   :  { %3954 = vmatmul.bf16.gmra.mxu2 %v3713_v40  ;;  %4132 = vmatmul.bf16.gmra.mxu0 %v3713_v40 }
 0x961   :  { %4043 = vmatmul.bf16.gmra.mxu3 %v3714_v11  ;;  %4221 = vmatmul.bf16.gmra.mxu1 %v3714_v11 }
 0x962   :  { %4633 = vmatpush.bf16.msrb.mxu0 %v6385_v46  ;;  %4646 = vmatpush.bf16.msrb.mxu1 %v6393_v34  ;;  %v6391_v46 = vld [vmem:[%s11660_s17 + $0x58] sm:$0xff] }
 0x970   :  { %3959 = vmatmul.bf16.gmra.mxu2 %v10207_v24  ;;  %4137 = vmatmul.bf16.gmra.mxu0 %v10207_v24 }
 0x971   :  { %4048 = vmatmul.bf16.gmra.mxu3 %v10213_v6  ;;  %4226 = vmatmul.bf16.gmra.mxu1 %v10213_v6 }
 0x980   :  { %3964 = vmatmul.bf16.gmra.mxu2 %v10220_v36  ;;  %4142 = vmatmul.bf16.gmra.mxu0 %v10220_v36 }
 0x981   :  { %4053 = vmatmul.bf16.gmra.mxu3 %v10228_v14  ;;  %4231 = vmatmul.bf16.gmra.mxu1 %v10228_v14 }
 0x990   :  { %3969 = vmatmul.bf16.gmra.mxu2 %v10232_v37  ;;  %4147 = vmatmul.bf16.gmra.mxu0 %v10232_v37 }
 0x991   :  { %4058 = vmatmul.bf16.gmra.mxu3 %v10240_v19  ;;  %4236 = vmatmul.bf16.gmra.mxu1 %v10240_v19 }
 0x9a0   :  { %3974 = vmatmul.bf16.gmra.mxu2 %v10243_v26  ;;  %4152 = vmatmul.bf16.gmra.mxu0 %v10243_v26 }
 0x9a1   :  { %4063 = vmatmul.bf16.gmra.mxu3 %v10248_v4  ;;  %4241 = vmatmul.bf16.gmra.mxu1 %v10248_v4 }
 0x9ad   :  { %v4118_v45 = vpop.f32.mrf.mxu0 }
 0x9ae   :  { %v4207_v33 = vpop.f32.mrf.mxu1 }
 0x9af   :  { %v10371_v9 = vadd.f32 %v4207_v33, %v4118_v45 }
 0x9b0   :  { %3979 = vmatmul.bf16.gmra.mxu2 %v10255_v30  ;;  %4157 = vmatmul.bf16.gmra.mxu0 %v10255_v30 }
 0x9b1   :  { %12161 = vst [vmem:[#allocation32_spill] sm:$0xff] %v10371_v9  ;;  %4068 = vmatmul.bf16.gmra.mxu3 %v10261_v2  ;;  %4246 = vmatmul.bf16.gmra.mxu1 %v10261_v2 }
 0x9b3   :  { %v3940_v17 = vpop.f32.mrf.mxu2 }
 0x9b4   :  { %v4029_v59 = vpop.f32.mrf.mxu3 }
 0x9b5   :  { %v10377_v25 = vadd.f32 %v4029_v59, %v3940_v17  ;;  %v4120_v24 = vpop.f32.mrf.mxu0 }
 0x9b6   :  { %v4209_v6 = vpop.f32.mrf.mxu1 }
 0x9b7   :  { %12162 = vst [vmem:[#allocation33_spill] sm:$0xff] %v10377_v25  ;;  %v10379_v36 = vadd.f32 %v4209_v6, %v4120_v24 }
 0x9b9   :  { %12163 = vst [vmem:[#allocation34_spill] sm:$0xff] %v10379_v36 }
 0x9bb   :  { %v3942_v14 = vpop.f32.mrf.mxu2 }
 0x9bc   :  { %v4031_v37 = vpop.f32.mrf.mxu3 }
 0x9bd   :  { %v10381_v19 = vadd.f32 %v4031_v37, %v3942_v14  ;;  %v4123_v26 = vpop.f32.mrf.mxu0 }
 0x9be   :  { %v4212_v4 = vpop.f32.mrf.mxu1 }
 0x9bf   :  { %12164 = vst [vmem:[#allocation35_spill] sm:$0xff] %v10381_v19  ;;  %v10383_v39 = vadd.f32 %v4212_v4, %v4123_v26  ;;  %v6384_v4 = vld [vmem:[%s11660_s17 + $0x20] sm:$0xff] }
 0x9c0   :  { %3984 = vmatmul.bf16.gmra.mxu2 %v10268_v0  ;;  %4162 = vmatmul.bf16.gmra.mxu0 %v10268_v0 }
 0x9c1   :  { %12165 = vst [vmem:[#allocation5_spill] sm:$0xff] %v10383_v39  ;;  %4073 = vmatmul.bf16.gmra.mxu3 %v10276_v3  ;;  %4251 = vmatmul.bf16.gmra.mxu1 %v10276_v3 }
 0x9c2   :  { %4634 = vmatpush.bf16.msrb.mxu0 %v6384_v4 }
 0x9c3   :  { %v3945_v30 = vpop.f32.mrf.mxu2 }
 0x9c4   :  { %v4034_v2 = vpop.f32.mrf.mxu3 }
 0x9c5   :  { %v10395_v12 = vadd.f32 %v4034_v2, %v3945_v30  ;;  %v4125_v35 = vpop.f32.mrf.mxu0  ;;  %v6392_v30 = vld [vmem:[%s11660_s17 + $0x60] sm:$0xff] }
 0x9c6   :  { %v4214_v27 = vpop.f32.mrf.mxu1  ;;  %4647 = vmatpush.bf16.msrb.mxu1 %v6392_v30 }
 0x9c7   :  { %v10397_v44 = vadd.f32 %v4214_v27, %v4125_v35 }
 0x9c9   :  { %12166 = vst [vmem:[#allocation43_spill] sm:$0xff] %v10397_v44 }
 0x9ca   :  { %4648 = vmatpush.bf16.msrb.mxu1 %v6391_v46 }
 0x9cb   :  { %v3947_v0 = vpop.f32.mrf.mxu2 }
 0x9cc   :  { %v4036_v3 = vpop.f32.mrf.mxu3 }
 0x9cd   :  { %v10399_v55 = vadd.f32 %v4036_v3, %v3947_v0  ;;  %v4128_v5 = vpop.f32.mrf.mxu0 }
 0x9ce   :  { %v4217_v53 = vpop.f32.mrf.mxu1 }
 0x9cf   :  { %v10401_v31 = vadd.f32 %v4217_v53, %v4128_v5 }
 0x9d0   :  { %3989 = vmatmul.bf16.gmra.mxu2 %v10280_v15  ;;  %4167 = vmatmul.bf16.gmra.mxu0 %v10280_v15 }
 0x9d1   :  { %12167 = vst [vmem:[#allocation7_spill] sm:$0xff] %v10401_v31  ;;  %4078 = vmatmul.bf16.gmra.mxu3 %v10288_v63  ;;  %4256 = vmatmul.bf16.gmra.mxu1 %v10288_v63 }
 0x9d3   :  { %v3950_v57 = vpop.f32.mrf.mxu2 }
 0x9d4   :  { %v4039_v16 = vpop.f32.mrf.mxu3 }
 0x9d5   :  { %v10407_v60 = vadd.f32 %v4039_v16, %v3950_v57  ;;  %v4130_v48 = vpop.f32.mrf.mxu0 }
 0x9d6   :  { %v4219_v21 = vpop.f32.mrf.mxu1 }
 0x9d7   :  { %v10409_v18 = vadd.f32 %v4219_v21, %v4130_v48 }
 0x9d9   :  { %12168 = vst [vmem:[#allocation21_spill] sm:$0xff] %v10409_v18 }
 0x9db   :  { %v3952_v8 = vpop.f32.mrf.mxu2 }
 0x9dc   :  { %v4041_v29 = vpop.f32.mrf.mxu3 }
 0x9dd   :  { %v10411_v10 = vadd.f32 %v4041_v29, %v3952_v8  ;;  %v4133_v61 = vpop.f32.mrf.mxu0 }
 0x9de   :  { %v4222_v22 = vpop.f32.mrf.mxu1 }
 0x9df   :  { %v10413_v47 = vadd.f32 %v4222_v22, %v4133_v61 }
 0x9e0   :  { %3994 = vmatmul.bf16.gmra.mxu2 %v10291_v38  ;;  %4172 = vmatmul.bf16.gmra.mxu0 %v10291_v38 }
 0x9e1   :  { %12169 = vst [vmem:[#allocation17_spill] sm:$0xff] %v10413_v47  ;;  %4083 = vmatmul.bf16.gmra.mxu3 %v10296_v41  ;;  %4261 = vmatmul.bf16.gmra.mxu1 %v10296_v41 }
 0x9e3   :  { %v3955_v15 = vpop.f32.mrf.mxu2 }
 0x9e4   :  { %v4044_v63 = vpop.f32.mrf.mxu3 }
 0x9e5   :  { %v10425_v42 = vadd.f32 %v4044_v63, %v3955_v15  ;;  %v4135_v54 = vpop.f32.mrf.mxu0  ;;  %v6383_v63 = vld [vmem:[%s11660_s17 + $0x18] sm:$0xff] }
 0x9e6   :  { %v4224_v7 = vpop.f32.mrf.mxu1  ;;  %4635 = vmatpush.bf16.msrb.mxu0 %v6383_v63 }
 0x9e7   :  { %v10427_v50 = vadd.f32 %v4224_v7, %v4135_v54 }
 0x9e9   :  { %12170 = vst [vmem:[#allocation13_spill] sm:$0xff] %v10427_v50 }
 0x9eb   :  { %v3957_v38 = vpop.f32.mrf.mxu2 }
 0x9ec   :  { %v4046_v41 = vpop.f32.mrf.mxu3 }
 0x9ed   :  { %v10429_v13 = vadd.f32 %v4046_v41, %v3957_v38  ;;  %v4138_v40 = vpop.f32.mrf.mxu0 }
 0x9ee   :  { %v4227_v11 = vpop.f32.mrf.mxu1 }
 0x9ef   :  { %v10431_v51 = vadd.f32 %v4227_v11, %v4138_v40 }
 0x9f0   :  { %3999 = vmatmul.bf16.gmra.mxu2 %v10307_v23  ;;  %4177 = vmatmul.bf16.gmra.mxu0 %v10307_v23 }
 0x9f1   :  { %4088 = vmatmul.bf16.gmra.mxu3 %v10313_v20  ;;  %4266 = vmatmul.bf16.gmra.mxu1 %v10313_v20 }
 0x9f3   :  { %v3960_v1 = vpop.f32.mrf.mxu2 }
 0x9f4   :  { %v4049_v45 = vpop.f32.mrf.mxu3 }
 0x9f5   :  { %v10437_v33 = vadd.f32 %v4049_v45, %v3960_v1  ;;  %v10439_v17 = vpop.f32.mrf.mxu0 }
 0x9f6   :  { %v10441_v59 = vpop.f32.mrf.mxu1 }
 0x9fb   :  { %v10443_v24 = vpop.f32.mrf.mxu2 }
 0x9fc   :  { %v10445_v6 = vpop.f32.mrf.mxu3 }
 0x9fd   :  { %v4143_v14 = vpop.f32.mrf.mxu0 }
 0x9fe   :  { %v4232_v37 = vpop.f32.mrf.mxu1 }
 0x9ff   :  { %v10447_v26 = vadd.f32 %v4232_v37, %v4143_v14 }
 0xa00   :  { %4004 = vmatmul.bf16.gmra.mxu2 %v10320_v62  ;;  %4182 = vmatmul.bf16.gmra.mxu0 %v10320_v62 }
 0xa01   :  { %4093 = vmatmul.bf16.gmra.mxu3 %v10328_v56  ;;  %4271 = vmatmul.bf16.gmra.mxu1 %v10328_v56 }
 0xa03   :  { %v3965_v23 = vpop.f32.mrf.mxu2 }
 0xa04   :  { %v4054_v20 = vpop.f32.mrf.mxu3 }
 0xa05   :  { %v10459_v2 = vadd.f32 %v4054_v20, %v3965_v23  ;;  %v4145_v58 = vpop.f32.mrf.mxu0 }
 0xa06   :  { %v4234_v32 = vpop.f32.mrf.mxu1 }
 0xa07   :  { %v10461_v35 = vadd.f32 %v4234_v32, %v4145_v58 }
 0xa09   :  { %12171 = vst [vmem:[#allocation6_spill] sm:$0xff] %v10461_v35 }
 0xa0b   :  { %v10463_v62 = vpop.f32.mrf.mxu2 }
 0xa0c   :  { %v10465_v56 = vpop.f32.mrf.mxu3 }
 0xa0d   :  { %v4148_v27 = vpop.f32.mrf.mxu0 }
 0xa0e   :  { %v4237_v0 = vpop.f32.mrf.mxu1 }
 0xa0f   :  { %v10467_v3 = vadd.f32 %v4237_v0, %v4148_v27 }
 0xa10   :  { %4009 = vmatmul.bf16.gmra.mxu2 %v10332_v28  ;;  %4187 = vmatmul.bf16.gmra.mxu0 %v10332_v28 }
 0xa11   :  { %12172 = vst [vmem:[#allocation44_spill] sm:$0xff] %v10467_v3  ;;  %4098 = vmatmul.bf16.gmra.mxu3 %v10337_v43  ;;  %4276 = vmatmul.bf16.gmra.mxu1 %v10337_v43 }
 0xa13   :  { %v3970_v5 = vpop.f32.mrf.mxu2 }
 0xa14   :  { %v4059_v53 = vpop.f32.mrf.mxu3 }
 0xa15   :  { %v10473_v57 = vadd.f32 %v4059_v53, %v3970_v5  ;;  %v4150_v16 = vpop.f32.mrf.mxu0  ;;  %v6382_v53 = vld [vmem:[%s11660_s17 + $0x10] sm:$0xff] }
 0xa16   :  { %v4239_v48 = vpop.f32.mrf.mxu1  ;;  %4636 = vmatpush.bf16.msrb.mxu0 %v6382_v53 }
 0xa17   :  { %v10475_v21 = vadd.f32 %v4239_v48, %v4150_v16  ;;  %v6390_v16 = vld [vmem:[%s11660_s17 + $0x50] sm:$0xff] }
 0xa18   :  { %4649 = vmatpush.bf16.msrb.mxu1 %v6390_v16 }
 0xa1b   :  { %v10477_v8 = vpop.f32.mrf.mxu2 }
 0xa1c   :  { %v10479_v29 = vpop.f32.mrf.mxu3 }
 0xa1d   :  { %v4153_v61 = vpop.f32.mrf.mxu0 }
 0xa1e   :  { %v4242_v22 = vpop.f32.mrf.mxu1 }
 0xa1f   :  { %v10481_v15 = vadd.f32 %v4242_v22, %v4153_v61 }
 0xa20   :  { %4014 = vmatmul.bf16.gmra.mxu2 %v10345_v49  ;;  %4192 = vmatmul.bf16.gmra.mxu0 %v10345_v49 }
 0xa21   :  { %12173 = vst [vmem:[#allocation24_spill] sm:$0xff] %v10481_v15  ;;  %4103 = vmatmul.bf16.gmra.mxu3 %v10347_v52  ;;  %4281 = vmatmul.bf16.gmra.mxu1 %v10347_v52 }
 0xa23   :  { %v3975_v28 = vpop.f32.mrf.mxu2 }
 0xa24   :  { %v4064_v43 = vpop.f32.mrf.mxu3 }
 0xa25   :  { %v10493_v34 = vadd.f32 %v4064_v43, %v3975_v28  ;;  %v4155_v54 = vpop.f32.mrf.mxu0 }
 0xa26   :  { %v4244_v7 = vpop.f32.mrf.mxu1 }
 0xa27   :  { %v10495_v38 = vadd.f32 %v4244_v7, %v4155_v54 }
 0xa29   :  { %12174 = vst [vmem:[#allocation25_spill] sm:$0xff] %v10495_v38 }
 0xa2b   :  { %v10497_v49 = vpop.f32.mrf.mxu2 }
 0xa2c   :  { %v10499_v52 = vpop.f32.mrf.mxu3 }
 0xa2d   :  { %v4158_v41 = vpop.f32.mrf.mxu0 }
 0xa2e   :  { %v4247_v40 = vpop.f32.mrf.mxu1 }
 0xa2f   :  { %v10501_v11 = vadd.f32 %v4247_v40, %v4158_v41 }
 0xa31   :  { %12175 = vst [vmem:[#allocation27_spill] sm:$0xff] %v10501_v11 }
 0xa33   :  { %v3980_v1 = vpop.f32.mrf.mxu2 }
 0xa34   :  { %v4069_v45 = vpop.f32.mrf.mxu3 }
 0xa35   :  { %v10503_v14 = vadd.f32 %v4069_v45, %v3980_v1  ;;  %v4160_v37 = vpop.f32.mrf.mxu0  ;;  %v4688_v1 = vld [vmem:[%s11661_s18] sm:$0xff] }
 0xa36   :  { %v4249_v23 = vpop.f32.mrf.mxu1 }
 0xa37   :  { %v10505_v20 = vadd.f32 %v4249_v23, %v4160_v37  ;;  %v4690_v37 = vunpack.c.l.b16 %v4688_v1  ;;  %v4691_v23 = vunpack.c.h.b16 %v4688_v1  ;;  %v6381_v1 = vld [vmem:[%s11660_s17 + $0x8] sm:$0xff] }
 0xa38   :  { %4637 = vmatpush.bf16.msrb.mxu0 %v6381_v1  ;;  %v4366_v1 = vmul.f32 %v10383_v39, %v10383_v39 }
 0xa39   :  { %12176 = vst [vmem:[#allocation41_spill] sm:$0xff] %v10505_v20 }
 0xa3b   :  { %v10507_v4 = vpop.f32.mrf.mxu2 }
 0xa3c   :  { %v10509_v30 = vpop.f32.mrf.mxu3 }
 0xa3d   :  { %v4163_v58 = vpop.f32.mrf.mxu0 }
 0xa3e   :  { %v4252_v32 = vpop.f32.mrf.mxu1 }
 0xa3f   :  { %v10511_v27 = vadd.f32 %v4252_v32, %v4163_v58 }
 0xa41   :  { %12177 = vst [vmem:[#allocation36_spill] sm:$0xff] %v10511_v27 }
 0xa43   :  { %v3985_v0 = vpop.f32.mrf.mxu2 }
 0xa44   :  { %v4074_v5 = vpop.f32.mrf.mxu3 }
 0xa45   :  { %v10519_v48 = vadd.f32 %v4074_v5, %v3985_v0  ;;  %v4165_v61 = vpop.f32.mrf.mxu0  ;;  %v4692_v0 = vpack.c.b16 %v4690_v37, %v4690_v37  ;;  %v4693_v5 = vpack.c.b16 %v4691_v23, %v4691_v23  ;;  %v6389_v37 = vld [vmem:[%s11660_s17 + $0x48] sm:$0xff] }
 0xa46   :  { %v4254_v22 = vpop.f32.mrf.mxu1  ;;  %4650 = vmatpush.bf16.msrb.mxu1 %v6389_v37 }
 0xa47   :  { %v10521_v28 = vadd.f32 %v4254_v22, %v4165_v61  ;;  %v4700_v53 = vsel %vm4698_vm13, %v4692_v0, 0  ;;  %v4703_v16 = vsel %vm4698_vm13, %v4693_v5, 0  ;;  %v4364_v5 = vmul.f32 %v10379_v36, %v10379_v36 }
 0xa48   :  { %4712 = vmatpush.bf16.msrb.mxu2 %v4700_v53  ;;  %4725 = vmatpush.bf16.msrb.mxu3 %v4703_v16 }
 0xa49   :  { %12178 = vst [vmem:[#allocation16_spill] sm:$0xff] %v10521_v28 }
 0xa4b   :  { %v10523_v43 = vpop.f32.mrf.mxu2 }
 0xa4c   :  { %v10525_v63 = vpop.f32.mrf.mxu3 }
 0xa4d   :  { %v4168_v46 = vpop.f32.mrf.mxu0 }
 0xa4e   :  { %v4257_v54 = vpop.f32.mrf.mxu1 }
 0xa4f   :  { %v10527_v7 = vadd.f32 %v4257_v54, %v4168_v46 }
 0xa51   :  { %12179 = vst [vmem:[#allocation29_spill] sm:$0xff] %v10527_v7 }
 0xa53   :  { %v3990_v41 = vpop.f32.mrf.mxu2 }
 0xa54   :  { %v4079_v40 = vpop.f32.mrf.mxu3 }
 0xa55   :  { %v10532_v45 = vadd.f32 %v4079_v40, %v3990_v41  ;;  %v10534_v58 = vpop.f32.mrf.mxu0 }
 0xa56   :  { %v10536_v32 = vpop.f32.mrf.mxu1 }
 0xa57   :  { %12180 = vst [vmem:[#allocation22_spill] sm:$0xff] %v10532_v45 }
 0xa5b   :  { %v10538_v61 = vpop.f32.mrf.mxu2 }
 0xa5c   :  { %12181 = vst [vmem:[#allocation9_spill] sm:$0xff] %v10538_v61  ;;  %v10540_v22 = vpop.f32.mrf.mxu3 }
 0xa5d   :  { %12182 = vst [vmem:[#allocation8_spill] sm:$0xff] %v10540_v22  ;;  %v10542_v46 = vpop.f32.mrf.mxu0 }
 0xa5e   :  { %v10544_v54 = vpop.f32.mrf.mxu1 }
 0xa63   :  { %v10546_v41 = vpop.f32.mrf.mxu2 }
 0xa64   :  { %12183 = vst [vmem:[#allocation10_spill] sm:$0xff] %v10546_v41  ;;  %v10548_v40 = vpop.f32.mrf.mxu3  ;;  %v4324_v41 = vadd.f32 %v10379_v36, %v10371_v9  ;;  %v4370_v36 = vmul.f32 %v10401_v31, %v10401_v31 }
 0xa65   :  { %12184 = vst [vmem:[#allocation19_spill] sm:$0xff] %v10548_v40  ;;  %v10556_v23 = vpop.f32.mrf.mxu0  ;;  %v4362_v40 = vmul.f32 %v10371_v9, %v10371_v9  ;;  %v4361_v9 = vmul.f32 %v10377_v25, %v10377_v25 }
 0xa66   :  { %12185 = vst [vmem:[#allocation11_spill] sm:$0xff] %v10556_v23  ;;  %v10558_v0 = vpop.f32.mrf.mxu1  ;;  %v4325_v61 = vadd.f32 %v4324_v41, %v10383_v39  ;;  %v4365_v41 = vmul.f32 %v10395_v12, %v10395_v12 }
 0xa67   :  { %12186 = vst [vmem:[#allocation14_spill] sm:$0xff] %v10558_v0  ;;  %v4462_v22 = vadd.f32 %v4364_v5, %v4362_v40  ;;  %v4287_v40 = vadd.f32 %v10381_v19, %v10377_v25 }
 0xa68   :  { %v4326_v23 = vadd.f32 %v4325_v61, %v10397_v44 }
 0xa69   :  { %v4463_v0 = vadd.f32 %v4462_v22, %v4366_v1  ;;  %v4372_v22 = vmul.f32 %v10409_v18, %v10409_v18 }
 0xa6a   :  { %v4327_v39 = vadd.f32 %v4326_v23, %v10401_v31  ;;  %v4369_v31 = vmul.f32 %v10407_v60, %v10407_v60 }
 0xa6b   :  { %v10562_v53 = vpop.f32.mrf.mxu2 }
 0xa6c   :  { %12187 = vst [vmem:[#allocation39_spill] sm:$0xff] %v10562_v53  ;;  %v10564_v16 = vpop.f32.mrf.mxu3  ;;  %v4368_v53 = vmul.f32 %v10397_v44, %v10397_v44  ;;  %v4328_v25 = vadd.f32 %v4327_v39, %v10409_v18  ;;  %v10615_v39 = vadd.f32 %v10441_v59, %v10439_v17 }
 0xa6d   :  { %12188 = vst [vmem:[#allocation23_spill] sm:$0xff] %v10564_v16  ;;  %v10572_v37 = vpop.f32.mrf.mxu0  ;;  %v4363_v16 = vmul.f32 %v10381_v19, %v10381_v19 }
 0xa6e   :  { %12189 = vst [vmem:[#allocation37_spill] sm:$0xff] %v10572_v37  ;;  %v10574_v45 = vpop.f32.mrf.mxu1  ;;  %v4464_v5 = vadd.f32 %v4463_v0, %v4368_v53  ;;  %v4367_v37 = vmul.f32 %v10399_v55, %v10399_v55  ;;  %v4374_v0 = vmul.f32 %v10413_v47, %v10413_v47 }
 0xa6f   :  { %12190 = vst [vmem:[#allocation20_spill] sm:$0xff] %v10574_v45  ;;  %v4425_v44 = vadd.f32 %v4363_v16, %v4361_v9  ;;  %v4288_v45 = vadd.f32 %v4287_v40, %v10395_v12  ;;  %v4329_v40 = vadd.f32 %v4328_v25, %v10413_v47  ;;  %v4373_v47 = vmul.f32 %v10425_v42, %v10425_v42 }
 0xa70   :  { %v4465_v19 = vadd.f32 %v4464_v5, %v4370_v36  ;;  %v4376_v36 = vmul.f32 %v10427_v50, %v10427_v50  ;;  %12192 = vst [vmem:[#allocation38_spill] sm:$0xff] %v10615_v39 }
 0xa71   :  { %v4426_v23 = vadd.f32 %v4425_v44, %v4365_v41  ;;  %v4289_v53 = vadd.f32 %v4288_v45, %v10399_v55  ;;  %v4371_v41 = vmul.f32 %v10411_v10, %v10411_v10  ;;  %v4330_v18 = vadd.f32 %v4329_v40, %v10427_v50 }
 0xa72   :  { %v4466_v16 = vadd.f32 %v4465_v19, %v4372_v22  ;;  %v4378_v19 = vmul.f32 %v10431_v51, %v10431_v51  ;;  %v10638_v40 = vadd.f32 %v10445_v6, %v10443_v24  ;;  %v4384_v6 = vmul.f32 %v10461_v35, %v10461_v35 }
 0xa73   :  { %v10593_v1 = vpop.f32.mrf.mxu2  ;;  %v4427_v44 = vadd.f32 %v4426_v23, %v4367_v37  ;;  %v4290_v45 = vadd.f32 %v4289_v53, %v10407_v60  ;;  %v4331_v59 = vadd.f32 %v4330_v18, %v10431_v51  ;;  %v4380_v37 = vmul.f32 %v10615_v39, %v10615_v39 }
 0xa74   :  { %12191 = vst [vmem:[#allocation30_spill] sm:$0xff] %v10593_v1  ;;  %v10595_v61 = vpop.f32.mrf.mxu3  ;;  %v4467_v5 = vadd.f32 %v4466_v16, %v4374_v0 }
 0xa75   :  { %v10606_v1 = vpop.f32.mrf.mxu0  ;;  %v4428_v25 = vadd.f32 %v4427_v44, %v4369_v31  ;;  %v4291_v22 = vadd.f32 %v4290_v45, %v10411_v10  ;;  %v4375_v31 = vmul.f32 %v10429_v13, %v10429_v13  ;;  %v4332_v18 = vadd.f32 %v4331_v59, %v10615_v39 }
 0xa76   :  { %v10608_v9 = vpop.f32.mrf.mxu1  ;;  %v4468_v17 = vadd.f32 %v4467_v5, %v4376_v36  ;;  %v4382_v44 = vmul.f32 %v10447_v26, %v10447_v26  ;;  %v10658_v59 = vadd.f32 %v10465_v56, %v10463_v62  ;;  %v4388_v39 = vmul.f32 %v10475_v21, %v10475_v21  ;;  %v6380_v56 = vld [vmem:[%s11660_s17] sm:$0xff] }
 0xa77   :  { %v4429_v53 = vadd.f32 %v4428_v25, %v4371_v41  ;;  %v4292_v16 = vadd.f32 %v4291_v22, %v10425_v42  ;;  %v4377_v41 = vmul.f32 %v10437_v33, %v10437_v33  ;;  %v4333_v24 = vadd.f32 %v4332_v18, %v10447_v26  ;;  %4638 = vmatpush.bf16.msrb.mxu0 %v6380_v56 }
 0xa78   :  { %v4469_v36 = vadd.f32 %v4468_v17, %v4378_v19  ;;  %v10704_v56 = vadd.f32 %v10499_v52, %v10497_v49 }
 0xa79   :  { %v4430_v45 = vadd.f32 %v4429_v53, %v4373_v47  ;;  %v4293_v5 = vadd.f32 %v4292_v16, %v10429_v13  ;;  %v4379_v47 = vmul.f32 %v10638_v40, %v10638_v40  ;;  %v4334_v16 = vadd.f32 %v4333_v24, %v10461_v35 }
 0xa7a   :  { %v4470_v50 = vadd.f32 %v4469_v36, %v4380_v37  ;;  %v4386_v37 = vmul.f32 %v10467_v3, %v10467_v3 }
 0xa7b   :  { %v10629_v23 = vpop.f32.mrf.mxu2  ;;  %v4431_v19 = vadd.f32 %v4430_v45, %v4375_v31  ;;  %v4294_v17 = vadd.f32 %v4293_v5, %v10437_v33  ;;  %v4381_v31 = vmul.f32 %v10459_v2, %v10459_v2  ;;  %v4335_v5 = vadd.f32 %v4334_v16, %v10467_v3 }
 0xa7c   :  { %v10631_v0 = vpop.f32.mrf.mxu3  ;;  %v4471_v53 = vadd.f32 %v4470_v50, %v4382_v44  ;;  %v6388_v44 = vld [vmem:[%s11660_s17 + $0x40] sm:$0xff]  ;;  %v4390_v16 = vmul.f32 %v10481_v15, %v10481_v15 }
 0xa7d   :  { %v10646_v25 = vpop.f32.mrf.mxu0  ;;  %v4432_v36 = vadd.f32 %v4431_v19, %v4377_v41  ;;  %v4295_v18 = vadd.f32 %v4294_v17, %v10638_v40  ;;  %v10684_v19 = vadd.f32 %v10479_v29, %v10477_v8  ;;  %4651 = vmatpush.bf16.msrb.mxu1 %v6388_v44 }
 0xa7e   :  { %v10648_v22 = vpop.f32.mrf.mxu1  ;;  %v4472_v45 = vadd.f32 %v4471_v53, %v4384_v6  ;;  %v4383_v6 = vmul.f32 %v10658_v59, %v10658_v59  ;;  %v4336_v53 = vadd.f32 %v4335_v5, %v10475_v21 }
 0xa7f   :  { %v4433_v41 = vadd.f32 %v4432_v36, %v4379_v47  ;;  %v4296_v24 = vadd.f32 %v4295_v18, %v10459_v2  ;;  %v4385_v36 = vmul.f32 %v10473_v57, %v10473_v57 }
 0xa80   :  { %v4473_v17 = vadd.f32 %v4472_v45, %v4386_v37  ;;  %v4337_v29 = vadd.f32 %v4336_v53, %v10481_v15  ;;  %v4392_v37 = vmul.f32 %v10495_v38, %v10495_v38  ;;  %v12202_v15 = vld [vmem:[#allocation19_spill] sm:$0xff] }
 0xa81   :  { %v4434_v3 = vadd.f32 %v4433_v41, %v4381_v31  ;;  %v4297_v47 = vadd.f32 %v4296_v24, %v10658_v59  ;;  %v4387_v31 = vmul.f32 %v10684_v19, %v10684_v19 }
 0xa82   :  { %v4474_v8 = vadd.f32 %v4473_v17, %v4388_v39  ;;  %v4338_v41 = vadd.f32 %v4337_v29, %v10495_v38  ;;  %v4394_v39 = vmul.f32 %v10501_v11, %v10501_v11  ;;  %v10724_v29 = vadd.f32 %v10509_v30, %v10507_v4  ;;  %v12201_v38 = vld [vmem:[#allocation10_spill] sm:$0xff] }
 0xa83   :  { %v10669_v62 = vpop.f32.mrf.mxu2  ;;  %v4435_v45 = vadd.f32 %v4434_v3, %v4383_v6  ;;  %v4298_v5 = vadd.f32 %v4297_v47, %v10473_v57  ;;  %v4389_v3 = vmul.f32 %v10493_v34, %v10493_v34  ;;  %v4396_v47 = vmul.f32 %v10505_v20, %v10505_v20 }
 0xa84   :  { %v10671_v50 = vpop.f32.mrf.mxu3  ;;  %v4475_v44 = vadd.f32 %v4474_v8, %v4390_v16  ;;  %v4339_v53 = vadd.f32 %v4338_v41, %v10501_v11  ;;  %v4400_v30 = vmul.f32 %v10521_v28, %v10521_v28 }
 0xa85   :  { %v10692_v18 = vpop.f32.mrf.mxu0  ;;  %v4436_v24 = vadd.f32 %v4435_v45, %v4385_v36  ;;  %v4299_v17 = vadd.f32 %v4298_v5, %v10684_v19  ;;  %v4391_v36 = vmul.f32 %v10704_v56, %v10704_v56  ;;  %v4398_v5 = vmul.f32 %v10511_v27, %v10511_v27 }
 0xa86   :  { %v10694_v35 = vpop.f32.mrf.mxu1  ;;  %v4476_v6 = vadd.f32 %v4475_v44, %v4392_v37  ;;  %v4340_v45 = vadd.f32 %v4339_v53, %v10505_v20  ;;  %v4395_v53 = vmul.f32 %v10724_v29, %v10724_v29 }
 0xa87   :  { %v4437_v16 = vadd.f32 %v4436_v24, %v4387_v31  ;;  %v4300_v8 = vadd.f32 %v4299_v17, %v10493_v34  ;;  %v4393_v31 = vmul.f32 %v10503_v14, %v10503_v14 }
 0xa88   :  { %v4477_v37 = vadd.f32 %v4476_v6, %v4394_v39  ;;  %v4341_v4 = vadd.f32 %v4340_v45, %v10511_v27  ;;  %v10741_v39 = vadd.f32 %v10536_v32, %v10534_v58  ;;  %v10755_v58 = vadd.f32 %v10544_v54, %v10542_v46 }
 0xa89   :  { %v4438_v44 = vadd.f32 %v4437_v16, %v4389_v3  ;;  %v4301_v41 = vadd.f32 %v4300_v8, %v10704_v56  ;;  %v10748_v16 = vadd.f32 %v10525_v63, %v10523_v43  ;;  %v4397_v45 = vmul.f32 %v10519_v48, %v10519_v48  ;;  %v12194_v63 = vld [vmem:[#allocation11_spill] sm:$0xff] }
 0xa8a   :  { %v4478_v11 = vadd.f32 %v4477_v37, %v4396_v47  ;;  %12193 = vst [vmem:[#allocation12_spill] sm:$0xff] %v10741_v39  ;;  %v4342_v8 = vadd.f32 %v4341_v4, %v10521_v28  ;;  %v4402_v37 = vmul.f32 %v10527_v7, %v10527_v7  ;;  %v12199_v28 = vld [vmem:[#allocation20_spill] sm:$0xff] }
 0xa8b   :  { %v10715_v49 = vpop.f32.mrf.mxu2  ;;  %v4439_v3 = vadd.f32 %v4438_v44, %v4391_v36  ;;  %v4302_v6 = vadd.f32 %v4301_v41, %v10503_v14 }
 0xa8c   :  { %v10717_v52 = vpop.f32.mrf.mxu3  ;;  %v4479_v47 = vadd.f32 %v4478_v11, %v4398_v5  ;;  %v4343_v43 = vadd.f32 %v4342_v8, %v10527_v7  ;;  %v4404_v11 = vmul.f32 %v10741_v39, %v10741_v39  ;;  %v12195_v5 = vld [vmem:[#allocation14_spill] sm:$0xff] }
 0xa8d   :  { %v10732_v24 = vpop.f32.mrf.mxu0  ;;  %v4440_v32 = vadd.f32 %v4439_v3, %v4393_v31  ;;  %v4303_v36 = vadd.f32 %v4302_v6, %v10724_v29  ;;  %v10765_v41 = vadd.f32 %v12195_v5, %v12194_v63  ;;  %v4399_v3 = vmul.f32 %v10748_v16, %v10748_v16  ;;  %v12197_v6 = vld [vmem:[#allocation8_spill] sm:$0xff]  ;;  %v12198_v5 = vld [vmem:[#allocation37_spill] sm:$0xff] }
 0xa8e   :  { %v10734_v17 = vpop.f32.mrf.mxu1  ;;  %v4480_v44 = vadd.f32 %v4479_v47, %v4400_v30  ;;  %v12196_v30 = vld [vmem:[#allocation9_spill] sm:$0xff]  ;;  %v4344_v7 = vadd.f32 %v4343_v43, %v10741_v39  ;;  %v4406_v63 = vmul.f32 %v10755_v58, %v10755_v58  ;;  %v10783_v27 = vadd.f32 %v12199_v28, %v12198_v5 }
 0xa8f   :  { %v4441_v54 = vadd.f32 %v4440_v32, %v4395_v53  ;;  %v4304_v31 = vadd.f32 %v4303_v36, %v10519_v48  ;;  %v10776_v47 = vadd.f32 %v12197_v6, %v12196_v30  ;;  %v12200_v36 = vld [vmem:[#allocation22_spill] sm:$0xff]  ;;  %v10790_v30 = vadd.f32 %v12202_v15, %v12201_v38  ;;  %v12203_v15 = vld [vmem:[#allocation39_spill] sm:$0xff] }
 0xa90   :  { %v4481_v8 = vadd.f32 %v4480_v44, %v4402_v37  ;;  %v4401_v20 = vmul.f32 %v12200_v36, %v12200_v36  ;;  %v4345_v6 = vadd.f32 %v4344_v7, %v10755_v58  ;;  %v4408_v39 = vmul.f32 %v10765_v41, %v10765_v41  ;;  %v12204_v38 = vld [vmem:[#allocation23_spill] sm:$0xff] }
 0xa91   :  { %v4442_v53 = vadd.f32 %v4441_v54, %v4397_v45  ;;  %v4305_v32 = vadd.f32 %v4304_v31, %v10748_v16  ;;  %v10797_v28 = vadd.f32 %v10608_v9, %v10606_v1  ;;  %v4403_v31 = vmul.f32 %v10776_v47, %v10776_v47 }
 0xa92   :  { %v4482_v43 = vadd.f32 %v4481_v8, %v4404_v11  ;;  %v10804_v5 = vadd.f32 %v12204_v38, %v12203_v15  ;;  %v4346_v7 = vadd.f32 %v4345_v6, %v10765_v41  ;;  %v4410_v8 = vmul.f32 %v10783_v27, %v10783_v27 }
 0xa93   :  { %v10767_v4 = vpop.f32.mrf.mxu2  ;;  %v4443_v45 = vadd.f32 %v4442_v53, %v4399_v3  ;;  %v4306_v54 = vadd.f32 %v4305_v32, %v12200_v36  ;;  %v10811_v1 = vadd.f32 %v10648_v22, %v10646_v25  ;;  %v4405_v53 = vmul.f32 %v10790_v30, %v10790_v30  ;;  %v12205_v32 = vld [vmem:[#allocation30_spill] sm:$0xff] }
 0xa94   :  { %v10769_v46 = vpop.f32.mrf.mxu3  ;;  %v4483_v11 = vadd.f32 %v4482_v43, %v4406_v63  ;;  %v10818_v15 = vadd.f32 %v10595_v61, %v12205_v32  ;;  %v4347_v43 = vadd.f32 %v4346_v7, %v10783_v27  ;;  %v4412_v6 = vmul.f32 %v10797_v28, %v10797_v28 }
 0xa95   :  { %v4190_v37 = vpop.f32.mrf.mxu0  ;;  %v4444_v9 = vadd.f32 %v4443_v45, %v4401_v20  ;;  %v4307_v3 = vadd.f32 %v4306_v54, %v10776_v47  ;;  %v10825_v25 = vadd.f32 %v10694_v35, %v10692_v18  ;;  %v4407_v38 = vmul.f32 %v10804_v5, %v10804_v5 }
 0xa96   :  { %v4279_v44 = vpop.f32.mrf.mxu1  ;;  %v4484_v63 = vadd.f32 %v4483_v11, %v4408_v39  ;;  %v10832_v61 = vadd.f32 %v10631_v0, %v10629_v23  ;;  %v4348_v11 = vadd.f32 %v4347_v43, %v10797_v28  ;;  %v4414_v7 = vmul.f32 %v10811_v1, %v10811_v1 }
 0xa97   :  { %v4445_v45 = vadd.f32 %v4444_v9, %v4403_v31  ;;  %v4308_v54 = vadd.f32 %v4307_v3, %v10790_v30  ;;  %v10839_v35 = vadd.f32 %v10734_v17, %v10732_v24  ;;  %v4409_v9 = vmul.f32 %v10818_v15, %v10818_v15 }
 0xa98   :  { %12206 = vst [vmem:[#allocation26_spill] sm:$0xff] %v10832_v61  ;;  %v4485_v39 = vadd.f32 %v4484_v63, %v4410_v8  ;;  %v10846_v23 = vadd.f32 %v10671_v50, %v10669_v62  ;;  %v4349_v32 = vadd.f32 %v4348_v11, %v10811_v1  ;;  %v4416_v63 = vmul.f32 %v10825_v25, %v10825_v25 }
 0xa99   :  { %v4446_v18 = vadd.f32 %v4445_v45, %v4405_v53  ;;  %v4309_v31 = vadd.f32 %v4308_v54, %v10804_v5  ;;  %v10851_v24 = vadd.f32 %v4279_v44, %v4190_v37  ;;  %v4411_v43 = vmul.f32 %v10832_v61, %v10832_v61 }
 0xa9a   :  { %v4486_v3 = vadd.f32 %v4485_v39, %v4412_v6  ;;  %v10858_v62 = vadd.f32 %v10717_v52, %v10715_v49  ;;  %v4350_v6 = vadd.f32 %v4349_v32, %v10825_v25  ;;  %v4418_v45 = vmul.f32 %v10839_v35, %v10839_v35 }
 0xa9b   :  { %v4012_v20 = vpop.f32.mrf.mxu2  ;;  %v4447_v17 = vadd.f32 %v4446_v18, %v4407_v38  ;;  %v4310_v53 = vadd.f32 %v4309_v31, %v10818_v15  ;;  %v4413_v38 = vmul.f32 %v10846_v23, %v10846_v23  ;;  %v10870_v39 = vadd.f32 %v10769_v46, %v10767_v4 }
 0xa9c   :  { %v4101_v22 = vpop.f32.mrf.mxu3  ;;  %12207 = vst [vmem:[#allocation42_spill] sm:$0xff] %v10858_v62  ;;  %v4487_v50 = vadd.f32 %v4486_v3, %v4414_v7  ;;  %v4351_v52 = vadd.f32 %v4350_v6, %v10839_v35  ;;  %v4420_v11 = vmul.f32 %v10851_v24, %v10851_v24 }
 0xa9d   :  { %v4193_v0 = vpop.f32.mrf.mxu0  ;;  %v4448_v37 = vadd.f32 %v4447_v17, %v4409_v9  ;;  %v4311_v44 = vadd.f32 %v4310_v53, %v10832_v61  ;;  %v4417_v17 = vmul.f32 %v10870_v39, %v10870_v39 }
 0xa9e   :  { %v4282_v8 = vpop.f32.mrf.mxu1  ;;  %v4488_v49 = vadd.f32 %v4487_v50, %v4416_v63  ;;  %v4352_v4 = vadd.f32 %v4351_v52, %v10851_v24 }
 0xa9f   :  { %v10863_v54 = vadd.f32 %v4282_v8, %v4193_v0  ;;  %v4449_v31 = vadd.f32 %v4448_v37, %v4411_v43  ;;  %v4312_v9 = vadd.f32 %v4311_v44, %v10846_v23  ;;  %v4415_v0 = vmul.f32 %v10858_v62, %v10858_v62 }
 0xaa0   :  { %v10878_v8 = vadd.f32 %v4101_v22, %v4012_v20  ;;  %v4489_v3 = vadd.f32 %v4488_v49, %v4418_v45 }
 0xaa1   :  { %v4422_v46 = vmul.f32 %v10863_v54, %v10863_v54  ;;  %v4450_v32 = vadd.f32 %v4449_v31, %v4413_v38  ;;  %v4313_v63 = vadd.f32 %v4312_v9, %v10858_v62  ;;  %v4353_v20 = vadd.f32 %v4352_v4, %v10863_v54 }
 0xaa2   :  { %12208 = vst [vmem:[#allocation40_spill] sm:$0xff] %v10878_v8  ;;  %v4490_v6 = vadd.f32 %v4489_v3, %v4420_v11  ;;  %v4419_v44 = vmul.f32 %v10878_v8, %v10878_v8 }
 0xaa3   :  { %v4015_v7 = vpop.f32.mrf.mxu2  ;;  %v4451_v45 = vadd.f32 %v4450_v32, %v4415_v0  ;;  %v4314_v37 = vadd.f32 %v4313_v63, %v10870_v39 }
 0xaa4   :  { %v4104_v18 = vpop.f32.mrf.mxu3  ;;  %v4491_v38 = vadd.f32 %v4490_v6, %v4422_v46 }
 0xaa5   :  { %v10886_v53 = vadd.f32 %v4104_v18, %v4015_v7  ;;  %v4195_v43 = vpop.f32.mrf.mxu0  ;;  %v4452_v7 = vadd.f32 %v4451_v45, %v4417_v17  ;;  %v4315_v18 = vadd.f32 %v4314_v37, %v10878_v8 }
 0xaa6   :  { %v4284_v50 = vpop.f32.mrf.mxu1 }
 0xaa7   :  { %v10889_v22 = vadd.f32 %v4284_v50, %v4195_v43  ;;  %v4421_v11 = vmul.f32 %v10886_v53, %v10886_v53  ;;  %v4453_v4 = vadd.f32 %v4452_v7, %v4419_v44  ;;  %v4316_v32 = vadd.f32 %v4315_v18, %v10886_v53 }
 0xaa9   :  { %12209 = vst [vmem:[#allocation28_spill] sm:$0xff] %v10889_v22  ;;  %v4354_v49 = vadd.f32 %v4353_v20, %v10889_v22  ;;  %v4424_v52 = vmul.f32 %v10889_v22, %v10889_v22  ;;  %v4454_v50 = vadd.f32 %v4453_v4, %v4421_v11 }
 0xaab   :  { %v4355_v31 = vrot.slane %v4354_v49, 4  ;;  %v4492_v9 = vadd.f32 %v4491_v38, %v4424_v52  ;;  %v4017_v0 = vpop.f32.mrf.mxu2 }
 0xaac   :  { %v4106_v3 = vpop.f32.mrf.mxu3 }
 0xaad   :  { %v10901_v63 = vadd.f32 %v4106_v3, %v4017_v0  ;;  %v4356_v46 = vadd.f32 %v4355_v31, %v4354_v49  ;;  %v4493_v43 = vrot.slane %v4492_v9, 4 }
 0xaaf   :  { %12210 = vst [vmem:[#allocation18_spill] sm:$0xff] %v10901_v63  ;;  %v4317_v6 = vadd.f32 %v4316_v32, %v10901_v63  ;;  %v4423_v17 = vmul.f32 %v10901_v63, %v10901_v63  ;;  %v4357_v20 = vrot.slane %v4356_v46, 2  ;;  %v4494_v45 = vadd.f32 %v4493_v43, %v4492_v9 }
 0xab1   :  { %v4318_v37 = vrot.slane %v4317_v6, 4  ;;  %v4455_v8 = vadd.f32 %v4454_v50, %v4423_v17  ;;  %v4358_v38 = vadd.f32 %v4357_v20, %v4356_v46  ;;  %v4495_v52 = vrot.slane %v4494_v45, 2 }
 0xab3   :  { %v4319_v62 = vadd.f32 %v4318_v37, %v4317_v6  ;;  %v4456_v44 = vrot.slane %v4455_v8, 4  ;;  %v4359_v7 = vrot.slane %v4358_v38, 1  ;;  %v4496_v18 = vadd.f32 %v4495_v52, %v4494_v45 }
 0xab5   :  { %v4320_v0 = vrot.slane %v4319_v62, 2  ;;  %v4457_v3 = vadd.f32 %v4456_v44, %v4455_v8  ;;  %v4497_v49 = vrot.slane %v4496_v18, 1  ;;  %v4360_v4 = vadd.f32 %v4359_v7, %v4358_v38 }
 0xab7   :  { %v4321_v31 = vadd.f32 %v4320_v0, %v4319_v62  ;;  %v4458_v11 = vrot.slane %v4457_v3, 2  ;;  %v4498_v32 = vadd.f32 %v4497_v49, %v4496_v18  ;;  %v6402_v0 = vld [vmem:[%s11664_s21 + $0x30] sm:$0xff] }
 0xab9   :  { %v4322_v61 = vrot.slane %v4321_v31, 1  ;;  %v4459_v22 = vadd.f32 %v4458_v11, %v4457_v3  ;;  %v4500_v63 = vsel %vm602_vm1, %v4360_v4, %v4498_v32  ;;  %v6410_v3 = vld [vmem:[%s11664_s21 + $0x70] sm:$0xff]  ;;  %v6401_v11 = vld [vmem:[%s11664_s21 + $0x28] sm:$0xff] }
 0xaba   :  { %v4502_v43 = vpack.c.bf16 %v4500_v63, %v4500_v63  ;;  %v6409_v4 = vld [vmem:[%s11664_s21 + $0x68] sm:$0xff] }
 0xabb   :  { %v4460_v9 = vrot.slane %v4459_v22, 1  ;;  %v4323_v50 = vadd.f32 %v4322_v61, %v4321_v31  ;;  %v6403_v61 = vld [vmem:[%s11664_s21 + $0x38] sm:$0xff] }
 0xabc   :  { %4652 = vmatmul.bf16.vlgmr.msrb.gmra.mxu1 %v4502_v43  ;;  %5155 = vmatpush.bf16.msra.mxu2 %v6403_v61  ;;  %v6400_v43 = vld [vmem:[%s11664_s21 + $0x20] sm:$0xff] }
 0xabd   :  { %v4461_v46 = vadd.f32 %v4460_v9, %v4459_v22  ;;  %v6411_v22 = vld [vmem:[%s11664_s21 + $0x78] sm:$0xff] }
 0xabe   :  { %5244 = vmatpush.bf16.msra.mxu3 %v6411_v22 }
 0xabf   :  { %v4499_v6 = vsel %vm602_vm1, %v4323_v50, %v4461_v46  ;;  %v6408_v50 = vld [vmem:[%s11664_s21 + $0x60] sm:$0xff] }
 0xac0   :  { %v4501_v17 = vpack.c.bf16 %v4499_v6, %v4499_v6  ;;  %5156 = vmatpush.bf16.msra.mxu2 %v6402_v0  ;;  %v6399_v6 = vld [vmem:[%s11664_s21 + $0x18] sm:$0xff]  ;;  %v6398_v0 = vld [vmem:[%s11664_s21 + $0x10] sm:$0xff] }
 0xac2   :  { %4639 = vmatmul.bf16.vlgmr.msrb.gmra.mxu0 %v4501_v17  ;;  %5245 = vmatpush.bf16.msra.mxu3 %v6410_v3  ;;  %v6407_v17 = vld [vmem:[%s11664_s21 + $0x58] sm:$0xff]  ;;  %v6397_v3 = vld [vmem:[%s11664_s21 + $0x8] sm:$0xff] }
 0xac4   :  { %5157 = vmatpush.bf16.msra.mxu2 %v6401_v11  ;;  %v12211_v11 = vld [vmem:[#allocation33_spill] sm:$0xff] }
 0xac6   :  { %5246 = vmatpush.bf16.msra.mxu3 %v6409_v4 }
 0xac8   :  { %5158 = vmatpush.bf16.msra.mxu2 %v6400_v43 }
 0xaca   :  { %5247 = vmatpush.bf16.msra.mxu3 %v6408_v50 }
 0xacc   :  { %5159 = vmatpush.bf16.msra.mxu2 %v6399_v6 }
 0xace   :  { %5248 = vmatpush.bf16.msra.mxu3 %v6407_v17 }
 0xad0   :  { %5160 = vmatpush.bf16.msra.mxu2 %v6398_v0  ;;  %v12221_v0 = vld [vmem:[#allocation7_spill] sm:$0xff] }
 0xad4   :  { %5161 = vmatpush.bf16.msra.mxu2 %v6397_v3 }
 0xb39   :  { %v4653_v20 = vpop.f32.mrf.mxu1 }
 0xb3f   :  { %v4640_v8 = vpop.f32.mrf.mxu0 }
 0xb40   :  { %v4654_v45 = vadd.f32 %v4653_v20, %v4640_v8  ;;  %v4662_v20 = vld [vmem:[%s11662_s19] sm:$0x1] }
 0xb41   :  { %v4655_v37 = vpop.f32.mrf.mxu1 }
 0xb42   :  { %v4657_v62 = vmul.f32 %v4654_v45, %v4654_v45  ;;  %v4680_v37 = vld [vmem:[%s11663_s20] sm:$0x1] }
 0xb44   :  { %v4659_v38 = vrot.slane %v4657_v62, 7 }
 0xb46   :  { %v4661_v52 = vsub.f32 %v4654_v45, %v4659_v38 }
 0xb47   :  { %v4642_v44 = vpop.f32.mrf.mxu0 }
 0xb48   :  { %v4663_v7 = vadd.f32 0.0001, %v4661_v52 }
 0xb4a   :  { %6438 = vrsqrt.f32 %v4663_v7  ;;  %vm4670_vm15 = vweird.f32 %v4663_v7 }
 0xb50   :  { %v6439_v63 = vpop.eup %6438 }
 0xb51   :  { %v4665_v18 = vmul.f32 %v6439_v63, %v4663_v7  ;;  %vm4671_vm14 = vweird.f32 %v6439_v63 }
 0xb52   :  { %vm4672_vm0 = vmor %vm4670_vm15, %vm4671_vm14 }
 0xb53   :  { %v4666_v49 = vmul.f32 %v6439_v63, %v4665_v18 }
 0xb55   :  { %v4667_v31 = vmul.f32 0.5, %v4666_v49 }
 0xb57   :  { %v4668_v32 = vsub.f32 1.5, %v4667_v31  ;;  %v6405_v31 = vld [vmem:[%s11664_s21 + $0x48] sm:$0xff] }
 0xb59   :  { %v4669_v9 = vmul.f32 %v6439_v63, %v4668_v32  ;;  %v12212_v32 = vld [vmem:[#allocation35_spill] sm:$0xff] }
 0xb5b   :  { %v4673_v46 = vsel %vm4672_vm0, %v6439_v63, %v4669_v9 }
 0xb5c   :  { %4675 = vst [vmem:[#allocation1] sm:$0xff] %v4673_v46 }
 0xb63   :  { %v4677_v8 = vld [vmem:[#allocation1 + $0x1] ss:$9 sm:$0xff] }
 0xb64   :  { %v4679_v62 = vmul.f32 %v4677_v8, %v4662_v20 }
 0xb66   :  { %v4681_v38 = vmul.f32 %v4679_v62, %v4654_v45  ;;  %v6406_v45 = vld [vmem:[%s11664_s21 + $0x50] sm:$0xff] }
 0xb67   :  { %5249 = vmatpush.bf16.msra.mxu3 %v6406_v45  ;;  %v12222_v45 = vld [vmem:[#allocation21_spill] sm:$0xff] }
 0xb68   :  { %v4682_v52 = vsub.f32 %v4680_v37, %v4681_v38  ;;  %v6404_v38 = vld [vmem:[%s11664_s21 + $0x40] sm:$0xff] }
 0xb6a   :  { %v4684_v44 = vperm.slane %v4682_v52, 0 }
 0xb6b   :  { %5250 = vmatpush.bf16.msra.mxu3 %v6405_v31 }
 0xb6c   :  { %v4686_v7 = vsel %vm602_vm1, %v4679_v62, %v4684_v44 }
 0xb6d   :  { %v4687_v61 = vpack.c.bf16 %v4686_v7, %v4686_v7  ;;  %v12217_v7 = vld [vmem:[#allocation32_spill] sm:$0xff] }
 0xb6f   :  { %6152 = vmatmul.msk.bf16.vlgmr.msrb.gmra.mxu2 %vm4694_vm2, %v4687_v61  ;;  %6153 = vmatmul.msk.bf16.vlgmr.msrb.gmra.mxu3 %vm4694_vm2, %v4687_v61  ;;  %v12218_v61 = vld [vmem:[#allocation34_spill] sm:$0xff] }
 0xb70   :  { %5251 = vmatpush.bf16.msra.mxu3 %v6404_v38  ;;  %v12225_v38 = vld [vmem:[#allocation24_spill] sm:$0xff] }
 0xbf2   :  { %v4714_v22 = vpop.f32.mrf.mxu2  ;;  %v4727_v63 = vpop.f32.mrf.mxu3 }
 0xbf3   :  { %v10945_v18 = vperm.slane %v4714_v22, 0  ;;  %v10956_v49 = vperm.slane %v4714_v22, 1  ;;  %v10969_v43 = vperm.slane %v4727_v63, 0  ;;  %v10971_v50 = vperm.slane %v4727_v63, 1  ;;  %v12219_v22 = vld [vmem:[#allocation5_spill] sm:$0xff]  ;;  %v12220_v63 = vld [vmem:[#allocation43_spill] sm:$0xff] }
 0xbf5   :  { %v10963_v4 = vmul.f32 %v10945_v18, %v12211_v11  ;;  %v10967_v9 = vmul.f32 %v10945_v18, %v12212_v32  ;;  %v10975_v46 = vmul.f32 %v10945_v18, %v10395_v12  ;;  %v10979_v6 = vmul.f32 %v10945_v18, %v10399_v55  ;;  %v12223_v11 = vld [vmem:[#allocation6_spill] sm:$0xff] }
 0xbf6   :  { %v10983_v17 = vmul.f32 %v10945_v18, %v10407_v60  ;;  %v10987_v20 = vmul.f32 %v10945_v18, %v10411_v10  ;;  %v10991_v8 = vmul.f32 %v10945_v18, %v10425_v42  ;;  %v10995_v12 = vmul.f32 %v10945_v18, %v10429_v13  ;;  %v6396_v60 = vld [vmem:[%s11664_s21] sm:$0xff] }
 0xbf7   :  { %v4749_v55 = vmul.f32 %v10945_v18, %v10437_v33  ;;  %v11001_v62 = vmul.f32 %v10945_v18, %v10638_v40  ;;  %v4753_v10 = vmul.f32 %v10945_v18, %v10459_v2  ;;  %v11010_v42 = vmul.f32 %v10945_v18, %v10658_v59  ;;  %5162 = vmatpush.bf16.msra.mxu2 %v6396_v60  ;;  %v12224_v60 = vld [vmem:[#allocation44_spill] sm:$0xff] }
 0xbf8   :  { %v4757_v13 = vmul.f32 %v10945_v18, %v10473_v57  ;;  %v11016_v33 = vmul.f32 %v10945_v18, %v10684_v19  ;;  %v4761_v2 = vmul.f32 %v10945_v18, %v10493_v34  ;;  %v11025_v59 = vmul.f32 %v10945_v18, %v10704_v56 }
 0xbf9   :  { %v4765_v57 = vmul.f32 %v10945_v18, %v10503_v14  ;;  %v11031_v19 = vmul.f32 %v10945_v18, %v10724_v29  ;;  %v4769_v52 = vmul.f32 %v10945_v18, %v10519_v48  ;;  %v11037_v44 = vmul.f32 %v10945_v18, %v10748_v16 }
 0xbfa   :  { %v4716_v40 = vpop.f32.mrf.mxu2  ;;  %v4729_v37 = vpop.f32.mrf.mxu3  ;;  %v4773_v34 = vmul.f32 %v10945_v18, %v12200_v36  ;;  %v11043_v56 = vmul.f32 %v10945_v18, %v10776_v47  ;;  %v4777_v14 = vmul.f32 %v10945_v18, %v10790_v30  ;;  %v11049_v29 = vmul.f32 %v10945_v18, %v10804_v5 }
 0xbfb   :  { %12213 = vst [vmem:[#allocation15_spill] sm:$0xff] %v11031_v19  ;;  %v4781_v48 = vmul.f32 %v10945_v18, %v10818_v15  ;;  %v4785_v16 = vmul.f32 %v10945_v18, %v10846_v23  ;;  %v4789_v36 = vmul.f32 %v10945_v18, %v10870_v39  ;;  %v4793_v47 = vmul.f32 %v10945_v18, %v10886_v53  ;;  %v12233_v19 = vld [vmem:[#allocation28_spill] sm:$0xff] }
 0xbfc   :  { %12214 = vst [vmem:[#allocation31_spill] sm:$0xff] %v11037_v44  ;;  %v4734_v30 = vmul.f32 %v10969_v43, %v12217_v7  ;;  %v4736_v5 = vmul.f32 %v10969_v43, %v12218_v61  ;;  %v4738_v15 = vmul.f32 %v10969_v43, %v12219_v22  ;;  %v11067_v23 = vmul.f32 %v10969_v43, %v12220_v63  ;;  %v12226_v61 = vld [vmem:[#allocation25_spill] sm:$0xff]  ;;  %v12227_v63 = vld [vmem:[#allocation27_spill] sm:$0xff]  ;;  %v12232_v44 = vld [vmem:[#allocation12_spill] sm:$0xff] }
 0xbfd   :  { %12215 = vst [vmem:[#allocation11_spill] sm:$0xff] %v11043_v56  ;;  %v11071_v39 = vmul.f32 %v10969_v43, %v12221_v0  ;;  %v11075_v53 = vmul.f32 %v10969_v43, %v12222_v45  ;;  %v4750_v3 = vmul.f32 %v10969_v43, %v10431_v51  ;;  %v4754_v31 = vmul.f32 %v10969_v43, %v10447_v26  ;;  %v12228_v0 = vld [vmem:[#allocation41_spill] sm:$0xff]  ;;  %v12229_v45 = vld [vmem:[#allocation36_spill] sm:$0xff] }
 0xbfe   :  { %12216 = vst [vmem:[#allocation14_spill] sm:$0xff] %v11049_v29  ;;  %v4756_v32 = vmul.f32 %v10969_v43, %v12223_v11  ;;  %v4758_v40 = vmul.f32 %v10969_v43, %v12224_v60  ;;  %v4760_v37 = vmul.f32 %v10969_v43, %v10475_v21  ;;  %v4762_v7 = vmul.f32 %v10969_v43, %v12225_v38  ;;  %v12230_v29 = vld [vmem:[#allocation16_spill] sm:$0xff]  ;;  %v12231_v56 = vld [vmem:[#allocation29_spill] sm:$0xff] }
 0xbff   :  { %v4764_v22 = vmul.f32 %v10969_v43, %v12226_v61  ;;  %v4766_v51 = vmul.f32 %v10969_v43, %v12227_v63  ;;  %v4768_v26 = vmul.f32 %v10969_v43, %v12228_v0  ;;  %v4770_v11 = vmul.f32 %v10969_v43, %v12229_v45 }
 0xc00   :  { %v4772_v60 = vmul.f32 %v10969_v43, %v12230_v29  ;;  %v4774_v21 = vmul.f32 %v10969_v43, %v12231_v56  ;;  %v4776_v38 = vmul.f32 %v10969_v43, %v12232_v44  ;;  %v4778_v61 = vmul.f32 %v10969_v43, %v10755_v58 }
 0xc01   :  { %v4780_v63 = vmul.f32 %v10969_v43, %v10765_v41  ;;  %v4782_v0 = vmul.f32 %v10969_v43, %v10783_v27  ;;  %v4784_v45 = vmul.f32 %v10969_v43, %v10797_v28  ;;  %v4786_v29 = vmul.f32 %v10969_v43, %v10811_v1 }
 0xc02   :  { %v4788_v56 = vmul.f32 %v10969_v43, %v10825_v25  ;;  %v4790_v44 = vmul.f32 %v10969_v43, %v10839_v35  ;;  %v4792_v58 = vmul.f32 %v10969_v43, %v10851_v24  ;;  %v4794_v41 = vmul.f32 %v10969_v43, %v10863_v54 }
 0xc03   :  { %v4796_v27 = vmul.f32 %v10969_v43, %v12233_v19  ;;  %v4799_v28 = vadd.f32 %v10956_v49, %v10963_v4  ;;  %v4801_v1 = vadd.f32 %v10956_v49, %v10967_v9  ;;  %v11128_v25 = vadd.f32 %v10956_v49, %v4749_v55 }
 0xc04   :  { %v11131_v35 = vadd.f32 %v10956_v49, %v4753_v10  ;;  %v11134_v24 = vadd.f32 %v10956_v49, %v4757_v13  ;;  %v11137_v54 = vadd.f32 %v10956_v49, %v4761_v2  ;;  %v11140_v19 = vadd.f32 %v10956_v49, %v4765_v57 }
 0xc05   :  { %v11143_v4 = vadd.f32 %v10956_v49, %v4769_v52  ;;  %v11146_v9 = vadd.f32 %v10956_v49, %v4773_v34  ;;  %v11149_v55 = vadd.f32 %v10956_v49, %v4777_v14  ;;  %v11152_v10 = vadd.f32 %v10956_v49, %v4781_v48 }
 0xc06   :  { %v11155_v13 = vadd.f32 %v10956_v49, %v4785_v16  ;;  %v11158_v2 = vadd.f32 %v10956_v49, %v4789_v36  ;;  %v11162_v57 = vadd.f32 %v10956_v49, %v10975_v46  ;;  %v11166_v52 = vadd.f32 %v10956_v49, %v10983_v17 }
 0xc07   :  { %12234 = vst [vmem:[#allocation9_spill] sm:$0xff] %v11152_v10  ;;  %v11169_v34 = vadd.f32 %v10956_v49, %v4793_v47  ;;  %v4800_v14 = vadd.f32 %v10971_v50, %v4734_v30  ;;  %v4802_v48 = vadd.f32 %v10971_v50, %v4736_v5  ;;  %v11174_v16 = vadd.f32 %v10971_v50, %v4738_v15  ;;  %v12251_v10 = vld [vmem:[#allocation40_spill] sm:$0xff] }
 0xc08   :  { %12235 = vst [vmem:[#allocation8_spill] sm:$0xff] %v11155_v13  ;;  %v11177_v36 = vadd.f32 %v10971_v50, %v4750_v3  ;;  %v11180_v46 = vadd.f32 %v10971_v50, %v4754_v31  ;;  %v11186_v17 = vadd.f32 %v10971_v50, %v4758_v40  ;;  %v11189_v47 = vadd.f32 %v10971_v50, %v4760_v37  ;;  %v12246_v13 = vld [vmem:[#allocation26_spill] sm:$0xff] }
 0xc09   :  { %12236 = vst [vmem:[#allocation37_spill] sm:$0xff] %v11158_v2  ;;  %v11183_v2 = vadd.f32 %v10971_v50, %v4756_v32  ;;  %v11192_v30 = vadd.f32 %v10971_v50, %v4762_v7  ;;  %v11195_v5 = vadd.f32 %v10971_v50, %v4764_v22  ;;  %v11198_v15 = vadd.f32 %v10971_v50, %v4766_v51 }
 0xc0a   :  { %12237 = vst [vmem:[#allocation20_spill] sm:$0xff] %v11169_v34  ;;  %v11201_v3 = vadd.f32 %v10971_v50, %v4768_v26  ;;  %v11204_v31 = vadd.f32 %v10971_v50, %v4770_v11  ;;  %v11207_v32 = vadd.f32 %v10971_v50, %v4772_v60  ;;  %v11210_v40 = vadd.f32 %v10971_v50, %v4774_v21 }
 0xc0b   :  { %v11213_v37 = vadd.f32 %v10971_v50, %v4776_v38  ;;  %v11216_v7 = vadd.f32 %v10971_v50, %v4778_v61  ;;  %v11219_v22 = vadd.f32 %v10971_v50, %v4780_v63  ;;  %v11222_v51 = vadd.f32 %v10971_v50, %v4782_v0 }
 0xc0c   :  { %v11225_v26 = vadd.f32 %v10971_v50, %v4784_v45  ;;  %v11228_v11 = vadd.f32 %v10971_v50, %v4786_v29  ;;  %v11231_v60 = vadd.f32 %v10971_v50, %v4788_v56  ;;  %v11234_v21 = vadd.f32 %v10971_v50, %v4790_v44 }
 0xc0d   :  { %12238 = vst [vmem:[#allocation22_spill] sm:$0xff] %v11222_v51  ;;  %v11237_v38 = vadd.f32 %v10971_v50, %v4792_v58  ;;  %v11240_v61 = vadd.f32 %v10971_v50, %v4794_v41  ;;  %v11243_v63 = vadd.f32 %v10971_v50, %v4796_v27  ;;  %v4863_v0 = vmul.f32 0.2, %v4799_v28 }
 0xc0e   :  { %12239 = vst [vmem:[#allocation10_spill] sm:$0xff] %v11225_v26  ;;  %v4864_v45 = vmul.f32 0.2, %v4800_v14  ;;  %v4865_v34 = vmul.f32 0.2, %v4801_v1  ;;  %v4808_v29 = vadd.f32 %v10971_v50, %v11071_v39  ;;  %v4805_v44 = vadd.f32 %v10956_v49, %v10979_v6 }
 0xc0f   :  { %12240 = vst [vmem:[#allocation19_spill] sm:$0xff] %v11228_v11  ;;  %v4866_v56 = vmul.f32 0.2, %v4802_v48  ;;  %v4806_v58 = vadd.f32 %v10971_v50, %v11067_v23  ;;  %v11255_v39 = vmul.f32 %v10945_v18, %v12246_v13  ;;  %v4809_v6 = vadd.f32 %v10956_v49, %v10987_v20 }
 0xc10   :  { %12241 = vst [vmem:[#allocation39_spill] sm:$0xff] %v11231_v60  ;;  %v4929_v41 = vmax.f32 %v4801_v1, %v4865_v34  ;;  %v4868_v60 = vmul.f32 0.2, %v11174_v16  ;;  %v4871_v23 = vmul.f32 0.2, %v11166_v52  ;;  %v12249_v34 = vld [vmem:[#allocation17_spill] sm:$0xff] }
 0xc11   :  { %12242 = vst [vmem:[#allocation23_spill] sm:$0xff] %v11234_v21  ;;  %v4928_v21 = vmax.f32 %v4800_v14, %v4864_v45  ;;  %v4930_v27 = vmax.f32 %v4802_v48, %v4866_v56  ;;  %v4870_v11 = vmul.f32 0.2, %v4806_v58  ;;  %v4746_v14 = vmul.f32 %v10969_v43, %v12249_v34  ;;  %v12250_v45 = vld [vmem:[#allocation38_spill] sm:$0xff] }
 0xc12   :  { %12243 = vst [vmem:[#allocation30_spill] sm:$0xff] %v11237_v38  ;;  %v4927_v38 = vmax.f32 %v4799_v28, %v4863_v0  ;;  %v12247_v28 = vld [vmem:[#allocation42_spill] sm:$0xff]  ;;  %v4810_v0 = vadd.f32 %v10971_v50, %v11075_v53  ;;  %v4752_v13 = vmul.f32 %v10969_v43, %v12250_v45  ;;  %v4873_v20 = vmul.f32 0.2, %v4809_v6 }
 0xc13   :  { %12244 = vst [vmem:[#allocation33_spill] sm:$0xff] %v11240_v61  ;;  %v4867_v61 = vmul.f32 0.2, %v11162_v57  ;;  %v11262_v1 = vmul.f32 %v10945_v18, %v12247_v28  ;;  %v4992_v48 = vpack.c.bf16 %v4930_v27, %v4928_v21  ;;  %v4872_v56 = vmul.f32 0.2, %v4808_v29  ;;  %v12252_v27 = vld [vmem:[#allocation13_spill] sm:$0xff] }
 0xc14   :  { %12245 = vst [vmem:[#allocation35_spill] sm:$0xff] %v11243_v63  ;;  %v4869_v63 = vmul.f32 0.2, %v4805_v44  ;;  %v4991_v26 = vpack.c.bf16 %v4929_v41, %v4927_v38  ;;  %v4932_v28 = vmax.f32 %v11174_v16, %v4868_v60  ;;  %v4874_v51 = vmul.f32 0.2, %v4810_v0  ;;  %v12253_v45 = vld [vmem:[#allocation18_spill] sm:$0xff] }
 0xc15   :  { %12248 = vst [vmem:[#allocation32_spill] sm:$0xff] %v11262_v1  ;;  %v4931_v38 = vmax.f32 %v11162_v57, %v4867_v61  ;;  %5252 = vmatmul.bf16.vlgmr.msra.gmra.mxu3 %v4992_v48  ;;  %v4934_v1 = vmax.f32 %v4806_v58, %v4870_v11  ;;  %v11274_v21 = vmul.f32 %v10945_v18, %v12251_v10 }
 0xc16   :  { %5163 = vmatmul.bf16.vlgmr.msra.gmra.mxu2 %v4991_v26  ;;  %v4933_v41 = vmax.f32 %v4805_v44, %v4869_v63  ;;  %v4748_v53 = vmul.f32 %v10969_v43, %v12252_v27  ;;  %v4935_v34 = vmax.f32 %v11166_v52, %v4871_v23  ;;  %v4937_v26 = vmax.f32 %v4809_v6, %v4873_v20 }
 0xc17   :  { %v11281_v57 = vmul.f32 %v10945_v18, %v12253_v45  ;;  %v11285_v61 = vadd.f32 %v10956_v49, %v10991_v8  ;;  %v11288_v16 = vadd.f32 %v10971_v50, %v4746_v14  ;;  %v4817_v10 = vadd.f32 %v10956_v49, %v11001_v62 }
 0xc18   :  { %v4936_v11 = vmax.f32 %v4808_v29, %v4872_v56  ;;  %v4938_v60 = vmax.f32 %v4810_v0, %v4874_v51  ;;  %v11294_v43 = vadd.f32 %v10956_v49, %v10995_v12  ;;  %v4879_v52 = vmul.f32 0.2, %v11128_v25 }
 0xc19   :  { %v4993_v18 = vpack.c.bf16 %v4933_v41, %v4931_v38  ;;  %v4994_v63 = vpack.c.bf16 %v4934_v1, %v4932_v28  ;;  %v4881_v44 = vmul.f32 0.2, %v4817_v10  ;;  %v4818_v8 = vadd.f32 %v10971_v50, %v4752_v13 }
 0xc1a   :  { %v11298_v58 = vpack.c.bf16 %v4937_v26, %v4935_v34  ;;  %v11301_v6 = vadd.f32 %v10971_v50, %v4748_v53  ;;  %v4943_v62 = vmax.f32 %v11128_v25, %v4879_v52  ;;  %v4880_v51 = vmul.f32 0.2, %v11177_v36 }
 0xc1b   :  { %v4945_v29 = vmax.f32 %v4817_v10, %v4881_v44  ;;  %v4882_v23 = vmul.f32 0.2, %v4818_v8  ;;  %v4821_v12 = vadd.f32 %v10956_v49, %v11010_v42  ;;  %v4883_v14 = vmul.f32 0.2, %v11131_v35 }
 0xc1c   :  { %v11308_v1 = vpack.c.bf16 %v4938_v60, %v4936_v11  ;;  %v4944_v48 = vmax.f32 %v11177_v36, %v4880_v51  ;;  %v4884_v0 = vmul.f32 0.2, %v11180_v46  ;;  %v4886_v50 = vmul.f32 0.2, %v11183_v2  ;;  %v12254_v51 = vld [vmem:[#allocation15_spill] sm:$0xff] }
 0xc1d   :  { %v11313_v13 = vpack.c.bf16 %v4945_v29, %v4943_v62  ;;  %v4946_v25 = vmax.f32 %v4818_v8, %v4882_v23  ;;  %v4885_v38 = vmul.f32 0.2, %v4821_v12  ;;  %v4947_v20 = vmax.f32 %v11131_v35, %v4883_v14 }
 0xc1e   :  { %v4948_v56 = vmax.f32 %v11180_v46, %v4884_v0  ;;  %v4950_v42 = vmax.f32 %v11183_v2, %v4886_v50  ;;  %v4825_v41 = vadd.f32 %v10956_v49, %v11016_v33  ;;  %v4887_v28 = vmul.f32 0.2, %v11134_v24 }
 0xc1f   :  { %v11321_v36 = vpack.c.bf16 %v4946_v25, %v4944_v48  ;;  %v4949_v27 = vmax.f32 %v4821_v12, %v4885_v38  ;;  %v4888_v53 = vmul.f32 0.2, %v11186_v17  ;;  %v4890_v34 = vmul.f32 0.2, %v11189_v47 }
 0xc20   :  { %v11325_v26 = vpack.c.bf16 %v4950_v42, %v4948_v56  ;;  %v4889_v45 = vmul.f32 0.2, %v4825_v41  ;;  %v4951_v35 = vmax.f32 %v11134_v24, %v4887_v28  ;;  %v4829_v2 = vadd.f32 %v10956_v49, %v11025_v59  ;;  %v12256_v28 = vld [vmem:[#allocation11_spill] sm:$0xff] }
 0xc21   :  { %v11330_v46 = vpack.c.bf16 %v4949_v27, %v4947_v20  ;;  %v4952_v33 = vmax.f32 %v11186_v17, %v4888_v53  ;;  %v4954_v10 = vmax.f32 %v11189_v47, %v4890_v34  ;;  %v4891_v11 = vmul.f32 0.2, %v11137_v54 }
 0xc22   :  { %v4953_v60 = vmax.f32 %v4825_v41, %v4889_v45  ;;  %v4893_v52 = vmul.f32 0.2, %v4829_v2  ;;  %v4892_v44 = vmul.f32 0.2, %v11192_v30  ;;  %v4894_v8 = vmul.f32 0.2, %v11195_v5 }
 0xc23   :  { %v11337_v62 = vpack.c.bf16 %v4954_v10, %v4952_v33  ;;  %v4955_v24 = vmax.f32 %v11137_v54, %v4891_v11  ;;  %v4833_v59 = vadd.f32 %v10956_v49, %v12254_v51  ;;  %v4895_v29 = vmul.f32 0.2, %v11140_v19  ;;  %v12257_v11 = vld [vmem:[#allocation14_spill] sm:$0xff] }
 0xc24   :  { %v11343_v17 = vpack.c.bf16 %v4953_v60, %v4951_v35  ;;  %v4957_v47 = vmax.f32 %v4829_v2, %v4893_v52  ;;  %v4956_v23 = vmax.f32 %v11192_v30, %v4892_v44  ;;  %v4958_v12 = vmax.f32 %v11195_v5, %v4894_v8 }
 0xc25   :  { %5257 = vmatmul.bf16.gmra.mxu3 %v4994_v63  ;;  %v4897_v14 = vmul.f32 0.2, %v4833_v59  ;;  %v4959_v48 = vmax.f32 %v11140_v19, %v4895_v29  ;;  %v4896_v0 = vmul.f32 0.2, %v11198_v15  ;;  %v4898_v54 = vmul.f32 0.2, %v11201_v3 }
 0xc26   :  { %5168 = vmatmul.bf16.gmra.mxu2 %v4993_v18  ;;  %v11350_v50 = vpack.c.bf16 %v4957_v47, %v4955_v24  ;;  %v11352_v25 = vpack.c.bf16 %v4958_v12, %v4956_v23  ;;  %v12255_v18 = vld [vmem:[#allocation31_spill] sm:$0xff]  ;;  %v4899_v20 = vmul.f32 0.2, %v11143_v4  ;;  %v4900_v19 = vmul.f32 0.2, %v11204_v31  ;;  %v12258_v12 = vld [vmem:[#allocation9_spill] sm:$0xff] }
 0xc27   :  { %v4837_v38 = vadd.f32 %v10956_v49, %v12255_v18  ;;  %v4961_v30 = vmax.f32 %v4833_v59, %v4897_v14  ;;  %v4960_v5 = vmax.f32 %v11198_v15, %v4896_v0  ;;  %v4962_v63 = vmax.f32 %v11201_v3, %v4898_v54 }
 0xc28   :  { %v4963_v42 = vmax.f32 %v11143_v4, %v4899_v20  ;;  %v4902_v41 = vmul.f32 0.2, %v11207_v32  ;;  %v4841_v27 = vadd.f32 %v10956_v49, %v12256_v28  ;;  %v4964_v45 = vmax.f32 %v11204_v31, %v4900_v19  ;;  %v12260_v20 = vld [vmem:[#allocation10_spill] sm:$0xff] }
 0xc29   :  { %v4901_v56 = vmul.f32 0.2, %v4837_v38  ;;  %v11364_v53 = vpack.c.bf16 %v4961_v30, %v4959_v48  ;;  %v11366_v34 = vpack.c.bf16 %v4962_v63, %v4960_v5  ;;  %v4903_v15 = vmul.f32 0.2, %v11146_v9  ;;  %v12261_v63 = vld [vmem:[#allocation32_spill] sm:$0xff] }
 0xc2a   :  { %v4966_v3 = vmax.f32 %v11207_v32, %v4902_v41  ;;  %v4905_v2 = vmul.f32 0.2, %v4841_v27  ;;  %v4904_v33 = vmul.f32 0.2, %v11210_v40  ;;  %v4906_v10 = vmul.f32 0.2, %v11213_v37 }
 0xc2b   :  { %v4965_v35 = vmax.f32 %v4837_v38, %v4901_v56  ;;  %v4967_v4 = vmax.f32 %v11146_v9, %v4903_v15  ;;  %v4845_v60 = vadd.f32 %v10956_v49, %v12257_v11  ;;  %v4907_v52 = vmul.f32 0.2, %v11149_v55  ;;  %v12262_v56 = vld [vmem:[#allocation8_spill] sm:$0xff]  ;;  %v12265_v11 = vld [vmem:[#allocation37_spill] sm:$0xff] }
 0xc2c   :  { %v11379_v31 = vpack.c.bf16 %v4966_v3, %v4964_v45  ;;  %v4969_v8 = vmax.f32 %v4841_v27, %v4905_v2  ;;  %v4968_v24 = vmax.f32 %v11210_v40, %v4904_v33  ;;  %v4970_v32 = vmax.f32 %v11213_v37, %v4906_v10  ;;  %v12259_v37 = vld [vmem:[#allocation22_spill] sm:$0xff] }
 0xc2d   :  { %v11377_v44 = vpack.c.bf16 %v4965_v35, %v4963_v42  ;;  %v4909_v51 = vmul.f32 0.2, %v4845_v60  ;;  %v4971_v59 = vmax.f32 %v11149_v55, %v4907_v52  ;;  %v4908_v9 = vmul.f32 0.2, %v11216_v7  ;;  %v12264_v35 = vld [vmem:[#allocation39_spill] sm:$0xff] }
 0xc2e   :  { %v11385_v29 = vpack.c.bf16 %v4969_v8, %v4967_v4  ;;  %v4910_v47 = vmul.f32 0.2, %v11219_v22  ;;  %v4849_v23 = vadd.f32 %v10956_v49, %v11255_v39  ;;  %v4911_v14 = vmul.f32 0.2, %v12258_v12 }
 0xc2f   :  { %v11391_v48 = vpack.c.bf16 %v4970_v32, %v4968_v24  ;;  %v4973_v0 = vmax.f32 %v4845_v60, %v4909_v51  ;;  %v4972_v40 = vmax.f32 %v11216_v7, %v4908_v9  ;;  %v4912_v54 = vmul.f32 0.2, %v12259_v37  ;;  %v12266_v32 = vld [vmem:[#allocation23_spill] sm:$0xff] }
 0xc30   :  { %v4974_v55 = vmax.f32 %v11219_v22, %v4910_v47  ;;  %v4913_v18 = vmul.f32 0.2, %v4849_v23  ;;  %v4975_v38 = vmax.f32 %v12258_v12, %v4911_v14  ;;  %v4914_v30 = vmul.f32 0.2, %v12260_v20  ;;  %v12263_v22 = vld [vmem:[#allocation19_spill] sm:$0xff]  ;;  %v12268_v47 = vld [vmem:[#allocation20_spill] sm:$0xff] }
 0xc31   :  { %v11398_v5 = vpack.c.bf16 %v4973_v0, %v4971_v59  ;;  %v4976_v39 = vmax.f32 %v12259_v37, %v4912_v54  ;;  %v4853_v19 = vadd.f32 %v10956_v49, %v12261_v63  ;;  %v4915_v42 = vmul.f32 0.2, %v12262_v56  ;;  %v12267_v59 = vld [vmem:[#allocation30_spill] sm:$0xff] }
 0xc32   :  { %v11404_v41 = vpack.c.bf16 %v4974_v55, %v4972_v40  ;;  %v4977_v7 = vmax.f32 %v4849_v23, %v4913_v18  ;;  %v4978_v28 = vmax.f32 %v12260_v20, %v4914_v30  ;;  %v4916_v27 = vmul.f32 0.2, %v12263_v22  ;;  %v12269_v55 = vld [vmem:[#allocation33_spill] sm:$0xff] }
 0xc33   :  { %v4917_v45 = vmul.f32 0.2, %v4853_v19  ;;  %v4979_v15 = vmax.f32 %v12262_v56, %v4915_v42  ;;  %v4918_v3 = vmul.f32 0.2, %v12264_v35  ;;  %v4857_v2 = vadd.f32 %v10956_v49, %v11274_v21 }
 0xc34   :  { %v11413_v33 = vpack.c.bf16 %v4977_v7, %v4975_v38  ;;  %v11415_v4 = vpack.c.bf16 %v4978_v28, %v4976_v39  ;;  %v4980_v10 = vmax.f32 %v12263_v22, %v4916_v27  ;;  %v4919_v60 = vmul.f32 0.2, %v12265_v11 }
 0xc35   :  { %5262 = vmatmul.bf16.gmra.mxu3 %v11308_v1  ;;  %v4981_v52 = vmax.f32 %v4853_v19, %v4917_v45  ;;  %v4982_v8 = vmax.f32 %v12264_v35, %v4918_v3  ;;  %v4921_v24 = vmul.f32 0.2, %v4857_v2  ;;  %v4920_v51 = vmul.f32 0.2, %v12266_v32 }
 0xc36   :  { %5173 = vmatmul.bf16.gmra.mxu2 %v11298_v58  ;;  %v4983_v21 = vmax.f32 %v12265_v11, %v4919_v60  ;;  %v4922_v58 = vmul.f32 0.2, %v12267_v59  ;;  %v4861_v9 = vadd.f32 %v10956_v49, %v11281_v57  ;;  %v4923_v23 = vmul.f32 0.2, %v12268_v47  ;;  %v12270_v49 = vld [vmem:[#allocation35_spill] sm:$0xff] }
 0xc37   :  { %v11427_v12 = vpack.c.bf16 %v4981_v52, %v4979_v15  ;;  %v11429_v14 = vpack.c.bf16 %v4982_v8, %v4980_v10  ;;  %v4985_v1 = vmax.f32 %v4857_v2, %v4921_v24  ;;  %v4984_v0 = vmax.f32 %v12266_v32, %v4920_v51 }
 0xc38   :  { %v4986_v40 = vmax.f32 %v12267_v59, %v4922_v58  ;;  %v4925_v37 = vmul.f32 0.2, %v4861_v9  ;;  %v4987_v54 = vmax.f32 %v12268_v47, %v4923_v23  ;;  %v4924_v18 = vmul.f32 0.2, %v12269_v55 }
 0xc39   :  { %v4875_v38 = vmul.f32 0.2, %v11285_v61  ;;  %v11436_v20 = vpack.c.bf16 %v4985_v1, %v4983_v21  ;;  %v4926_v57 = vmul.f32 0.2, %v12270_v49  ;;  %v4877_v30 = vmul.f32 0.2, %v11294_v43 }
 0xc3a   :  { %v11440_v39 = vpack.c.bf16 %v4986_v40, %v4984_v0  ;;  %v4989_v63 = vmax.f32 %v4861_v9, %v4925_v37  ;;  %v4988_v19 = vmax.f32 %v12269_v55, %v4924_v18  ;;  %v4876_v56 = vmul.f32 0.2, %v11288_v16 }
 0xc3b   :  { %v4878_v42 = vmul.f32 0.2, %v11301_v6  ;;  %v4990_v7 = vmax.f32 %v12270_v49, %v4926_v57  ;;  %v4939_v27 = vmax.f32 %v11285_v61, %v4875_v38  ;;  %v4941_v45 = vmax.f32 %v11294_v43, %v4877_v30  ;;  %v11466_v61 = vld [vmem:[%s11665_s22] ss:$0 sm:$0xff] }
 0xc3c   :  { %v11446_v28 = vpack.c.bf16 %v4989_v63, %v4987_v54  ;;  %v4940_v15 = vmax.f32 %v11288_v16, %v4876_v56 }
 0xc3d   :  { %v11448_v22 = vpack.c.bf16 %v4990_v7, %v4988_v19  ;;  %v4942_v35 = vmax.f32 %v11301_v6, %v4878_v42  ;;  %v4997_v3 = vpack.c.bf16 %v4941_v45, %v4939_v27 }
 0xc3f   :  { %v4998_v2 = vpack.c.bf16 %v4942_v35, %v4940_v15 }
 0xc45   :  { %5267 = vmatmul.bf16.gmra.mxu3 %v4998_v2 }
 0xc46   :  { %5178 = vmatmul.bf16.gmra.mxu2 %v4997_v3 }
 0xc55   :  { %5272 = vmatmul.bf16.gmra.mxu3 %v11321_v36 }
 0xc56   :  { %5183 = vmatmul.bf16.gmra.mxu2 %v11313_v13 }
 0xc65   :  { %5277 = vmatmul.bf16.gmra.mxu3 %v11325_v26 }
 0xc66   :  { %5188 = vmatmul.bf16.gmra.mxu2 %v11330_v46 }
 0xc75   :  { %5282 = vmatmul.bf16.gmra.mxu3 %v11337_v62 }
 0xc76   :  { %5193 = vmatmul.bf16.gmra.mxu2 %v11343_v17 }
 0xc85   :  { %5287 = vmatmul.bf16.gmra.mxu3 %v11352_v25 }
 0xc86   :  { %5198 = vmatmul.bf16.gmra.mxu2 %v11350_v50 }
 0xc95   :  { %5292 = vmatmul.bf16.gmra.mxu3 %v11366_v34 }
 0xc96   :  { %5203 = vmatmul.bf16.gmra.mxu2 %v11364_v53 }
 0xc98   :  { %v5253_v6 = vpop.f32.mrf.mxu3 }
 0xc99   :  { %v5164_v16 = vpop.f32.mrf.mxu2 }
 0xc9a   :  { %v5165_v43 = vadd.f32 %v11466_v61, %v5164_v16 }
 0xc9c   :  { %v5254_v13 = vadd.f32 %v5253_v6, %v5165_v43 }
 0xc9e   :  { %6440 = vtanh.f32 %v5254_v13 }
 0xca0   :  { %v5255_v46 = vpop.f32.mrf.mxu3 }
 0xca1   :  { %v5166_v36 = vpop.f32.mrf.mxu2 }
 0xca2   :  { %v5167_v26 = vadd.f32 %v11466_v61, %v5166_v36 }
 0xca4   :  { %v6441_v62 = vpop.eup %6440  ;;  %v5256_v17 = vadd.f32 %v5255_v46, %v5167_v26 }
 0xca5   :  { %5365 = vst.msk [vmem:[%s11666_s23] sm:$0xff] %vm840_vm5, %v6441_v62  ;;  %5297 = vmatmul.bf16.gmra.mxu3 %v11379_v31 }
 0xca6   :  { %6442 = vtanh.f32 %v5256_v17  ;;  %5208 = vmatmul.bf16.gmra.mxu2 %v11377_v44 }
 0xca8   :  { %v5258_v53 = vpop.f32.mrf.mxu3 }
 0xca9   :  { %v5169_v50 = vpop.f32.mrf.mxu2 }
 0xcaa   :  { %v5170_v25 = vadd.f32 %v11466_v61, %v5169_v50 }
 0xcac   :  { %v6443_v34 = vpop.eup %6442  ;;  %v5259_v10 = vadd.f32 %v5258_v53, %v5170_v25 }
 0xcad   :  { %5366 = vst.msk [vmem:[%s11666_s23 + $0x8] sm:$0xff] %vm840_vm5, %v6443_v34 }
 0xcae   :  { %6444 = vtanh.f32 %v5259_v10 }
 0xcb0   :  { %v5260_v52 = vpop.f32.mrf.mxu3 }
 0xcb1   :  { %v5171_v11 = vpop.f32.mrf.mxu2 }
 0xcb2   :  { %v5172_v60 = vadd.f32 %v11466_v61, %v5171_v11 }
 0xcb4   :  { %v6445_v8 = vpop.eup %6444  ;;  %v5261_v44 = vadd.f32 %v5260_v52, %v5172_v60 }
 0xcb5   :  { %5367 = vst.msk [vmem:[%s11666_s23 + $0x10] sm:$0xff] %vm840_vm5, %v6445_v8  ;;  %5302 = vmatmul.bf16.gmra.mxu3 %v11391_v48 }
 0xcb6   :  { %6446 = vtanh.f32 %v5261_v44  ;;  %5213 = vmatmul.bf16.gmra.mxu2 %v11385_v29 }
 0xcb8   :  { %v5263_v32 = vpop.f32.mrf.mxu3 }
 0xcb9   :  { %v5174_v31 = vpop.f32.mrf.mxu2 }
 0xcba   :  { %v5175_v24 = vadd.f32 %v11466_v61, %v5174_v31 }
 0xcbc   :  { %v6447_v51 = vpop.eup %6446  ;;  %v5264_v21 = vadd.f32 %v5263_v32, %v5175_v24 }
 0xcbd   :  { %5368 = vst.msk [vmem:[%s11666_s23 + $0x18] sm:$0xff] %vm840_vm5, %v6447_v51 }
 0xcbe   :  { %6448 = vtanh.f32 %v5264_v21 }
 0xcc0   :  { %v5265_v9 = vpop.f32.mrf.mxu3 }
 0xcc1   :  { %v5176_v59 = vpop.f32.mrf.mxu2 }
 0xcc2   :  { %v5177_v58 = vadd.f32 %v11466_v61, %v5176_v59 }
 0xcc4   :  { %v6449_v47 = vpop.eup %6448  ;;  %v5266_v29 = vadd.f32 %v5265_v9, %v5177_v58 }
 0xcc5   :  { %5369 = vst.msk [vmem:[%s11666_s23 + $0x20] sm:$0xff] %vm840_vm5, %v6449_v47  ;;  %5307 = vmatmul.bf16.gmra.mxu3 %v11404_v41 }
 0xcc6   :  { %6450 = vtanh.f32 %v5266_v29  ;;  %5218 = vmatmul.bf16.gmra.mxu2 %v11398_v5 }
 0xcc8   :  { %v5268_v1 = vpop.f32.mrf.mxu3 }
 0xcc9   :  { %v5179_v48 = vpop.f32.mrf.mxu2 }
 0xcca   :  { %v5180_v23 = vadd.f32 %v11466_v61, %v5179_v48 }
 0xccc   :  { %v6451_v0 = vpop.eup %6450  ;;  %v5269_v40 = vadd.f32 %v5268_v1, %v5180_v23 }
 0xccd   :  { %5370 = vst.msk [vmem:[%s11666_s23 + $0x28] sm:$0xff] %vm840_vm5, %v6451_v0 }
 0xcce   :  { %6452 = vtanh.f32 %v5269_v40 }
 0xcd0   :  { %v5270_v55 = vpop.f32.mrf.mxu3 }
 0xcd1   :  { %v5181_v37 = vpop.f32.mrf.mxu2 }
 0xcd2   :  { %v5182_v54 = vadd.f32 %v11466_v61, %v5181_v37 }
 0xcd4   :  { %v6453_v18 = vpop.eup %6452  ;;  %v5271_v5 = vadd.f32 %v5270_v55, %v5182_v54 }
 0xcd5   :  { %5371 = vst.msk [vmem:[%s11666_s23 + $0x30] sm:$0xff] %vm840_vm5, %v6453_v18  ;;  %5312 = vmatmul.bf16.gmra.mxu3 %v11415_v4 }
 0xcd6   :  { %6454 = vtanh.f32 %v5271_v5  ;;  %5223 = vmatmul.bf16.gmra.mxu2 %v11413_v33 }
 0xcd8   :  { %v5273_v49 = vpop.f32.mrf.mxu3 }
 0xcd9   :  { %v5184_v41 = vpop.f32.mrf.mxu2 }
 0xcda   :  { %v5185_v38 = vadd.f32 %v11466_v61, %v5184_v41 }
 0xcdc   :  { %v6455_v57 = vpop.eup %6454  ;;  %v5274_v30 = vadd.f32 %v5273_v49, %v5185_v38 }
 0xcdd   :  { %5372 = vst.msk [vmem:[%s11666_s23 + $0x38] sm:$0xff] %vm840_vm5, %v6455_v57 }
 0xcde   :  { %6456 = vtanh.f32 %v5274_v30 }
 0xce0   :  { %v5275_v56 = vpop.f32.mrf.mxu3 }
 0xce1   :  { %v5186_v63 = vpop.f32.mrf.mxu2 }
 0xce2   :  { %v5187_v19 = vadd.f32 %v11466_v61, %v5186_v63 }
 0xce4   :  { %v6457_v42 = vpop.eup %6456  ;;  %v5276_v33 = vadd.f32 %v5275_v56, %v5187_v19 }
 0xce5   :  { %5373 = vst.msk [vmem:[%s11666_s23 + $0x40] sm:$0xff] %vm840_vm5, %v6457_v42  ;;  %5317 = vmatmul.bf16.gmra.mxu3 %v11429_v14 }
 0xce6   :  { %6458 = vtanh.f32 %v5276_v33  ;;  %5228 = vmatmul.bf16.gmra.mxu2 %v11427_v12 }
 0xce8   :  { %v5278_v27 = vpop.f32.mrf.mxu3 }
 0xce9   :  { %v5189_v4 = vpop.f32.mrf.mxu2 }
 0xcea   :  { %v5190_v7 = vadd.f32 %v11466_v61, %v5189_v4 }
 0xcec   :  { %v6459_v45 = vpop.eup %6458  ;;  %v5279_v15 = vadd.f32 %v5278_v27, %v5190_v7 }
 0xced   :  { %5374 = vst.msk [vmem:[%s11666_s23 + $0x48] sm:$0xff] %vm840_vm5, %v6459_v45 }
 0xcee   :  { %6460 = vtanh.f32 %v5279_v15 }
 0xcf0   :  { %v5280_v2 = vpop.f32.mrf.mxu3 }
 0xcf1   :  { %v5191_v35 = vpop.f32.mrf.mxu2 }
 0xcf2   :  { %v5192_v3 = vadd.f32 %v11466_v61, %v5191_v35 }
 0xcf4   :  { %v6461_v16 = vpop.eup %6460  ;;  %v5281_v12 = vadd.f32 %v5280_v2, %v5192_v3 }
 0xcf5   :  { %5375 = vst.msk [vmem:[%s11666_s23 + $0x50] sm:$0xff] %vm840_vm5, %v6461_v16  ;;  %5322 = vmatmul.bf16.gmra.mxu3 %v11440_v39 }
 0xcf6   :  { %6462 = vtanh.f32 %v5281_v12  ;;  %5233 = vmatmul.bf16.gmra.mxu2 %v11436_v20 }
 0xcf8   :  { %v5283_v6 = vpop.f32.mrf.mxu3 }
 0xcf9   :  { %v5194_v14 = vpop.f32.mrf.mxu2 }
 0xcfa   :  { %v5195_v43 = vadd.f32 %v11466_v61, %v5194_v14 }
 0xcfc   :  { %v6463_v13 = vpop.eup %6462  ;;  %v5284_v36 = vadd.f32 %v5283_v6, %v5195_v43 }
 0xcfd   :  { %5376 = vst.msk [vmem:[%s11666_s23 + $0x58] sm:$0xff] %vm840_vm5, %v6463_v13 }
 0xcfe   :  { %6464 = vtanh.f32 %v5284_v36 }
 0xd00   :  { %v5285_v62 = vpop.f32.mrf.mxu3 }
 0xd01   :  { %v5196_v26 = vpop.f32.mrf.mxu2 }
 0xd02   :  { %v5197_v46 = vadd.f32 %v11466_v61, %v5196_v26 }
 0xd04   :  { %v6465_v17 = vpop.eup %6464  ;;  %v5286_v20 = vadd.f32 %v5285_v62, %v5197_v46 }
 0xd05   :  { %5377 = vst.msk [vmem:[%s11666_s23 + $0x60] sm:$0xff] %vm840_vm5, %v6465_v17  ;;  %5327 = vmatmul.bf16.gmra.mxu3 %v11448_v22 }
 0xd06   :  { %6466 = vtanh.f32 %v5286_v20  ;;  %5238 = vmatmul.bf16.gmra.mxu2 %v11446_v28 }
 0xd08   :  { %v5288_v25 = vpop.f32.mrf.mxu3 }
 0xd09   :  { %v5199_v39 = vpop.f32.mrf.mxu2 }
 0xd0a   :  { %v5200_v50 = vadd.f32 %v11466_v61, %v5199_v39 }
 0xd0c   :  { %v6467_v53 = vpop.eup %6466  ;;  %v5289_v34 = vadd.f32 %v5288_v25, %v5200_v50 }
 0xd0d   :  { %5378 = vst.msk [vmem:[%s11666_s23 + $0x68] sm:$0xff] %vm840_vm5, %v6467_v53 }
 0xd0e   :  { %6468 = vtanh.f32 %v5289_v34 }
 0xd10   :  { %v5290_v60 = vpop.f32.mrf.mxu3 }
 0xd11   :  { %v5201_v10 = vpop.f32.mrf.mxu2 }
 0xd12   :  { %v5202_v11 = vadd.f32 %v11466_v61, %v5201_v10 }
 0xd14   :  { %v6469_v52 = vpop.eup %6468  ;;  %v5291_v28 = vadd.f32 %v5290_v60, %v5202_v11 }
 0xd15   :  { %5379 = vst.msk [vmem:[%s11666_s23 + $0x70] sm:$0xff] %vm840_vm5, %v6469_v52 }
 0xd16   :  { %6470 = vtanh.f32 %v5291_v28 }
 0xd18   :  { %v5293_v44 = vpop.f32.mrf.mxu3 }
 0xd19   :  { %v5204_v22 = vpop.f32.mrf.mxu2 }
 0xd1a   :  { %v5205_v8 = vadd.f32 %v11466_v61, %v5204_v22 }
 0xd1c   :  { %v6471_v31 = vpop.eup %6470  ;;  %v5294_v24 = vadd.f32 %v5293_v44, %v5205_v8 }
 0xd1d   :  { %5380 = vst.msk [vmem:[%s11666_s23 + $0x78] sm:$0xff] %vm840_vm5, %v6471_v31 }
 0xd1e   :  { %6472 = vtanh.f32 %v5294_v24 }
 0xd20   :  { %v5295_v21 = vpop.f32.mrf.mxu3 }
 0xd21   :  { %v5206_v32 = vpop.f32.mrf.mxu2 }
 0xd22   :  { %v5207_v51 = vadd.f32 %v11466_v61, %v5206_v32 }
 0xd24   :  { %v6473_v59 = vpop.eup %6472  ;;  %v5296_v58 = vadd.f32 %v5295_v21, %v5207_v51 }
 0xd25   :  { %5381 = vst.msk [vmem:[%s11666_s23 + $0x80] sm:$0xff] %vm840_vm5, %v6473_v59 }
 0xd26   :  { %6474 = vtanh.f32 %v5296_v58 }
 0xd28   :  { %v5298_v29 = vpop.f32.mrf.mxu3 }
 0xd29   :  { %v5209_v9 = vpop.f32.mrf.mxu2 }
 0xd2a   :  { %v5210_v47 = vadd.f32 %v11466_v61, %v5209_v9 }
 0xd2c   :  { %v6475_v48 = vpop.eup %6474  ;;  %v5299_v23 = vadd.f32 %v5298_v29, %v5210_v47 }
 0xd2d   :  { %5382 = vst.msk [vmem:[%s11666_s23 + $0x88] sm:$0xff] %vm840_vm5, %v6475_v48 }
 0xd2e   :  { %6476 = vtanh.f32 %v5299_v23 }
 0xd30   :  { %v5300_v40 = vpop.f32.mrf.mxu3 }
 0xd31   :  { %v5211_v1 = vpop.f32.mrf.mxu2 }
 0xd32   :  { %v5212_v0 = vadd.f32 %v11466_v61, %v5211_v1 }
 0xd34   :  { %v6477_v37 = vpop.eup %6476  ;;  %v5301_v54 = vadd.f32 %v5300_v40, %v5212_v0 }
 0xd35   :  { %5383 = vst.msk [vmem:[%s11666_s23 + $0x90] sm:$0xff] %vm840_vm5, %v6477_v37 }
 0xd36   :  { %6478 = vtanh.f32 %v5301_v54 }
 0xd38   :  { %v5303_v5 = vpop.f32.mrf.mxu3 }
 0xd39   :  { %v5214_v55 = vpop.f32.mrf.mxu2 }
 0xd3a   :  { %v5215_v18 = vadd.f32 %v11466_v61, %v5214_v55 }
 0xd3c   :  { %v6479_v41 = vpop.eup %6478  ;;  %v5304_v38 = vadd.f32 %v5303_v5, %v5215_v18 }
 0xd3d   :  { %5384 = vst.msk [vmem:[%s11666_s23 + $0x98] sm:$0xff] %vm840_vm5, %v6479_v41 }
 0xd3e   :  { %6480 = vtanh.f32 %v5304_v38 }
 0xd40   :  { %v5305_v30 = vpop.f32.mrf.mxu3 }
 0xd41   :  { %v5216_v49 = vpop.f32.mrf.mxu2 }
 0xd42   :  { %v5217_v57 = vadd.f32 %v11466_v61, %v5216_v49 }
 0xd44   :  { %v6481_v63 = vpop.eup %6480  ;;  %v5306_v19 = vadd.f32 %v5305_v30, %v5217_v57 }
 0xd45   :  { %5385 = vst.msk [vmem:[%s11666_s23 + $0xa0] sm:$0xff] %vm840_vm5, %v6481_v63 }
 0xd46   :  { %6482 = vtanh.f32 %v5306_v19 }
 0xd48   :  { %v5308_v33 = vpop.f32.mrf.mxu3 }
 0xd49   :  { %v5219_v56 = vpop.f32.mrf.mxu2 }
 0xd4a   :  { %v5220_v42 = vadd.f32 %v11466_v61, %v5219_v56 }
 0xd4c   :  { %v6483_v4 = vpop.eup %6482  ;;  %v5309_v7 = vadd.f32 %v5308_v33, %v5220_v42 }
 0xd4d   :  { %5386 = vst.msk [vmem:[%s11666_s23 + $0xa8] sm:$0xff] %vm840_vm5, %v6483_v4 }
 0xd4e   :  { %6484 = vtanh.f32 %v5309_v7 }
 0xd50   :  { %v5310_v15 = vpop.f32.mrf.mxu3 }
 0xd51   :  { %v5221_v27 = vpop.f32.mrf.mxu2 }
 0xd52   :  { %v5222_v45 = vadd.f32 %v11466_v61, %v5221_v27 }
 0xd54   :  { %v6485_v35 = vpop.eup %6484  ;;  %v5311_v3 = vadd.f32 %v5310_v15, %v5222_v45 }
 0xd55   :  { %5387 = vst.msk [vmem:[%s11666_s23 + $0xb0] sm:$0xff] %vm840_vm5, %v6485_v35 }
 0xd56   :  { %6486 = vtanh.f32 %v5311_v3 }
 0xd58   :  { %v5313_v12 = vpop.f32.mrf.mxu3 }
 0xd59   :  { %v5224_v2 = vpop.f32.mrf.mxu2 }
 0xd5a   :  { %v5225_v16 = vadd.f32 %v11466_v61, %v5224_v2 }
 0xd5c   :  { %v6487_v14 = vpop.eup %6486  ;;  %v5314_v43 = vadd.f32 %v5313_v12, %v5225_v16 }
 0xd5d   :  { %5388 = vst.msk [vmem:[%s11666_s23 + $0xb8] sm:$0xff] %vm840_vm5, %v6487_v14 }
 0xd5e   :  { %6488 = vtanh.f32 %v5314_v43 }
 0xd60   :  { %v5315_v36 = vpop.f32.mrf.mxu3 }
 0xd61   :  { %v5226_v6 = vpop.f32.mrf.mxu2 }
 0xd62   :  { %v5227_v13 = vadd.f32 %v11466_v61, %v5226_v6 }
 0xd64   :  { %v6489_v26 = vpop.eup %6488  ;;  %v5316_v46 = vadd.f32 %v5315_v36, %v5227_v13 }
 0xd65   :  { %5389 = vst.msk [vmem:[%s11666_s23 + $0xc0] sm:$0xff] %vm840_vm5, %v6489_v26 }
 0xd66   :  { %6490 = vtanh.f32 %v5316_v46 }
 0xd68   :  { %v5318_v20 = vpop.f32.mrf.mxu3 }
 0xd69   :  { %v5229_v62 = vpop.f32.mrf.mxu2 }
 0xd6a   :  { %v5230_v17 = vadd.f32 %v11466_v61, %v5229_v62 }
 0xd6c   :  { %v6491_v39 = vpop.eup %6490  ;;  %v5319_v50 = vadd.f32 %v5318_v20, %v5230_v17 }
 0xd6d   :  { %5390 = vst.msk [vmem:[%s11666_s23 + $0xc8] sm:$0xff] %vm840_vm5, %v6491_v39 }
 0xd6e   :  { %6492 = vtanh.f32 %v5319_v50 }
 0xd70   :  { %v5320_v34 = vpop.f32.mrf.mxu3 }
 0xd71   :  { %v5231_v25 = vpop.f32.mrf.mxu2 }
 0xd72   :  { %v5232_v53 = vadd.f32 %v11466_v61, %v5231_v25 }
 0xd74   :  { %v6493_v10 = vpop.eup %6492  ;;  %v5321_v11 = vadd.f32 %v5320_v34, %v5232_v53 }
 0xd75   :  { %5391 = vst.msk [vmem:[%s11666_s23 + $0xd0] sm:$0xff] %vm840_vm5, %v6493_v10 }
 0xd76   :  { %6494 = vtanh.f32 %v5321_v11 }
 0xd78   :  { %v5323_v28 = vpop.f32.mrf.mxu3 }
 0xd79   :  { %v5234_v60 = vpop.f32.mrf.mxu2 }
 0xd7a   :  { %v5235_v52 = vadd.f32 %v11466_v61, %v5234_v60 }
 0xd7c   :  { %v6495_v22 = vpop.eup %6494  ;;  %v5324_v8 = vadd.f32 %v5323_v28, %v5235_v52 }
 0xd7d   :  { %5392 = vst.msk [vmem:[%s11666_s23 + $0xd8] sm:$0xff] %vm840_vm5, %v6495_v22 }
 0xd7e   :  { %6496 = vtanh.f32 %v5324_v8 }
 0xd80   :  { %v5325_v24 = vpop.f32.mrf.mxu3 }
 0xd81   :  { %v5236_v44 = vpop.f32.mrf.mxu2 }
 0xd82   :  { %v5237_v31 = vadd.f32 %v11466_v61, %v5236_v44 }
 0xd84   :  { %v6497_v32 = vpop.eup %6496  ;;  %v5326_v51 = vadd.f32 %v5325_v24, %v5237_v31 }
 0xd85   :  { %5393 = vst.msk [vmem:[%s11666_s23 + $0xe0] sm:$0xff] %vm840_vm5, %v6497_v32 }
 0xd86   :  { %6498 = vtanh.f32 %v5326_v51 }
 0xd88   :  { %v5328_v58 = vpop.f32.mrf.mxu3 }
 0xd89   :  { %v5239_v21 = vpop.f32.mrf.mxu2 }
 0xd8a   :  { %v5240_v59 = vadd.f32 %v11466_v61, %v5239_v21 }
 0xd8c   :  { %v6499_v9 = vpop.eup %6498  ;;  %v5329_v47 = vadd.f32 %v5328_v58, %v5240_v59 }
 0xd8d   :  { %5394 = vst.msk [vmem:[%s11666_s23 + $0xe8] sm:$0xff] %vm840_vm5, %v6499_v9 }
 0xd8e   :  { %6500 = vtanh.f32 %v5329_v47 }
 0xd90   :  { %v5330_v23 = vpop.f32.mrf.mxu3 }
 0xd91   :  { %v5241_v29 = vpop.f32.mrf.mxu2 }
 0xd92   :  { %v5242_v48 = vadd.f32 %v11466_v61, %v5241_v29 }
 0xd94   :  { %v6501_v1 = vpop.eup %6500  ;;  %v5331_v0 = vadd.f32 %v5330_v23, %v5242_v48 }
 0xd95   :  { %5395 = vst.msk [vmem:[%s11666_s23 + $0xf0] sm:$0xff] %vm840_vm5, %v6501_v1 }
 0xd96   :  { %6502 = vtanh.f32 %v5331_v0 }
 0xd9c   :  { %v6503_v40 = vpop.eup %6502 }
 0xd9d   :  { %5396 = vst.msk [vmem:[%s11666_s23 + $0xf8] sm:$0xff] %vm840_vm5, %v6503_v40 }
 0xd9e   :  { %5401 = vsyncpa [#allocation3], 1 }

</bundles_post_ra>
